<compile_context>
chip_gen: v5e
topology: v5e:2x2
jax: 0.10.0
libtpu: 0.0.40
codegen_flags: <defaults>
</compile_context>

<pallas_src>
import jax
import jax.numpy as jnp
from jax import lax
from jax.experimental import pallas as pl
from jax.experimental.pallas import tpu as pltpu

_LANES = 128


def _basic_block_kernel(x_ref, w1_ref, b1_ref, w2_ref, b2_ref, out_ref,
                        shift_ref):
    """One batch element per grid step.

    x_ref    : (1, H, W, Cp)    f32   unpadded input (also the residual)
    w1_ref   : (3, 3*Cp, Cp)    bf16  conv1 weights, BN1 scale folded in,
                                      dx taps stacked along the K dim
    b1_ref   : (1, Cp)          f32   folded BN1 bias
    w2_ref   : (3, 3*Cp, Cp)    bf16  conv2 weights, BN2 scale folded in
    b2_ref   : (1, Cp)          f32   folded BN2 bias
    out_ref  : (1, H, W, Cp)    f32
    shift_ref: VMEM (H+2, W, 3*Cp) bf16  dx-shifted, row-padded image copies,
                                         dx planes packed along lanes
    """
    _, H, W, Cp = x_ref.shape
    HW = H * W
    K = 3 * Cp

    # Zero only the never-overwritten SAME-padding halo: scratch rows 0 and
    # H+1 (dy = -1 / +1), column 0 of the dx=0 lane block and column W-1 of
    # the dx=2 lane block.  The interior is fully rewritten by each
    # fill_shift() call below, so no full memset is needed.
    zrow = jnp.zeros((1, W, K), jnp.bfloat16)
    shift_ref[0:1, :, :] = zrow
    shift_ref[H + 1:H + 2, :, :] = zrow
    zcol = jnp.zeros((H + 2, 1, Cp), jnp.bfloat16)
    shift_ref[:, 0:1, 0:Cp] = zcol
    shift_ref[:, W - 1:W, 2 * Cp:3 * Cp] = zcol

    def fill_shift(img_hwc):
        # img_hwc: (H, W, Cp) f32.  Cast to bf16 once, then store three
        # dx-shifted copies packed along lanes so that scratch[y+1, x, dx*Cp+c]
        # equals the SAME-padded image at (y, x+dx-1, c).  Each dy tap window
        # is then the full-row slice shift_ref[dy:dy+H] whose flatten to
        # (H*W, 3*Cp) is tile-aligned (W % 8 == 0, Cp == 128) -> no relayout.
        img = img_hwc.astype(jnp.bfloat16)
        shift_ref[1:H + 1, :, Cp:2 * Cp] = img                      # dx = 1
        shift_ref[1:H + 1, 1:W, 0:Cp] = img[:, :W - 1, :]           # dx = 0
        shift_ref[1:H + 1, 0:W - 1, 2 * Cp:3 * Cp] = img[:, 1:, :]  # dx = 2

    def conv3x3(w_ref):
        # 3x3, stride 1, SAME conv as 3 matmuls with K = 3*Cp (dx packed),
        # bf16 MXU operands, f32 value-chain accumulation (no per-tap VMEM
        # accumulator round trips; v7x can accumulate in the MRB).
        acc = jnp.dot(shift_ref[0:H, :, :].reshape(HW, K), w_ref[0],
                      preferred_element_type=jnp.float32)
        acc = acc + jnp.dot(shift_ref[1:H + 1, :, :].reshape(HW, K), w_ref[1],
                            preferred_element_type=jnp.float32)
        acc = acc + jnp.dot(shift_ref[2:H + 2, :, :].reshape(HW, K), w_ref[2],
                            preferred_element_type=jnp.float32)
        return acc

    # ---- conv1 (BN1 scale folded into w1) -> +bias -> ReLU ----
    fill_shift(x_ref[0])
    y1 = jnp.maximum(conv3x3(w1_ref) + b1_ref[...], 0.0)

    # ---- conv2 (BN2 scale folded into w2) -> +bias -> +residual -> ReLU ----
    # Residual comes straight from the input block already resident in VMEM
    # (stride=1, downsample=None  =>  residual == x).
    fill_shift(y1.reshape(H, W, Cp))
    residual = x_ref[0].reshape(HW, Cp)
    out = jnp.maximum(conv3x3(w2_ref) + b2_ref[...] + residual, 0.0)
    out_ref[0] = out.reshape(H, W, Cp)


@jax.jit
def basic_block_pallas(x_nchw, w1_hwio, s1, b1, w2_hwio, s2, b2):
    """BasicBlock forward (stride=1, no downsample), eval-mode BatchNorm.

    x_nchw : (N, C, H, W) f32;  w*_hwio: (3, 3, C, C) f32;  s*, b*: (C,) f32.
    Returns (N, C, H, W) f32.
    """
    N, C, H, W = x_nchw.shape
    # Keeps the (H, W, Cp) <-> (H*W, Cp) flattens and the fill stores
    # tile-aligned (W % 16 additionally keeps the bf16 scratch reshape free).
    assert W % 8 == 0, "W must be a multiple of 8 for the lane-dense layout"

    Cp = max(_LANES, ((C + _LANES - 1) // _LANES) * _LANES)
    K = 3 * Cp

    # Glue: NCHW -> NHWC, pad channels to the 128-lane width so every kernel
    # tile is lane-dense.  (Spatial SAME-padding is done inside the kernel.)
    x_nhwc = jnp.transpose(x_nchw, (0, 2, 3, 1))
    x_p = jnp.pad(x_nhwc, ((0, 0), (0, 0), (0, 0), (0, Cp - C)))

    def pack_w(w, s):
        # Fold the BN scale into the conv's output channels (f32), pad the
        # channels, cast to bf16, and stack the 3 dx taps along the
        # contraction dim:  (3, 3, C, C) -> (3 dy, 3*Cp, Cp).
        w = w * s[None, None, None, :]
        w = jnp.pad(w, ((0, 0), (0, 0), (0, Cp - C), (0, Cp - C)))
        return w.astype(jnp.bfloat16).reshape(3, K, Cp)

    def pad_b(v):  # (C,) -> (1, Cp) f32
        return jnp.pad(v, (0, Cp - C)).reshape(1, Cp).astype(jnp.float32)

    out_nhwc = pl.pallas_call(
        _basic_block_kernel,
        out_shape=jax.ShapeDtypeStruct((N, H, W, Cp), jnp.float32),
        grid_spec=pltpu.PrefetchScalarGridSpec(
            num_scalar_prefetch=0,
            grid=(N,),
            in_specs=[
                pl.BlockSpec((1, H, W, Cp), lambda n: (n, 0, 0, 0)),
                # Grid-invariant weights: single-buffered to avoid dead VMEM.
                pl.BlockSpec((3, K, Cp), lambda n: (0, 0, 0),
                             pipeline_mode=pl.Buffered(1)),
                pl.BlockSpec((1, Cp), lambda n: (0, 0)),
                pl.BlockSpec((3, K, Cp), lambda n: (0, 0, 0),
                             pipeline_mode=pl.Buffered(1)),
                pl.BlockSpec((1, Cp), lambda n: (0, 0)),
            ],
            out_specs=pl.BlockSpec((1, H, W, Cp), lambda n: (n, 0, 0, 0)),
            scratch_shapes=[
                # dx-shifted, row-padded image copies (bf16, lane-packed dx).
                pltpu.VMEM((H + 2, W, K), jnp.bfloat16),
            ],
        ),
        compiler_params=pltpu.CompilerParams(
            dimension_semantics=("parallel",),
            vmem_limit_bytes=32 * 1024 * 1024),
    )(x_p, pack_w(w1_hwio, s1), pad_b(b1), pack_w(w2_hwio, s2), pad_b(b2))

    return jnp.transpose(out_nhwc[..., :C], (0, 3, 1, 2))


def _reference(x_nchw, w1_hwio, s1, b1, w2_hwio, s2, b2):
    """Pure-JAX reference matching the kernel's precision contract
    (BN scale folded into bf16 weights, bf16 conv operands, f32 accumulation,
    f32 elementwise math)."""
    x = jnp.transpose(x_nchw, (0, 2, 3, 1))
    dn = ("NHWC", "HWIO", "NHWC")
    w1 = (w1_hwio * s1[None, None, None, :]).astype(jnp.bfloat16)
    w2 = (w2_hwio * s2[None, None, None, :]).astype(jnp.bfloat16)
    y = lax.conv_general_dilated(
        x.astype(jnp.bfloat16), w1, (1, 1), "SAME",
        dimension_numbers=dn, preferred_element_type=jnp.float32)
    y = jnp.maximum(y + b1, 0.0)
    y = lax.conv_general_dilated(
        y.astype(jnp.bfloat16), w2, (1, 1), "SAME",
        dimension_numbers=dn, preferred_element_type=jnp.float32)
    y = jnp.maximum(y + b2 + x, 0.0)
    return jnp.transpose(y, (0, 3, 1, 2))


if __name__ == "__main__":
    # Small shapes consistent with BasicBlock(inplanes=planes, stride=1).
    N, C, H, W = 2, 8, 16, 16

    key = jax.random.PRNGKey(0)
    ks = jax.random.split(key, 9)

    x = jax.random.normal(ks[0], (N, C, H, W), jnp.float32)

    # Conv weights: PyTorch OIHW -> HWIO for the kernel (bias=False).
    fan_in = C * 3 * 3
    w1_oihw = jax.random.normal(ks[1], (C, C, 3, 3), jnp.float32) / jnp.sqrt(fan_in)
    w2_oihw = jax.random.normal(ks[2], (C, C, 3, 3), jnp.float32) / jnp.sqrt(fan_in)
    w1_hwio = jnp.transpose(w1_oihw, (2, 3, 1, 0))
    w2_hwio = jnp.transpose(w2_oihw, (2, 3, 1, 0))

    # BatchNorm (eval mode) params, folded into per-channel scale/bias.
    eps = 1e-5
    g1 = 1.0 + 0.1 * jax.random.normal(ks[3], (C,), jnp.float32)
    be1 = 0.1 * jax.random.normal(ks[4], (C,), jnp.float32)
    m1 = 0.1 * jax.random.normal(ks[5], (C,), jnp.float32)
    v1 = jax.random.uniform(ks[6], (C,), jnp.float32, 0.5, 1.5)
    g2 = 1.0 + 0.1 * jax.random.normal(ks[7], (C,), jnp.float32)
    be2 = 0.1 * jax.random.normal(ks[8], (C,), jnp.float32)
    m2 = jnp.zeros((C,), jnp.float32)
    v2 = jnp.ones((C,), jnp.float32)

    s1 = g1 / jnp.sqrt(v1 + eps)
    b1 = be1 - m1 * s1
    s2 = g2 / jnp.sqrt(v2 + eps)
    b2 = be2 - m2 * s2

    out = basic_block_pallas(x, w1_hwio, s1, b1, w2_hwio, s2, b2)
    out = jax.block_until_ready(out)

    ref = _reference(x, w1_hwio, s1, b1, w2_hwio, s2, b2)
    assert out.shape == (N, C, H, W)
    assert jnp.allclose(out, ref, atol=1e-2, rtol=1e-2)

    print("KERNEL_OK")
</pallas_src>

<mosaic_0001>
module attributes {stable_mosaic.version = 11 : i64} {
  func.func @_basic_block_kernel(%arg0: i32, %arg1: memref<1x16x16x128xf32, #tpu.memory_space<vmem>>, %arg2: memref<3x384x128xbf16, #tpu.memory_space<vmem>>, %arg3: memref<1x128xf32, #tpu.memory_space<vmem>>, %arg4: memref<3x384x128xbf16, #tpu.memory_space<vmem>>, %arg5: memref<1x128xf32, #tpu.memory_space<vmem>>, %arg6: memref<1x16x16x128xf32, #tpu.memory_space<vmem>>, %arg7: memref<18x16x384xbf16, #tpu.memory_space<vmem>>) attributes {dimension_semantics = [#tpu.dimension_semantics<parallel>], iteration_bounds = array<i64: 2>, scalar_prefetch = 0 : i64, scratch_operands = 1 : i64, tpu.core_type = #tpu.core_type<tc>, window_params = [{transform_indices = @transform_0, window_bounds = array<i64: 1, 16, 16, 128>}, {pipeline_mode = #tpu.pipeline_mode<synchronous>, transform_indices = @transform_1, window_bounds = array<i64: 3, 384, 128>}, {pipeline_mode = #tpu.pipeline_mode<synchronous>, transform_indices = @transform_2, window_bounds = array<i64: 1, 128>}, {pipeline_mode = #tpu.pipeline_mode<synchronous>, transform_indices = @transform_3, window_bounds = array<i64: 3, 384, 128>}, {pipeline_mode = #tpu.pipeline_mode<synchronous>, transform_indices = @transform_4, window_bounds = array<i64: 1, 128>}, {transform_indices = @transform_5, window_bounds = array<i64: 1, 16, 16, 128>}]} {
    %cst = arith.constant 0.000000e+00 : bf16
    %0 = vector.broadcast %cst : bf16 to vector<1x16x384xbf16>
    %c0 = arith.constant 0 : index
    %c0_0 = arith.constant 0 : index
    %c0_1 = arith.constant 0 : index
    %1 = vector.load %arg7[%c0, %c0_0, %c0_1] : memref<18x16x384xbf16, #tpu.memory_space<vmem>>, vector<1x16x384xbf16>
    tpu.vector_store %arg7[%c0, %c0_0, %c0_1], %0 {strides = array<i32>} : memref<18x16x384xbf16, #tpu.memory_space<vmem>>, vector<1x16x384xbf16>,
    %c17 = arith.constant 17 : index
    %c0_2 = arith.constant 0 : index
    %c0_3 = arith.constant 0 : index
    %2 = vector.load %arg7[%c17, %c0_2, %c0_3] : memref<18x16x384xbf16, #tpu.memory_space<vmem>>, vector<1x16x384xbf16>
    tpu.vector_store %arg7[%c17, %c0_2, %c0_3], %0 {strides = array<i32>} : memref<18x16x384xbf16, #tpu.memory_space<vmem>>, vector<1x16x384xbf16>,
    %cst_4 = arith.constant 0.000000e+00 : bf16
    %3 = vector.broadcast %cst_4 : bf16 to vector<18x1x128xbf16>
    %c0_5 = arith.constant 0 : index
    %c0_6 = arith.constant 0 : index
    %c0_7 = arith.constant 0 : index
    %4 = vector.load %arg7[%c0_5, %c0_6, %c0_7] : memref<18x16x384xbf16, #tpu.memory_space<vmem>>, vector<18x1x128xbf16>
    tpu.vector_store %arg7[%c0_5, %c0_6, %c0_7], %3 {strides = array<i32>} : memref<18x16x384xbf16, #tpu.memory_space<vmem>>, vector<18x1x128xbf16>,
    %c0_8 = arith.constant 0 : index
    %c15 = arith.constant 15 : index
    %c256 = arith.constant 256 : index
    %5 = vector.load %arg7[%c0_8, %c15, %c256] : memref<18x16x384xbf16, #tpu.memory_space<vmem>>, vector<18x1x128xbf16>
    tpu.vector_store %arg7[%c0_8, %c15, %c256], %3 {strides = array<i32>} : memref<18x16x384xbf16, #tpu.memory_space<vmem>>, vector<18x1x128xbf16>,
    %c0_9 = arith.constant 0 : index
    %c0_10 = arith.constant 0 : index
    %c0_11 = arith.constant 0 : index
    %c0_12 = arith.constant 0 : index
    %6 = vector.load %arg1[%c0_9, %c0_10, %c0_11, %c0_12] : memref<1x16x16x128xf32, #tpu.memory_space<vmem>>, vector<1x16x16x128xf32>
    %7 = vector.shape_cast %6 : vector<1x16x16x128xf32> to vector<16x16x128xf32>
    %8 = arith.truncf %7 : vector<16x16x128xf32> to vector<16x16x128xbf16>
    %c1 = arith.constant 1 : index
    %c0_13 = arith.constant 0 : index
    %c128 = arith.constant 128 : index
    %9 = vector.load %arg7[%c1, %c0_13, %c128] : memref<18x16x384xbf16, #tpu.memory_space<vmem>>, vector<16x16x128xbf16>
    tpu.vector_store %arg7[%c1, %c0_13, %c128], %8 {strides = array<i32>} : memref<18x16x384xbf16, #tpu.memory_space<vmem>>, vector<16x16x128xbf16>,
    %10 = vector.extract_strided_slice %8 {offsets = [0, 0, 0], sizes = [16, 15, 128], strides = [1, 1, 1]} : vector<16x16x128xbf16> to vector<16x15x128xbf16>
    %c1_14 = arith.constant 1 : index
    %c1_15 = arith.constant 1 : index
    %c0_16 = arith.constant 0 : index
    %11 = vector.load %arg7[%c1_14, %c1_15, %c0_16] : memref<18x16x384xbf16, #tpu.memory_space<vmem>>, vector<16x15x128xbf16>
    tpu.vector_store %arg7[%c1_14, %c1_15, %c0_16], %10 {strides = array<i32>} : memref<18x16x384xbf16, #tpu.memory_space<vmem>>, vector<16x15x128xbf16>,
    %12 = vector.extract_strided_slice %8 {offsets = [0, 1, 0], sizes = [16, 15, 128], strides = [1, 1, 1]} : vector<16x16x128xbf16> to vector<16x15x128xbf16>
    %c1_17 = arith.constant 1 : index
    %c0_18 = arith.constant 0 : index
    %c256_19 = arith.constant 256 : index
    %13 = vector.load %arg7[%c1_17, %c0_18, %c256_19] : memref<18x16x384xbf16, #tpu.memory_space<vmem>>, vector<16x15x128xbf16>
    tpu.vector_store %arg7[%c1_17, %c0_18, %c256_19], %12 {strides = array<i32>} : memref<18x16x384xbf16, #tpu.memory_space<vmem>>, vector<16x15x128xbf16>,
    %c0_20 = arith.constant 0 : index
    %c0_21 = arith.constant 0 : index
    %c0_22 = arith.constant 0 : index
    %14 = vector.load %arg7[%c0_20, %c0_21, %c0_22] : memref<18x16x384xbf16, #tpu.memory_space<vmem>>, vector<16x16x384xbf16>
    %15 = vector.shape_cast %14 : vector<16x16x384xbf16> to vector<256x384xbf16>
    %c0_23 = arith.constant 0 : index
    %c0_24 = arith.constant 0 : index
    %c0_25 = arith.constant 0 : index
    %16 = vector.load %arg2[%c0_23, %c0_24, %c0_25] : memref<3x384x128xbf16, #tpu.memory_space<vmem>>, vector<1x384x128xbf16>
    %17 = vector.shape_cast %16 : vector<1x384x128xbf16> to vector<384x128xbf16>
    %cst_26 = arith.constant dense<0.000000e+00> : vector<256x128xf32>
    %18 = tpu.matmul %15, %17, %cst_26 {dimension_numbers = #tpu.dot_dimension_numbers<[1], [0], [0], [1], [0, 0, 1, 1], [], []>} : vector<256x384xbf16>, vector<384x128xbf16>, vector<256x128xf32> -> vector<256x128xf32>
    %c1_27 = arith.constant 1 : index
    %c0_28 = arith.constant 0 : index
    %c0_29 = arith.constant 0 : index
    %19 = vector.load %arg7[%c1_27, %c0_28, %c0_29] : memref<18x16x384xbf16, #tpu.memory_space<vmem>>, vector<16x16x384xbf16>
    %20 = vector.shape_cast %19 : vector<16x16x384xbf16> to vector<256x384xbf16>
    %c1_30 = arith.constant 1 : index
    %c0_31 = arith.constant 0 : index
    %c0_32 = arith.constant 0 : index
    %21 = vector.load %arg2[%c1_30, %c0_31, %c0_32] : memref<3x384x128xbf16, #tpu.memory_space<vmem>>, vector<1x384x128xbf16>
    %22 = vector.shape_cast %21 : vector<1x384x128xbf16> to vector<384x128xbf16>
    %cst_33 = arith.constant dense<0.000000e+00> : vector<256x128xf32>
    %23 = tpu.matmul %20, %22, %cst_33 {dimension_numbers = #tpu.dot_dimension_numbers<[1], [0], [0], [1], [0, 0, 1, 1], [], []>} : vector<256x384xbf16>, vector<384x128xbf16>, vector<256x128xf32> -> vector<256x128xf32>
    %24 = arith.addf %18, %23 : vector<256x128xf32>
    %c2 = arith.constant 2 : index
    %c0_34 = arith.constant 0 : index
    %c0_35 = arith.constant 0 : index
    %25 = vector.load %arg7[%c2, %c0_34, %c0_35] : memref<18x16x384xbf16, #tpu.memory_space<vmem>>, vector<16x16x384xbf16>
    %26 = vector.shape_cast %25 : vector<16x16x384xbf16> to vector<256x384xbf16>
    %c2_36 = arith.constant 2 : index
    %c0_37 = arith.constant 0 : index
    %c0_38 = arith.constant 0 : index
    %27 = vector.load %arg2[%c2_36, %c0_37, %c0_38] : memref<3x384x128xbf16, #tpu.memory_space<vmem>>, vector<1x384x128xbf16>
    %28 = vector.shape_cast %27 : vector<1x384x128xbf16> to vector<384x128xbf16>
    %cst_39 = arith.constant dense<0.000000e+00> : vector<256x128xf32>
    %29 = tpu.matmul %26, %28, %cst_39 {dimension_numbers = #tpu.dot_dimension_numbers<[1], [0], [0], [1], [0, 0, 1, 1], [], []>} : vector<256x384xbf16>, vector<384x128xbf16>, vector<256x128xf32> -> vector<256x128xf32>
    %30 = arith.addf %24, %29 : vector<256x128xf32>
    %c0_40 = arith.constant 0 : index
    %c0_41 = arith.constant 0 : index
    %31 = vector.load %arg3[%c0_40, %c0_41] : memref<1x128xf32, #tpu.memory_space<vmem>>, vector<1x128xf32>
    %32 = vector.broadcast %31 : vector<1x128xf32> to vector<256x128xf32>
    %33 = arith.addf %30, %32 : vector<256x128xf32>
    %cst_42 = arith.constant 0.000000e+00 : f32
    %34 = vector.broadcast %cst_42 : f32 to vector<256x128xf32>
    %35 = arith.maximumf %33, %34 : vector<256x128xf32>
    %36 = vector.shape_cast %35 : vector<256x128xf32> to vector<16x16x128xf32>
    %37 = arith.truncf %36 : vector<16x16x128xf32> to vector<16x16x128xbf16>
    %c1_43 = arith.constant 1 : index
    %c0_44 = arith.constant 0 : index
    %c128_45 = arith.constant 128 : index
    %38 = vector.load %arg7[%c1_43, %c0_44, %c128_45] : memref<18x16x384xbf16, #tpu.memory_space<vmem>>, vector<16x16x128xbf16>
    tpu.vector_store %arg7[%c1_43, %c0_44, %c128_45], %37 {strides = array<i32>} : memref<18x16x384xbf16, #tpu.memory_space<vmem>>, vector<16x16x128xbf16>,
    %39 = vector.extract_strided_slice %37 {offsets = [0, 0, 0], sizes = [16, 15, 128], strides = [1, 1, 1]} : vector<16x16x128xbf16> to vector<16x15x128xbf16>
    %c1_46 = arith.constant 1 : index
    %c1_47 = arith.constant 1 : index
    %c0_48 = arith.constant 0 : index
    %40 = vector.load %arg7[%c1_46, %c1_47, %c0_48] : memref<18x16x384xbf16, #tpu.memory_space<vmem>>, vector<16x15x128xbf16>
    tpu.vector_store %arg7[%c1_46, %c1_47, %c0_48], %39 {strides = array<i32>} : memref<18x16x384xbf16, #tpu.memory_space<vmem>>, vector<16x15x128xbf16>,
    %41 = vector.extract_strided_slice %37 {offsets = [0, 1, 0], sizes = [16, 15, 128], strides = [1, 1, 1]} : vector<16x16x128xbf16> to vector<16x15x128xbf16>
    %c1_49 = arith.constant 1 : index
    %c0_50 = arith.constant 0 : index
    %c256_51 = arith.constant 256 : index
    %42 = vector.load %arg7[%c1_49, %c0_50, %c256_51] : memref<18x16x384xbf16, #tpu.memory_space<vmem>>, vector<16x15x128xbf16>
    tpu.vector_store %arg7[%c1_49, %c0_50, %c256_51], %41 {strides = array<i32>} : memref<18x16x384xbf16, #tpu.memory_space<vmem>>, vector<16x15x128xbf16>,
    %c0_52 = arith.constant 0 : index
    %c0_53 = arith.constant 0 : index
    %c0_54 = arith.constant 0 : index
    %c0_55 = arith.constant 0 : index
    %43 = vector.load %arg1[%c0_52, %c0_53, %c0_54, %c0_55] : memref<1x16x16x128xf32, #tpu.memory_space<vmem>>, vector<1x16x16x128xf32>
    %44 = vector.shape_cast %43 : vector<1x16x16x128xf32> to vector<16x16x128xf32>
    %45 = vector.shape_cast %44 : vector<16x16x128xf32> to vector<256x128xf32>
    %c0_56 = arith.constant 0 : index
    %c0_57 = arith.constant 0 : index
    %c0_58 = arith.constant 0 : index
    %46 = vector.load %arg7[%c0_56, %c0_57, %c0_58] : memref<18x16x384xbf16, #tpu.memory_space<vmem>>, vector<16x16x384xbf16>
    %47 = vector.shape_cast %46 : vector<16x16x384xbf16> to vector<256x384xbf16>
    %c0_59 = arith.constant 0 : index
    %c0_60 = arith.constant 0 : index
    %c0_61 = arith.constant 0 : index
    %48 = vector.load %arg4[%c0_59, %c0_60, %c0_61] : memref<3x384x128xbf16, #tpu.memory_space<vmem>>, vector<1x384x128xbf16>
    %49 = vector.shape_cast %48 : vector<1x384x128xbf16> to vector<384x128xbf16>
    %cst_62 = arith.constant dense<0.000000e+00> : vector<256x128xf32>
    %50 = tpu.matmul %47, %49, %cst_62 {dimension_numbers = #tpu.dot_dimension_numbers<[1], [0], [0], [1], [0, 0, 1, 1], [], []>} : vector<256x384xbf16>, vector<384x128xbf16>, vector<256x128xf32> -> vector<256x128xf32>
    %c1_63 = arith.constant 1 : index
    %c0_64 = arith.constant 0 : index
    %c0_65 = arith.constant 0 : index
    %51 = vector.load %arg7[%c1_63, %c0_64, %c0_65] : memref<18x16x384xbf16, #tpu.memory_space<vmem>>, vector<16x16x384xbf16>
    %52 = vector.shape_cast %51 : vector<16x16x384xbf16> to vector<256x384xbf16>
    %c1_66 = arith.constant 1 : index
    %c0_67 = arith.constant 0 : index
    %c0_68 = arith.constant 0 : index
    %53 = vector.load %arg4[%c1_66, %c0_67, %c0_68] : memref<3x384x128xbf16, #tpu.memory_space<vmem>>, vector<1x384x128xbf16>
    %54 = vector.shape_cast %53 : vector<1x384x128xbf16> to vector<384x128xbf16>
    %cst_69 = arith.constant dense<0.000000e+00> : vector<256x128xf32>
    %55 = tpu.matmul %52, %54, %cst_69 {dimension_numbers = #tpu.dot_dimension_numbers<[1], [0], [0], [1], [0, 0, 1, 1], [], []>} : vector<256x384xbf16>, vector<384x128xbf16>, vector<256x128xf32> -> vector<256x128xf32>
    %56 = arith.addf %50, %55 : vector<256x128xf32>
    %c2_70 = arith.constant 2 : index
    %c0_71 = arith.constant 0 : index
    %c0_72 = arith.constant 0 : index
    %57 = vector.load %arg7[%c2_70, %c0_71, %c0_72] : memref<18x16x384xbf16, #tpu.memory_space<vmem>>, vector<16x16x384xbf16>
    %58 = vector.shape_cast %57 : vector<16x16x384xbf16> to vector<256x384xbf16>
    %c2_73 = arith.constant 2 : index
    %c0_74 = arith.constant 0 : index
    %c0_75 = arith.constant 0 : index
    %59 = vector.load %arg4[%c2_73, %c0_74, %c0_75] : memref<3x384x128xbf16, #tpu.memory_space<vmem>>, vector<1x384x128xbf16>
    %60 = vector.shape_cast %59 : vector<1x384x128xbf16> to vector<384x128xbf16>
    %cst_76 = arith.constant dense<0.000000e+00> : vector<256x128xf32>
    %61 = tpu.matmul %58, %60, %cst_76 {dimension_numbers = #tpu.dot_dimension_numbers<[1], [0], [0], [1], [0, 0, 1, 1], [], []>} : vector<256x384xbf16>, vector<384x128xbf16>, vector<256x128xf32> -> vector<256x128xf32>
    %62 = arith.addf %56, %61 : vector<256x128xf32>
    %c0_77 = arith.constant 0 : index
    %c0_78 = arith.constant 0 : index
    %63 = vector.load %arg5[%c0_77, %c0_78] : memref<1x128xf32, #tpu.memory_space<vmem>>, vector<1x128xf32>
    %64 = vector.broadcast %63 : vector<1x128xf32> to vector<256x128xf32>
    %65 = arith.addf %62, %64 : vector<256x128xf32>
    %66 = arith.addf %65, %45 : vector<256x128xf32>
    %cst_79 = arith.constant 0.000000e+00 : f32
    %67 = vector.broadcast %cst_79 : f32 to vector<256x128xf32>
    %68 = arith.maximumf %66, %67 : vector<256x128xf32>
    %69 = vector.shape_cast %68 : vector<256x128xf32> to vector<16x16x128xf32>
    %c0_80 = arith.constant 0 : index
    %c0_81 = arith.constant 0 : index
    %c0_82 = arith.constant 0 : index
    %c0_83 = arith.constant 0 : index
    %70 = vector.load %arg6[%c0_80, %c0_81, %c0_82, %c0_83] : memref<1x16x16x128xf32, #tpu.memory_space<vmem>>, vector<1x16x16x128xf32>
    %71 = vector.shape_cast %70 : vector<1x16x16x128xf32> to vector<16x16x128xf32>
    %72 = vector.shape_cast %69 : vector<16x16x128xf32> to vector<1x16x16x128xf32>
    tpu.vector_store %arg6[%c0_80, %c0_81, %c0_82, %c0_83], %72 {strides = array<i32>} : memref<1x16x16x128xf32, #tpu.memory_space<vmem>>, vector<1x16x16x128xf32>,
    return
  }
  func.func @transform_0(%arg0: i32) -> (i32, i32, i32, i32) {
    %c0_i32 = arith.constant 0 : i32
    %c0_i32_0 = arith.constant 0 : i32
    %c0_i32_1 = arith.constant 0 : i32
    %c0_i32_2 = arith.constant 0 : i32
    return %arg0, %c0_i32, %c0_i32_0, %c0_i32_1 : i32, i32, i32, i32
  }
  func.func @transform_1(%arg0: i32) -> (i32, i32, i32) {
    %c0_i32 = arith.constant 0 : i32
    %c0_i32_0 = arith.constant 0 : i32
    %c0_i32_1 = arith.constant 0 : i32
    %c0_i32_2 = arith.constant 0 : i32
    return %c0_i32, %c0_i32_0, %c0_i32_1 : i32, i32, i32
  }
  func.func @transform_2(%arg0: i32) -> (i32, i32) {
    %c0_i32 = arith.constant 0 : i32
    %c0_i32_0 = arith.constant 0 : i32
    %c0_i32_1 = arith.constant 0 : i32
    return %c0_i32, %c0_i32_0 : i32, i32
  }
  func.func @transform_3(%arg0: i32) -> (i32, i32, i32) {
    %c0_i32 = arith.constant 0 : i32
    %c0_i32_0 = arith.constant 0 : i32
    %c0_i32_1 = arith.constant 0 : i32
    %c0_i32_2 = arith.constant 0 : i32
    return %c0_i32, %c0_i32_0, %c0_i32_1 : i32, i32, i32
  }
  func.func @transform_4(%arg0: i32) -> (i32, i32) {
    %c0_i32 = arith.constant 0 : i32
    %c0_i32_0 = arith.constant 0 : i32
    %c0_i32_1 = arith.constant 0 : i32
    return %c0_i32, %c0_i32_0 : i32, i32
  }
  func.func @transform_5(%arg0: i32) -> (i32, i32, i32, i32) {
    %c0_i32 = arith.constant 0 : i32
    %c0_i32_0 = arith.constant 0 : i32
    %c0_i32_1 = arith.constant 0 : i32
    %c0_i32_2 = arith.constant 0 : i32
    return %arg0, %c0_i32, %c0_i32_0, %c0_i32_1 : i32, i32, i32, i32
  }
}

</mosaic_0001>

<bundles_post_ra>
// kernel: basic_block_pallas.1
= control target key start
LH: loop header
LB: loop body
LE: loop exit
PB: predicated region body
PF: predicated region fallthrough
CT: control target
= control target key end

     0   :  { %s9166_s18 = smov 0   ;;  %s11242_s0 = inlined_call_operand.vmem [shape: f32[2,16,16,128], index: 0, kind: input, shape index: {}]   ;;  %s11243_s1 = inlined_call_operand.vmem [shape: bf16[3,384,128], index: 1, kind: input, shape index: {}]   ;;  %s11244_s2 = inlined_call_operand.vmem [shape: f32[1,128], index: 2, kind: input, shape index: {}]   ;;  %s11245_s3 = inlined_call_operand.vmem [shape: bf16[3,384,128], index: 3, kind: input, shape index: {}]   ;;  %s11246_s4 = inlined_call_operand.vmem [shape: f32[1,128], index: 4, kind: input, shape index: {}]   ;;  %s11247_s5 = inlined_call_operand.vmem [shape: f32[2,16,16,128], index: 5, kind: output, shape index: {}]  }
   0x1 LB: > { %s6733_s19 = sadd.s32 4294967295, %s9133_s18   ;;  %p6737_p0 = scmp.ge.s32.totalorder %s9133_s18, 1  ;;  %s9133_s18 = sphi %s9166_s18, %s15_s18  }
   0x2   : > { %p187_p1 = scmp.lt.s32.totalorder %s9133_s18, 3 }
   0x4   : > { %p188_p2 = pnand %p6737_p0, %p187_p1 }
   0x6   : > { %191 = sbr.rel (%p188_p2) target bundleno = 1497 (0x5d9), region = 40 }
   0xb   : > { %v8793_v0 = vld [vmem:[%s11243_s1 + $0xf8] sm:$0xff]  ;;  %p215_p3 = scmp.lt.s32.totalorder %s6733_s19, 1  ;;  %v8792_v2 = vld [vmem:[%s11243_s1 + $0xf0] sm:$0xff]  ;;  %vm235_vm0 = vcmask 1040384   ;;  %vm236_vm1 = vsmask.f32 256 }
   0xc   : > { %v8801_v1 = vld [vmem:[%s11243_s1 + $0x138] sm:$0xff]  ;;  %1672 = vmatpush.bf16.msra.mxu0 %v8793_v0  ;;  %9098 = vmatpush.bf16.msra.mxu2 %v8793_v0  ;;  %v8800_v3 = vld [vmem:[%s11243_s1 + $0x130] sm:$0xff]  ;;  %vm9197_vm2 = vmand %vm235_vm0, %vm236_vm1  ;;  %v11310_v4 = vmov 0  ;;  %vm736_vm3 = vcmask 1043456   ;;  %vm446_vm4 = vsmask.f32 4368 }
   0xd   : > { %s11418_s19 = smov (!%p215_p3, %s6733_s19), 1  ;;  %1761 = vmatpush.bf16.msra.mxu1 %v8801_v1  ;;  %9106 = vmatpush.bf16.msra.mxu3 %v8801_v1  ;;  %v11311_v4 = vsel %vm9197_vm2, 4294967295, %v11310_v4  ;;  %v241_v5 = vld [vmem:[#allocation2 + $0x18] sm:$0x1]  ;;  %v8791_v6 = vld [vmem:[%s11243_s1 + $0xe8] sm:$0xff]  ;;  %v8790_v22 = vld [vmem:[%s11243_s1 + $0xe0] sm:$0xff] }
   0xe   : > { %s8664_s28 = sshll.u32 %s11418_s19, 8  ;;  %11312 = vst [vmem:[#allocation3_spill] sm:$0xff] %v11311_v4  ;;  %v242_v7 = vsel %vm9197_vm2, 0, %v241_v5  ;;  %v8799_v10 = vld [vmem:[%s11243_s1 + $0x128] sm:$0xff]  ;;  %v265_v13 = vld [vmem:[#allocation2 + $0xd8] sm:$0x1]  ;;  %vm9240_vm6 = vmor %vm236_vm1, %vm446_vm4 }
   0xf   : > { %s9194_s6 = scalar_lea.vmem %s11242_s0, %s8664_s28  ;;  %243 = vst [vmem:[#allocation2 + $0x18] sm:$0x1] %v242_v7  ;;  %vm737_vm5 = vsmask.f32 7938  ;;  %v266_v15 = vsel %vm9197_vm2, 0, %v265_v13  ;;  %v8798_v27 = vld [vmem:[%s11243_s1 + $0x120] sm:$0xff]  ;;  %s11037_s26 = scalar_lea.vmem %s11247_s5, %s8664_s28 }
  0x10   : > { %1673 = vmatpush.bf16.msra.mxu0 %v8792_v2  ;;  %9099 = vmatpush.bf16.msra.mxu2 %v8792_v2  ;;  %v349_v8 = vld [vmem:[%s9194_s6] sm:$0xff]  ;;  %v350_v9 = vld [vmem:[%s9194_s6 + $0x8] sm:$0xff]  ;;  %v351_v26 = vld [vmem:[%s9194_s6 + $0x10] sm:$0xff]  ;;  %v11313_v28 = vmov 0  ;;  %267 = vst [vmem:[#allocation2 + $0xd8] sm:$0x1] %v266_v15 }
  0x11   : > { %1762 = vmatpush.bf16.msra.mxu1 %v8800_v3  ;;  %9107 = vmatpush.bf16.msra.mxu3 %v8800_v3  ;;  %v9211_v11 = vpack.c.bf16 %v349_v8, %v349_v8  ;;  %v9213_v12 = vpack.c.bf16 %v350_v9, %v350_v9  ;;  %v365_v14 = vld [vmem:[%s9194_s6 + $0x80] sm:$0xff]  ;;  %v366_v16 = vld [vmem:[%s9194_s6 + $0x88] sm:$0xff]  ;;  %v11314_v28 = vsel %vm9240_vm6, 4294967295, %v11313_v28  ;;  %v352_v31 = vld [vmem:[%s9194_s6 + $0x18] sm:$0xff]  ;;  %v9249_v32 = vpack.c.bf16 %v351_v26, %v351_v26 }
  0x12   : > { %v9219_v17 = vpack.c.bf16 %v365_v14, %v365_v14  ;;  %v9230_v23 = vpack.c.bf16 %v366_v16, %v366_v16  ;;  %11315 = vst [vmem:[#allocation4_spill] sm:$0xff] %v11314_v28  ;;  %vm9253_vm7 = vmand %vm736_vm3, %vm737_vm5  ;;  %v11316_v33 = vmov 0  ;;  %v9262_v37 = vpack.c.bf16 %v352_v31, %v352_v31  ;;  %v367_v38 = vld [vmem:[%s9194_s6 + $0x90] sm:$0xff]  ;;  %v8789_v44 = vld [vmem:[%s11243_s1 + $0xd8] sm:$0xff] }
  0x13   : > { %v449_v18 = vshrl.u32 %v9211_v11, 16  ;;  %v452_v19 = vshll.u32 %v9211_v11, 16  ;;  %v457_v20 = vshrl.u32 %v9213_v12, 16  ;;  %v460_v21 = vshll.u32 %v9213_v12, 16  ;;  %414 = vst [vmem:[#allocation2 + $0x1c] sm:$0xf] %v9211_v11 }
  0x14   : > { %1674 = vmatpush.bf16.msra.mxu0 %v8791_v6  ;;  %9100 = vmatpush.bf16.msra.mxu2 %v8791_v6  ;;  %415 = vst [vmem:[#allocation2 + $0x28] sm:$0xf] %v9213_v12  ;;  %v11262_v24 = vshrl.u32 %v9219_v17, 16  ;;  %v11261_v25 = vshll.u32 %v9219_v17, 16  ;;  %v11317_v33 = vsel %vm9253_vm7, 4294967295, %v11316_v33  ;;  %v11264_v35 = vshrl.u32 %v9230_v23, 16 }
  0x15   : > { %1763 = vmatpush.bf16.msra.mxu1 %v8799_v10  ;;  %9108 = vmatpush.bf16.msra.mxu3 %v8799_v10  ;;  %v451_v29 = vrot.slane %v449_v18, 7  ;;  %v459_v30 = vrot.slane %v457_v20, 7  ;;  %11318 = vst [vmem:[#allocation5_spill] sm:$0xff] %v11317_v33  ;;  %v11260_v36 = vshll.u32 %v9230_v23, 16  ;;  %v244_v42 = vld [vmem:[#allocation2 + $0x30] sm:$0x1]  ;;  %v9294_v58 = vpack.c.bf16 %v367_v38, %v367_v38 }
  0x16   : > { %v579_v34 = vrot.slane %v11262_v24, 7  ;;  %430 = vst [vmem:[#allocation2 + $0xdc] sm:$0xf] %v9219_v17  ;;  %v465_v43 = vshrl.u32 %v9249_v32, 16  ;;  %v739_v45 = vld [vmem:[#allocation2 + $0x18] sm:$0xf] }
  0x17   : > { %v454_v39 = vor.u32 %v452_v19, %v451_v29  ;;  %v455_v40 = vrot.slane %v451_v29, 4  ;;  %v462_v41 = vor.u32 %v460_v21, %v459_v30  ;;  %431 = vst [vmem:[#allocation2 + $0xe8] sm:$0xf] %v9230_v23  ;;  %v587_v48 = vrot.slane %v11264_v35, 7  ;;  %v368_v49 = vld [vmem:[%s9194_s6 + $0x98] sm:$0xff]  ;;  %v8788_v61 = vld [vmem:[%s11243_s1 + $0xd0] sm:$0xff] }
  0x18   : > { %1675 = vmatpush.bf16.msra.mxu0 %v8790_v22  ;;  %9101 = vmatpush.bf16.msra.mxu2 %v8790_v22  ;;  %v582_v46 = vor.u32 %v11261_v25, %v579_v34  ;;  %v583_v47 = vrot.slane %v579_v34, 4  ;;  %v8797_v50 = vld [vmem:[%s11243_s1 + $0x118] sm:$0xff]  ;;  %v245_v53 = vsel %vm9197_vm2, 0, %v244_v42  ;;  %v467_v54 = vrot.slane %v465_v43, 7  ;;  %416 = vst [vmem:[#allocation2 + $0x34] sm:$0xf] %v9249_v32 }
  0x19   : > { %1764 = vmatpush.bf16.msra.mxu1 %v8798_v27  ;;  %9109 = vmatpush.bf16.msra.mxu3 %v8798_v27  ;;  %v463_v51 = vsel %vm9240_vm6, %v455_v40, %v462_v41  ;;  %v740_v52 = vsel %vm9253_vm7, %v454_v39, %v739_v45  ;;  %v590_v55 = vor.u32 %v11260_v36, %v587_v48  ;;  %v11303_v56 = vshrl.u32 %v9262_v37, 16  ;;  %v268_v57 = vld [vmem:[#allocation2 + $0xf0] sm:$0x1]  ;;  %v771_v63 = vld [vmem:[#allocation2 + $0xd8] sm:$0xf]  ;;  %v353_v13 = vld [vmem:[%s9194_s6 + $0x20] sm:$0xff] }
  0x1a   : > { %741 = vst [vmem:[#allocation2 + $0x18] sm:$0xf] %v740_v52  ;;  %v476_v59 = vshll.u32 %v9262_v37, 16  ;;  %v9297_v60 = vpack.c.bf16 %v368_v49, %v368_v49  ;;  %v468_v0 = vshll.u32 %v9249_v32, 16  ;;  %v8796_v1 = vld [vmem:[%s11243_s1 + $0x110] sm:$0xff]  ;;  %v772_v2 = vsel %vm9253_vm7, %v582_v46, %v771_v63  ;;  %v8787_v14 = vld [vmem:[%s11243_s1 + $0xc8] sm:$0xff] }
  0x1b   : > { %742 = vst [vmem:[#allocation2 + $0x24] sm:$0xf] %v463_v51  ;;  %v591_v62 = vsel %vm9240_vm6, %v583_v47, %v590_v55  ;;  %v471_v3 = vrot.slane %v467_v54, 4  ;;  %v475_v5 = vrot.slane %v11303_v56, 7  ;;  %v269_v6 = vsel %vm9197_vm2, 0, %v268_v57  ;;  %v354_v26 = vld [vmem:[%s9194_s6 + $0x28] sm:$0xff] }
  0x1c   : > { %1676 = vmatpush.bf16.msra.mxu0 %v8789_v44  ;;  %9102 = vmatpush.bf16.msra.mxu2 %v8789_v44  ;;  %246 = vst [vmem:[#allocation2 + $0x30] sm:$0x1] %v245_v53  ;;  %v11258_v7 = vshrl.u32 %v9294_v58, 16  ;;  %v11259_v9 = vshrl.u32 %v9297_v60, 16  ;;  %v11253_v10 = vshll.u32 %v9297_v60, 16  ;;  %v470_v15 = vor.u32 %v468_v0, %v467_v54  ;;  %v8795_v29 = vld [vmem:[%s11243_s1 + $0x108] sm:$0xff] }
  0x1d   : > { %1765 = vmatpush.bf16.msra.mxu1 %v8797_v50  ;;  %9110 = vmatpush.bf16.msra.mxu3 %v8797_v50  ;;  %774 = vst [vmem:[#allocation2 + $0xe4] sm:$0xf] %v591_v62  ;;  %v478_v8 = vor.u32 %v476_v59, %v475_v5  ;;  %v11257_v22 = vshll.u32 %v9294_v58, 16  ;;  %v9330_v27 = vpack.c.bf16 %v353_v13, %v353_v13  ;;  %v8786_v39 = vld [vmem:[%s11243_s1 + $0xc0] sm:$0xff]  ;;  %v9351_v45 = vld [vmem:[#allocation2 + $0x1c] sm:$0xf] }
  0x1e   : > { %773 = vst [vmem:[#allocation2 + $0xd8] sm:$0xf] %v772_v2  ;;  %v595_v16 = vrot.slane %v11258_v7, 7  ;;  %v603_v34 = vrot.slane %v11259_v9, 7  ;;  %v9342_v38 = vpack.c.bf16 %v354_v26, %v354_v26  ;;  %v8794_v44 = vld [vmem:[%s11243_s1 + $0x100] sm:$0xff]  ;;  %v8809_v53 = vld [vmem:[%s11243_s1 + $0x178] sm:$0xff] }
  0x1f   : > { %417 = vst [vmem:[#allocation2 + $0x40] sm:$0xf] %v9262_v37  ;;  %v479_v31 = vsel %vm9240_vm6, %v471_v3, %v478_v8  ;;  %v11302_v42 = vshrl.u32 %v9330_v27, 16  ;;  %v9353_v46 = vld [vmem:[#allocation2 + $0x24] sm:$0xf0]  ;;  %v369_v62 = vld [vmem:[%s9194_s6 + $0xa0] sm:$0xff] }
  0x20   : > { %1677 = vmatpush.bf16.msra.mxu0 %v8788_v61  ;;  %9103 = vmatpush.bf16.msra.mxu2 %v8788_v61  ;;  %270 = vst [vmem:[#allocation2 + $0xf0] sm:$0x1] %v269_v6  ;;  %v599_v41 = vrot.slane %v595_v16, 4  ;;  %v9355_v47 = vld [vmem:[#allocation2 + $0xdc] sm:$0xf]  ;;  %v606_v50 = vor.u32 %v11253_v10, %v603_v34  ;;  %v598_v55 = vor.u32 %v11257_v22, %v595_v16  ;;  %v11292_v2 = vshrl.u32 %v9342_v38, 16 }
  0x21   : > { %1766 = vmatpush.bf16.msra.mxu1 %v8796_v1  ;;  %9111 = vmatpush.bf16.msra.mxu3 %v8796_v1  ;;  %v9335_v30 = vld [vmem:[#allocation2 + $0x18] sm:$0xf]  ;;  %432 = vst [vmem:[#allocation2 + $0xf4] sm:$0xf] %v9294_v58  ;;  %v9357_v48 = vld [vmem:[#allocation2 + $0xe4] sm:$0xf0]  ;;  %v9378_v5 = vpack.c.bf16 %v369_v62, %v369_v62 }
  0x22   : > { %v8739_v40 = vld [vmem:[#allocation2 + $0x20] sm:$0xf0]  ;;  %746 = vst [vmem:[#allocation2 + $0x3c] sm:$0xf] %v479_v31  ;;  %v247_v51 = vld [vmem:[#allocation2 + $0x48] sm:$0x1]  ;;  %v607_v1 = vsel %vm9240_vm6, %v599_v41, %v606_v50 }
  0x23   : > { %v743_v49 = vld [vmem:[#allocation2 + $0x30] sm:$0xf]  ;;  %433 = vst [vmem:[#allocation2 + $0x100] sm:$0xf] %v9297_v60  ;;  %v248_v57 = vsel %vm9197_vm2, 0, %v247_v51  ;;  %v483_v61 = vrot.slane %v11302_v42, 7  ;;  %v6793_v6 = vor.u32 %v8739_v40, %v9335_v30  ;;  %v6797_v30 = vor.u32 %v9351_v45, %v9353_v46 }
  0x24   : > { %1678 = vmatpush.bf16.msra.mxu0 %v8787_v14  ;;  %9104 = vmatpush.bf16.msra.mxu2 %v8787_v14  ;;  %v8763_v52 = vld [vmem:[#allocation2 + $0xe0] sm:$0xf0]  ;;  %v744_v54 = vsel %vm9253_vm7, %v470_v15, %v743_v49  ;;  %v11293_v3 = vshll.u32 %v9342_v38, 16  ;;  %v8721_v8 = vld [vmem:[%s11243_s1 + $0x38] sm:$0xff]  ;;  %778 = vst [vmem:[#allocation2 + $0xfc] sm:$0xf] %v607_v1  ;;  %v6893_v40 = vor.u32 %v9355_v47, %v9357_v48 }
  0x25   : > { %1767 = vmatpush.bf16.msra.mxu1 %v8795_v29  ;;  %9112 = vmatpush.bf16.msra.mxu3 %v8795_v29  ;;  %v6888_v63 = vld [vmem:[#allocation2 + $0xd8] sm:$0xf]  ;;  %745 = vst [vmem:[#allocation2 + $0x30] sm:$0xf] %v744_v54  ;;  %v11301_v13 = vshll.u32 %v9330_v27, 16  ;;  %v487_v14 = vrot.slane %v483_v61, 4 }
  0x26   : > { %v370_v15 = vld [vmem:[%s9194_s6 + $0xa8] sm:$0xff]  ;;  %v6889_v16 = vor.u32 %v8763_v52, %v6888_v63  ;;  %249 = vst [vmem:[#allocation2 + $0x48] sm:$0x1] %v248_v57  ;;  %v491_v29 = vrot.slane %v11292_v2, 7  ;;  %v11250_v34 = vshrl.u32 %v9378_v5, 16  ;;  %v8729_v50 = vld [vmem:[%s11243_s1 + $0x78] sm:$0xff] }
  0x27   : > { %v775_v26 = vld [vmem:[#allocation2 + $0xf0] sm:$0xf]  ;;  %v9388_v31 = vpack.c.bf16 %v370_v15, %v370_v15  ;;  %418 = vst [vmem:[#allocation2 + $0x4c] sm:$0xf] %v9330_v27  ;;  %v271_v49 = vld [vmem:[#allocation2 + $0x108] sm:$0x1]  ;;  %v486_v51 = vor.u32 %v11301_v13, %v483_v61 }
  0x28   : > { %1679 = vmatpush.bf16.msra.mxu0 %v8786_v39  ;;  %9105 = vmatpush.bf16.msra.mxu2 %v8786_v39  ;;  %v776_v41 = vsel %vm9253_vm7, %v598_v55, %v775_v26  ;;  %v494_v39 = vor.u32 %v11293_v3, %v491_v29  ;;  %v272_v45 = vsel %vm9197_vm2, 0, %v271_v49  ;;  %v611_v46 = vrot.slane %v11250_v34, 7  ;;  %v8720_v47 = vld [vmem:[%s11243_s1 + $0x30] sm:$0xff]  ;;  %419 = vst [vmem:[#allocation2 + $0x58] sm:$0xf] %v9342_v38  ;;  %v8807_v63 = vld [vmem:[%s11243_s1 + $0x168] sm:$0xff] }
  0x29   : > { %1768 = vmatpush.bf16.msra.mxu1 %v8794_v44  ;;  %9113 = vmatpush.bf16.msra.mxu3 %v8794_v44  ;;  %777 = vst [vmem:[#allocation2 + $0xf0] sm:$0xf] %v776_v41  ;;  %v8808_v44 = vld [vmem:[%s11243_s1 + $0x170] sm:$0xff]  ;;  %v11251_v48 = vshrl.u32 %v9388_v31, 16  ;;  %v11248_v54 = vshll.u32 %v9388_v31, 16  ;;  %v356_v29 = vld [vmem:[%s9194_s6 + $0x38] sm:$0xff] }
  0x2a   : > { %v495_v52 = vsel %vm9240_vm6, %v487_v14, %v494_v39  ;;  %273 = vst [vmem:[#allocation2 + $0x108] sm:$0x1] %v272_v45  ;;  %v250_v55 = vld [vmem:[#allocation2 + $0x60] sm:$0x1]  ;;  %v615_v57 = vrot.slane %v611_v46, 4  ;;  %v8728_v61 = vld [vmem:[%s11243_s1 + $0x70] sm:$0xff] }
  0x2b   : > { %1680 = vmatmul.bf16.vlgmr.msra.gmra.mxu0 %v6793_v6  ;;  %1720 = vmatmul.bf16.vlgmr.msra.gmra.mxu2 %v6889_v16  ;;  %750 = vst [vmem:[#allocation2 + $0x54] sm:$0xf] %v495_v52  ;;  %v619_v62 = vrot.slane %v11251_v48, 7  ;;  %v251_v14 = vsel %vm9197_vm2, 0, %v250_v55  ;;  %v355_v26 = vld [vmem:[%s9194_s6 + $0x30] sm:$0xff]  ;;  %v8727_v45 = vld [vmem:[%s11243_s1 + $0x68] sm:$0xff] }
  0x2c   : > { %1850 = vmatpush.bf16.msrb.mxu2 %v8809_v53  ;;  %v11249_v53 = vshll.u32 %v9378_v5, 16  ;;  %1769 = vmatmul.bf16.vlgmr.msra.gmra.mxu1 %v6797_v30  ;;  %434 = vst [vmem:[#allocation2 + $0x10c] sm:$0xf] %v9378_v5  ;;  %v9444_v30 = vld [vmem:[#allocation2 + $0x30] sm:$0xf]  ;;  %v9448_v49 = vpack.c.bf16 %v355_v26, %v355_v26  ;;  %v364_v2 = vld [vmem:[%s9194_s6 + $0x78] sm:$0xff] }
  0x2d   : > { %2339 = vmatpush.bf16.msrb.mxu3 %v8721_v8  ;;  %2428 = vmatpush.bf16.msrb.mxu0 %v8729_v50  ;;  %v747_v1 = vld [vmem:[#allocation2 + $0x48] sm:$0xf]  ;;  %v622_v6 = vor.u32 %v11248_v54, %v619_v62  ;;  %435 = vst [vmem:[#allocation2 + $0x118] sm:$0xf] %v9388_v31  ;;  %v9450_v50 = vpack.c.bf16 %v356_v29, %v356_v29  ;;  %v274_v39 = vld [vmem:[#allocation2 + $0x120] sm:$0x1] }
  0x2e   : > { %1809 = vmatmul.bf16.vlgmr.msra.gmra.mxu3 %v6893_v40  ;;  %v8719_v8 = vld [vmem:[%s11243_s1 + $0x28] sm:$0xff]  ;;  %v748_v15 = vsel %vm9253_vm7, %v486_v51, %v747_v1  ;;  %v614_v16 = vor.u32 %v11249_v53, %v611_v46  ;;  %252 = vst [vmem:[#allocation2 + $0x60] sm:$0x1] %v251_v14  ;;  %v8742_v40 = vld [vmem:[#allocation2 + $0x38] sm:$0xf0]  ;;  %v275_v46 = vsel %vm9197_vm2, 0, %v274_v39 }
  0x2f   : > { %749 = vst [vmem:[#allocation2 + $0x48] sm:$0xf] %v748_v15  ;;  %v623_v41 = vsel %vm9240_vm6, %v615_v57, %v622_v6  ;;  %v11289_v51 = vshrl.u32 %v9448_v49, 16  ;;  %v11282_v52 = vshll.u32 %v9448_v49, 16  ;;  %v11270_v55 = vshrl.u32 %v9450_v50, 16  ;;  %v372_v57 = vld [vmem:[%s9194_s6 + $0xb8] sm:$0xff] }
  0x30   : > { %1851 = vmatpush.bf16.msrb.mxu2 %v8808_v44  ;;  %782 = vst [vmem:[#allocation2 + $0x114] sm:$0xf] %v623_v41  ;;  %v371_v44 = vld [vmem:[%s9194_s6 + $0xb0] sm:$0xff]  ;;  %v8766_v62 = vld [vmem:[#allocation2 + $0xf8] sm:$0xf0]  ;;  %v11281_v15 = vshll.u32 %v9450_v50, 16  ;;  %v6805_v39 = vor.u32 %v8742_v40, %v9444_v30 }
  0x31   : > { %2340 = vmatpush.bf16.msrb.mxu3 %v8720_v47  ;;  %2429 = vmatpush.bf16.msrb.mxu0 %v8728_v61  ;;  %v779_v47 = vld [vmem:[#allocation2 + $0x108] sm:$0xf]  ;;  %v8741_v61 = vld [vmem:[#allocation2 + $0x34] sm:$0xf]  ;;  %v6806_v1 = vld [vmem:[#allocation2 + $0x3c] sm:$0xf0] }
  0x32   : > { %v8765_v6 = vld [vmem:[#allocation2 + $0xf4] sm:$0xf]  ;;  %v780_v14 = vsel %vm9253_vm7, %v614_v16, %v779_v47  ;;  %420 = vst [vmem:[#allocation2 + $0x64] sm:$0xf] %v9448_v49  ;;  %v6900_v26 = vld [vmem:[#allocation2 + $0xf0] sm:$0xf]  ;;  %v6809_v48 = vor.u32 %v8741_v61, %v6806_v1 }
  0x33   : > { %781 = vst [vmem:[#allocation2 + $0x108] sm:$0xf] %v780_v14  ;;  %v499_v29 = vrot.slane %v11289_v51, 7  ;;  %v507_v41 = vrot.slane %v11270_v55, 7  ;;  %v6902_v54 = vld [vmem:[#allocation2 + $0xfc] sm:$0xf0]  ;;  %v6901_v34 = vor.u32 %v8766_v62, %v6900_v26 }
  0x34   : > { %1852 = vmatpush.bf16.msrb.mxu2 %v8807_v63  ;;  %v9466_v63 = vpack.c.bf16 %v371_v44, %v371_v44  ;;  %421 = vst [vmem:[#allocation2 + $0x70] sm:$0xf] %v9450_v50  ;;  %v253_v62 = vld [vmem:[#allocation2 + $0x78] sm:$0x1]  ;;  %v357_v61 = vld [vmem:[%s9194_s6 + $0x40] sm:$0xff]  ;;  %v358_v1 = vld [vmem:[%s9194_s6 + $0x48] sm:$0xff] }
  0x35   : > { %2341 = vmatpush.bf16.msrb.mxu3 %v8719_v8  ;;  %v9468_v8 = vpack.c.bf16 %v372_v57, %v372_v57  ;;  %2430 = vmatpush.bf16.msrb.mxu0 %v8727_v45  ;;  %v502_v44 = vor.u32 %v11282_v52, %v499_v29  ;;  %v503_v47 = vrot.slane %v499_v29, 4  ;;  %v510_v57 = vor.u32 %v11281_v15, %v507_v41  ;;  %v751_v14 = vld [vmem:[#allocation2 + $0x60] sm:$0xf]  ;;  %v6818_v22 = vld [vmem:[#allocation2 + $0x54] sm:$0xf0] }
  0x36   : > { %v11252_v16 = vshrl.u32 %v9466_v63, 16  ;;  %276 = vst [vmem:[#allocation2 + $0x120] sm:$0x1] %v275_v46  ;;  %v11255_v53 = vshll.u32 %v9466_v63, 16  ;;  %v6905_v29 = vor.u32 %v8765_v6, %v6902_v54  ;;  %v254_v10 = vsel %vm9197_vm2, 0, %v253_v62 }
  0x37   : > { %v11256_v40 = vshrl.u32 %v9468_v8, 16  ;;  %v11254_v45 = vshll.u32 %v9468_v8, 16  ;;  %v511_v41 = vsel %vm9240_vm6, %v503_v47, %v510_v57  ;;  %v752_v46 = vsel %vm9253_vm7, %v502_v44, %v751_v14  ;;  %436 = vst [vmem:[#allocation2 + $0x124] sm:$0xf] %v9466_v63  ;;  %v373_v44 = vld [vmem:[%s9194_s6 + $0xc0] sm:$0xff]  ;;  %v374_v14 = vld [vmem:[%s9194_s6 + $0xc8] sm:$0xff] }
  0x38   : > { %v627_v30 = vrot.slane %v11252_v16, 7  ;;  %753 = vst [vmem:[#allocation2 + $0x60] sm:$0xf] %v752_v46  ;;  %v9499_v6 = vpack.c.bf16 %v357_v61, %v357_v61  ;;  %v9505_v57 = vpack.c.bf16 %v358_v1, %v358_v1  ;;  %v9521_v46 = vpack.c.bf16 %v373_v44, %v373_v44  ;;  %v277_v61 = vld [vmem:[#allocation2 + $0x138] sm:$0x1] }
  0x39   : > { %v635_v16 = vrot.slane %v11256_v40, 7  ;;  %754 = vst [vmem:[#allocation2 + $0x6c] sm:$0xf] %v511_v41  ;;  %v8718_v41 = vld [vmem:[%s11243_s1 + $0x20] sm:$0xff]  ;;  %v9527_v1 = vpack.c.bf16 %v374_v14, %v374_v14  ;;  %v278_v44 = vsel %vm9197_vm2, 0, %v277_v61  ;;  %vm292_vm8 = vcmask 1043459  }
  0x3a   : > { %v631_v26 = vrot.slane %v627_v30, 4  ;;  %v630_v54 = vor.u32 %v11255_v53, %v627_v30  ;;  %437 = vst [vmem:[#allocation2 + $0x130] sm:$0xf] %v9468_v8  ;;  %v8806_v30 = vld [vmem:[%s11243_s1 + $0x160] sm:$0xff]  ;;  %2342 = vmatpush.bf16.msrb.mxu3 %v8718_v41  ;;  %v11263_v14 = vshrl.u32 %v9521_v46, 16 }
  0x3b   : > { %1685 = vmatmul.bf16.gmra.mxu0 %v6805_v39  ;;  %1725 = vmatmul.bf16.gmra.mxu2 %v6901_v34  ;;  %v638_v47 = vor.u32 %v11254_v45, %v635_v16  ;;  %255 = vst [vmem:[#allocation2 + $0x78] sm:$0x1] %v254_v10  ;;  %v8726_v16 = vld [vmem:[%s11243_s1 + $0x60] sm:$0xff]  ;;  %v11269_v10 = vshrl.u32 %v9505_v57, 16  ;;  %v11271_v45 = vshll.u32 %v9521_v46, 16  ;;  %v11267_v53 = vshrl.u32 %v9527_v1, 16 }
  0x3c   : > { %1774 = vmatmul.bf16.gmra.mxu1 %v6809_v48  ;;  %v11268_v48 = vshrl.u32 %v9499_v6, 16  ;;  %1853 = vmatpush.bf16.msrb.mxu2 %v8806_v30  ;;  %422 = vst [vmem:[#allocation2 + $0x7c] sm:$0xf] %v9499_v6  ;;  %v8744_v40 = vld [vmem:[#allocation2 + $0x4c] sm:$0xf]  ;;  %v643_v9 = vrot.slane %v11263_v14, 7 }
  0x3d   : > { %v639_v34 = vsel %vm9240_vm6, %v631_v26, %v638_v47  ;;  %v783_v39 = vld [vmem:[#allocation2 + $0x120] sm:$0xf]  ;;  %v11265_v26 = vshll.u32 %v9505_v57, 16  ;;  %2431 = vmatpush.bf16.msrb.mxu0 %v8726_v16  ;;  %423 = vst [vmem:[#allocation2 + $0x88] sm:$0xf] %v9505_v57  ;;  %v11273_v36 = vshll.u32 %v9527_v1, 16 }
  0x3e   : > { %1814 = vmatmul.bf16.gmra.mxu3 %v6905_v29  ;;  %v11266_v29 = vshll.u32 %v9499_v6, 16  ;;  %v784_v62 = vsel %vm9253_vm7, %v630_v54, %v783_v39  ;;  %786 = vst [vmem:[#allocation2 + $0x12c] sm:$0xf] %v639_v34  ;;  %v515_v47 = vrot.slane %v11268_v48, 7  ;;  %v523_v54 = vrot.slane %v11269_v10, 7  ;;  %v360_v10 = vld [vmem:[%s9194_s6 + $0x58] sm:$0xff] }
  0x3f   : > { %785 = vst [vmem:[#allocation2 + $0x120] sm:$0xf] %v784_v62  ;;  %v6816_v34 = vld [vmem:[#allocation2 + $0x48] sm:$0xf]  ;;  %v8745_v39 = vld [vmem:[#allocation2 + $0x50] sm:$0xf0]  ;;  %v646_v35 = vor.u32 %v11271_v45, %v643_v9  ;;  %v9568_v45 = vpack.c.bf16 %v360_v10, %v360_v10 }
  0x40   : > { %v518_v30 = vor.u32 %v11266_v29, %v515_v47  ;;  %v519_v41 = vrot.slane %v515_v47, 4  ;;  %v6912_v16 = vld [vmem:[#allocation2 + $0x108] sm:$0xf]  ;;  %v8769_v62 = vld [vmem:[#allocation2 + $0x110] sm:$0xf0]  ;;  %v526_v61 = vor.u32 %v11265_v26, %v523_v54  ;;  %v651_v54 = vrot.slane %v11267_v53, 7 }
  0x41   : > { %279 = vst [vmem:[#allocation2 + $0x138] sm:$0x1] %v278_v44  ;;  %v8768_v7 = vld [vmem:[#allocation2 + $0x10c] sm:$0xf]  ;;  %v6914_v24 = vld [vmem:[#allocation2 + $0x114] sm:$0xf0]  ;;  %v6821_v26 = vor.u32 %v8744_v40, %v6818_v22 }
  0x42   : > { %v755_v47 = vld [vmem:[#allocation2 + $0x78] sm:$0xf]  ;;  %438 = vst [vmem:[#allocation2 + $0x13c] sm:$0xf] %v9521_v46  ;;  %v527_v25 = vsel %vm9240_vm6, %v519_v41, %v526_v61  ;;  %v647_v14 = vrot.slane %v643_v9, 4  ;;  %v654_v41 = vor.u32 %v11273_v36, %v651_v54  ;;  %v6817_v61 = vor.u32 %v8745_v39, %v6816_v34 }
  0x43   : > { %v756_v44 = vsel %vm9253_vm7, %v518_v30, %v755_v47  ;;  %439 = vst [vmem:[#allocation2 + $0x148] sm:$0xf] %v9527_v1  ;;  %v6913_v30 = vor.u32 %v8769_v62, %v6912_v16  ;;  %v256_v47 = vld [vmem:[#allocation2 + $0x90] sm:$0x1]  ;;  %v6917_v29 = vor.u32 %v8768_v7, %v6914_v24  ;;  %v11278_v40 = vshrl.u32 %v9568_v45, 16 }
  0x44   : > { %757 = vst [vmem:[#allocation2 + $0x78] sm:$0xf] %v756_v44  ;;  %v655_v53 = vsel %vm9240_vm6, %v647_v14, %v654_v41  ;;  %v257_v48 = vsel %vm9197_vm2, 0, %v256_v47  ;;  %v359_v44 = vld [vmem:[%s9194_s6 + $0x50] sm:$0xff]  ;;  %v376_v14 = vld [vmem:[%s9194_s6 + $0xd8] sm:$0xff] }
  0x45   : > { %758 = vst [vmem:[#allocation2 + $0x84] sm:$0xf] %v527_v25  ;;  %v375_v25 = vld [vmem:[%s9194_s6 + $0xd0] sm:$0xff]  ;;  %v9566_v9 = vpack.c.bf16 %v359_v44, %v359_v44  ;;  %v539_v39 = vrot.slane %v11278_v40, 7  ;;  %v9595_v16 = vpack.c.bf16 %v376_v14, %v376_v14  ;;  %vm293_vm9 = vsmask.f32 7950 }
  0x46   : > { %790 = vst [vmem:[#allocation2 + $0x144] sm:$0xf] %v655_v53  ;;  %v280_v24 = vld [vmem:[#allocation2 + $0x150] sm:$0x1]  ;;  %v9573_v22 = vpack.c.bf16 %v375_v25, %v375_v25  ;;  %v8805_v53 = vld [vmem:[%s11243_s1 + $0x158] sm:$0xff]  ;;  %vm9747_vm10 = vmand %vm292_vm8, %vm293_vm9 }
  0x47   : > { %258 = vst [vmem:[#allocation2 + $0x90] sm:$0x1] %v257_v48  ;;  %v11277_v7 = vshrl.u32 %v9566_v9, 16  ;;  %v8725_v48 = vld [vmem:[%s11243_s1 + $0x58] sm:$0xff]  ;;  %1854 = vmatpush.bf16.msrb.mxu2 %v8805_v53  ;;  %v11274_v47 = vshrl.u32 %v9595_v16, 16  ;;  %v11280_v44 = vshll.u32 %v9595_v16, 16 }
  0x48   : > { %v787_v55 = vld [vmem:[#allocation2 + $0x138] sm:$0xf]  ;;  %424 = vst [vmem:[#allocation2 + $0x94] sm:$0xf] %v9566_v9  ;;  %2432 = vmatpush.bf16.msrb.mxu0 %v8725_v48  ;;  %v11272_v41 = vshrl.u32 %v9573_v22, 16 }
  0x49   : > { %v788_v34 = vsel %vm9253_vm7, %v646_v35, %v787_v55  ;;  %v8717_v35 = vld [vmem:[%s11243_s1 + $0x18] sm:$0xff]  ;;  %v11276_v55 = vshll.u32 %v9566_v9, 16  ;;  %v531_v10 = vrot.slane %v11277_v7, 7  ;;  %425 = vst [vmem:[#allocation2 + $0xa0] sm:$0xf] %v9568_v45  ;;  %v667_v48 = vrot.slane %v11274_v47, 7 }
  0x4a   : > { %789 = vst [vmem:[#allocation2 + $0x138] sm:$0xf] %v788_v34  ;;  %2343 = vmatpush.bf16.msrb.mxu3 %v8717_v35  ;;  %v659_v34 = vrot.slane %v11272_v41, 7  ;;  %v8772_v41 = vld [vmem:[#allocation2 + $0x128] sm:$0xf0] }
  0x4b   : > { %1690 = vmatmul.bf16.gmra.mxu0 %v6817_v61  ;;  %1730 = vmatmul.bf16.gmra.mxu2 %v6913_v30  ;;  %v534_v62 = vor.u32 %v11276_v55, %v531_v10  ;;  %v535_v54 = vrot.slane %v531_v10, 4  ;;  %v11279_v30 = vshll.u32 %v9573_v22, 16  ;;  %440 = vst [vmem:[#allocation2 + $0x154] sm:$0xf] %v9573_v22  ;;  %v8748_v10 = vld [vmem:[#allocation2 + $0x68] sm:$0xf0] }
  0x4c   : > { %1779 = vmatmul.bf16.gmra.mxu1 %v6821_v26  ;;  %v281_v26 = vsel %vm9197_vm2, 0, %v280_v24  ;;  %v6828_v24 = vld [vmem:[#allocation2 + $0x60] sm:$0xf]  ;;  %441 = vst [vmem:[#allocation2 + $0x160] sm:$0xf] %v9595_v16  ;;  %v663_v14 = vrot.slane %v659_v34, 4 }
  0x4d   : > { %282 = vst [vmem:[#allocation2 + $0x150] sm:$0x1] %v281_v26  ;;  %v8747_v26 = vld [vmem:[#allocation2 + $0x64] sm:$0xf]  ;;  %v662_v36 = vor.u32 %v11279_v30, %v659_v34  ;;  %v259_v7 = vld [vmem:[#allocation2 + $0xa8] sm:$0x1] }
  0x4e   : > { %1819 = vmatmul.bf16.gmra.mxu3 %v6917_v29  ;;  %v11275_v29 = vshll.u32 %v9568_v45, 16  ;;  %v759_v25 = vld [vmem:[#allocation2 + $0x90] sm:$0xf]  ;;  %v260_v30 = vsel %vm9197_vm2, 0, %v259_v7  ;;  %vm803_vm11 = vsmask.f32 3328 }
  0x4f   : > { %v760_v35 = vsel %vm9253_vm7, %v534_v62, %v759_v25  ;;  %v670_v62 = vor.u32 %v11280_v44, %v667_v48  ;;  %v6926_v25 = vld [vmem:[#allocation2 + $0x12c] sm:$0xf0]  ;;  %v361_v48 = vld [vmem:[%s9194_s6 + $0x60] sm:$0xff]  ;;  %v362_v44 = vld [vmem:[%s9194_s6 + $0x68] sm:$0xff]  ;;  %261 = vst [vmem:[#allocation2 + $0xa8] sm:$0x1] %v260_v30 }
  0x50   : > { %v542_v61 = vor.u32 %v11275_v29, %v539_v39  ;;  %761 = vst [vmem:[#allocation2 + $0x90] sm:$0xf] %v760_v35  ;;  %v6924_v39 = vld [vmem:[#allocation2 + $0x120] sm:$0xf]  ;;  %v6829_v29 = vor.u32 %v8748_v10, %v6828_v24  ;;  %v9628_v15 = vpack.c.bf16 %v361_v48, %v361_v48  ;;  %v9630_v52 = vpack.c.bf16 %v362_v44, %v362_v44  ;;  %v283_v24 = vld [vmem:[#allocation2 + $0x168] sm:$0x1]  ;;  %vm9786_vm14 = vmand %vm736_vm3, %vm803_vm11 }
  0x51   : > { %v671_v47 = vsel %vm9240_vm6, %v663_v14, %v670_v62  ;;  %v6925_v35 = vor.u32 %v8772_v41, %v6924_v39  ;;  %v8716_v7 = vld [vmem:[%s11243_s1 + $0x10] sm:$0xff]  ;;  %v284_v44 = vsel %vm9197_vm2, 0, %v283_v24  ;;  %v377_v10 = vld [vmem:[%s9194_s6 + $0xe0] sm:$0xff]  ;;  %v6840_v24 = vld [vmem:[#allocation2 + $0x78] sm:$0xf] }
  0x52   : > { %v543_v53 = vsel %vm9240_vm6, %v535_v54, %v542_v61  ;;  %v6830_v54 = vld [vmem:[#allocation2 + $0x6c] sm:$0xf0]  ;;  %v8771_v61 = vld [vmem:[#allocation2 + $0x124] sm:$0xf]  ;;  %794 = vst [vmem:[#allocation2 + $0x15c] sm:$0xf] %v671_v47  ;;  %2344 = vmatpush.bf16.msrb.mxu3 %v8716_v7  ;;  %v9655_v39 = vpack.c.bf16 %v377_v10, %v377_v10 }
  0x53   : > { %762 = vst [vmem:[#allocation2 + $0x9c] sm:$0xf] %v543_v53  ;;  %v6833_v53 = vor.u32 %v8747_v26, %v6830_v54  ;;  %v6929_v40 = vor.u32 %v8771_v61, %v6926_v25  ;;  %v11287_v41 = vshrl.u32 %v9628_v15, 16  ;;  %v11288_v30 = vshrl.u32 %v9630_v52, 16  ;;  %v378_v26 = vld [vmem:[%s9194_s6 + $0xe8] sm:$0xff] }
  0x54   : > { %v791_v55 = vld [vmem:[#allocation2 + $0x150] sm:$0xf]  ;;  %v11283_v47 = vshll.u32 %v9630_v52, 16  ;;  %426 = vst [vmem:[#allocation2 + $0xac] sm:$0xf] %v9628_v15  ;;  %v9657_v62 = vpack.c.bf16 %v378_v26, %v378_v26 }
  0x55   : > { %v792_v34 = vsel %vm9253_vm7, %v662_v36, %v791_v55  ;;  %v8804_v36 = vld [vmem:[%s11243_s1 + $0x150] sm:$0xff]  ;;  %v555_v14 = vrot.slane %v11288_v30, 7  ;;  %427 = vst [vmem:[#allocation2 + $0xb8] sm:$0xf] %v9630_v52  ;;  %v8775_v10 = vld [vmem:[#allocation2 + $0x140] sm:$0xf0] }
  0x56   : > { %793 = vst [vmem:[#allocation2 + $0x150] sm:$0xf] %v792_v34  ;;  %v8724_v55 = vld [vmem:[%s11243_s1 + $0x50] sm:$0xff]  ;;  %1855 = vmatpush.bf16.msrb.mxu2 %v8804_v36  ;;  %v11285_v34 = vshrl.u32 %v9657_v62, 16  ;;  %v11291_v48 = vshll.u32 %v9657_v62, 16 }
  0x57   : > { %2433 = vmatpush.bf16.msrb.mxu0 %v8724_v55  ;;  %285 = vst [vmem:[#allocation2 + $0x168] sm:$0x1] %v284_v44  ;;  %v558_v25 = vor.u32 %v11283_v47, %v555_v14  ;;  %v763_v7 = vld [vmem:[#allocation2 + $0xa8] sm:$0xf]  ;;  %v8751_v44 = vld [vmem:[#allocation2 + $0x80] sm:$0xf0] }
  0x58   : > { %442 = vst [vmem:[#allocation2 + $0x16c] sm:$0xf] %v9655_v39  ;;  %v8750_v26 = vld [vmem:[#allocation2 + $0x7c] sm:$0xf]  ;;  %v6936_v47 = vld [vmem:[#allocation2 + $0x138] sm:$0xf] }
  0x59   : > { %443 = vst [vmem:[#allocation2 + $0x178] sm:$0xf] %v9657_v62  ;;  %vm804_vm12 = vsmask.f32 7440 }
  0x5a   : > { %vm9778_vm13 = vmor %vm803_vm11, %vm804_vm12 }
  0x5b   : > { %1695 = vmatmul.bf16.gmra.mxu0 %v6829_v29  ;;  %1735 = vmatmul.bf16.gmra.mxu2 %v6925_v35  ;;  %v11286_v29 = vshll.u32 %v9628_v15, 16  ;;  %v11284_v35 = vshrl.u32 %v9655_v39, 16 }
  0x5c   : > { %1784 = vmatmul.bf16.gmra.mxu1 %v6833_v53  ;;  %v11290_v53 = vshll.u32 %v9655_v39, 16 }
  0x5d   : > { %v675_v55 = vrot.slane %v11284_v35, 7 }
  0x5e   : > { %1824 = vmatmul.bf16.gmra.mxu3 %v6929_v40  ;;  %v547_v40 = vrot.slane %v11287_v41, 7  ;;  %v6938_v41 = vld [vmem:[#allocation2 + $0x144] sm:$0xf0] }
  0x5f   : > { %v795_v51 = vld [vmem:[#allocation2 + $0x168] sm:$0xf] }
  0x60   : > { %v550_v54 = vor.u32 %v11286_v29, %v547_v40  ;;  %v551_v61 = vrot.slane %v547_v40, 4  ;;  %v683_v40 = vrot.slane %v11285_v34, 7  ;;  %v6842_v34 = vld [vmem:[#allocation2 + $0x84] sm:$0xf0]  ;;  %v8774_v29 = vld [vmem:[#allocation2 + $0x13c] sm:$0xf] }
  0x62   : > { %v559_v36 = vsel %vm9240_vm6, %v551_v61, %v558_v25  ;;  %v764_v14 = vsel %vm9253_vm7, %v550_v54, %v763_v7  ;;  %v678_v61 = vor.u32 %v11290_v53, %v675_v55  ;;  %v679_v25 = vrot.slane %v675_v55, 4  ;;  %v262_v55 = vld [vmem:[#allocation2 + $0xc0] sm:$0x1] }
  0x63   : > { %766 = vst [vmem:[#allocation2 + $0xb4] sm:$0xf] %v559_v36  ;;  %v686_v35 = vor.u32 %v11291_v48, %v683_v40  ;;  %v6841_v54 = vor.u32 %v8751_v44, %v6840_v24  ;;  %v6937_v36 = vor.u32 %v8775_v10, %v6936_v47  ;;  %v6941_v53 = vor.u32 %v8774_v29, %v6938_v41  ;;  %v363_v48 = vld [vmem:[%s9194_s6 + $0x70] sm:$0xff]  ;;  %v286_v24 = vld [vmem:[#allocation2 + $0x180] sm:$0x1]  ;;  %v8803_v41 = vld [vmem:[%s11243_s1 + $0x148] sm:$0xff] }
  0x64   : > { %765 = vst [vmem:[#allocation2 + $0xa8] sm:$0xf] %v764_v14  ;;  %v796_v7 = vsel %vm9253_vm7, %v678_v61, %v795_v51  ;;  %v6845_v14 = vor.u32 %v8750_v26, %v6842_v34  ;;  %v263_v40 = vsel %vm9197_vm2, 0, %v262_v55  ;;  %v9689_v3 = vpack.c.bf16 %v363_v48, %v363_v48  ;;  %v379_v47 = vld [vmem:[%s9194_s6 + $0xf0] sm:$0xff]  ;;  %v8723_v29 = vld [vmem:[%s11243_s1 + $0x48] sm:$0xff]  ;;  %v8737_v10 = vld [vmem:[%s11243_s1 + $0xb8] sm:$0xff]  ;;  %1856 = vmatpush.bf16.msrb.mxu2 %v8803_v41 }
  0x65   : > { %v687_v30 = vsel %vm9240_vm6, %v679_v25, %v686_v35  ;;  %797 = vst [vmem:[#allocation2 + $0x168] sm:$0xf] %v796_v7  ;;  %v9691_v35 = vpack.c.bf16 %v364_v2, %v364_v2  ;;  %v8715_v2 = vld [vmem:[%s11243_s1 + $0x8] sm:$0xff]  ;;  %v287_v44 = vsel %vm9197_vm2, 0, %v286_v24  ;;  %v380_v25 = vld [vmem:[%s9194_s6 + $0xf8] sm:$0xff]  ;;  %2434 = vmatpush.bf16.msrb.mxu0 %v8723_v29  ;;  %2517 = vmatpush.bf16.msrb.mxu1 %v8737_v10 }
  0x66   : > { %798 = vst [vmem:[#allocation2 + $0x174] sm:$0xf] %v687_v30  ;;  %v11297_v51 = vshrl.u32 %v9689_v3, 16  ;;  %v11296_v34 = vshll.u32 %v9689_v3, 16  ;;  %2345 = vmatpush.bf16.msrb.mxu3 %v8715_v2  ;;  %v6852_v2 = vld [vmem:[#allocation2 + $0x90] sm:$0xf] }
  0x67   : > { %264 = vst [vmem:[#allocation2 + $0xc0] sm:$0x1] %v263_v40  ;;  %v11299_v30 = vshrl.u32 %v9691_v35, 16  ;;  %v11295_v48 = vshll.u32 %v9691_v35, 16  ;;  %v9727_v40 = vpack.c.bf16 %v380_v25, %v380_v25  ;;  %v8754_v29 = vld [vmem:[#allocation2 + $0x98] sm:$0xf0] }
  0x68   : > { %v563_v26 = vrot.slane %v11297_v51, 7  ;;  %428 = vst [vmem:[#allocation2 + $0xc4] sm:$0xf] %v9689_v3 }
  0x69   : > { %v571_v61 = vrot.slane %v11299_v30, 7  ;;  %429 = vst [vmem:[#allocation2 + $0xd0] sm:$0xf] %v9691_v35 }
  0x6a   : > { %v567_v7 = vrot.slane %v563_v26, 4  ;;  %288 = vst [vmem:[#allocation2 + $0x180] sm:$0x1] %v287_v44  ;;  %v11300_v44 = vshrl.u32 %v9727_v40, 16 }
  0x6b   : > { %1700 = vmatmul.bf16.gmra.mxu0 %v6841_v54  ;;  %1740 = vmatmul.bf16.gmra.mxu2 %v6937_v36  ;;  %v566_v36 = vor.u32 %v11296_v34, %v563_v26  ;;  %v574_v55 = vor.u32 %v11295_v48, %v571_v61  ;;  %v8778_v26 = vld [vmem:[#allocation2 + $0x158] sm:$0xf0]  ;;  %v8753_v61 = vld [vmem:[#allocation2 + $0x94] sm:$0xf]  ;;  %v6948_v48 = vld [vmem:[#allocation2 + $0x150] sm:$0xf] }
  0x6c   : > { %1789 = vmatmul.bf16.gmra.mxu1 %v6845_v14  ;;  %445 = vst [vmem:[#allocation2 + $0x190] sm:$0xf] %v9727_v40 }
  0x6e   : > { %1829 = vmatmul.bf16.gmra.mxu3 %v6941_v53  ;;  %v9709_v53 = vpack.c.bf16 %v379_v47, %v379_v47  ;;  %v575_v47 = vsel %vm9240_vm6, %v567_v7, %v574_v55  ;;  %v767_v41 = vld [vmem:[#allocation2 + $0xc0] sm:$0xf]  ;;  %v699_v7 = vrot.slane %v11300_v44, 7  ;;  %v298_v44 = vld [vmem:[#allocation2 + $0x2c] sm:$0x8] }
  0x6f   : > { %v768_v10 = vsel %vm9253_vm7, %v566_v36, %v767_v41  ;;  %770 = vst [vmem:[#allocation2 + $0xcc] sm:$0xf] %v575_v47  ;;  %v6854_v55 = vld [vmem:[#allocation2 + $0x9c] sm:$0xf0]  ;;  %v8777_v36 = vld [vmem:[#allocation2 + $0x154] sm:$0xf] }
  0x70   : > { %v11294_v54 = vshrl.u32 %v9709_v53, 16  ;;  %v11298_v14 = vshll.u32 %v9709_v53, 16  ;;  %444 = vst [vmem:[#allocation2 + $0x184] sm:$0xf] %v9709_v53  ;;  %v6950_v47 = vld [vmem:[#allocation2 + $0x15c] sm:$0xf0]  ;;  %v6857_v13 = vor.u32 %v8753_v61, %v6854_v55 }
  0x71   : > { %769 = vst [vmem:[#allocation2 + $0xc0] sm:$0xf] %v768_v10  ;;  %v799_v51 = vld [vmem:[#allocation2 + $0x180] sm:$0xf]  ;;  %v6853_v10 = vor.u32 %v8754_v29, %v6852_v2  ;;  %v6953_v42 = vor.u32 %v8777_v36, %v6950_v47  ;;  %v9135_v2 = vmov 0  }
  0x72   : > { %v691_v24 = vrot.slane %v11294_v54, 7  ;;  %v11304_v54 = vshll.u32 %v9727_v40, 16  ;;  %226 = vst [vmem:[#allocation2] sm:$0xff] %v9135_v2  ;;  %v6864_v55 = vld [vmem:[#allocation2 + $0xa8] sm:$0xf] }
  0x73   : > { %228 = vst [vmem:[#allocation2 + $0xc] sm:$0xff] %v9135_v2  ;;  %v8781_v36 = vld [vmem:[#allocation2 + $0x170] sm:$0xf0]  ;;  %v8756_v47 = vld [vmem:[#allocation2 + $0xac] sm:$0xf] }
  0x74   : > { %v694_v25 = vor.u32 %v11298_v14, %v691_v24  ;;  %v695_v34 = vrot.slane %v691_v24, 4  ;;  %v702_v41 = vor.u32 %v11304_v54, %v699_v7  ;;  %v6949_v14 = vor.u32 %v8778_v26, %v6948_v48  ;;  %227 = vst [vmem:[#allocation2 + $0x8] sm:$0xf] %v9135_v2  ;;  %v8757_v26 = vld [vmem:[#allocation2 + $0xb0] sm:$0xf0]  ;;  %v8935_v24 = vld [vmem:[%s11245_s3 + $0x28] sm:$0xff] }
  0x75   : > { %v299_v7 = vsel %vm9747_vm10, 0, %v298_v44  ;;  %v812_v48 = vrot.slane %v457_v20, 4  ;;  %v806_v20 = vrot.slane %v449_v18, 4  ;;  %229 = vst [vmem:[#allocation2 + $0x14] sm:$0xf] %v9135_v2 }
  0x76   : > { %v800_v30 = vsel %vm9253_vm7, %v694_v25, %v799_v51  ;;  %v703_v56 = vsel %vm9240_vm6, %v695_v34, %v702_v41  ;;  %v8736_v51 = vld [vmem:[%s11243_s1 + $0xb0] sm:$0xff]  ;;  %300 = vst [vmem:[#allocation2 + $0x2c] sm:$0x8] %v299_v7  ;;  %v807_v34 = vrot.slane %v452_v19, 5  ;;  %v6866_v41 = vld [vmem:[#allocation2 + $0xb4] sm:$0xf0] }
  0x77   : > { %801 = vst [vmem:[#allocation2 + $0x180] sm:$0xf] %v800_v30  ;;  %v8802_v30 = vld [vmem:[%s11243_s1 + $0x140] sm:$0xff]  ;;  %2518 = vmatpush.bf16.msrb.mxu1 %v8736_v51 }
  0x78   : > { %802 = vst [vmem:[#allocation2 + $0x18c] sm:$0xf] %v703_v56  ;;  %v8714_v56 = vld [vmem:[%s11243_s1] sm:$0xff]  ;;  %1857 = vmatpush.bf16.msrb.mxu2 %v8802_v30  ;;  %v808_v18 = vor.u32 %v807_v34, %v806_v20  ;;  %v6962_v30 = vld [vmem:[#allocation2 + $0x174] sm:$0xf0]  ;;  %v6865_v20 = vor.u32 %v8757_v26, %v6864_v55  ;;  %v11325_v55 = vshrl.u32 %v9262_v37, 16 }
  0x79   : > { %2346 = vmatpush.bf16.msrb.mxu3 %v8714_v56  ;;  %231 = vst [vmem:[#allocation2 + $0x198] sm:$0xff] %v9135_v2  ;;  %v238_v51 = vld [vmem:[#allocation2] sm:$0x1]  ;;  %v8865_v26 = vld [vmem:[%s11243_s1 + $0x1b8] sm:$0xff] }
  0x7a   : > { %v809_v12 = vrot.slane %v808_v18, 4  ;;  %v239_v56 = vsel %vm9197_vm2, 0, %v238_v51  ;;  %232 = vst [vmem:[#allocation2 + $0x1a0] sm:$0xf] %v9135_v2 }
  0x7b   : > { %1705 = vmatmul.bf16.gmra.mxu0 %v6853_v10  ;;  %1745 = vmatmul.bf16.gmra.mxu2 %v6949_v14  ;;  %v810_v14 = vrot.slane %v460_v21, 5  ;;  %v8734_v21 = vld [vmem:[%s11243_s1 + $0xa0] sm:$0xff]  ;;  %v8780_v10 = vld [vmem:[#allocation2 + $0x16c] sm:$0xf]  ;;  %240 = vst [vmem:[#allocation2] sm:$0x1] %v239_v56 }
  0x7c   : > { %1794 = vmatmul.bf16.gmra.mxu1 %v6857_v13  ;;  %v8722_v13 = vld [vmem:[%s11243_s1 + $0x40] sm:$0xff]  ;;  %233 = vst [vmem:[#allocation2 + $0x1a4] sm:$0xff] %v9135_v2  ;;  %v6965_v18 = vor.u32 %v8780_v10, %v6962_v30  ;;  %3120 = vmatpush.bf16.msra.mxu2 %v8865_v26  ;;  %v8760_v30 = vld [vmem:[#allocation2 + $0xc8] sm:$0xf0] }
  0x7d   : > { %v813_v29 = vor.u32 %v812_v48, %v810_v14  ;;  %2435 = vmatpush.bf16.msrb.mxu0 %v8722_v13  ;;  %v811_v61 = vsel %vm9778_vm13, %v809_v12, %v810_v14  ;;  %v984_v25 = vld [vmem:[#allocation2 + $0x2c] sm:$0xf]  ;;  %v6960_v48 = vld [vmem:[#allocation2 + $0x168] sm:$0xf]  ;;  %v8733_v14 = vld [vmem:[%s11243_s1 + $0x98] sm:$0xff]  ;;  %v6869_v13 = vor.u32 %v8756_v47, %v6866_v41 }
  0x7e   : > { %1834 = vmatmul.bf16.gmra.mxu3 %v6953_v42  ;;  %v8735_v42 = vld [vmem:[%s11243_s1 + $0xa8] sm:$0xff]  ;;  %982 = vst [vmem:[#allocation2 + $0x20] sm:$0xf] %v811_v61  ;;  %v6961_v34 = vor.u32 %v8781_v36, %v6960_v48  ;;  %v8732_v12 = vld [vmem:[%s11243_s1 + $0x90] sm:$0xff]  ;;  %v8873_v61 = vld [vmem:[%s11243_s1 + $0x1f8] sm:$0xff] }
  0x7f   : > { %v814_v19 = vrot.slane %v813_v29, 4  ;;  %2519 = vmatpush.bf16.msrb.mxu1 %v8735_v42  ;;  %v301_v42 = vld [vmem:[#allocation2 + $0x44] sm:$0x8]  ;;  %234 = vst [vmem:[#allocation2 + $0x1ac] sm:$0xf] %v9135_v2  ;;  %v819_v2 = vrot.slane %v476_v59, 5  ;;  %3209 = vmatpush.bf16.msra.mxu3 %v8873_v61 }
  0x80   : > { %v302_v29 = vsel %vm9747_vm10, 0, %v301_v42  ;;  %v8731_v36 = vld [vmem:[%s11243_s1 + $0x88] sm:$0xff]  ;;  %v8730_v48 = vld [vmem:[%s11243_s1 + $0x80] sm:$0xff]  ;;  %v6878_v42 = vld [vmem:[#allocation2 + $0xcc] sm:$0xf0]  ;;  %v11326_v61 = vshrl.u32 %v9330_v27, 16 }
  0x81   : > { %v985_v7 = vsel %vm9786_vm14, %v814_v19, %v984_v25  ;;  %303 = vst [vmem:[#allocation2 + $0x44] sm:$0x8] %v302_v29  ;;  %v815_v19 = vrot.slane %v465_v43, 4  ;;  %v295_v25 = vld [vmem:[#allocation2 + $0x14] sm:$0x8]  ;;  %v821_v43 = vrot.slane %v11325_v55, 4 }
  0x82   : > { %986 = vst [vmem:[#allocation2 + $0x2c] sm:$0xf] %v985_v7  ;;  %v296_v32 = vsel %vm9747_vm10, 0, %v295_v25  ;;  %v8881_v7 = vld [vmem:[%s11243_s1 + $0x238] sm:$0xff]  ;;  %v8759_v56 = vld [vmem:[#allocation2 + $0xc4] sm:$0xf] }
  0x83   : > { %2520 = vmatpush.bf16.msrb.mxu1 %v8734_v21  ;;  %v816_v21 = vrot.slane %v468_v0, 5  ;;  %297 = vst [vmem:[#allocation2 + $0x14] sm:$0x8] %v296_v32  ;;  %v822_v59 = vor.u32 %v821_v43, %v819_v2  ;;  %3298 = vmatpush.bf16.msra.mxu0 %v8881_v7  ;;  %v824_v25 = vrot.slane %v11326_v61, 4  ;;  %v11327_v55 = vshll.u32 %v9330_v27, 16 }
  0x84   : > { %v11328_v32 = vshll.u32 %v9342_v38, 16  ;;  %v8666_v27 = vld [vmem:[#allocation2 + $0x4] sm:$0xf] }
  0x85   : > { %v817_v0 = vor.u32 %v816_v21, %v815_v19  ;;  %v823_v41 = vrot.slane %v822_v59, 4  ;;  %v304_v19 = vld [vmem:[#allocation2 + $0x5c] sm:$0x8]  ;;  %v6881_v21 = vor.u32 %v8759_v56, %v6878_v42  ;;  %v825_v43 = vrot.slane %v11327_v55, 5 }
  0x86   : > { %v305_v26 = vsel %vm9747_vm10, 0, %v304_v19  ;;  %v11329_v59 = vshrl.u32 %v9342_v38, 16  ;;  %v7080_v38 = vld [vmem:[#allocation2] sm:$0xf] }
  0x87   : > { %2521 = vmatpush.bf16.msrb.mxu1 %v8733_v14  ;;  %v818_v47 = vrot.slane %v817_v0, 4  ;;  %v8784_v14 = vld [vmem:[#allocation2 + $0x188] sm:$0xf0]  ;;  %306 = vst [vmem:[#allocation2 + $0x5c] sm:$0x8] %v305_v26  ;;  %v828_v0 = vrot.slane %v11328_v32, 5 }
  0x88   : > { %v988_v10 = vld [vmem:[#allocation2 + $0x44] sm:$0xf] }
  0x89   : > { %v820_v37 = vsel %vm9778_vm13, %v818_v47, %v819_v2  ;;  %v989_v51 = vsel %vm9786_vm14, %v823_v41, %v988_v10  ;;  %v826_v47 = vor.u32 %v825_v43, %v824_v25  ;;  %v11330_v25 = vshrl.u32 %v9448_v49, 16 }
  0x8a   : > { %987 = vst [vmem:[#allocation2 + $0x38] sm:$0xf] %v820_v37  ;;  %v8668_v42 = vld [vmem:[#allocation2 + $0x10] sm:$0xf0]  ;;  %v11331_v43 = vshll.u32 %v9448_v49, 16 }
  0x8b   : > { %1710 = vmatmul.bf16.gmra.mxu0 %v6865_v20  ;;  %1750 = vmatmul.bf16.gmra.mxu2 %v6961_v34  ;;  %990 = vst [vmem:[#allocation2 + $0x44] sm:$0xf] %v989_v51  ;;  %v6876_v20 = vld [vmem:[#allocation2 + $0xc0] sm:$0xf]  ;;  %v827_v37 = vrot.slane %v826_v47, 4  ;;  %v833_v55 = vrot.slane %v11330_v25, 4 }
  0x8c   : > { %1799 = vmatmul.bf16.gmra.mxu1 %v6869_v13  ;;  %v6972_v34 = vld [vmem:[#allocation2 + $0x180] sm:$0xf]  ;;  %v8783_v13 = vld [vmem:[#allocation2 + $0x184] sm:$0xf]  ;;  %v6877_v29 = vor.u32 %v8760_v30, %v6876_v20  ;;  %v8667_v51 = vld [vmem:[#allocation2 + $0x8] sm:$0xf0] }
  0x8d   : > { %2522 = vmatpush.bf16.msrb.mxu1 %v8732_v12  ;;  %v6973_v12 = vor.u32 %v8784_v14, %v6972_v34  ;;  %v829_v7 = vsel %vm9778_vm13, %v827_v37, %v828_v0  ;;  %v7082_v30 = vld [vmem:[#allocation2 + $0xc] sm:$0xf0]  ;;  %v6800_v20 = vld [vmem:[#allocation2 + $0x20] sm:$0xf]  ;;  %v8740_v34 = vld [vmem:[#allocation2 + $0x28] sm:$0xf0]  ;;  %v7081_v19 = vor.u32 %v8667_v51, %v7080_v38 }
  0x8e   : > { %1839 = vmatmul.bf16.gmra.mxu3 %v6965_v18  ;;  %v6974_v18 = vld [vmem:[#allocation2 + $0x18c] sm:$0xf0]  ;;  %991 = vst [vmem:[#allocation2 + $0x50] sm:$0xf] %v829_v7  ;;  %v7088_v14 = vld [vmem:[#allocation2 + $0x8] sm:$0xf] }
  0x8f   : > { %v6977_v2 = vor.u32 %v8783_v13, %v6974_v18  ;;  %v6801_v13 = vor.u32 %v8740_v34, %v6800_v20  ;;  %v7085_v18 = vor.u32 %v8666_v27, %v7082_v30  ;;  %v834_v32 = vrot.slane %v11331_v43, 5  ;;  %v8872_v47 = vld [vmem:[%s11243_s1 + $0x1f0] sm:$0xff] }
  0x90   : > { %3210 = vmatpush.bf16.msra.mxu3 %v8872_v47 }
  0x91   : > { %2523 = vmatpush.bf16.msrb.mxu1 %v8731_v36  ;;  %v830_v36 = vrot.slane %v11329_v59, 4 }
  0x93   : > { %v831_v41 = vor.u32 %v830_v36, %v828_v0  ;;  %v11332_v0 = vshll.u32 %v9450_v50, 16  ;;  %v8864_v36 = vld [vmem:[%s11243_s1 + $0x1b0] sm:$0xff] }
  0x94   : > { %3121 = vmatpush.bf16.msra.mxu2 %v8864_v36 }
  0x95   : > { %2524 = vmatpush.bf16.msrb.mxu1 %v8730_v48  ;;  %v832_v10 = vrot.slane %v831_v41, 4  ;;  %v992_v48 = vld [vmem:[#allocation2 + $0x5c] sm:$0xf]  ;;  %v837_v59 = vrot.slane %v11332_v0, 5  ;;  %v11333_v41 = vshrl.u32 %v9450_v50, 16  ;;  %v8880_v50 = vld [vmem:[%s11243_s1 + $0x230] sm:$0xff] }
  0x96   : > { %3299 = vmatpush.bf16.msra.mxu0 %v8880_v50  ;;  %v310_v0 = vld [vmem:[#allocation2 + $0x8c] sm:$0x8] }
  0x97   : > { %v993_v56 = vsel %vm9786_vm14, %v832_v10, %v992_v48  ;;  %v839_v37 = vrot.slane %v11333_v41, 4  ;;  %v835_v10 = vor.u32 %v834_v32, %v833_v55 }
  0x98   : > { %994 = vst [vmem:[#allocation2 + $0x5c] sm:$0xf] %v993_v56 }
  0x99   : > { %v840_v49 = vor.u32 %v839_v37, %v837_v59  ;;  %v836_v51 = vrot.slane %v835_v10, 4  ;;  %v311_v37 = vsel %vm9747_vm10, 0, %v310_v0 }
  0x9a   : > { %312 = vst [vmem:[#allocation2 + $0x8c] sm:$0x8] %v311_v37  ;;  %v8674_v37 = vld [vmem:[#allocation2 + $0x40] sm:$0xf0] }
  0x9b   : > { %1715 = vmatmul.bf16.gmra.mxu0 %v6877_v29  ;;  %1755 = vmatmul.bf16.gmra.mxu2 %v6973_v12  ;;  %v307_v29 = vld [vmem:[#allocation2 + $0x74] sm:$0x8]  ;;  %v841_v56 = vrot.slane %v840_v49, 4  ;;  %v838_v34 = vsel %vm9778_vm13, %v836_v51, %v837_v59  ;;  %v11335_v51 = vshrl.u32 %v9499_v6, 16 }
  0x9c   : > { %1804 = vmatmul.bf16.gmra.mxu1 %v6881_v21  ;;  %v7089_v21 = vor.u32 %v8668_v42, %v7088_v14  ;;  %995 = vst [vmem:[#allocation2 + $0x68] sm:$0xf] %v838_v34  ;;  %v11337_v34 = vshll.u32 %v9505_v57, 16 }
  0x9e   : > { %1844 = vmatmul.bf16.gmra.mxu3 %v6977_v2  ;;  %v308_v2 = vsel %vm9747_vm10, 0, %v307_v29  ;;  %v8743_v29 = vld [vmem:[#allocation2 + $0x40] sm:$0xf0] }
  0x9f   : > { %309 = vst [vmem:[#allocation2 + $0x74] sm:$0x8] %v308_v2  ;;  %v7100_v2 = vld [vmem:[#allocation2 + $0x20] sm:$0xf]  ;;  %v8746_v0 = vld [vmem:[#allocation2 + $0x58] sm:$0xf0] }
  0xa6   : > { %v996_v38 = vld [vmem:[#allocation2 + $0x74] sm:$0xf] }
  0xa7   : > { %v997_v42 = vsel %vm9786_vm14, %v841_v56, %v996_v38  ;;  %v11336_v56 = vshll.u32 %v9499_v6, 16  ;;  %v846_v38 = vrot.slane %v11337_v34, 5 }
  0xa8   : > { %v1681_v12 = vpop.f32.mrf.mxu0  ;;  %998 = vst [vmem:[#allocation2 + $0x74] sm:$0xf] %v997_v42 }
  0xa9   : > { %v1770_v26 = vpop.f32.mrf.mxu1 }
  0xaa   : > { %v9849_v61 = vadd.f32 %v1770_v26, %v1681_v12  ;;  %v8669_v12 = vld [vmem:[#allocation2 + $0x1c] sm:$0xf]  ;;  %v8671_v26 = vld [vmem:[#allocation2 + $0x28] sm:$0xf0] }
  0xab   : > { %1858 = vmatmul.bf16.vlgmr.msrb.gmra.mxu2 %v6801_v13  ;;  %2436 = vmatmul.bf16.vlgmr.msrb.gmra.mxu0 %v7085_v18  ;;  %v6812_v13 = vld [vmem:[#allocation2 + $0x38] sm:$0xf]  ;;  %v7101_v41 = vor.u32 %v8671_v26, %v7100_v2 }
  0xac   : > { %2525 = vmatmul.bf16.vlgmr.msrb.gmra.mxu1 %v7089_v21  ;;  %v7092_v18 = vld [vmem:[#allocation2 + $0x18] sm:$0xf]  ;;  %v8670_v21 = vld [vmem:[#allocation2 + $0x20] sm:$0xf0]  ;;  %v6813_v43 = vor.u32 %v8743_v29, %v6812_v13 }
  0xad   : > { %v7093_v47 = vor.u32 %v8670_v21, %v7092_v18 }
  0xae   : > { %2347 = vmatmul.bf16.vlgmr.msrb.gmra.mxu3 %v7081_v19  ;;  %v1721_v7 = vpop.f32.mrf.mxu2  ;;  %v7094_v19 = vld [vmem:[#allocation2 + $0x24] sm:$0xf0] }
  0xaf   : > { %v7097_v32 = vor.u32 %v8669_v12, %v7094_v19 }
  0xb0   : > { %v1683_v30 = vpop.f32.mrf.mxu0 }
  0xb1   : > { %v1810_v48 = vpop.f32.mrf.mxu3  ;;  %v1772_v20 = vpop.f32.mrf.mxu1 }
  0xb2   : > { %v9865_v27 = vadd.f32 %v1810_v48, %v1721_v7  ;;  %v9869_v14 = vadd.f32 %v1772_v20, %v1683_v30  ;;  %v11334_v7 = vshrl.u32 %v9505_v57, 16  ;;  %v842_v30 = vrot.slane %v11335_v51, 4  ;;  %v7104_v57 = vld [vmem:[#allocation2 + $0x30] sm:$0xf] }
  0xb3   : > { %v843_v20 = vrot.slane %v11336_v56, 5 }
  0xb4   : > { %v848_v49 = vrot.slane %v11334_v7, 4 }
  0xb5   : > { %v844_v50 = vor.u32 %v843_v20, %v842_v30  ;;  %v313_v30 = vld [vmem:[#allocation2 + $0xa4] sm:$0x8] }
  0xb6   : > { %v1723_v25 = vpop.f32.mrf.mxu2  ;;  %v849_v13 = vor.u32 %v848_v49, %v846_v38 }
  0xb7   : > { %v845_v29 = vrot.slane %v844_v50, 4  ;;  %v314_v50 = vsel %vm9747_vm10, 0, %v313_v30  ;;  %v8879_v30 = vld [vmem:[%s11243_s1 + $0x228] sm:$0xff] }
  0xb8   : > { %v1686_v36 = vpop.f32.mrf.mxu0  ;;  %v850_v21 = vrot.slane %v849_v13, 4  ;;  %315 = vst [vmem:[#allocation2 + $0xa4] sm:$0x8] %v314_v50  ;;  %v8749_v50 = vld [vmem:[#allocation2 + $0x70] sm:$0xf0]  ;;  %3300 = vmatpush.bf16.msra.mxu0 %v8879_v30  ;;  %v11344_v30 = vshll.u32 %v9628_v15, 16 }
  0xb9   : > { %v1812_v55 = vpop.f32.mrf.mxu3  ;;  %v1775_v10 = vpop.f32.mrf.mxu1  ;;  %v847_v26 = vsel %vm9778_vm13, %v845_v29, %v846_v38 }
  0xba   : > { %v9876_v59 = vadd.f32 %v1812_v55, %v1723_v25  ;;  %v9882_v48 = vadd.f32 %v1775_v10, %v1686_v36  ;;  %999 = vst [vmem:[#allocation2 + $0x80] sm:$0xf] %v847_v26  ;;  %v1000_v25 = vld [vmem:[#allocation2 + $0x8c] sm:$0xf]  ;;  %v6824_v55 = vld [vmem:[#allocation2 + $0x50] sm:$0xf] }
  0xbb   : > { %1863 = vmatmul.bf16.gmra.mxu2 %v6813_v43  ;;  %2441 = vmatmul.bf16.gmra.mxu0 %v7097_v32  ;;  %v8672_v43 = vld [vmem:[#allocation2 + $0x34] sm:$0xf]  ;;  %v1001_v32 = vsel %vm9786_vm14, %v850_v21, %v1000_v25  ;;  %v7106_v36 = vld [vmem:[#allocation2 + $0x3c] sm:$0xf0]  ;;  %v6825_v49 = vor.u32 %v8746_v0, %v6824_v55  ;;  %v11341_v25 = vshll.u32 %v9568_v45, 16 }
  0xbc   : > { %2530 = vmatmul.bf16.gmra.mxu1 %v7101_v41  ;;  %1002 = vst [vmem:[#allocation2 + $0x8c] sm:$0xf] %v1001_v32  ;;  %v7112_v41 = vld [vmem:[#allocation2 + $0x38] sm:$0xf]  ;;  %v7109_v51 = vor.u32 %v8672_v43, %v7106_v36  ;;  %v8871_v43 = vld [vmem:[%s11243_s1 + $0x1e8] sm:$0xff] }
  0xbd   : > { %v7113_v38 = vor.u32 %v8674_v37, %v7112_v41  ;;  %v855_v55 = vrot.slane %v11341_v25, 5  ;;  %3211 = vmatpush.bf16.msra.mxu3 %v8871_v43 }
  0xbe   : > { %2352 = vmatmul.bf16.gmra.mxu3 %v7093_v47  ;;  %v1726_v42 = vpop.f32.mrf.mxu2  ;;  %v8673_v47 = vld [vmem:[#allocation2 + $0x38] sm:$0xf0] }
  0xbf   : > { %v7105_v34 = vor.u32 %v8673_v47, %v7104_v57  ;;  %v8863_v57 = vld [vmem:[%s11243_s1 + $0x1a8] sm:$0xff] }
  0xc0   : > { %v1688_v19 = vpop.f32.mrf.mxu0  ;;  %3122 = vmatpush.bf16.msra.mxu2 %v8863_v57  ;;  %v316_v57 = vld [vmem:[#allocation2 + $0xbc] sm:$0x8] }
  0xc1   : > { %v1815_v18 = vpop.f32.mrf.mxu3  ;;  %v1777_v2 = vpop.f32.mrf.mxu1 }
  0xc2   : > { %v9890_v12 = vadd.f32 %v1815_v18, %v1726_v42  ;;  %v9894_v6 = vadd.f32 %v1777_v2, %v1688_v19  ;;  %v11338_v42 = vshrl.u32 %v9568_v45, 16  ;;  %v11339_v19 = vshrl.u32 %v9566_v9, 16 }
  0xc3   : > { %v11340_v2 = vshll.u32 %v9566_v9, 16 }
  0xc4   : > { %v857_v13 = vrot.slane %v11338_v42, 4  ;;  %v851_v21 = vrot.slane %v11339_v19, 4  ;;  %v8675_v42 = vld [vmem:[#allocation2 + $0x4c] sm:$0xf]  ;;  %v7124_v19 = vld [vmem:[#allocation2 + $0x50] sm:$0xf] }
  0xc5   : > { %v852_v26 = vrot.slane %v11340_v2, 5 }
  0xc6   : > { %v1728_v10 = vpop.f32.mrf.mxu2  ;;  %v858_v0 = vor.u32 %v857_v13, %v855_v55  ;;  %v7118_v13 = vld [vmem:[#allocation2 + $0x54] sm:$0xf0] }
  0xc7   : > { %v853_v32 = vor.u32 %v852_v26, %v851_v21  ;;  %v8677_v21 = vld [vmem:[#allocation2 + $0x58] sm:$0xf0] }
  0xc8   : > { %v1691_v20 = vpop.f32.mrf.mxu0  ;;  %v859_v41 = vrot.slane %v858_v0, 4 }
  0xc9   : > { %v1817_v7 = vpop.f32.mrf.mxu3  ;;  %v1780_v18 = vpop.f32.mrf.mxu1  ;;  %v854_v47 = vrot.slane %v853_v32, 4 }
  0xca   : > { %v9898_v56 = vadd.f32 %v1817_v7, %v1728_v10  ;;  %v9904_v29 = vadd.f32 %v1780_v18, %v1691_v20  ;;  %v8676_v18 = vld [vmem:[#allocation2 + $0x50] sm:$0xf0] }
  0xcb   : > { %1868 = vmatmul.bf16.gmra.mxu2 %v6825_v49  ;;  %2446 = vmatmul.bf16.gmra.mxu0 %v7109_v51  ;;  %v856_v7 = vsel %vm9778_vm13, %v854_v47, %v855_v55  ;;  %v1004_v49 = vld [vmem:[#allocation2 + $0xa4] sm:$0xf]  ;;  %v7121_v55 = vor.u32 %v8675_v42, %v7118_v13 }
  0xcc   : > { %2535 = vmatmul.bf16.gmra.mxu1 %v7113_v38  ;;  %1003 = vst [vmem:[#allocation2 + $0x98] sm:$0xf] %v856_v7  ;;  %v1005_v20 = vsel %vm9786_vm14, %v859_v41, %v1004_v49  ;;  %v7116_v38 = vld [vmem:[#allocation2 + $0x48] sm:$0xf]  ;;  %v11342_v41 = vshrl.u32 %v9630_v52, 16  ;;  %v11343_v7 = vshrl.u32 %v9628_v15, 16 }
  0xcd   : > { %1006 = vst [vmem:[#allocation2 + $0xa4] sm:$0xf] %v1005_v20  ;;  %v7117_v0 = vor.u32 %v8676_v18, %v7116_v38  ;;  %v861_v20 = vrot.slane %v11344_v30, 5 }
  0xce   : > { %2357 = vmatmul.bf16.gmra.mxu3 %v7105_v34  ;;  %v1731_v36 = vpop.f32.mrf.mxu2  ;;  %v6836_v34 = vld [vmem:[#allocation2 + $0x68] sm:$0xf]  ;;  %v860_v49 = vrot.slane %v11343_v7, 4  ;;  %v8680_v7 = vld [vmem:[#allocation2 + $0x70] sm:$0xf0] }
  0xcf   : > { %v6837_v25 = vor.u32 %v8749_v50, %v6836_v34  ;;  %v11345_v34 = vshll.u32 %v9630_v52, 16  ;;  %v7128_v52 = vld [vmem:[#allocation2 + $0x60] sm:$0xf] }
  0xd0   : > { %v1693_v37 = vpop.f32.mrf.mxu0  ;;  %v862_v50 = vor.u32 %v861_v20, %v860_v49 }
  0xd1   : > { %v1820_v9 = vpop.f32.mrf.mxu3  ;;  %v1782_v10 = vpop.f32.mrf.mxu1  ;;  %v864_v38 = vrot.slane %v11345_v34, 5 }
  0xd2   : > { %v9918_v45 = vadd.f32 %v1820_v9, %v1731_v36  ;;  %v9922_v51 = vadd.f32 %v1782_v10, %v1693_v37  ;;  %v7125_v36 = vor.u32 %v8677_v21, %v7124_v19  ;;  %v317_v9 = vsel %vm9747_vm10, 0, %v316_v57 }
  0xd3   : > { %v866_v37 = vrot.slane %v11342_v41, 4  ;;  %318 = vst [vmem:[#allocation2 + $0xbc] sm:$0x8] %v317_v9  ;;  %v863_v19 = vrot.slane %v862_v50, 4  ;;  %v8752_v9 = vld [vmem:[#allocation2 + $0x88] sm:$0xf0] }
  0xd4   : > { %v8679_v41 = vld [vmem:[#allocation2 + $0x68] sm:$0xf0] }
  0xd5   : > { %v867_v13 = vor.u32 %v866_v37, %v864_v38  ;;  %v7136_v37 = vld [vmem:[#allocation2 + $0x68] sm:$0xf] }
  0xd6   : > { %v1733_v2 = vpop.f32.mrf.mxu2 }
  0xd8   : > { %v1696_v32 = vpop.f32.mrf.mxu0 }
  0xd9   : > { %v1822_v26 = vpop.f32.mrf.mxu3  ;;  %v1785_v47 = vpop.f32.mrf.mxu1 }
  0xda   : > { %v9929_v43 = vadd.f32 %v1822_v26, %v1733_v2  ;;  %v9935_v10 = vadd.f32 %v1785_v47, %v1696_v32  ;;  %v868_v26 = vrot.slane %v867_v13, 4  ;;  %v1008_v57 = vld [vmem:[#allocation2 + $0xbc] sm:$0xf]  ;;  %v6848_v32 = vld [vmem:[#allocation2 + $0x80] sm:$0xf]  ;;  %v7129_v13 = vor.u32 %v8679_v41, %v7128_v52 }
  0xdb   : > { %1873 = vmatmul.bf16.gmra.mxu2 %v6837_v25  ;;  %2451 = vmatmul.bf16.gmra.mxu0 %v7121_v55  ;;  %v865_v55 = vsel %vm9778_vm13, %v863_v19, %v864_v38  ;;  %v7130_v47 = vld [vmem:[#allocation2 + $0x6c] sm:$0xf0]  ;;  %v6849_v20 = vor.u32 %v8752_v9, %v6848_v32  ;;  %v319_v38 = vld [vmem:[#allocation2 + $0xd4] sm:$0x8]  ;;  %v11349_v52 = vshll.u32 %v9691_v35, 16  ;;  %v8870_v41 = vld [vmem:[%s11243_s1 + $0x1e0] sm:$0xff] }
  0xdc   : > { %2540 = vmatmul.bf16.gmra.mxu1 %v7125_v36  ;;  %1007 = vst [vmem:[#allocation2 + $0xb0] sm:$0xf] %v865_v55  ;;  %v1009_v36 = vsel %vm9786_vm14, %v868_v26, %v1008_v57  ;;  %v320_v19 = vsel %vm9747_vm10, 0, %v319_v38  ;;  %v11347_v57 = vshrl.u32 %v9689_v3, 16  ;;  %3212 = vmatpush.bf16.msra.mxu3 %v8870_v41 }
  0xdd   : > { %1010 = vst [vmem:[#allocation2 + $0xbc] sm:$0xf] %v1009_v36  ;;  %v873_v9 = vrot.slane %v11349_v52, 5  ;;  %v7148_v52 = vld [vmem:[#allocation2 + $0x80] sm:$0xf] }
  0xde   : > { %2362 = vmatmul.bf16.gmra.mxu3 %v7117_v0  ;;  %v1736_v42 = vpop.f32.mrf.mxu2  ;;  %v8678_v0 = vld [vmem:[#allocation2 + $0x64] sm:$0xf]  ;;  %321 = vst [vmem:[#allocation2 + $0xd4] sm:$0x8] %v320_v19  ;;  %v869_v32 = vrot.slane %v11347_v57, 4 }
  0xdf   : > { %v7133_v34 = vor.u32 %v8678_v0, %v7130_v47  ;;  %v11348_v0 = vshll.u32 %v9689_v3, 16  ;;  %v8862_v47 = vld [vmem:[%s11243_s1 + $0x1a0] sm:$0xff] }
  0xe0   : > { %v1698_v2 = vpop.f32.mrf.mxu0  ;;  %3123 = vmatpush.bf16.msra.mxu2 %v8862_v47  ;;  %v8878_v19 = vld [vmem:[%s11243_s1 + $0x220] sm:$0xff] }
  0xe1   : > { %v1825_v18 = vpop.f32.mrf.mxu3  ;;  %v1787_v25 = vpop.f32.mrf.mxu1  ;;  %v870_v36 = vrot.slane %v11348_v0, 5  ;;  %v8755_v57 = vld [vmem:[#allocation2 + $0xa0] sm:$0xf0]  ;;  %v7142_v0 = vld [vmem:[#allocation2 + $0x84] sm:$0xf0]  ;;  %3301 = vmatpush.bf16.msra.mxu0 %v8878_v19 }
  0xe2   : > { %v9943_v21 = vadd.f32 %v1825_v18, %v1736_v42  ;;  %v9947_v15 = vadd.f32 %v1787_v25, %v1698_v2  ;;  %v7137_v18 = vor.u32 %v8680_v7, %v7136_v37  ;;  %v11346_v2 = vshrl.u32 %v9691_v35, 16 }
  0xe3   : > { %v871_v37 = vor.u32 %v870_v36, %v869_v32  ;;  %v8681_v32 = vld [vmem:[#allocation2 + $0x7c] sm:$0xf]  ;;  %v8682_v36 = vld [vmem:[#allocation2 + $0x80] sm:$0xf0] }
  0xe4   : > { %v875_v26 = vrot.slane %v11346_v2, 4 }
  0xe6   : > { %v1738_v49 = vpop.f32.mrf.mxu2  ;;  %v876_v7 = vor.u32 %v875_v26, %v873_v9  ;;  %v6860_v26 = vld [vmem:[#allocation2 + $0x98] sm:$0xf] }
  0xe8   : > { %v1701_v42 = vpop.f32.mrf.mxu0 }
  0xe9   : > { %v1827_v30 = vpop.f32.mrf.mxu3  ;;  %v1790_v25 = vpop.f32.mrf.mxu1 }
  0xea   : > { %v9951_v50 = vadd.f32 %v1827_v30, %v1738_v49  ;;  %v9957_v55 = vadd.f32 %v1790_v25, %v1701_v42  ;;  %v872_v30 = vrot.slane %v871_v37, 4  ;;  %v7140_v25 = vld [vmem:[#allocation2 + $0x78] sm:$0xf]  ;;  %v6861_v37 = vor.u32 %v8755_v57, %v6860_v26 }
  0xeb   : > { %1878 = vmatmul.bf16.gmra.mxu2 %v6849_v20  ;;  %2456 = vmatmul.bf16.gmra.mxu0 %v7133_v34  ;;  %v877_v20 = vrot.slane %v876_v7, 4  ;;  %v7145_v7 = vor.u32 %v8681_v32, %v7142_v0  ;;  %v11351_v26 = vshrl.u32 %v9219_v17, 16  ;;  %v11352_v32 = vshll.u32 %v9219_v17, 16 }
  0xec   : > { %2545 = vmatmul.bf16.gmra.mxu1 %v7137_v18  ;;  %v874_v42 = vsel %vm9778_vm13, %v872_v30, %v873_v9  ;;  %v8683_v9 = vld [vmem:[#allocation2 + $0x88] sm:$0xf0] }
  0xed   : > { %1011 = vst [vmem:[#allocation2 + $0xc8] sm:$0xf] %v874_v42  ;;  %v878_v57 = vrot.slane %v11351_v26, 4  ;;  %v879_v0 = vrot.slane %v11352_v32, 5  ;;  %v8758_v26 = vld [vmem:[#allocation2 + $0xb8] sm:$0xf0] }
  0xee   : > { %2367 = vmatmul.bf16.gmra.mxu3 %v7129_v13  ;;  %v1741_v49 = vpop.f32.mrf.mxu2  ;;  %v1012_v13 = vld [vmem:[#allocation2 + $0xd4] sm:$0xf]  ;;  %v8685_v32 = vld [vmem:[#allocation2 + $0x98] sm:$0xf0] }
  0xef   : > { %v1013_v2 = vsel %vm9786_vm14, %v877_v20, %v1012_v13  ;;  %v7149_v20 = vor.u32 %v8683_v9, %v7148_v52  ;;  %v11350_v13 = vshrl.u32 %v9230_v23, 16  ;;  %v880_v52 = vor.u32 %v879_v0, %v878_v57  ;;  %v7154_v57 = vld [vmem:[#allocation2 + $0x9c] sm:$0xf0]  ;;  %v7160_v0 = vld [vmem:[#allocation2 + $0x98] sm:$0xf] }
  0xf0   : > { %v1703_v34 = vpop.f32.mrf.mxu0  ;;  %1014 = vst [vmem:[#allocation2 + $0xd4] sm:$0xf] %v1013_v2 }
  0xf1   : > { %v1830_v3 = vpop.f32.mrf.mxu3  ;;  %v1792_v38 = vpop.f32.mrf.mxu1  ;;  %v884_v19 = vrot.slane %v11350_v13, 4  ;;  %v8684_v13 = vld [vmem:[#allocation2 + $0x94] sm:$0xf] }
  0xf2   : > { %v9971_v35 = vadd.f32 %v1830_v3, %v1741_v49  ;;  %v9975_v18 = vadd.f32 %v1792_v38, %v1703_v34  ;;  %v322_v49 = vld [vmem:[#allocation2 + $0xec] sm:$0x8]  ;;  %v7141_v34 = vor.u32 %v8682_v36, %v7140_v25  ;;  %v11353_v25 = vshll.u32 %v9230_v23, 16  ;;  %v7152_v23 = vld [vmem:[#allocation2 + $0x90] sm:$0xf] }
  0xf3   : > { %v323_v38 = vsel %vm9747_vm10, 0, %v322_v49  ;;  %v881_v49 = vrot.slane %v880_v52, 4 }
  0xf4   : > { %324 = vst [vmem:[#allocation2 + $0xec] sm:$0x8] %v323_v38  ;;  %v882_v36 = vrot.slane %v11353_v25, 5  ;;  %v8686_v25 = vld [vmem:[#allocation2 + $0xa0] sm:$0xf0] }
  0xf6   : > { %v1743_v47 = vpop.f32.mrf.mxu2 }
  0xf8   : > { %v1706_v30 = vpop.f32.mrf.mxu0 }
  0xf9   : > { %v1832_v41 = vpop.f32.mrf.mxu3  ;;  %v1795_v42 = vpop.f32.mrf.mxu1 }
  0xfa   : > { %v9982_v3 = vadd.f32 %v1832_v41, %v1743_v47  ;;  %v9988_v2 = vadd.f32 %v1795_v42, %v1706_v30  ;;  %v885_v47 = vor.u32 %v884_v19, %v882_v36  ;;  %v883_v42 = vsel %vm9778_vm13, %v881_v49, %v882_v36 }
  0xfb   : > { %1883 = vmatmul.bf16.gmra.mxu2 %v6861_v37  ;;  %2461 = vmatmul.bf16.gmra.mxu0 %v7145_v7  ;;  %1015 = vst [vmem:[#allocation2 + $0xe0] sm:$0xf] %v883_v42  ;;  %v7157_v36 = vor.u32 %v8684_v13, %v7154_v57  ;;  %v7161_v42 = vor.u32 %v8686_v25, %v7160_v0  ;;  %v8861_v0 = vld [vmem:[%s11243_s1 + $0x198] sm:$0xff] }
  0xfc   : > { %2550 = vmatmul.bf16.gmra.mxu1 %v7149_v20  ;;  %v886_v7 = vrot.slane %v885_v47, 4  ;;  %v6872_v20 = vld [vmem:[#allocation2 + $0xb0] sm:$0xf]  ;;  %3124 = vmatpush.bf16.msra.mxu2 %v8861_v0  ;;  %v8688_v0 = vld [vmem:[#allocation2 + $0xb0] sm:$0xf0] }
  0xfd   : > { %v6873_v47 = vor.u32 %v8758_v26, %v6872_v20  ;;  %v11355_v20 = vshrl.u32 %v9294_v58, 16  ;;  %v11356_v26 = vshll.u32 %v9294_v58, 16 }
  0xfe   : > { %2372 = vmatmul.bf16.gmra.mxu3 %v7141_v34  ;;  %v1746_v9 = vpop.f32.mrf.mxu2  ;;  %v1016_v34 = vld [vmem:[#allocation2 + $0xec] sm:$0xf] }
  0xff   : > { %v1017_v19 = vsel %vm9786_vm14, %v886_v7, %v1016_v34  ;;  %v11354_v7 = vshrl.u32 %v9297_v60, 16  ;;  %v887_v13 = vrot.slane %v11355_v20, 4  ;;  %v888_v57 = vrot.slane %v11356_v26, 5  ;;  %v6884_v20 = vld [vmem:[#allocation2 + $0xc8] sm:$0xf] }
 0x100   : > { %v1708_v37 = vpop.f32.mrf.mxu0  ;;  %1018 = vst [vmem:[#allocation2 + $0xec] sm:$0xf] %v1017_v19  ;;  %v8761_v26 = vld [vmem:[#allocation2 + $0xd0] sm:$0xf0] }
 0x101   : > { %v1835_v41 = vpop.f32.mrf.mxu3  ;;  %v1797_v38 = vpop.f32.mrf.mxu1  ;;  %v893_v34 = vrot.slane %v11354_v7, 4  ;;  %v889_v25 = vor.u32 %v888_v57, %v887_v13  ;;  %v7164_v13 = vld [vmem:[#allocation2 + $0xa8] sm:$0xf]  ;;  %v8687_v57 = vld [vmem:[#allocation2 + $0xac] sm:$0xf] }
 0x102   : > { %v9996_v30 = vadd.f32 %v1835_v41, %v1746_v9  ;;  %v10000_v17 = vadd.f32 %v1797_v38, %v1708_v37  ;;  %v325_v41 = vld [vmem:[#allocation2 + $0x104] sm:$0x8]  ;;  %v7153_v38 = vor.u32 %v8685_v32, %v7152_v23  ;;  %v11357_v23 = vshll.u32 %v9297_v60, 16 }
 0x103   : > { %v326_v54 = vsel %vm9747_vm10, 0, %v325_v41 }
 0x104   : > { %327 = vst [vmem:[#allocation2 + $0x104] sm:$0x8] %v326_v54  ;;  %v891_v32 = vrot.slane %v11357_v23, 5  ;;  %v8869_v54 = vld [vmem:[%s11243_s1 + $0x1d8] sm:$0xff] }
 0x105   : > { %3213 = vmatpush.bf16.msra.mxu3 %v8869_v54  ;;  %v7166_v23 = vld [vmem:[#allocation2 + $0xb4] sm:$0xf0]  ;;  %v7172_v54 = vld [vmem:[#allocation2 + $0xb0] sm:$0xf] }
 0x106   : > { %v1748_v52 = vpop.f32.mrf.mxu2 }
 0x108   : > { %v1711_v37 = vpop.f32.mrf.mxu0 }
 0x109   : > { %v1837_v9 = vpop.f32.mrf.mxu3  ;;  %v1800_v19 = vpop.f32.mrf.mxu1 }
 0x10a   : > { %v10004_v49 = vadd.f32 %v1837_v9, %v1748_v52  ;;  %v10010_v4 = vadd.f32 %v1800_v19, %v1711_v37  ;;  %v894_v52 = vor.u32 %v893_v34, %v891_v32 }
 0x10b   : > { %1888 = vmatmul.bf16.gmra.mxu2 %v6873_v47  ;;  %2466 = vmatmul.bf16.gmra.mxu0 %v7157_v36  ;;  %v890_v47 = vrot.slane %v889_v25, 4  ;;  %v1020_v7 = vld [vmem:[#allocation2 + $0x104] sm:$0xf]  ;;  %v8689_v25 = vld [vmem:[#allocation2 + $0xb8] sm:$0xf0] }
 0x10c   : > { %2555 = vmatmul.bf16.gmra.mxu1 %v7161_v42  ;;  %v895_v36 = vrot.slane %v894_v52, 4 }
 0x10d   : > { %v892_v42 = vsel %vm9778_vm13, %v890_v47, %v891_v32  ;;  %v6885_v32 = vor.u32 %v8761_v26, %v6884_v20  ;;  %v328_v47 = vld [vmem:[#allocation2 + $0x11c] sm:$0x8]  ;;  %v11361_v20 = vshrl.u32 %v9378_v5, 16 }
 0x10e   : > { %2377 = vmatmul.bf16.gmra.mxu3 %v7153_v38  ;;  %v1751_v9 = vpop.f32.mrf.mxu2  ;;  %v8877_v38 = vld [vmem:[%s11243_s1 + $0x218] sm:$0xff]  ;;  %1019 = vst [vmem:[#allocation2 + $0xf8] sm:$0xf] %v892_v42  ;;  %v1021_v34 = vsel %vm9786_vm14, %v895_v36, %v1020_v7  ;;  %v7165_v42 = vor.u32 %v8688_v0, %v7164_v13  ;;  %v7173_v36 = vor.u32 %v8689_v25, %v7172_v54  ;;  %v11363_v13 = vshll.u32 %v9388_v31, 16 }
 0x10f   : > { %3302 = vmatpush.bf16.msra.mxu0 %v8877_v38  ;;  %1022 = vst [vmem:[#allocation2 + $0x104] sm:$0xf] %v1021_v34  ;;  %v329_v38 = vsel %vm9747_vm10, 0, %v328_v47  ;;  %v11360_v34 = vshrl.u32 %v9388_v31, 16  ;;  %v896_v26 = vrot.slane %v11361_v20, 4 }
 0x110   : > { %v1713_v41 = vpop.f32.mrf.mxu0  ;;  %330 = vst [vmem:[#allocation2 + $0x11c] sm:$0x8] %v329_v38  ;;  %v900_v0 = vrot.slane %v11363_v13, 5  ;;  %v7176_v31 = vld [vmem:[#allocation2 + $0xc0] sm:$0xf] }
 0x111   : > { %v1840_v58 = vpop.f32.mrf.mxu3  ;;  %v1802_v37 = vpop.f32.mrf.mxu1  ;;  %v902_v28 = vrot.slane %v11360_v34, 4  ;;  %v8690_v34 = vld [vmem:[#allocation2 + $0xc4] sm:$0xf]  ;;  %v8764_v20 = vld [vmem:[#allocation2 + $0xe8] sm:$0xf0] }
 0x112   : > { %v10024_v60 = vadd.f32 %v1840_v58, %v1751_v9  ;;  %v10031_v19 = vadd.f32 %v1802_v37, %v1713_v41  ;;  %v7169_v58 = vor.u32 %v8687_v57, %v7166_v23  ;;  %v11362_v57 = vshll.u32 %v9378_v5, 16  ;;  %v8692_v13 = vld [vmem:[#allocation2 + $0xd0] sm:$0xf0] }
 0x114   : > { %11358 = vst [vmem:[#allocation6_spill] sm:$0xff] %v10024_v60  ;;  %v897_v23 = vrot.slane %v11362_v57, 5  ;;  %v8691_v57 = vld [vmem:[#allocation2 + $0xc8] sm:$0xf0] }
 0x116   : > { %v1753_v52 = vpop.f32.mrf.mxu2  ;;  %v898_v54 = vor.u32 %v897_v23, %v896_v26  ;;  %v7178_v26 = vld [vmem:[#allocation2 + $0xcc] sm:$0xf0]  ;;  %v7184_v23 = vld [vmem:[#allocation2 + $0xc8] sm:$0xf] }
 0x118   : > { %v1716_v37 = vpop.f32.mrf.mxu0  ;;  %v899_v47 = vrot.slane %v898_v54, 4 }
 0x119   : > { %v1842_v9 = vpop.f32.mrf.mxu3  ;;  %v1805_v7 = vpop.f32.mrf.mxu1 }
 0x11a   : > { %v10035_v41 = vadd.f32 %v1842_v9, %v1753_v52  ;;  %v10041_v33 = vadd.f32 %v1805_v7, %v1716_v37  ;;  %v903_v52 = vor.u32 %v902_v28, %v900_v0  ;;  %v901_v7 = vsel %vm9778_vm13, %v899_v47, %v900_v0 }
 0x11b   : > { %1893 = vmatmul.bf16.gmra.mxu2 %v6885_v32  ;;  %2471 = vmatmul.bf16.gmra.mxu0 %v7169_v58  ;;  %1023 = vst [vmem:[#allocation2 + $0x110] sm:$0xf] %v901_v7  ;;  %v7181_v0 = vor.u32 %v8690_v34, %v7178_v26  ;;  %v7185_v7 = vor.u32 %v8692_v13, %v7184_v23  ;;  %v11368_v34 = vshll.u32 %v9466_v63, 16  ;;  %v11369_v26 = vshll.u32 %v9468_v8, 16 }
 0x11c   : > { %11359 = vst [vmem:[#allocation7_spill] sm:$0xff] %v10035_v41  ;;  %2560 = vmatmul.bf16.gmra.mxu1 %v7173_v36  ;;  %v904_v58 = vrot.slane %v903_v52, 4  ;;  %v6896_v36 = vld [vmem:[#allocation2 + $0xe0] sm:$0xf]  ;;  %v11367_v41 = vshrl.u32 %v9466_v63, 16 }
 0x11d   : > { %v6897_v52 = vor.u32 %v8764_v20, %v6896_v36  ;;  %v906_v20 = vrot.slane %v11368_v34, 5  ;;  %v7188_v34 = vld [vmem:[#allocation2 + $0xd8] sm:$0xf] }
 0x11e   : > { %2382 = vmatmul.bf16.gmra.mxu3 %v7165_v42  ;;  %v1756_v25 = vpop.f32.mrf.mxu2  ;;  %v1024_v42 = vld [vmem:[#allocation2 + $0x11c] sm:$0xf]  ;;  %v905_v36 = vrot.slane %v11367_v41, 4 }
 0x11f   : > { %v1025_v28 = vsel %vm9786_vm14, %v904_v58, %v1024_v42  ;;  %v11366_v58 = vshrl.u32 %v9468_v8, 16 }
 0x120   : > { %v1718_v32 = vpop.f32.mrf.mxu0  ;;  %1026 = vst [vmem:[#allocation2 + $0x11c] sm:$0xf] %v1025_v28  ;;  %v907_v23 = vor.u32 %v906_v20, %v905_v36  ;;  %v8694_v20 = vld [vmem:[#allocation2 + $0xe0] sm:$0xf0] }
 0x121   : > { %v1845_v9 = vpop.f32.mrf.mxu3  ;;  %v1807_v38 = vpop.f32.mrf.mxu1  ;;  %v911_v42 = vrot.slane %v11366_v58, 4 }
 0x122   : > { %v10049_v37 = vadd.f32 %v1845_v9, %v1756_v25  ;;  %v10053_v5 = vadd.f32 %v1807_v38, %v1718_v32  ;;  %v331_v9 = vld [vmem:[#allocation2 + $0x134] sm:$0x8]  ;;  %v7177_v38 = vor.u32 %v8691_v57, %v7176_v31  ;;  %v909_v31 = vrot.slane %v11369_v26, 5  ;;  %v8767_v26 = vld [vmem:[#allocation2 + $0x100] sm:$0xf0] }
 0x123   : > { %v8860_v57 = vld [vmem:[%s11243_s1 + $0x190] sm:$0xff]  ;;  %v908_v8 = vrot.slane %v907_v23, 4 }
 0x124   : > { %11364 = vst [vmem:[#allocation8_spill] sm:$0xff] %v10049_v37  ;;  %v332_v37 = vsel %vm9747_vm10, 0, %v331_v9  ;;  %v912_v13 = vor.u32 %v911_v42, %v909_v31  ;;  %3125 = vmatpush.bf16.msra.mxu2 %v8860_v57  ;;  %v6908_v42 = vld [vmem:[#allocation2 + $0xf8] sm:$0xf]  ;;  %v8693_v57 = vld [vmem:[#allocation2 + $0xdc] sm:$0xf] }
 0x125   : > { %333 = vst [vmem:[#allocation2 + $0x134] sm:$0x8] %v332_v37  ;;  %v8868_v37 = vld [vmem:[%s11243_s1 + $0x1d0] sm:$0xff] }
 0x126   : > { %v1758_v54 = vpop.f32.mrf.mxu2  ;;  %3214 = vmatpush.bf16.msra.mxu3 %v8868_v37  ;;  %v7190_v37 = vld [vmem:[#allocation2 + $0xe4] sm:$0xf0] }
 0x128   : > { %v2437_v32 = vpop.f32.mrf.mxu0 }
 0x129   : > { %v1847_v25 = vpop.f32.mrf.mxu3  ;;  %v2526_v28 = vpop.f32.mrf.mxu1 }
 0x12a   : > { %v10057_v47 = vadd.f32 %v1847_v25, %v1758_v54  ;;  %v913_v25 = vrot.slane %v912_v13, 4  ;;  %v7196_v13 = vld [vmem:[#allocation2 + $0xe0] sm:$0xf] }
 0x12b   : > { %1898 = vmatmul.bf16.gmra.mxu2 %v6897_v52  ;;  %2476 = vmatmul.bf16.gmra.mxu0 %v7181_v0 }
 0x12c   : > { %11365 = vst [vmem:[#allocation9_spill] sm:$0xff] %v10057_v47  ;;  %2565 = vmatmul.bf16.gmra.mxu1 %v7185_v7  ;;  %v910_v7 = vsel %vm9778_vm13, %v908_v8, %v909_v31  ;;  %v1028_v58 = vld [vmem:[#allocation2 + $0x134] sm:$0xf]  ;;  %v9009_v31 = vld [vmem:[%s11245_s3 + $0xf8] sm:$0xff] }
 0x12d   : > { %1027 = vst [vmem:[#allocation2 + $0x128] sm:$0xf] %v910_v7  ;;  %v1029_v36 = vsel %vm9786_vm14, %v913_v25, %v1028_v58  ;;  %v7193_v25 = vor.u32 %v8693_v57, %v7190_v37  ;;  %4800 = vmatpush.bf16.msra.mxu1 %v9009_v31  ;;  %v7189_v7 = vor.u32 %v8694_v20, %v7188_v34  ;;  %v11373_v34 = vshll.u32 %v9521_v46, 16 }
 0x12e   : > { %2387 = vmatmul.bf16.gmra.mxu3 %v7177_v38  ;;  %v1859_v54 = vpop.f32.mrf.mxu2  ;;  %v8876_v38 = vld [vmem:[%s11243_s1 + $0x210] sm:$0xff]  ;;  %1030 = vst [vmem:[#allocation2 + $0x134] sm:$0xf] %v1029_v36 }
 0x12f   : > { %v1860_v63 = vadd.f32 %v1859_v54, %v9849_v61  ;;  %3303 = vmatpush.bf16.msra.mxu0 %v8876_v38  ;;  %v8695_v54 = vld [vmem:[#allocation2 + $0xe8] sm:$0xf0]  ;;  %v915_v20 = vrot.slane %v11373_v34, 5 }
 0x130   : > { %v2439_v52 = vpop.f32.mrf.mxu0  ;;  %v7197_v58 = vor.u32 %v8695_v54, %v7196_v13 }
 0x131   : > { %v2348_v41 = vpop.f32.mrf.mxu3  ;;  %v2528_v9 = vpop.f32.mrf.mxu1 }
 0x132   : > { %v2349_v0 = vadd.f32 %v2348_v41, %v1860_v63 }
 0x134   : > { %v2438_v61 = vadd.f32 %v2437_v32, %v2349_v0  ;;  %v6909_v32 = vor.u32 %v8767_v26, %v6908_v42  ;;  %v334_v0 = vld [vmem:[#allocation2 + $0x14c] sm:$0x8]  ;;  %v11374_v26 = vshll.u32 %v9527_v1, 16 }
 0x136   : > { %v10083_v23 = vadd.f32 %v2526_v28, %v2438_v61  ;;  %v1861_v63 = vpop.f32.mrf.mxu2  ;;  %v335_v28 = vsel %vm9747_vm10, 0, %v334_v0  ;;  %v918_v57 = vrot.slane %v11374_v26, 5  ;;  %v6920_v0 = vld [vmem:[#allocation2 + $0x110] sm:$0xf] }
 0x137   : > { %v1862_v41 = vadd.f32 %v1861_v63, %v9869_v14  ;;  %336 = vst [vmem:[#allocation2 + $0x14c] sm:$0x8] %v335_v28  ;;  %v11372_v14 = vshrl.u32 %v9521_v46, 16 }
 0x138   : > { %11370 = vst [vmem:[#allocation10_spill] sm:$0xff] %v10083_v23  ;;  %v2442_v38 = vpop.f32.mrf.mxu0  ;;  %v11371_v23 = vshrl.u32 %v9527_v1, 16 }
 0x139   : > { %v2350_v8 = vpop.f32.mrf.mxu3  ;;  %v2531_v61 = vpop.f32.mrf.mxu1  ;;  %v914_v42 = vrot.slane %v11372_v14, 4  ;;  %v7208_v14 = vld [vmem:[#allocation2 + $0xf8] sm:$0xf] }
 0x13a   : > { %v2351_v36 = vadd.f32 %v2350_v8, %v1862_v41  ;;  %v920_v47 = vrot.slane %v11371_v23, 4 }
 0x13b   : > { %1903 = vmatmul.bf16.gmra.mxu2 %v6909_v32  ;;  %2481 = vmatmul.bf16.gmra.mxu0 %v7193_v25  ;;  %v916_v54 = vor.u32 %v915_v20, %v914_v42  ;;  %v8698_v42 = vld [vmem:[#allocation2 + $0x100] sm:$0xf0] }
 0x13c   : > { %v2440_v60 = vadd.f32 %v2439_v52, %v2351_v36  ;;  %2570 = vmatmul.bf16.gmra.mxu1 %v7197_v58  ;;  %v921_v23 = vor.u32 %v920_v47, %v918_v57  ;;  %v7200_v58 = vld [vmem:[#allocation2 + $0xf0] sm:$0xf]  ;;  %v8697_v36 = vld [vmem:[#allocation2 + $0xf8] sm:$0xf0] }
 0x13d   : > { %v917_v41 = vrot.slane %v916_v54, 4 }
 0x13e   : > { %2392 = vmatmul.bf16.gmra.mxu3 %v7189_v7  ;;  %v10099_v37 = vadd.f32 %v2528_v9, %v2440_v60  ;;  %v1864_v13 = vpop.f32.mrf.mxu2  ;;  %v922_v8 = vrot.slane %v921_v23, 4  ;;  %v1032_v7 = vld [vmem:[#allocation2 + $0x14c] sm:$0xf]  ;;  %v8696_v60 = vld [vmem:[#allocation2 + $0xf4] sm:$0xf]  ;;  %v7201_v23 = vor.u32 %v8697_v36, %v7200_v58 }
 0x13f   : > { %v1865_v31 = vadd.f32 %v1864_v13, %v9882_v48  ;;  %v919_v46 = vsel %vm9778_vm13, %v917_v41, %v918_v57  ;;  %v8770_v9 = vld [vmem:[#allocation2 + $0x118] sm:$0xf0]  ;;  %v7202_v48 = vld [vmem:[#allocation2 + $0xfc] sm:$0xf0]  ;;  %v337_v13 = vld [vmem:[#allocation2 + $0x164] sm:$0x8] }
 0x140   : > { %v2444_v63 = vpop.f32.mrf.mxu0  ;;  %1031 = vst [vmem:[#allocation2 + $0x140] sm:$0xf] %v919_v46  ;;  %v1033_v47 = vsel %vm9786_vm14, %v922_v8, %v1032_v7  ;;  %v6921_v57 = vor.u32 %v8770_v9, %v6920_v0  ;;  %v11377_v7 = vshll.u32 %v9573_v22, 16  ;;  %v8859_v58 = vld [vmem:[%s11243_s1 + $0x188] sm:$0xff] }
 0x141   : > { %v2353_v52 = vpop.f32.mrf.mxu3  ;;  %v2533_v25 = vpop.f32.mrf.mxu1  ;;  %1034 = vst [vmem:[#allocation2 + $0x14c] sm:$0xf] %v1033_v47  ;;  %v11378_v47 = vshll.u32 %v9595_v16, 16  ;;  %3126 = vmatpush.bf16.msra.mxu2 %v8859_v58 }
 0x142   : > { %v2354_v32 = vadd.f32 %v2353_v52, %v1865_v31  ;;  %v7209_v31 = vor.u32 %v8698_v42, %v7208_v14  ;;  %v338_v52 = vsel %vm9747_vm10, 0, %v337_v13 }
 0x143   : > { %339 = vst [vmem:[#allocation2 + $0x164] sm:$0x8] %v338_v52  ;;  %v927_v9 = vrot.slane %v11378_v47, 5  ;;  %v7212_v52 = vld [vmem:[#allocation2 + $0x108] sm:$0xf] }
 0x144   : > { %v2443_v1 = vadd.f32 %v2442_v38, %v2354_v32  ;;  %v7205_v38 = vor.u32 %v8696_v60, %v7202_v48  ;;  %v8867_v60 = vld [vmem:[%s11243_s1 + $0x1c8] sm:$0xff] }
 0x145   : > { %3215 = vmatpush.bf16.msra.mxu3 %v8867_v60 }
 0x146   : > { %v10106_v28 = vadd.f32 %v2531_v61, %v2443_v1  ;;  %v1866_v34 = vpop.f32.mrf.mxu2  ;;  %v11375_v61 = vshrl.u32 %v9595_v16, 16  ;;  %v924_v1 = vrot.slane %v11377_v7, 5  ;;  %v8875_v16 = vld [vmem:[%s11243_s1 + $0x208] sm:$0xff]  ;;  %v8701_v7 = vld [vmem:[#allocation2 + $0x118] sm:$0xf0] }
 0x147   : > { %v1867_v20 = vadd.f32 %v1866_v34, %v9894_v6  ;;  %v11376_v6 = vshrl.u32 %v9573_v22, 16  ;;  %3304 = vmatpush.bf16.msra.mxu0 %v8875_v16 }
 0x148   : > { %v2447_v54 = vpop.f32.mrf.mxu0  ;;  %v929_v32 = vrot.slane %v11375_v61, 4  ;;  %v8773_v61 = vld [vmem:[#allocation2 + $0x130] sm:$0xf0] }
 0x149   : > { %v2355_v26 = vpop.f32.mrf.mxu3  ;;  %v2536_v8 = vpop.f32.mrf.mxu1  ;;  %v923_v0 = vrot.slane %v11376_v6, 4 }
 0x14a   : > { %v2356_v41 = vadd.f32 %v2355_v26, %v1867_v20  ;;  %v930_v22 = vor.u32 %v929_v32, %v927_v9  ;;  %v1036_v13 = vld [vmem:[#allocation2 + $0x164] sm:$0xf]  ;;  %v8699_v32 = vld [vmem:[#allocation2 + $0x10c] sm:$0xf] }
 0x14b   : > { %1908 = vmatmul.bf16.gmra.mxu2 %v6921_v57  ;;  %2486 = vmatmul.bf16.gmra.mxu0 %v7205_v38  ;;  %v925_v48 = vor.u32 %v924_v1, %v923_v0  ;;  %v7220_v0 = vld [vmem:[#allocation2 + $0x110] sm:$0xf] }
 0x14c   : > { %v2445_v46 = vadd.f32 %v2444_v63, %v2356_v41  ;;  %2575 = vmatmul.bf16.gmra.mxu1 %v7209_v31  ;;  %v931_v26 = vrot.slane %v930_v22, 4  ;;  %v8700_v41 = vld [vmem:[#allocation2 + $0x110] sm:$0xf0] }
 0x14d   : > { %v926_v34 = vrot.slane %v925_v48, 4  ;;  %v9008_v1 = vld [vmem:[%s11245_s3 + $0xf0] sm:$0xff]  ;;  %v340_v48 = vld [vmem:[#allocation2 + $0x17c] sm:$0x8]  ;;  %v7213_v22 = vor.u32 %v8700_v41, %v7212_v52 }
 0x14e   : > { %2397 = vmatmul.bf16.gmra.mxu3 %v7201_v23  ;;  %v10125_v63 = vadd.f32 %v2533_v25, %v2445_v46  ;;  %v1869_v36 = vpop.f32.mrf.mxu2  ;;  %v6932_v23 = vld [vmem:[#allocation2 + $0x128] sm:$0xf]  ;;  %v1037_v31 = vsel %vm9786_vm14, %v931_v26, %v1036_v13  ;;  %v7214_v46 = vld [vmem:[#allocation2 + $0x114] sm:$0xf0]  ;;  %4801 = vmatpush.bf16.msra.mxu1 %v9008_v1  ;;  %v11379_v26 = vshrl.u32 %v9657_v62, 16  ;;  %v11381_v13 = vshll.u32 %v9655_v39, 16 }
 0x14f   : > { %v1870_v14 = vadd.f32 %v1869_v36, %v9904_v29  ;;  %v928_v25 = vsel %vm9778_vm13, %v926_v34, %v927_v9  ;;  %1038 = vst [vmem:[#allocation2 + $0x164] sm:$0xf] %v1037_v31  ;;  %v7217_v9 = vor.u32 %v8699_v32, %v7214_v46  ;;  %v11382_v31 = vshll.u32 %v9657_v62, 16  ;;  %v6944_v62 = vld [vmem:[#allocation2 + $0x140] sm:$0xf] }
 0x150   : > { %v2449_v20 = vpop.f32.mrf.mxu0  ;;  %1035 = vst [vmem:[#allocation2 + $0x158] sm:$0xf] %v928_v25 }
 0x151   : > { %v2358_v42 = vpop.f32.mrf.mxu3  ;;  %v2538_v38 = vpop.f32.mrf.mxu1 }
 0x152   : > { %v2359_v57 = vadd.f32 %v2358_v42, %v1870_v14  ;;  %v7221_v14 = vor.u32 %v8701_v7, %v7220_v0 }
 0x154   : > { %v2448_v29 = vadd.f32 %v2447_v54, %v2359_v57  ;;  %v6933_v54 = vor.u32 %v8773_v61, %v6932_v23  ;;  %v938_v57 = vrot.slane %v11379_v26, 4  ;;  %v933_v23 = vrot.slane %v11381_v13, 5  ;;  %v8704_v26 = vld [vmem:[#allocation2 + $0x130] sm:$0xf0] }
 0x155   : > { %v343_v13 = vld [vmem:[#allocation2 + $0x194] sm:$0x8] }
 0x156   : > { %v10135_v6 = vadd.f32 %v2536_v8, %v2448_v29  ;;  %v1871_v58 = vpop.f32.mrf.mxu2  ;;  %v341_v8 = vsel %vm9747_vm10, 0, %v340_v48  ;;  %v936_v29 = vrot.slane %v11382_v31, 5 }
 0x157   : > { %v1872_v60 = vadd.f32 %v1871_v58, %v9922_v51  ;;  %342 = vst [vmem:[#allocation2 + $0x17c] sm:$0x8] %v341_v8  ;;  %v11380_v51 = vshrl.u32 %v9655_v39, 16  ;;  %v8703_v8 = vld [vmem:[#allocation2 + $0x128] sm:$0xf0] }
 0x158   : > { %v2452_v36 = vpop.f32.mrf.mxu0  ;;  %v939_v32 = vor.u32 %v938_v57, %v936_v29 }
 0x159   : > { %v2360_v47 = vpop.f32.mrf.mxu3  ;;  %v2541_v34 = vpop.f32.mrf.mxu1  ;;  %v932_v25 = vrot.slane %v11380_v51, 4 }
 0x15a   : > { %v2361_v42 = vadd.f32 %v2360_v47, %v1872_v60  ;;  %v940_v1 = vrot.slane %v939_v32, 4 }
 0x15b   : > { %1913 = vmatmul.bf16.gmra.mxu2 %v6933_v54  ;;  %2491 = vmatmul.bf16.gmra.mxu0 %v7217_v9  ;;  %v934_v61 = vor.u32 %v933_v23, %v932_v25  ;;  %v7224_v9 = vld [vmem:[#allocation2 + $0x120] sm:$0xf] }
 0x15c   : > { %v2450_v16 = vadd.f32 %v2449_v20, %v2361_v42  ;;  %2580 = vmatmul.bf16.gmra.mxu1 %v7221_v14  ;;  %v7232_v42 = vld [vmem:[#allocation2 + $0x128] sm:$0xf]  ;;  %v7225_v31 = vor.u32 %v8703_v8, %v7224_v9 }
 0x15d   : > { %v935_v7 = vrot.slane %v934_v61, 4 }
 0x15e   : > { %2402 = vmatmul.bf16.gmra.mxu3 %v7213_v22  ;;  %v10151_v52 = vadd.f32 %v2538_v38, %v2450_v16  ;;  %v1874_v41 = vpop.f32.mrf.mxu2  ;;  %v1040_v47 = vld [vmem:[#allocation2 + $0x17c] sm:$0xf]  ;;  %v8702_v38 = vld [vmem:[#allocation2 + $0x124] sm:$0xf]  ;;  %v8776_v22 = vld [vmem:[#allocation2 + $0x148] sm:$0xf0] }
 0x15f   : > { %v1875_v46 = vadd.f32 %v1874_v41, %v9935_v10  ;;  %v937_v39 = vsel %vm9778_vm13, %v935_v7, %v936_v29  ;;  %v1041_v48 = vsel %vm9786_vm14, %v940_v1, %v1040_v47  ;;  %v7226_v10 = vld [vmem:[#allocation2 + $0x12c] sm:$0xf0]  ;;  %v7233_v29 = vor.u32 %v8704_v26, %v7232_v42  ;;  %v8866_v47 = vld [vmem:[%s11243_s1 + $0x1c0] sm:$0xff] }
 0x160   : > { %v2454_v0 = vpop.f32.mrf.mxu0  ;;  %1039 = vst [vmem:[#allocation2 + $0x170] sm:$0xf] %v937_v39  ;;  %v7229_v25 = vor.u32 %v8702_v38, %v7226_v10  ;;  %v344_v41 = vsel %vm9747_vm10, 0, %v343_v13  ;;  %v11385_v1 = vshll.u32 %v9709_v53, 16  ;;  %v8858_v39 = vld [vmem:[%s11243_s1 + $0x180] sm:$0xff]  ;;  %3216 = vmatpush.bf16.msra.mxu3 %v8866_v47 }
 0x161   : > { %v2363_v20 = vpop.f32.mrf.mxu3  ;;  %v2543_v60 = vpop.f32.mrf.mxu1  ;;  %1042 = vst [vmem:[#allocation2 + $0x17c] sm:$0xf] %v1041_v48  ;;  %3127 = vmatpush.bf16.msra.mxu2 %v8858_v39  ;;  %v8706_v13 = vld [vmem:[#allocation2 + $0x140] sm:$0xf0] }
 0x162   : > { %v2364_v58 = vadd.f32 %v2363_v20, %v1875_v46  ;;  %345 = vst [vmem:[#allocation2 + $0x194] sm:$0x8] %v344_v41  ;;  %v7238_v41 = vld [vmem:[#allocation2 + $0x144] sm:$0xf0] }
 0x164   : > { %v2453_v54 = vadd.f32 %v2452_v36, %v2364_v58  ;;  %v6945_v36 = vor.u32 %v8776_v22, %v6944_v62  ;;  %v942_v58 = vrot.slane %v11385_v1, 5 }
 0x166   : > { %v10158_v14 = vadd.f32 %v2541_v34, %v2453_v54  ;;  %v1876_v57 = vpop.f32.mrf.mxu2  ;;  %v11383_v34 = vshrl.u32 %v9727_v40, 16  ;;  %v11386_v54 = vshll.u32 %v9727_v40, 16  ;;  %v8874_v40 = vld [vmem:[%s11243_s1 + $0x200] sm:$0xff] }
 0x167   : > { %v1877_v16 = vadd.f32 %v1876_v57, %v9947_v15  ;;  %v11384_v15 = vshrl.u32 %v9709_v53, 16  ;;  %3305 = vmatpush.bf16.msra.mxu0 %v8874_v40  ;;  %v8708_v40 = vld [vmem:[#allocation2 + $0x154] sm:$0xf] }
 0x168   : > { %v2457_v23 = vpop.f32.mrf.mxu0  ;;  %v947_v46 = vrot.slane %v11383_v34, 4  ;;  %v945_v62 = vrot.slane %v11386_v54, 5  ;;  %v7244_v34 = vld [vmem:[#allocation2 + $0x140] sm:$0xf] }
 0x169   : > { %v2365_v51 = vpop.f32.mrf.mxu3  ;;  %v2546_v32 = vpop.f32.mrf.mxu1  ;;  %v941_v7 = vrot.slane %v11384_v15, 4 }
 0x16a   : > { %v2366_v61 = vadd.f32 %v2365_v51, %v1877_v16  ;;  %v948_v53 = vor.u32 %v947_v46, %v945_v62  ;;  %v1044_v16 = vld [vmem:[#allocation2 + $0x194] sm:$0xf]  ;;  %v6956_v51 = vld [vmem:[#allocation2 + $0x158] sm:$0xf]  ;;  %v8707_v46 = vld [vmem:[#allocation2 + $0x148] sm:$0xf0] }
 0x16b   : > { %1918 = vmatmul.bf16.gmra.mxu2 %v6945_v36  ;;  %2496 = vmatmul.bf16.gmra.mxu0 %v7229_v25  ;;  %v943_v9 = vor.u32 %v942_v58, %v941_v7  ;;  %v7236_v25 = vld [vmem:[#allocation2 + $0x138] sm:$0xf]  ;;  %v7245_v54 = vor.u32 %v8707_v46, %v7244_v34 }
 0x16c   : > { %v2455_v20 = vadd.f32 %v2454_v0, %v2366_v61  ;;  %2585 = vmatmul.bf16.gmra.mxu1 %v7233_v29  ;;  %v949_v42 = vrot.slane %v948_v53, 4  ;;  %v8705_v29 = vld [vmem:[#allocation2 + $0x13c] sm:$0xf]  ;;  %v7237_v47 = vor.u32 %v8706_v13, %v7236_v25  ;;  %v8710_v25 = vld [vmem:[#allocation2 + $0x160] sm:$0xf0] }
 0x16d   : > { %v944_v10 = vrot.slane %v943_v9, 4  ;;  %v7241_v58 = vor.u32 %v8705_v29, %v7238_v41 }
 0x16e   : > { %2407 = vmatmul.bf16.gmra.mxu3 %v7225_v31  ;;  %v10177_v0 = vadd.f32 %v2543_v60, %v2455_v20  ;;  %v1879_v38 = vpop.f32.mrf.mxu2  ;;  %v8779_v31 = vld [vmem:[#allocation2 + $0x160] sm:$0xf0]  ;;  %v9007_v20 = vld [vmem:[%s11245_s3 + $0xe8] sm:$0xff] }
 0x16f   : > { %v1880_v48 = vadd.f32 %v1879_v38, %v9957_v55  ;;  %v946_v60 = vsel %vm9778_vm13, %v944_v10, %v945_v62  ;;  %v1045_v55 = vsel %vm9786_vm14, %v949_v42, %v1044_v16  ;;  %4802 = vmatpush.bf16.msra.mxu1 %v9007_v20  ;;  %v8782_v16 = vld [vmem:[#allocation2 + $0x178] sm:$0xf0] }
 0x170   : > { %v2459_v8 = vpop.f32.mrf.mxu0  ;;  %1043 = vst [vmem:[#allocation2 + $0x188] sm:$0xf] %v946_v60  ;;  %v6968_v60 = vld [vmem:[#allocation2 + $0x170] sm:$0xf] }
 0x171   : > { %v2368_v22 = vpop.f32.mrf.mxu3  ;;  %v10180_v57 = vpop.f32.mrf.mxu1  ;;  %1046 = vst [vmem:[#allocation2 + $0x194] sm:$0xf] %v1045_v55  ;;  %v6969_v29 = vor.u32 %v8782_v16, %v6968_v60 }
 0x172   : > { %v2369_v26 = vadd.f32 %v2368_v22, %v1880_v48 }
 0x174   : > { %v2458_v36 = vadd.f32 %v2457_v23, %v2369_v26  ;;  %v6957_v23 = vor.u32 %v8779_v31, %v6956_v51  ;;  %v7248_v26 = vld [vmem:[#allocation2 + $0x150] sm:$0xf]  ;;  %v7250_v51 = vld [vmem:[#allocation2 + $0x15c] sm:$0xf0] }
 0x175   : > { %v7253_v41 = vor.u32 %v8708_v40, %v7250_v51  ;;  %v8713_v40 = vld [vmem:[#allocation2 + $0x178] sm:$0xf0] }
 0x176   : > { %v10189_v61 = vadd.f32 %v2546_v32, %v2458_v36  ;;  %v1881_v15 = vpop.f32.mrf.mxu2  ;;  %v7256_v36 = vld [vmem:[#allocation2 + $0x158] sm:$0xf] }
 0x177   : > { %v1882_v7 = vadd.f32 %v1881_v15, %v9975_v18  ;;  %v7257_v20 = vor.u32 %v8710_v25, %v7256_v36 }
 0x178   : > { %v2462_v39 = vpop.f32.mrf.mxu0 }
 0x179   : > { %v2370_v1 = vpop.f32.mrf.mxu3  ;;  %v2551_v9 = vpop.f32.mrf.mxu1 }
 0x17a   : > { %v2371_v62 = vadd.f32 %v2370_v1, %v1882_v7 }
 0x17b   : > { %1923 = vmatmul.bf16.gmra.mxu2 %v6957_v23  ;;  %2501 = vmatmul.bf16.gmra.mxu0 %v7241_v58 }
 0x17c   : > { %v10195_v32 = vadd.f32 %v2459_v8, %v2371_v62  ;;  %2590 = vmatmul.bf16.gmra.mxu1 %v7245_v54  ;;  %v8709_v8 = vld [vmem:[#allocation2 + $0x158] sm:$0xf0] }
 0x17d   : > { %v7249_v46 = vor.u32 %v8709_v8, %v7248_v26 }
 0x17e   : > { %2412 = vmatmul.bf16.gmra.mxu3 %v7237_v47  ;;  %v1884_v38 = vpop.f32.mrf.mxu2 }
 0x17f   : > { %v1885_v53 = vadd.f32 %v1884_v38, %v9988_v2  ;;  %v7260_v38 = vld [vmem:[#allocation2 + $0x168] sm:$0xf] }
 0x180   : > { %v2464_v18 = vpop.f32.mrf.mxu0 }
 0x181   : > { %v2373_v48 = vpop.f32.mrf.mxu3  ;;  %v10198_v10 = vpop.f32.mrf.mxu1 }
 0x182   : > { %v2374_v22 = vadd.f32 %v2373_v48, %v1885_v53  ;;  %v8712_v53 = vld [vmem:[#allocation2 + $0x170] sm:$0xf0] }
 0x183   : > { %v8785_v48 = vld [vmem:[#allocation2 + $0x190] sm:$0xf0] }
 0x184   : > { %v2463_v42 = vadd.f32 %v2462_v39, %v2374_v22  ;;  %v8711_v22 = vld [vmem:[#allocation2 + $0x16c] sm:$0xf] }
 0x186   : > { %v10200_v55 = vadd.f32 %v2551_v9, %v2463_v42  ;;  %v1886_v13 = vpop.f32.mrf.mxu2  ;;  %v6980_v9 = vld [vmem:[#allocation2 + $0x188] sm:$0xf]  ;;  %v7262_v42 = vld [vmem:[#allocation2 + $0x174] sm:$0xf0] }
 0x187   : > { %v1887_v31 = vadd.f32 %v1886_v13, %v10000_v17  ;;  %v6981_v8 = vor.u32 %v8785_v48, %v6980_v9  ;;  %v7265_v36 = vor.u32 %v8711_v22, %v7262_v42  ;;  %v7261_v13 = vor.u32 %v8712_v53, %v7260_v38  ;;  %v8810_v38 = vld [vmem:[#allocation2 + $0x34] sm:$0xf] }
 0x188   : > { %v2467_v34 = vpop.f32.mrf.mxu0 }
 0x189   : > { %v2375_v2 = vpop.f32.mrf.mxu3  ;;  %v2556_v7 = vpop.f32.mrf.mxu1 }
 0x18a   : > { %v2376_v15 = vadd.f32 %v2375_v2, %v1887_v31 }
 0x18b   : > { %1928 = vmatmul.bf16.gmra.mxu2 %v6969_v29  ;;  %2506 = vmatmul.bf16.gmra.mxu0 %v7253_v41 }
 0x18c   : > { %v10203_v1 = vadd.f32 %v2464_v18, %v2376_v15  ;;  %2595 = vmatmul.bf16.gmra.mxu1 %v7257_v20  ;;  %v7268_v18 = vld [vmem:[#allocation2 + $0x170] sm:$0xf] }
 0x18d   : > { %v7269_v31 = vor.u32 %v8713_v40, %v7268_v18 }
 0x18e   : > { %2417 = vmatmul.bf16.gmra.mxu3 %v7249_v46  ;;  %v1889_v23 = vpop.f32.mrf.mxu2 }
 0x18f   : > { %v1890_v58 = vadd.f32 %v1889_v23, %v10010_v4  ;;  %v9006_v4 = vld [vmem:[%s11245_s3 + $0xe0] sm:$0xff] }
 0x190   : > { %v2469_v47 = vpop.f32.mrf.mxu0  ;;  %4803 = vmatpush.bf16.msra.mxu1 %v9006_v4 }
 0x191   : > { %v2378_v39 = vpop.f32.mrf.mxu3  ;;  %v10206_v54 = vpop.f32.mrf.mxu1 }
 0x192   : > { %v2379_v17 = vadd.f32 %v2378_v39, %v1890_v58  ;;  %v7416_v58 = vld [vmem:[#allocation2 + $0x30] sm:$0xf]  ;;  %v8811_v39 = vld [vmem:[#allocation2 + $0x38] sm:$0xf0] }
 0x193   : > { %v7417_v42 = vor.u32 %v8811_v39, %v7416_v58 }
 0x194   : > { %v2468_v62 = vadd.f32 %v2467_v34, %v2379_v17  ;;  %v7424_v17 = vld [vmem:[#allocation2 + $0x38] sm:$0xf] }
 0x196   : > { %v10208_v26 = vadd.f32 %v2556_v7, %v2468_v62  ;;  %v1891_v60 = vpop.f32.mrf.mxu2  ;;  %v8812_v62 = vld [vmem:[#allocation2 + $0x40] sm:$0xf0] }
 0x197   : > { %v1892_v16 = vadd.f32 %v1891_v60, %v10031_v19 }
 0x198   : > { %v2472_v25 = vpop.f32.mrf.mxu0 }
 0x199   : > { %v2380_v51 = vpop.f32.mrf.mxu3  ;;  %v2561_v29 = vpop.f32.mrf.mxu1 }
 0x19a   : > { %v2381_v2 = vadd.f32 %v2380_v51, %v1892_v16 }
 0x19b   : > { %1933 = vmatmul.bf16.gmra.mxu2 %v6981_v8  ;;  %2511 = vmatmul.bf16.gmra.mxu0 %v7265_v36 }
 0x19c   : > { %v10214_v41 = vadd.f32 %v2469_v47, %v2381_v2  ;;  %2600 = vmatmul.bf16.gmra.mxu1 %v7269_v31  ;;  %v7418_v47 = vld [vmem:[#allocation2 + $0x3c] sm:$0xf0]  ;;  %v7428_v2 = vld [vmem:[#allocation2 + $0x48] sm:$0xf] }
 0x19d   : > { %v7421_v40 = vor.u32 %v8810_v38, %v7418_v47 }
 0x19e   : > { %2422 = vmatmul.bf16.gmra.mxu3 %v7261_v13  ;;  %v1894_v34 = vpop.f32.mrf.mxu2 }
 0x19f   : > { %v1895_v46 = vadd.f32 %v1894_v34, %v10041_v33  ;;  %v7425_v33 = vor.u32 %v8812_v62, %v7424_v17  ;;  %v7436_v34 = vld [vmem:[#allocation2 + $0x50] sm:$0xf] }
 0x1a0   : > { %v2474_v19 = vpop.f32.mrf.mxu0 }
 0x1a1   : > { %v2383_v20 = vpop.f32.mrf.mxu3  ;;  %v10217_v7 = vpop.f32.mrf.mxu1 }
 0x1a2   : > { %v2384_v15 = vadd.f32 %v2383_v20, %v1895_v46  ;;  %v8815_v46 = vld [vmem:[#allocation2 + $0x58] sm:$0xf0] }
 0x1a3   : > { %v7437_v62 = vor.u32 %v8815_v46, %v7436_v34 }
 0x1a4   : > { %v2473_v23 = vadd.f32 %v2472_v25, %v2384_v15  ;;  %v8813_v15 = vld [vmem:[#allocation2 + $0x4c] sm:$0xf] }
 0x1a6   : > { %v10219_v9 = vadd.f32 %v2561_v29, %v2473_v23  ;;  %v1896_v53 = vpop.f32.mrf.mxu2  ;;  %v8814_v29 = vld [vmem:[#allocation2 + $0x50] sm:$0xf0]  ;;  %v7430_v23 = vld [vmem:[#allocation2 + $0x54] sm:$0xf0] }
 0x1a7   : > { %v1897_v48 = vadd.f32 %v1896_v53, %v10053_v5  ;;  %v7429_v17 = vor.u32 %v8814_v29, %v7428_v2  ;;  %v7433_v47 = vor.u32 %v8813_v15, %v7430_v23  ;;  %v8816_v2 = vld [vmem:[#allocation2 + $0x64] sm:$0xf]  ;;  %v7442_v29 = vld [vmem:[#allocation2 + $0x6c] sm:$0xf0] }
 0x1a8   : > { %v2477_v18 = vpop.f32.mrf.mxu0 }
 0x1a9   : > { %v2385_v22 = vpop.f32.mrf.mxu3  ;;  %v2566_v60 = vpop.f32.mrf.mxu1 }
 0x1aa   : > { %v2386_v4 = vadd.f32 %v2385_v22, %v1897_v48 }
 0x1ab   : > { %3128 = vmatmul.bf16.vlgmr.msra.gmra.mxu2 %v7417_v42  ;;  %3306 = vmatmul.bf16.vlgmr.msra.gmra.mxu0 %v7425_v33 }
 0x1ac   : > { %v10222_v16 = vadd.f32 %v2474_v19, %v2386_v4  ;;  %v9005_v19 = vld [vmem:[%s11245_s3 + $0xd8] sm:$0xff] }
 0x1ad   : > { %4804 = vmatpush.bf16.msra.mxu1 %v9005_v19  ;;  %v7445_v19 = vor.u32 %v8816_v2, %v7442_v29 }
 0x1ae   : > { %3217 = vmatmul.bf16.vlgmr.msra.gmra.mxu3 %v7421_v40  ;;  %v1899_v51 = vpop.f32.mrf.mxu2 }
 0x1af   : > { %v1900_v8 = vadd.f32 %v1899_v51, %v9865_v27  ;;  %v7440_v51 = vld [vmem:[#allocation2 + $0x60] sm:$0xf] }
 0x1b0   : > { %v2479_v25 = vpop.f32.mrf.mxu0 }
 0x1b1   : > { %v2388_v36 = vpop.f32.mrf.mxu3  ;;  %v10225_v31 = vpop.f32.mrf.mxu1 }
 0x1b2   : > { %v2389_v13 = vadd.f32 %v2388_v36, %v1900_v8  ;;  %v8817_v8 = vld [vmem:[#allocation2 + $0x68] sm:$0xf0]  ;;  %v7448_v36 = vld [vmem:[#allocation2 + $0x68] sm:$0xf] }
 0x1b3   : > { %v7441_v15 = vor.u32 %v8817_v8, %v7440_v51  ;;  %v8819_v51 = vld [vmem:[#allocation2 + $0x7c] sm:$0xf]  ;;  %v7454_v8 = vld [vmem:[#allocation2 + $0x84] sm:$0xf0] }
 0x1b4   : > { %v2478_v5 = vadd.f32 %v2477_v18, %v2389_v13  ;;  %v8818_v13 = vld [vmem:[#allocation2 + $0x70] sm:$0xf0] }
 0x1b6   : > { %v10227_v20 = vadd.f32 %v2566_v60, %v2478_v5  ;;  %v1901_v58 = vpop.f32.mrf.mxu2 }
 0x1b7   : > { %v1902_v27 = vadd.f32 %v1901_v58, %v9876_v59 }
 0x1b8   : > { %v2482_v38 = vpop.f32.mrf.mxu0 }
 0x1b9   : > { %v2390_v39 = vpop.f32.mrf.mxu3  ;;  %v2571_v48 = vpop.f32.mrf.mxu1 }
 0x1ba   : > { %v2391_v53 = vadd.f32 %v2390_v39, %v1902_v27 }
 0x1bb   : > { %3133 = vmatmul.bf16.gmra.mxu2 %v7429_v17  ;;  %3311 = vmatmul.bf16.gmra.mxu0 %v7437_v62 }
 0x1bc   : > { %v10233_v22 = vadd.f32 %v2479_v25, %v2391_v53 }
 0x1be   : > { %3222 = vmatmul.bf16.gmra.mxu3 %v7433_v47  ;;  %v1904_v42 = vpop.f32.mrf.mxu2 }
 0x1bf   : > { %v1905_v33 = vadd.f32 %v1904_v42, %v9890_v12  ;;  %v7449_v12 = vor.u32 %v8818_v13, %v7448_v36  ;;  %v7452_v42 = vld [vmem:[#allocation2 + $0x78] sm:$0xf] }
 0x1c0   : > { %v2484_v40 = vpop.f32.mrf.mxu0 }
 0x1c1   : > { %v2393_v18 = vpop.f32.mrf.mxu3  ;;  %v10236_v59 = vpop.f32.mrf.mxu1 }
 0x1c2   : > { %v2394_v4 = vadd.f32 %v2393_v18, %v1905_v33  ;;  %v8820_v33 = vld [vmem:[#allocation2 + $0x80] sm:$0xf0]  ;;  %v7460_v18 = vld [vmem:[#allocation2 + $0x80] sm:$0xf] }
 0x1c3   : > { %v7453_v2 = vor.u32 %v8820_v33, %v7452_v42  ;;  %v8824_v42 = vld [vmem:[#allocation2 + $0xa0] sm:$0xf0] }
 0x1c4   : > { %v2483_v60 = vadd.f32 %v2482_v38, %v2394_v4  ;;  %v8821_v4 = vld [vmem:[#allocation2 + $0x88] sm:$0xf0] }
 0x1c5   : > { %v7461_v29 = vor.u32 %v8821_v4, %v7460_v18  ;;  %v8822_v18 = vld [vmem:[#allocation2 + $0x94] sm:$0xf]  ;;  %v7466_v4 = vld [vmem:[#allocation2 + $0x9c] sm:$0xf0] }
 0x1c6   : > { %v10238_v5 = vadd.f32 %v2571_v48, %v2483_v60  ;;  %v1906_v25 = vpop.f32.mrf.mxu2 }
 0x1c7   : > { %v1907_v34 = vadd.f32 %v1906_v25, %v9898_v56 }
 0x1c8   : > { %v2487_v23 = vpop.f32.mrf.mxu0 }
 0x1c9   : > { %v2395_v46 = vpop.f32.mrf.mxu3  ;;  %v2576_v27 = vpop.f32.mrf.mxu1 }
 0x1ca   : > { %v2396_v58 = vadd.f32 %v2395_v46, %v1907_v34  ;;  %v7457_v34 = vor.u32 %v8819_v51, %v7454_v8 }
 0x1cb   : > { %3138 = vmatmul.bf16.gmra.mxu2 %v7441_v15  ;;  %3316 = vmatmul.bf16.gmra.mxu0 %v7449_v12 }
 0x1cc   : > { %v10241_v39 = vadd.f32 %v2484_v40, %v2396_v58  ;;  %v9004_v40 = vld [vmem:[%s11245_s3 + $0xd0] sm:$0xff] }
 0x1cd   : > { %4805 = vmatpush.bf16.msra.mxu1 %v9004_v40 }
 0x1ce   : > { %3227 = vmatmul.bf16.gmra.mxu3 %v7445_v19  ;;  %v1909_v17 = vpop.f32.mrf.mxu2 }
 0x1cf   : > { %v1910_v62 = vadd.f32 %v1909_v17, %v9918_v45 }
 0x1d0   : > { %v2489_v47 = vpop.f32.mrf.mxu0 }
 0x1d1   : > { %v2398_v38 = vpop.f32.mrf.mxu3  ;;  %v10244_v48 = vpop.f32.mrf.mxu1 }
 0x1d2   : > { %v2399_v53 = vadd.f32 %v2398_v38, %v1910_v62  ;;  %v7464_v38 = vld [vmem:[#allocation2 + $0x90] sm:$0xf] }
 0x1d4   : > { %v2488_v56 = vadd.f32 %v2487_v23, %v2399_v53  ;;  %v8823_v53 = vld [vmem:[#allocation2 + $0x98] sm:$0xf0] }
 0x1d5   : > { %v7465_v40 = vor.u32 %v8823_v53, %v7464_v38  ;;  %v8827_v38 = vld [vmem:[#allocation2 + $0xb8] sm:$0xf0] }
 0x1d6   : > { %v10246_v60 = vadd.f32 %v2576_v27, %v2488_v56  ;;  %v1911_v36 = vpop.f32.mrf.mxu2  ;;  %v7472_v56 = vld [vmem:[#allocation2 + $0x98] sm:$0xf] }
 0x1d7   : > { %v1912_v45 = vadd.f32 %v1911_v36, %v9929_v43 }
 0x1d8   : > { %v2492_v25 = vpop.f32.mrf.mxu0 }
 0x1d9   : > { %v2400_v13 = vpop.f32.mrf.mxu3  ;;  %v2581_v15 = vpop.f32.mrf.mxu1 }
 0x1da   : > { %v2401_v46 = vadd.f32 %v2400_v13, %v1912_v45  ;;  %v7469_v45 = vor.u32 %v8822_v18, %v7466_v4 }
 0x1db   : > { %3143 = vmatmul.bf16.gmra.mxu2 %v7453_v2  ;;  %3321 = vmatmul.bf16.gmra.mxu0 %v7461_v29 }
 0x1dc   : > { %v10252_v12 = vadd.f32 %v2489_v47, %v2401_v46 }
 0x1de   : > { %3232 = vmatmul.bf16.gmra.mxu3 %v7457_v34  ;;  %v1914_v23 = vpop.f32.mrf.mxu2 }
 0x1df   : > { %v1915_v19 = vadd.f32 %v1914_v23, %v9943_v21  ;;  %v7473_v21 = vor.u32 %v8824_v42, %v7472_v56  ;;  %v8825_v56 = vld [vmem:[#allocation2 + $0xac] sm:$0xf]  ;;  %v7478_v42 = vld [vmem:[#allocation2 + $0xb4] sm:$0xf0] }
 0x1e0   : > { %v2494_v27 = vpop.f32.mrf.mxu0 }
 0x1e1   : > { %v2403_v58 = vpop.f32.mrf.mxu3  ;;  %v10255_v43 = vpop.f32.mrf.mxu1 }
 0x1e2   : > { %v2404_v17 = vadd.f32 %v2403_v58, %v1915_v19  ;;  %v7476_v58 = vld [vmem:[#allocation2 + $0xa8] sm:$0xf] }
 0x1e4   : > { %v2493_v62 = vadd.f32 %v2492_v25, %v2404_v17  ;;  %v8826_v17 = vld [vmem:[#allocation2 + $0xb0] sm:$0xf0] }
 0x1e6   : > { %v10257_v33 = vadd.f32 %v2581_v15, %v2493_v62  ;;  %v1916_v47 = vpop.f32.mrf.mxu2  ;;  %v7484_v62 = vld [vmem:[#allocation2 + $0xb0] sm:$0xf] }
 0x1e7   : > { %v1917_v51 = vadd.f32 %v1916_v47, %v9951_v50  ;;  %v7477_v47 = vor.u32 %v8826_v17, %v7476_v58  ;;  %v7496_v58 = vld [vmem:[#allocation2 + $0xc8] sm:$0xf]  ;;  %v8830_v17 = vld [vmem:[#allocation2 + $0xd0] sm:$0xf0] }
 0x1e8   : > { %v2497_v36 = vpop.f32.mrf.mxu0 }
 0x1e9   : > { %v2405_v8 = vpop.f32.mrf.mxu3  ;;  %v2586_v2 = vpop.f32.mrf.mxu1 }
 0x1ea   : > { %v2406_v13 = vadd.f32 %v2405_v8, %v1917_v51  ;;  %v7485_v51 = vor.u32 %v8827_v38, %v7484_v62 }
 0x1eb   : > { %3148 = vmatmul.bf16.gmra.mxu2 %v7465_v40  ;;  %3326 = vmatmul.bf16.gmra.mxu0 %v7473_v21  ;;  %v7481_v40 = vor.u32 %v8825_v56, %v7478_v42  ;;  %v8828_v56 = vld [vmem:[#allocation2 + $0xc4] sm:$0xf]  ;;  %v7490_v42 = vld [vmem:[#allocation2 + $0xcc] sm:$0xf0] }
 0x1ec   : > { %v10260_v29 = vadd.f32 %v2494_v27, %v2406_v13  ;;  %v9003_v27 = vld [vmem:[%s11245_s3 + $0xc8] sm:$0xff] }
 0x1ed   : > { %4806 = vmatpush.bf16.msra.mxu1 %v9003_v27 }
 0x1ee   : > { %3237 = vmatmul.bf16.gmra.mxu3 %v7469_v45  ;;  %v1919_v25 = vpop.f32.mrf.mxu2 }
 0x1ef   : > { %v1920_v34 = vadd.f32 %v1919_v25, %v9971_v35 }
 0x1f0   : > { %v2499_v15 = vpop.f32.mrf.mxu0 }
 0x1f1   : > { %v2408_v46 = vpop.f32.mrf.mxu3  ;;  %v10263_v19 = vpop.f32.mrf.mxu1 }
 0x1f2   : > { %v2409_v23 = vadd.f32 %v2408_v46, %v1920_v34  ;;  %11387 = vst [vmem:[#allocation11_spill] sm:$0xff] %v10263_v19 }
 0x1f4   : > { %v2498_v50 = vadd.f32 %v2497_v36, %v2409_v23  ;;  %v7488_v23 = vld [vmem:[#allocation2 + $0xc0] sm:$0xf] }
 0x1f6   : > { %v10265_v53 = vadd.f32 %v2586_v2, %v2498_v50  ;;  %v1921_v18 = vpop.f32.mrf.mxu2  ;;  %v8829_v50 = vld [vmem:[#allocation2 + $0xc8] sm:$0xf0] }
 0x1f7   : > { %v1922_v35 = vadd.f32 %v1921_v18, %v9982_v3 }
 0x1f8   : > { %11388 = vst [vmem:[#allocation12_spill] sm:$0xff] %v10265_v53  ;;  %v2502_v8 = vpop.f32.mrf.mxu0 }
 0x1f9   : > { %v2410_v4 = vpop.f32.mrf.mxu3  ;;  %v2591_v36 = vpop.f32.mrf.mxu1 }
 0x1fa   : > { %v2411_v21 = vadd.f32 %v2410_v4, %v1922_v35  ;;  %v7489_v35 = vor.u32 %v8829_v50, %v7488_v23  ;;  %v7508_v23 = vld [vmem:[#allocation2 + $0xe0] sm:$0xf]  ;;  %v8833_v50 = vld [vmem:[#allocation2 + $0xe8] sm:$0xf0] }
 0x1fb   : > { %3153 = vmatmul.bf16.gmra.mxu2 %v7477_v47  ;;  %3331 = vmatmul.bf16.gmra.mxu0 %v7485_v51  ;;  %v7493_v47 = vor.u32 %v8828_v56, %v7490_v42  ;;  %v7502_v56 = vld [vmem:[#allocation2 + $0xe4] sm:$0xf0] }
 0x1fc   : > { %v10271_v45 = vadd.f32 %v2499_v15, %v2411_v21 }
 0x1fe   : > { %11389 = vst [vmem:[#allocation13_spill] sm:$0xff] %v10271_v45  ;;  %3242 = vmatmul.bf16.gmra.mxu3 %v7481_v40  ;;  %v1924_v13 = vpop.f32.mrf.mxu2 }
 0x1ff   : > { %v1925_v2 = vadd.f32 %v1924_v13, %v9996_v30  ;;  %v7497_v30 = vor.u32 %v8830_v17, %v7496_v58  ;;  %v8831_v17 = vld [vmem:[#allocation2 + $0xdc] sm:$0xf] }
 0x200   : > { %v2504_v34 = vpop.f32.mrf.mxu0 }
 0x201   : > { %v2413_v25 = vpop.f32.mrf.mxu3  ;;  %v10274_v62 = vpop.f32.mrf.mxu1 }
 0x202   : > { %v2414_v46 = vadd.f32 %v2413_v25, %v1925_v2  ;;  %11390 = vst [vmem:[#allocation14_spill] sm:$0xff] %v10274_v62 }
 0x204   : > { %v2503_v3 = vadd.f32 %v2502_v8, %v2414_v46 }
 0x206   : > { %v10276_v38 = vadd.f32 %v2591_v36, %v2503_v3  ;;  %v1926_v15 = vpop.f32.mrf.mxu2  ;;  %v11393_v36 = vld [vmem:[#allocation6_spill] sm:$0xff] }
 0x207   : > { %v1927_v27 = vadd.f32 %v1926_v15, %v10004_v49  ;;  %v7500_v49 = vld [vmem:[#allocation2 + $0xd8] sm:$0xf]  ;;  %v8832_v15 = vld [vmem:[#allocation2 + $0xe0] sm:$0xf0] }
 0x208   : > { %11391 = vst [vmem:[#allocation15_spill] sm:$0xff] %v10276_v38  ;;  %v2507_v4 = vpop.f32.mrf.mxu0 }
 0x209   : > { %v2415_v18 = vpop.f32.mrf.mxu3  ;;  %v2596_v21 = vpop.f32.mrf.mxu1 }
 0x20a   : > { %v2416_v51 = vadd.f32 %v2415_v18, %v1927_v27 }
 0x20b   : > { %3158 = vmatmul.bf16.gmra.mxu2 %v7489_v35  ;;  %3336 = vmatmul.bf16.gmra.mxu0 %v7497_v30  ;;  %v7501_v35 = vor.u32 %v8832_v15, %v7500_v49  ;;  %v7509_v30 = vor.u32 %v8833_v50, %v7508_v23  ;;  %v7512_v49 = vld [vmem:[#allocation2 + $0xf0] sm:$0xf]  ;;  %v9002_v15 = vld [vmem:[%s11245_s3 + $0xc0] sm:$0xff]  ;;  %v8835_v23 = vld [vmem:[#allocation2 + $0xf8] sm:$0xf0] }
 0x20c   : > { %v10279_v8 = vadd.f32 %v2504_v34, %v2416_v51  ;;  %v11395_v34 = vld [vmem:[#allocation7_spill] sm:$0xff]  ;;  %v7505_v51 = vor.u32 %v8831_v17, %v7502_v56  ;;  %v7520_v50 = vld [vmem:[#allocation2 + $0xf8] sm:$0xf]  ;;  %v8836_v17 = vld [vmem:[#allocation2 + $0x100] sm:$0xf0]  ;;  %4807 = vmatpush.bf16.msra.mxu1 %v9002_v15 }
 0x20d   : > { %v10301_v15 = vld [vmem:[%s11244_s2] ss:$0 sm:$0xff] }
 0x20e   : > { %11392 = vst [vmem:[#allocation16_spill] sm:$0xff] %v10279_v8  ;;  %3247 = vmatmul.bf16.gmra.mxu3 %v7493_v47  ;;  %v1929_v40 = vpop.f32.mrf.mxu2 }
 0x20f   : > { %v1930_v13 = vadd.f32 %v1929_v40, %v11393_v36 }
 0x210   : > { %v2509_v25 = vpop.f32.mrf.mxu0 }
 0x211   : > { %v2418_v2 = vpop.f32.mrf.mxu3  ;;  %v10285_v40 = vpop.f32.mrf.mxu1 }
 0x212   : > { %v2419_v46 = vadd.f32 %v2418_v2, %v1930_v13  ;;  %11396 = vst [vmem:[#allocation7_spill] sm:$0xff] %v10285_v40  ;;  %v11398_v13 = vld [vmem:[#allocation8_spill] sm:$0xff] }
 0x214   : > { %v2508_v3 = vadd.f32 %v2507_v4, %v2419_v46 }
 0x216   : > { %v10282_v58 = vadd.f32 %v2596_v21, %v2508_v3  ;;  %v1931_v42 = vpop.f32.mrf.mxu2 }
 0x217   : > { %v1932_v27 = vadd.f32 %v1931_v42, %v11395_v34 }
 0x218   : > { %11394 = vst [vmem:[#allocation6_spill] sm:$0xff] %v10282_v58  ;;  %v2512_v47 = vpop.f32.mrf.mxu0 }
 0x219   : > { %v2420_v18 = vpop.f32.mrf.mxu3  ;;  %v2601_v42 = vpop.f32.mrf.mxu1 }
 0x21a   : > { %v2421_v36 = vadd.f32 %v2420_v18, %v1932_v27  ;;  %v7514_v27 = vld [vmem:[#allocation2 + $0xfc] sm:$0xf0] }
 0x21b   : > { %3163 = vmatmul.bf16.gmra.mxu2 %v7501_v35  ;;  %3341 = vmatmul.bf16.gmra.mxu0 %v7509_v30  ;;  %v11400_v35 = vld [vmem:[#allocation9_spill] sm:$0xff] }
 0x21c   : > { %v10287_v4 = vadd.f32 %v2509_v25, %v2421_v36  ;;  %v8834_v25 = vld [vmem:[#allocation2 + $0xf4] sm:$0xf]  ;;  %v7513_v36 = vor.u32 %v8835_v23, %v7512_v49  ;;  %v7524_v49 = vld [vmem:[#allocation2 + $0x108] sm:$0xf] }
 0x21d   : > { %v11402_v23 = vld [vmem:[#allocation10_spill] sm:$0xff] }
 0x21e   : > { %11397 = vst [vmem:[#allocation17_spill] sm:$0xff] %v10287_v4  ;;  %3252 = vmatmul.bf16.gmra.mxu3 %v7505_v51  ;;  %v1934_v21 = vpop.f32.mrf.mxu2  ;;  %v7544_v4 = vld [vmem:[#allocation2 + $0x128] sm:$0xf] }
 0x21f   : > { %v1935_v2 = vadd.f32 %v1934_v21, %v11398_v13  ;;  %v7521_v21 = vor.u32 %v8836_v17, %v7520_v50  ;;  %v8838_v17 = vld [vmem:[#allocation2 + $0x110] sm:$0xf0] }
 0x220   : > { %v2514_v3 = vpop.f32.mrf.mxu0 }
 0x221   : > { %v2423_v46 = vpop.f32.mrf.mxu3 }
 0x222   : > { %v2424_v58 = vadd.f32 %v2423_v46, %v1935_v2 }
 0x224   : > { %v2513_v34 = vadd.f32 %v2512_v47, %v2424_v58  ;;  %v7517_v47 = vor.u32 %v8834_v25, %v7514_v27  ;;  %v7532_v25 = vld [vmem:[#allocation2 + $0x110] sm:$0xf]  ;;  %v8839_v27 = vld [vmem:[#allocation2 + $0x118] sm:$0xf0] }
 0x226   : > { %v10293_v56 = vadd.f32 %v2601_v42, %v2513_v34  ;;  %v1936_v18 = vpop.f32.mrf.mxu2 }
 0x227   : > { %v1937_v30 = vadd.f32 %v1936_v18, %v11400_v35  ;;  %v8837_v18 = vld [vmem:[#allocation2 + $0x10c] sm:$0xf] }
 0x228   : > { %11399 = vst [vmem:[#allocation8_spill] sm:$0xff] %v10293_v56  ;;  %v3307_v58 = vpop.f32.mrf.mxu0 }
 0x229   : > { %v2425_v51 = vpop.f32.mrf.mxu3 }
 0x22a   : > { %v2426_v13 = vadd.f32 %v2425_v51, %v1937_v30 }
 0x22b   : > { %3168 = vmatmul.bf16.gmra.mxu2 %v7513_v36  ;;  %3346 = vmatmul.bf16.gmra.mxu0 %v7521_v21  ;;  %v7525_v36 = vor.u32 %v8838_v17, %v7524_v49  ;;  %v7533_v21 = vor.u32 %v8839_v27, %v7532_v25 }
 0x22c   : > { %v10296_v2 = vadd.f32 %v2514_v3, %v2426_v13  ;;  %v7526_v3 = vld [vmem:[#allocation2 + $0x114] sm:$0xf0] }
 0x22e   : > { %11401 = vst [vmem:[#allocation9_spill] sm:$0xff] %v10296_v2  ;;  %3257 = vmatmul.bf16.gmra.mxu3 %v7517_v47  ;;  %v3129_v46 = vpop.f32.mrf.mxu2 }
 0x230   : > { %v3309_v56 = vpop.f32.mrf.mxu0 }
 0x231   : > { %v3218_v42 = vpop.f32.mrf.mxu3 }
 0x232   : > { %v3219_v34 = vadd.f32 %v3218_v42, %v3129_v46  ;;  %v7529_v46 = vor.u32 %v8837_v18, %v7526_v3  ;;  %v3839_v3 = vld [vmem:[#allocation2 + $0x18] sm:$0xf] }
 0x234   : > { %v3308_v40 = vadd.f32 %v3307_v58, %v3219_v34 }
 0x236   : > { %v3387_v50 = vadd.f32 %v3308_v40, %v11402_v23  ;;  %v3131_v30 = vpop.f32.mrf.mxu2 }
 0x238   : > { %v3423_v35 = vadd.f32 %v10301_v15, %v3387_v50  ;;  %v3312_v13 = vpop.f32.mrf.mxu0  ;;  %v9025_v50 = vld [vmem:[%s11245_s3 + $0x178] sm:$0xff] }
 0x239   : > { %v3220_v51 = vpop.f32.mrf.mxu3  ;;  %4978 = vmatpush.bf16.msrb.mxu3 %v9025_v50  ;;  %v9017_v50 = vld [vmem:[%s11245_s3 + $0x138] sm:$0xff] }
 0x23a   : > { %v3455_v58 = vmax.f32 %v3423_v35, 0.0  ;;  %v3221_v47 = vadd.f32 %v3220_v51, %v3131_v30  ;;  %4889 = vmatpush.bf16.msrb.mxu2 %v9017_v50 }
 0x23b   : > { %3173 = vmatmul.bf16.gmra.mxu2 %v7525_v36  ;;  %3351 = vmatmul.bf16.gmra.mxu0 %v7533_v21  ;;  %v7536_v21 = vld [vmem:[#allocation2 + $0x120] sm:$0xf] }
 0x23c   : > { %v3487_v42 = vpack.c.bf16 %v3455_v58, %v3455_v58  ;;  %v3310_v34 = vadd.f32 %v3309_v56, %v3221_v47 }
 0x23e   : > { %3519 = vst [vmem:[#allocation2 + $0x1c] sm:$0xf] %v3487_v42  ;;  %v3552_v40 = vshrl.u32 %v3487_v42, 16  ;;  %v3555_v23 = vshll.u32 %v3487_v42, 16  ;;  %v3388_v2 = vadd.f32 %v3310_v34, %v10099_v37  ;;  %3262 = vmatmul.bf16.gmra.mxu3 %v7529_v46  ;;  %v3134_v18 = vpop.f32.mrf.mxu2  ;;  %v8841_v37 = vld [vmem:[#allocation2 + $0x128] sm:$0xf0] }
 0x23f   : > { %v8840_v34 = vld [vmem:[#allocation2 + $0x124] sm:$0xf] }
 0x240   : > { %v3554_v49 = vrot.slane %v3552_v40, 7  ;;  %v3903_v17 = vrot.slane %v3552_v40, 4  ;;  %v3904_v25 = vrot.slane %v3555_v23, 5  ;;  %v3424_v27 = vadd.f32 %v10301_v15, %v3388_v2  ;;  %v3314_v51 = vpop.f32.mrf.mxu0  ;;  %v7538_v40 = vld [vmem:[#allocation2 + $0x12c] sm:$0xf0] }
 0x241   : > { %v3223_v56 = vpop.f32.mrf.mxu3  ;;  %v7541_v19 = vor.u32 %v8840_v34, %v7538_v40 }
 0x242   : > { %v3557_v35 = vor.u32 %v3555_v23, %v3554_v49  ;;  %v3456_v30 = vmax.f32 %v3424_v27, 0.0  ;;  %v3224_v36 = vadd.f32 %v3223_v56, %v3134_v18  ;;  %v3905_v46 = vor.u32 %v3904_v25, %v3903_v17  ;;  %v8937_v23 = vld [vmem:[%s11245_s3 + $0x38] sm:$0xff]  ;;  %v8842_v18 = vld [vmem:[#allocation2 + $0x130] sm:$0xf0] }
 0x243   : > { %v8945_v27 = vld [vmem:[%s11245_s3 + $0x78] sm:$0xff]  ;;  %v7537_v56 = vor.u32 %v8841_v37, %v7536_v21  ;;  %5467 = vmatpush.bf16.msrb.mxu0 %v8937_v23  ;;  %v3558_v62 = vrot.slane %v3554_v49, 4  ;;  %v7545_v45 = vor.u32 %v8842_v18, %v7544_v4 }
 0x244   : > { %v3840_v47 = vsel %vm9253_vm7, %v3557_v35, %v3839_v3  ;;  %v3488_v42 = vpack.c.bf16 %v3456_v30, %v3456_v30  ;;  %v3313_v2 = vadd.f32 %v3312_v13, %v3224_v36  ;;  %v3906_v13 = vrot.slane %v3905_v46, 4  ;;  %5556 = vmatpush.bf16.msrb.mxu1 %v8945_v27  ;;  %v4080_v46 = vld [vmem:[#allocation2 + $0x2c] sm:$0xf] }
 0x245   : > { %3841 = vst [vmem:[#allocation2 + $0x18] sm:$0xf] %v3840_v47 }
 0x246   : > { %3520 = vst [vmem:[#allocation2 + $0x28] sm:$0xf] %v3488_v42  ;;  %v3560_v17 = vshrl.u32 %v3488_v42, 16  ;;  %v3563_v25 = vshll.u32 %v3488_v42, 16  ;;  %v3389_v3 = vadd.f32 %v3313_v2, %v10106_v28  ;;  %v3136_v47 = vpop.f32.mrf.mxu2 }
 0x248   : > { %v3562_v35 = vrot.slane %v3560_v17, 7  ;;  %v3907_v30 = vrot.slane %v3563_v25, 5  ;;  %v3909_v36 = vrot.slane %v3560_v17, 4  ;;  %v3425_v8 = vadd.f32 %v10301_v15, %v3389_v3  ;;  %v3317_v37 = vpop.f32.mrf.mxu0  ;;  %v3843_v3 = vld [vmem:[#allocation2 + $0x30] sm:$0xf] }
 0x249   : > { %v3225_v38 = vpop.f32.mrf.mxu3 }
 0x24a   : > { %v3565_v53 = vor.u32 %v3563_v25, %v3562_v35  ;;  %v3908_v42 = vsel %vm9778_vm13, %v3906_v13, %v3907_v30  ;;  %v3910_v28 = vor.u32 %v3909_v36, %v3907_v30  ;;  %v3226_v21 = vadd.f32 %v3225_v38, %v3136_v47 }
 0x24b   : > { %4079 = vst [vmem:[#allocation2 + $0x20] sm:$0xf] %v3908_v42  ;;  %v3457_v2 = vmax.f32 %v3425_v8, 0.0  ;;  %3178 = vmatmul.bf16.gmra.mxu2 %v7537_v56  ;;  %3356 = vmatmul.bf16.gmra.mxu0 %v7545_v45  ;;  %v7548_v42 = vld [vmem:[#allocation2 + $0x138] sm:$0xf] }
 0x24c   : > { %v3566_v23 = vsel %vm9240_vm6, %v3558_v62, %v3565_v53  ;;  %v3911_v27 = vrot.slane %v3910_v28, 4  ;;  %v3315_v49 = vadd.f32 %v3314_v51, %v3226_v21  ;;  %v8844_v28 = vld [vmem:[#allocation2 + $0x140] sm:$0xf0] }
 0x24d   : > { %3842 = vst [vmem:[#allocation2 + $0x24] sm:$0xf] %v3566_v23  ;;  %v3489_v17 = vpack.c.bf16 %v3457_v2, %v3457_v2  ;;  %v8843_v2 = vld [vmem:[#allocation2 + $0x13c] sm:$0xf]  ;;  %v7550_v23 = vld [vmem:[#allocation2 + $0x144] sm:$0xf0] }
 0x24e   : > { %v4081_v4 = vsel %vm9786_vm14, %v3911_v27, %v4080_v46  ;;  %v3390_v34 = vadd.f32 %v3315_v49, %v10125_v63  ;;  %3267 = vmatmul.bf16.gmra.mxu3 %v7541_v19  ;;  %v3139_v25 = vpop.f32.mrf.mxu2  ;;  %v7752_v19 = vld [vmem:[#allocation2 + $0x18] sm:$0xf]  ;;  %v7556_v27 = vld [vmem:[#allocation2 + $0x140] sm:$0xf] }
 0x24f   : > { %4082 = vst [vmem:[#allocation2 + $0x2c] sm:$0xf] %v4081_v4  ;;  %v3568_v38 = vshrl.u32 %v3489_v17, 16  ;;  %v3571_v40 = vshll.u32 %v3489_v17, 16 }
 0x250   : > { %3521 = vst [vmem:[#allocation2 + $0x34] sm:$0xf] %v3489_v17  ;;  %v3426_v8 = vadd.f32 %v10301_v15, %v3390_v34  ;;  %v3319_v13 = vpop.f32.mrf.mxu0  ;;  %v8845_v34 = vld [vmem:[#allocation2 + $0x148] sm:$0xf0] }
 0x251   : > { %v3570_v53 = vrot.slane %v3568_v38, 7  ;;  %v3912_v62 = vrot.slane %v3568_v38, 4  ;;  %v3913_v51 = vrot.slane %v3571_v40, 5  ;;  %v3228_v18 = vpop.f32.mrf.mxu3 }
 0x252   : > { %v3458_v56 = vmax.f32 %v3426_v8, 0.0  ;;  %v3229_v45 = vadd.f32 %v3228_v18, %v3139_v25 }
 0x253   : > { %v3573_v35 = vor.u32 %v3571_v40, %v3570_v53  ;;  %v3914_v30 = vor.u32 %v3913_v51, %v3912_v62  ;;  %v3574_v51 = vrot.slane %v3570_v53, 4 }
 0x254   : > { %v3490_v36 = vpack.c.bf16 %v3458_v56, %v3458_v56  ;;  %v3318_v63 = vadd.f32 %v3317_v37, %v3229_v45  ;;  %v8955_v47 = vld [vmem:[#allocation2 + $0x20] sm:$0xf0]  ;;  %v7553_v56 = vor.u32 %v8843_v2, %v7550_v23  ;;  %v7557_v45 = vor.u32 %v8845_v34, %v7556_v27  ;;  %v9024_v27 = vld [vmem:[%s11245_s3 + $0x170] sm:$0xff]  ;;  %v3847_v34 = vld [vmem:[#allocation2 + $0x48] sm:$0xf] }
 0x255   : > { %v3844_v21 = vsel %vm9253_vm7, %v3573_v35, %v3843_v3  ;;  %v7753_v46 = vor.u32 %v8955_v47, %v7752_v19  ;;  %v3915_v38 = vrot.slane %v3914_v30, 4  ;;  %v7549_v3 = vor.u32 %v8844_v28, %v7548_v42  ;;  %4979 = vmatpush.bf16.msrb.mxu3 %v9024_v27 }
 0x256   : > { %3845 = vst [vmem:[#allocation2 + $0x30] sm:$0xf] %v3844_v21  ;;  %v3576_v49 = vshrl.u32 %v3490_v36, 16  ;;  %v3579_v17 = vshll.u32 %v3490_v36, 16  ;;  %v3391_v4 = vadd.f32 %v3318_v63, %v10135_v6  ;;  %v3141_v62 = vpop.f32.mrf.mxu2 }
 0x257   : > { %3522 = vst [vmem:[#allocation2 + $0x40] sm:$0xf] %v3490_v36  ;;  %4808 = vmatmul.bf16.vlgmr.msra.gmra.mxu1 %v7753_v46  ;;  %v4084_v36 = vld [vmem:[#allocation2 + $0x44] sm:$0xf] }
 0x258   : > { %v3578_v37 = vrot.slane %v3576_v49, 7  ;;  %v3916_v40 = vrot.slane %v3579_v17, 5  ;;  %v3918_v8 = vrot.slane %v3576_v49, 4  ;;  %v3427_v25 = vadd.f32 %v10301_v15, %v3391_v4  ;;  %v3322_v30 = vpop.f32.mrf.mxu0 }
 0x259   : > { %v3230_v18 = vpop.f32.mrf.mxu3 }
 0x25a   : > { %v3581_v35 = vor.u32 %v3579_v17, %v3578_v37  ;;  %v3917_v19 = vsel %vm9778_vm13, %v3915_v38, %v3916_v40  ;;  %v3919_v6 = vor.u32 %v3918_v8, %v3916_v40  ;;  %v3459_v63 = vmax.f32 %v3427_v25, 0.0 }
 0x25b   : > { %4083 = vst [vmem:[#allocation2 + $0x38] sm:$0xf] %v3917_v19  ;;  %v3231_v47 = vadd.f32 %v3230_v18, %v3141_v62  ;;  %3183 = vmatmul.bf16.gmra.mxu2 %v7549_v3  ;;  %3361 = vmatmul.bf16.gmra.mxu0 %v7557_v45  ;;  %v7560_v18 = vld [vmem:[#allocation2 + $0x150] sm:$0xf] }
 0x25c   : > { %v3582_v21 = vsel %vm9240_vm6, %v3574_v51, %v3581_v35  ;;  %v3920_v46 = vrot.slane %v3919_v6, 4  ;;  %v3491_v49 = vpack.c.bf16 %v3459_v63, %v3459_v63  ;;  %v8847_v35 = vld [vmem:[#allocation2 + $0x158] sm:$0xf0] }
 0x25d   : > { %3846 = vst [vmem:[#allocation2 + $0x3c] sm:$0xf] %v3582_v21  ;;  %v3320_v53 = vadd.f32 %v3319_v13, %v3231_v47  ;;  %v7568_v47 = vld [vmem:[#allocation2 + $0x158] sm:$0xf]  ;;  %v8848_v21 = vld [vmem:[#allocation2 + $0x160] sm:$0xf0]  ;;  %v7561_v27 = vor.u32 %v8847_v35, %v7560_v18 }
 0x25e   : > { %v4085_v42 = vsel %vm9786_vm14, %v3920_v46, %v4084_v36  ;;  %3523 = vst [vmem:[#allocation2 + $0x4c] sm:$0xf] %v3491_v49  ;;  %v3584_v28 = vshrl.u32 %v3491_v49, 16  ;;  %v3587_v2 = vshll.u32 %v3491_v49, 16  ;;  %3272 = vmatmul.bf16.gmra.mxu3 %v7553_v56  ;;  %v3144_v4 = vpop.f32.mrf.mxu2  ;;  %v7764_v56 = vld [vmem:[#allocation2 + $0x30] sm:$0xf] }
 0x25f   : > { %4086 = vst [vmem:[#allocation2 + $0x44] sm:$0xf] %v4085_v42  ;;  %v3392_v23 = vadd.f32 %v3320_v53, %v10151_v52  ;;  %v8846_v36 = vld [vmem:[#allocation2 + $0x154] sm:$0xf]  ;;  %v4088_v18 = vld [vmem:[#allocation2 + $0x5c] sm:$0xf] }
 0x260   : > { %v3586_v17 = vrot.slane %v3584_v28, 7  ;;  %v3921_v13 = vrot.slane %v3584_v28, 4  ;;  %v3922_v38 = vrot.slane %v3587_v2, 5  ;;  %v3324_v62 = vpop.f32.mrf.mxu0  ;;  %v9016_v49 = vld [vmem:[%s11245_s3 + $0x130] sm:$0xff] }
 0x261   : > { %v3428_v37 = vadd.f32 %v10301_v15, %v3392_v23  ;;  %v3233_v40 = vpop.f32.mrf.mxu3  ;;  %v8944_v53 = vld [vmem:[%s11245_s3 + $0x70] sm:$0xff]  ;;  %4890 = vmatpush.bf16.msrb.mxu2 %v9016_v49 }
 0x262   : > { %v3589_v8 = vor.u32 %v3587_v2, %v3586_v17  ;;  %v3234_v25 = vadd.f32 %v3233_v40, %v3144_v4  ;;  %v3923_v19 = vor.u32 %v3922_v38, %v3921_v13  ;;  %v7562_v2 = vld [vmem:[#allocation2 + $0x15c] sm:$0xf0]  ;;  %v7569_v4 = vor.u32 %v8848_v21, %v7568_v47  ;;  %5557 = vmatpush.bf16.msrb.mxu1 %v8944_v53 }
 0x263   : > { %v3460_v51 = vmax.f32 %v3428_v37, 0.0 }
 0x264   : > { %v3848_v52 = vsel %vm9253_vm7, %v3589_v8, %v3847_v34  ;;  %v3323_v3 = vadd.f32 %v3322_v30, %v3234_v25  ;;  %v8958_v45 = vld [vmem:[#allocation2 + $0x38] sm:$0xf0]  ;;  %v8936_v30 = vld [vmem:[%s11245_s3 + $0x30] sm:$0xff]  ;;  %v3924_v34 = vrot.slane %v3923_v19, 4 }
 0x265   : > { %3849 = vst [vmem:[#allocation2 + $0x48] sm:$0xf] %v3848_v52  ;;  %v3492_v6 = vpack.c.bf16 %v3460_v51, %v3460_v51  ;;  %v7765_v63 = vor.u32 %v8958_v45, %v7764_v56  ;;  %5468 = vmatpush.bf16.msrb.mxu0 %v8936_v30  ;;  %v7565_v52 = vor.u32 %v8846_v36, %v7562_v2 }
 0x266   : > { %v3393_v46 = vadd.f32 %v3323_v3, %v10158_v14  ;;  %v3146_v14 = vpop.f32.mrf.mxu2  ;;  %v3590_v3 = vrot.slane %v3586_v17, 4 }
 0x267   : > { %3524 = vst [vmem:[#allocation2 + $0x58] sm:$0xf] %v3492_v6  ;;  %v3592_v42 = vshrl.u32 %v3492_v6, 16  ;;  %v3595_v28 = vshll.u32 %v3492_v6, 16  ;;  %4813 = vmatmul.bf16.gmra.mxu1 %v7765_v63 }
 0x268   : > { %v3429_v23 = vadd.f32 %v10301_v15, %v3393_v46  ;;  %v3327_v51 = vpop.f32.mrf.mxu0 }
 0x269   : > { %v3594_v13 = vrot.slane %v3592_v42, 7  ;;  %v3925_v38 = vrot.slane %v3595_v28, 5  ;;  %v3927_v37 = vrot.slane %v3592_v42, 4  ;;  %v3235_v40 = vpop.f32.mrf.mxu3  ;;  %5469 = vmatpush.bf16.msrb.mxu0 %v8935_v24  ;;  %v8933_v24 = vld [vmem:[%s11245_s3 + $0x18] sm:$0xff] }
 0x26a   : > { %v3461_v8 = vmax.f32 %v3429_v23, 0.0  ;;  %v3236_v25 = vadd.f32 %v3235_v40, %v3146_v14 }
 0x26b   : > { %v3597_v56 = vor.u32 %v3595_v28, %v3594_v13  ;;  %v3926_v45 = vsel %vm9778_vm13, %v3924_v34, %v3925_v38  ;;  %v3928_v6 = vor.u32 %v3927_v37, %v3925_v38  ;;  %3188 = vmatmul.bf16.gmra.mxu2 %v7561_v27  ;;  %3366 = vmatmul.bf16.gmra.mxu0 %v7569_v4  ;;  %v3851_v28 = vld [vmem:[#allocation2 + $0x60] sm:$0xf]  ;;  %v7572_v4 = vld [vmem:[#allocation2 + $0x168] sm:$0xf]  ;;  %v8850_v34 = vld [vmem:[#allocation2 + $0x170] sm:$0xf0] }
 0x26c   : > { %4087 = vst [vmem:[#allocation2 + $0x50] sm:$0xf] %v3926_v45  ;;  %v3493_v35 = vpack.c.bf16 %v3461_v8, %v3461_v8  ;;  %v3325_v63 = vadd.f32 %v3324_v62, %v3236_v25  ;;  %v7776_v40 = vld [vmem:[#allocation2 + $0x48] sm:$0xf]  ;;  %v8849_v8 = vld [vmem:[#allocation2 + $0x16c] sm:$0xf] }
 0x26d   : > { %v3598_v19 = vsel %vm9240_vm6, %v3590_v3, %v3597_v56  ;;  %v3929_v47 = vrot.slane %v3928_v6, 4  ;;  %v7574_v25 = vld [vmem:[#allocation2 + $0x174] sm:$0xf0]  ;;  %v346_v56 = vld [vmem:[#allocation2 + $0x1ac] sm:$0x8] }
 0x26e   : > { %3850 = vst [vmem:[#allocation2 + $0x54] sm:$0xf] %v3598_v19  ;;  %v3600_v21 = vshrl.u32 %v3493_v35, 16  ;;  %v3603_v46 = vshll.u32 %v3493_v35, 16  ;;  %v3394_v17 = vadd.f32 %v3325_v63, %v10177_v0  ;;  %3277 = vmatmul.bf16.gmra.mxu3 %v7565_v52  ;;  %v3149_v42 = vpop.f32.mrf.mxu2  ;;  %v7580_v52 = vld [vmem:[#allocation2 + $0x170] sm:$0xf] }
 0x26f   : > { %v4089_v36 = vsel %vm9786_vm14, %v3929_v47, %v4088_v18  ;;  %3525 = vst [vmem:[#allocation2 + $0x64] sm:$0xf] %v3493_v35  ;;  %v289_v3 = vld [vmem:[#allocation2 + $0x198] sm:$0x1]  ;;  %v347_v63 = vsel %vm9747_vm10, 0, %v346_v56 }
 0x270   : > { %4090 = vst [vmem:[#allocation2 + $0x5c] sm:$0xf] %v4089_v36  ;;  %v10366_v49 = vrot.slane %v3600_v21, 7  ;;  %v3930_v62 = vrot.slane %v3600_v21, 4  ;;  %v3931_v30 = vrot.slane %v3603_v46, 5  ;;  %v3430_v53 = vadd.f32 %v10301_v15, %v3394_v17  ;;  %v3329_v27 = vpop.f32.mrf.mxu0 }
 0x271   : > { %v3238_v2 = vpop.f32.mrf.mxu3  ;;  %v290_v35 = vsel %vm9197_vm2, 0, %v289_v3  ;;  %v7573_v36 = vor.u32 %v8850_v34, %v7572_v4  ;;  %348 = vst [vmem:[#allocation2 + $0x1ac] sm:$0x8] %v347_v63 }
 0x272   : > { %v3605_v23 = vor.u32 %v3603_v46, %v10366_v49  ;;  %v3462_v14 = vmax.f32 %v3430_v53, 0.0  ;;  %v3239_v0 = vadd.f32 %v3238_v2, %v3149_v42  ;;  %v3932_v38 = vor.u32 %v3931_v30, %v3930_v62  ;;  %v8851_v46 = vld [vmem:[#allocation2 + $0x178] sm:$0xf0]  ;;  %v9023_v62 = vld [vmem:[%s11245_s3 + $0x168] sm:$0xff]  ;;  %291 = vst [vmem:[#allocation2 + $0x198] sm:$0x1] %v290_v35 }
 0x273   : > { %v3606_v2 = vrot.slane %v10366_v49, 4  ;;  %v7581_v4 = vor.u32 %v8851_v46, %v7580_v52  ;;  %4980 = vmatpush.bf16.msrb.mxu3 %v9023_v62  ;;  %v9014_v49 = vld [vmem:[%s11245_s3 + $0x120] sm:$0xff]  ;;  %v2549_v52 = vadd.f32 %v10180_v57, %v10195_v32  ;;  %v9021_v46 = vld [vmem:[%s11245_s3 + $0x158] sm:$0xff] }
 0x274   : > { %v3852_v13 = vsel %vm9253_vm7, %v3605_v23, %v3851_v28  ;;  %v3494_v37 = vpack.c.bf16 %v3462_v14, %v3462_v14  ;;  %v3328_v45 = vadd.f32 %v3327_v51, %v3239_v0  ;;  %v9015_v51 = vld [vmem:[%s11245_s3 + $0x128] sm:$0xff]  ;;  %v3933_v30 = vrot.slane %v3932_v38, 4 }
 0x275   : > { %3853 = vst [vmem:[#allocation2 + $0x60] sm:$0xf] %v3852_v13  ;;  %v8961_v6 = vld [vmem:[#allocation2 + $0x50] sm:$0xf0]  ;;  %v7577_v0 = vor.u32 %v8849_v8, %v7574_v25  ;;  %4891 = vmatpush.bf16.msrb.mxu2 %v9015_v51  ;;  %v9022_v8 = vld [vmem:[%s11245_s3 + $0x160] sm:$0xff] }
 0x276   : > { %3526 = vst [vmem:[#allocation2 + $0x70] sm:$0xf] %v3494_v37  ;;  %v3608_v19 = vshrl.u32 %v3494_v37, 16  ;;  %v3611_v47 = vshll.u32 %v3494_v37, 16  ;;  %v7777_v21 = vor.u32 %v8961_v6, %v7776_v40  ;;  %v3395_v17 = vadd.f32 %v3328_v45, %v10189_v61  ;;  %v3151_v61 = vpop.f32.mrf.mxu2  ;;  %v4092_v37 = vld [vmem:[#allocation2 + $0x74] sm:$0xf] }
 0x277   : > { %v8934_v25 = vld [vmem:[%s11245_s3 + $0x20] sm:$0xff]  ;;  %4981 = vmatpush.bf16.msrb.mxu3 %v9022_v8 }
 0x278   : > { %v3610_v53 = vrot.slane %v3608_v19, 7  ;;  %v3934_v42 = vrot.slane %v3611_v47, 5  ;;  %v3936_v28 = vrot.slane %v3608_v19, 4  ;;  %4818 = vmatmul.bf16.gmra.mxu1 %v7777_v21  ;;  %v3431_v23 = vadd.f32 %v10301_v15, %v3395_v17  ;;  %v3332_v3 = vpop.f32.mrf.mxu0  ;;  %5470 = vmatpush.bf16.msrb.mxu0 %v8934_v25  ;;  %v7586_v25 = vld [vmem:[#allocation2 + $0x18c] sm:$0xf0] }
 0x279   : > { %v3240_v14 = vpop.f32.mrf.mxu3  ;;  %4892 = vmatpush.bf16.msrb.mxu2 %v9014_v49 }
 0x27a   : > { %v3613_v34 = vor.u32 %v3611_v47, %v3610_v53  ;;  %v3935_v13 = vsel %vm9778_vm13, %v3933_v30, %v3934_v42  ;;  %v3937_v38 = vor.u32 %v3936_v28, %v3934_v42  ;;  %v3241_v40 = vadd.f32 %v3240_v14, %v3151_v61  ;;  %v3855_v30 = vld [vmem:[#allocation2 + $0x78] sm:$0xf]  ;;  %v9020_v14 = vld [vmem:[%s11245_s3 + $0x150] sm:$0xff] }
 0x27b   : > { %4091 = vst [vmem:[#allocation2 + $0x68] sm:$0xf] %v3935_v13  ;;  %v3463_v56 = vmax.f32 %v3431_v23, 0.0  ;;  %3193 = vmatmul.bf16.gmra.mxu2 %v7573_v36  ;;  %3371 = vmatmul.bf16.gmra.mxu0 %v7581_v4  ;;  %v9012_v23 = vld [vmem:[%s11245_s3 + $0x110] sm:$0xff] }
 0x27c   : > { %v3614_v45 = vsel %vm9240_vm6, %v3606_v2, %v3613_v34  ;;  %v3938_v6 = vrot.slane %v3937_v38, 4  ;;  %v3330_v18 = vadd.f32 %v3329_v27, %v3241_v40  ;;  %v9013_v27 = vld [vmem:[%s11245_s3 + $0x118] sm:$0xff]  ;;  %4982 = vmatpush.bf16.msrb.mxu3 %v9021_v46  ;;  %5471 = vmatpush.bf16.msrb.mxu0 %v8933_v24  ;;  %v7788_v34 = vld [vmem:[#allocation2 + $0x60] sm:$0xf]  ;;  %v8852_v40 = vld [vmem:[#allocation2 + $0x184] sm:$0xf] }
 0x27d   : > { %3854 = vst [vmem:[#allocation2 + $0x6c] sm:$0xf] %v3614_v45  ;;  %v3495_v35 = vpack.c.bf16 %v3463_v56, %v3463_v56  ;;  %4893 = vmatpush.bf16.msrb.mxu2 %v9013_v27  ;;  %v7584_v38 = vld [vmem:[#allocation2 + $0x180] sm:$0xf]  ;;  %v8932_v56 = vld [vmem:[%s11245_s3 + $0x10] sm:$0xff]  ;;  %v8943_v45 = vld [vmem:[%s11245_s3 + $0x68] sm:$0xff]  ;;  %v7589_v24 = vor.u32 %v8852_v40, %v7586_v25  ;;  %v2554_v40 = vadd.f32 %v10198_v10, %v10203_v1 }
 0x27e   : > { %v4093_v63 = vsel %vm9786_vm14, %v3938_v6, %v4092_v37  ;;  %v3396_v19 = vadd.f32 %v3330_v18, %v2549_v52  ;;  %3282 = vmatmul.bf16.gmra.mxu3 %v7577_v0  ;;  %v3154_v32 = vpop.f32.mrf.mxu2  ;;  %v8853_v37 = vld [vmem:[#allocation2 + $0x188] sm:$0xf0]  ;;  %v7592_v52 = vld [vmem:[#allocation2 + $0x188] sm:$0xf]  ;;  %5558 = vmatpush.bf16.msrb.mxu1 %v8943_v45  ;;  %v3859_v10 = vld [vmem:[#allocation2 + $0x90] sm:$0xf] }
 0x27f   : > { %4094 = vst [vmem:[#allocation2 + $0x74] sm:$0xf] %v4093_v63  ;;  %v3616_v47 = vshrl.u32 %v3495_v35, 16  ;;  %v3619_v21 = vshll.u32 %v3495_v35, 16  ;;  %v8931_v46 = vld [vmem:[%s11245_s3 + $0x8] sm:$0xff] }
 0x280   : > { %3527 = vst [vmem:[#allocation2 + $0x7c] sm:$0xf] %v3495_v35  ;;  %v3432_v57 = vadd.f32 %v10301_v15, %v3396_v19  ;;  %v10417_v28 = vpop.f32.mrf.mxu0  ;;  %v8854_v35 = vld [vmem:[#allocation2 + $0x190] sm:$0xf0]  ;;  %4983 = vmatpush.bf16.msrb.mxu3 %v9020_v14  ;;  %v9011_v19 = vld [vmem:[%s11245_s3 + $0x108] sm:$0xff]  ;;  %5472 = vmatpush.bf16.msrb.mxu0 %v8932_v56 }
 0x281   : > { %v10412_v17 = vrot.slane %v3616_v47, 7  ;;  %v3939_v36 = vrot.slane %v3616_v47, 4  ;;  %v3940_v62 = vrot.slane %v3619_v21, 5  ;;  %v3243_v51 = vpop.f32.mrf.mxu3  ;;  %4894 = vmatpush.bf16.msrb.mxu2 %v9012_v23  ;;  %v9019_v47 = vld [vmem:[%s11245_s3 + $0x148] sm:$0xff] }
 0x282   : > { %v3464_v53 = vmax.f32 %v3432_v57, 0.0  ;;  %v3244_v42 = vadd.f32 %v3243_v51, %v3154_v32  ;;  %v7585_v51 = vor.u32 %v8853_v37, %v7584_v38  ;;  %v4096_v14 = vld [vmem:[#allocation2 + $0x8c] sm:$0xf]  ;;  %v8930_v37 = vld [vmem:[%s11245_s3] sm:$0xff] }
 0x283   : > { %v3621_v61 = vor.u32 %v3619_v21, %v10412_v17  ;;  %v3941_v2 = vor.u32 %v3940_v62, %v3939_v36  ;;  %v3622_v36 = vrot.slane %v10412_v17, 4  ;;  %v9010_v17 = vld [vmem:[%s11245_s3 + $0x100] sm:$0xff] }
 0x284   : > { %v3496_v0 = vpack.c.bf16 %v3464_v53, %v3464_v53  ;;  %v3333_v4 = vadd.f32 %v3332_v3, %v3244_v42  ;;  %v8964_v13 = vld [vmem:[#allocation2 + $0x68] sm:$0xf0]  ;;  %4984 = vmatpush.bf16.msrb.mxu3 %v9019_v47  ;;  %5473 = vmatpush.bf16.msrb.mxu0 %v8931_v46  ;;  %v7596_v46 = vld [vmem:[#allocation2 + $0x198] sm:$0xf] }
 0x285   : > { %v3856_v49 = vsel %vm9253_vm7, %v3621_v61, %v3855_v30  ;;  %v7789_v8 = vor.u32 %v8964_v13, %v7788_v34  ;;  %v3942_v63 = vrot.slane %v3941_v2, 4  ;;  %v7593_v30 = vor.u32 %v8854_v35, %v7592_v52  ;;  %4895 = vmatpush.bf16.msrb.mxu2 %v9011_v19 }
 0x286   : > { %3857 = vst [vmem:[#allocation2 + $0x78] sm:$0xf] %v3856_v49  ;;  %v3624_v3 = vshrl.u32 %v3496_v0, 16  ;;  %v3627_v6 = vshll.u32 %v3496_v0, 16  ;;  %v3397_v18 = vadd.f32 %v3333_v4, %v10200_v55  ;;  %v3156_v55 = vpop.f32.mrf.mxu2  ;;  %v9018_v4 = vld [vmem:[%s11245_s3 + $0x140] sm:$0xff] }
 0x287   : > { %3528 = vst [vmem:[#allocation2 + $0x88] sm:$0xf] %v3496_v0 }
 0x288   : > { %v3626_v21 = vrot.slane %v3624_v3, 7  ;;  %v3943_v57 = vrot.slane %v3627_v6, 5  ;;  %v3945_v32 = vrot.slane %v3624_v3, 4  ;;  %v3433_v27 = vadd.f32 %v10301_v15, %v3397_v18  ;;  %4823 = vmatmul.bf16.gmra.mxu1 %v7789_v8  ;;  %v3337_v23 = vpop.f32.mrf.mxu0  ;;  %4985 = vmatpush.bf16.msrb.mxu3 %v9018_v4 }
 0x289   : > { %v3245_v62 = vpop.f32.mrf.mxu3  ;;  %4896 = vmatpush.bf16.msrb.mxu2 %v9010_v17  ;;  %5474 = vmatpush.bf16.msrb.mxu0 %v8930_v37 }
 0x28a   : > { %v3629_v53 = vor.u32 %v3627_v6, %v3626_v21  ;;  %v3944_v42 = vsel %vm9778_vm13, %v3942_v63, %v3943_v57  ;;  %v3946_v61 = vor.u32 %v3945_v32, %v3943_v57  ;;  %v3465_v2 = vmax.f32 %v3433_v27, 0.0  ;;  %v8856_v21 = vld [vmem:[#allocation2 + $0x1a0] sm:$0xf0] }
 0x28b   : > { %4095 = vst [vmem:[#allocation2 + $0x80] sm:$0xf] %v3944_v42  ;;  %v3246_v0 = vadd.f32 %v3245_v62, %v3156_v55  ;;  %3198 = vmatmul.bf16.gmra.mxu2 %v7585_v51  ;;  %3376 = vmatmul.bf16.gmra.mxu0 %v7593_v30  ;;  %v8857_v30 = vld [vmem:[#allocation2 + $0x1a8] sm:$0xf0]  ;;  %v8855_v42 = vld [vmem:[#allocation2 + $0x19c] sm:$0xf]  ;;  %v7597_v17 = vor.u32 %v8856_v21, %v7596_v46 }
 0x28c   : > { %v3630_v34 = vsel %vm9240_vm6, %v3622_v36, %v3629_v53  ;;  %v3947_v13 = vrot.slane %v3946_v61, 4  ;;  %v3497_v38 = vpack.c.bf16 %v3465_v2, %v3465_v2 }
 0x28d   : > { %3858 = vst [vmem:[#allocation2 + $0x84] sm:$0xf] %v3630_v34  ;;  %v3335_v56 = vadd.f32 %v10417_v28, %v3246_v0  ;;  %v7800_v27 = vld [vmem:[#allocation2 + $0x78] sm:$0xf] }
 0x28e   : > { %v4097_v49 = vsel %vm9786_vm14, %v3947_v13, %v4096_v14  ;;  %3529 = vst [vmem:[#allocation2 + $0x94] sm:$0xf] %v3497_v38  ;;  %v3632_v8 = vshrl.u32 %v3497_v38, 16  ;;  %v3635_v25 = vshll.u32 %v3497_v38, 16  ;;  %3287 = vmatmul.bf16.gmra.mxu3 %v7589_v24  ;;  %v3159_v3 = vpop.f32.mrf.mxu2  ;;  %v7604_v24 = vld [vmem:[#allocation2 + $0x1a0] sm:$0xf] }
 0x28f   : > { %4098 = vst [vmem:[#allocation2 + $0x8c] sm:$0xf] %v4097_v49  ;;  %v3398_v52 = vadd.f32 %v3335_v56, %v2554_v40  ;;  %v7598_v14 = vld [vmem:[#allocation2 + $0x1a4] sm:$0xf0]  ;;  %v7605_v4 = vor.u32 %v8857_v30, %v7604_v24 }
 0x290   : > { %v3634_v45 = vrot.slane %v3632_v8, 7  ;;  %v3948_v1 = vrot.slane %v3632_v8, 4  ;;  %v3949_v6 = vrot.slane %v3635_v25, 5  ;;  %v3339_v19 = vpop.f32.mrf.mxu0 }
 0x291   : > { %v3434_v28 = vadd.f32 %v10301_v15, %v3398_v52  ;;  %v3248_v18 = vpop.f32.mrf.mxu3 }
 0x292   : > { %v3637_v35 = vor.u32 %v3635_v25, %v3634_v45  ;;  %v3249_v63 = vadd.f32 %v3248_v18, %v3159_v3  ;;  %v3950_v36 = vor.u32 %v3949_v6, %v3948_v1  ;;  %v3638_v25 = vrot.slane %v3634_v45, 4  ;;  %v4100_v6 = vld [vmem:[#allocation2 + $0xa4] sm:$0xf] }
 0x293   : > { %v3466_v47 = vmax.f32 %v3434_v28, 0.0  ;;  %v2559_v1 = vadd.f32 %v10206_v54, %v10214_v41 }
 0x294   : > { %v3860_v57 = vsel %vm9253_vm7, %v3637_v35, %v3859_v10  ;;  %v3338_v32 = vadd.f32 %v3337_v23, %v3249_v63  ;;  %v8967_v55 = vld [vmem:[#allocation2 + $0x80] sm:$0xf0]  ;;  %v3951_v34 = vrot.slane %v3950_v36, 4 }
 0x295   : > { %3861 = vst [vmem:[#allocation2 + $0x90] sm:$0xf] %v3860_v57  ;;  %v3498_v62 = vpack.c.bf16 %v3466_v47, %v3466_v47  ;;  %v7801_v51 = vor.u32 %v8967_v55, %v7800_v27  ;;  %v3863_v55 = vld [vmem:[#allocation2 + $0xa8] sm:$0xf] }
 0x296   : > { %v3399_v53 = vadd.f32 %v3338_v32, %v10208_v26  ;;  %v3161_v23 = vpop.f32.mrf.mxu2  ;;  %v7601_v26 = vor.u32 %v8855_v42, %v7598_v14 }
 0x297   : > { %3530 = vst [vmem:[#allocation2 + $0xa0] sm:$0xf] %v3498_v62  ;;  %v3640_v61 = vshrl.u32 %v3498_v62, 16  ;;  %v3643_v2 = vshll.u32 %v3498_v62, 16 }
 0x298   : > { %v3435_v0 = vadd.f32 %v10301_v15, %v3399_v53  ;;  %4828 = vmatmul.bf16.gmra.mxu1 %v7801_v51  ;;  %v3342_v8 = vpop.f32.mrf.mxu0 }
 0x299   : > { %v3642_v13 = vrot.slane %v3640_v61, 7  ;;  %v3952_v38 = vrot.slane %v3643_v2, 5  ;;  %v3954_v37 = vrot.slane %v3640_v61, 4  ;;  %v3250_v40 = vpop.f32.mrf.mxu3 }
 0x29a   : > { %v3467_v56 = vmax.f32 %v3435_v0, 0.0  ;;  %v3251_v49 = vadd.f32 %v3250_v40, %v3161_v23  ;;  %v8942_v23 = vld [vmem:[%s11245_s3 + $0x60] sm:$0xff] }
 0x29b   : > { %v3645_v52 = vor.u32 %v3643_v2, %v3642_v13  ;;  %v3953_v3 = vsel %vm9778_vm13, %v3951_v34, %v3952_v38  ;;  %v3955_v10 = vor.u32 %v3954_v37, %v3952_v38  ;;  %3203 = vmatmul.bf16.gmra.mxu2 %v7597_v17  ;;  %3381 = vmatmul.bf16.gmra.mxu0 %v7605_v4  ;;  %v8040_v2 = vld [vmem:[#allocation2] sm:$0xf]  ;;  %v8883_v13 = vld [vmem:[#allocation2 + $0x8] sm:$0xf0] }
 0x29c   : > { %4099 = vst [vmem:[#allocation2 + $0x98] sm:$0xf] %v3953_v3  ;;  %v3499_v28 = vpack.c.bf16 %v3467_v56, %v3467_v56  ;;  %v3340_v18 = vadd.f32 %v3339_v19, %v3251_v49  ;;  %v7812_v61 = vld [vmem:[#allocation2 + $0x90] sm:$0xf]  ;;  %5559 = vmatpush.bf16.msrb.mxu1 %v8942_v23 }
 0x29d   : > { %v3646_v35 = vsel %vm9240_vm6, %v3638_v25, %v3645_v52  ;;  %v3956_v63 = vrot.slane %v3955_v10, 4  ;;  %v8956_v10 = vld [vmem:[#allocation2 + $0x28] sm:$0xf0] }
 0x29e   : > { %3862 = vst [vmem:[#allocation2 + $0x9c] sm:$0xf] %v3646_v35  ;;  %v3648_v45 = vshrl.u32 %v3499_v28, 16  ;;  %v3651_v47 = vshll.u32 %v3499_v28, 16  ;;  %v3400_v21 = vadd.f32 %v3340_v18, %v2559_v1  ;;  %3292 = vmatmul.bf16.gmra.mxu3 %v7601_v26  ;;  %v3164_v27 = vpop.f32.mrf.mxu2  ;;  %v8041_v1 = vor.u32 %v8883_v13, %v8040_v2 }
 0x29f   : > { %v4101_v57 = vsel %vm9786_vm14, %v3956_v63, %v4100_v6  ;;  %3531 = vst [vmem:[#allocation2 + $0xac] sm:$0xf] %v3499_v28  ;;  %v8954_v63 = vld [vmem:[#allocation2 + $0x1c] sm:$0xf] }
 0x2a0   : > { %4102 = vst [vmem:[#allocation2 + $0xa4] sm:$0xf] %v4101_v57  ;;  %v3650_v54 = vrot.slane %v3648_v45, 7  ;;  %v3957_v41 = vrot.slane %v3648_v45, 4  ;;  %v3958_v32 = vrot.slane %v3651_v47, 5  ;;  %v3436_v19 = vadd.f32 %v10301_v15, %v3400_v21  ;;  %v3344_v51 = vpop.f32.mrf.mxu0 }
 0x2a1   : > { %v3253_v46 = vpop.f32.mrf.mxu3  ;;  %v7760_v45 = vld [vmem:[#allocation2 + $0x20] sm:$0xf]  ;;  %v4104_v21 = vld [vmem:[#allocation2 + $0xbc] sm:$0xf] }
 0x2a2   : > { %v3653_v36 = vor.u32 %v3651_v47, %v3650_v54  ;;  %v3468_v62 = vmax.f32 %v3436_v19, 0.0  ;;  %v3254_v24 = vadd.f32 %v3253_v46, %v3164_v27  ;;  %v3959_v53 = vor.u32 %v3958_v32, %v3957_v41 }
 0x2a3   : > { %v3654_v25 = vrot.slane %v3650_v54, 4  ;;  %v2564_v47 = vadd.f32 %v10217_v7, %v10222_v16  ;;  %v7761_v19 = vor.u32 %v8956_v10, %v7760_v45 }
 0x2a4   : > { %v3864_v30 = vsel %vm9253_vm7, %v3653_v36, %v3863_v55  ;;  %v3500_v42 = vpack.c.bf16 %v3468_v62, %v3468_v62  ;;  %v3343_v14 = vadd.f32 %v3342_v8, %v3254_v24  ;;  %v3960_v37 = vrot.slane %v3959_v53, 4  ;;  %v7754_v8 = vld [vmem:[#allocation2 + $0x24] sm:$0xf0]  ;;  %v10496_v36 = vld [vmem:[%s11244_s2] ss:$0 sm:$0xff] }
 0x2a5   : > { %3865 = vst [vmem:[#allocation2 + $0xa8] sm:$0xf] %v3864_v30  ;;  %v8970_v0 = vld [vmem:[#allocation2 + $0x98] sm:$0xf0]  ;;  %v7757_v54 = vor.u32 %v8954_v63, %v7754_v8 }
 0x2a6   : > { %3532 = vst [vmem:[#allocation2 + $0xb8] sm:$0xf] %v3500_v42  ;;  %v3656_v17 = vshrl.u32 %v3500_v42, 16  ;;  %v3659_v4 = vshll.u32 %v3500_v42, 16  ;;  %v7813_v34 = vor.u32 %v8970_v0, %v7812_v61  ;;  %v3401_v38 = vadd.f32 %v3343_v14, %v10219_v9  ;;  %v3166_v26 = vpop.f32.mrf.mxu2  ;;  %v3867_v61 = vld [vmem:[#allocation2 + $0xc0] sm:$0xf] }
 0x2a8   : > { %v3658_v40 = vrot.slane %v3656_v17, 7  ;;  %v3961_v56 = vrot.slane %v3659_v4, 5  ;;  %v3963_v49 = vrot.slane %v3656_v17, 4  ;;  %4833 = vmatmul.bf16.gmra.mxu1 %v7813_v34  ;;  %v3437_v52 = vadd.f32 %v10301_v15, %v3401_v38  ;;  %v3347_v35 = vpop.f32.mrf.mxu0 }
 0x2a9   : > { %v3255_v3 = vpop.f32.mrf.mxu3 }
 0x2aa   : > { %v3661_v6 = vor.u32 %v3659_v4, %v3658_v40  ;;  %v3962_v28 = vsel %vm9778_vm13, %v3960_v37, %v3961_v56  ;;  %v3964_v18 = vor.u32 %v3963_v49, %v3961_v56  ;;  %v3256_v9 = vadd.f32 %v3255_v3, %v3166_v26 }
 0x2ab   : > { %4103 = vst [vmem:[#allocation2 + $0xb0] sm:$0xf] %v3962_v28  ;;  %v3469_v57 = vmax.f32 %v3437_v52, 0.0  ;;  %4897 = vmatmul.bf16.vlgmr.msrb.gmra.mxu2 %v7757_v54  ;;  %5475 = vmatmul.bf16.vlgmr.msrb.gmra.mxu0 %v8041_v1  ;;  %v7766_v28 = vld [vmem:[#allocation2 + $0x3c] sm:$0xf0] }
 0x2ac   : > { %v3662_v15 = vsel %vm9240_vm6, %v3654_v25, %v3661_v6  ;;  %v3965_v41 = vrot.slane %v3964_v18, 4  ;;  %v3345_v32 = vadd.f32 %v3344_v51, %v3256_v9  ;;  %v7824_v13 = vld [vmem:[#allocation2 + $0xa8] sm:$0xf]  ;;  %v8886_v25 = vld [vmem:[#allocation2 + $0x20] sm:$0xf0] }
 0x2ad   : > { %3866 = vst [vmem:[#allocation2 + $0xb4] sm:$0xf] %v3662_v15  ;;  %v3501_v27 = vpack.c.bf16 %v3469_v57, %v3469_v57  ;;  %v8957_v57 = vld [vmem:[#allocation2 + $0x34] sm:$0xf]  ;;  %v8052_v54 = vld [vmem:[#allocation2 + $0x18] sm:$0xf] }
 0x2ae   : > { %v4105_v55 = vsel %vm9786_vm14, %v3965_v41, %v4104_v21  ;;  %v3402_v46 = vadd.f32 %v3345_v32, %v2564_v47  ;;  %4986 = vmatmul.bf16.vlgmr.msrb.gmra.mxu3 %v7761_v19  ;;  %v3169_v51 = vpop.f32.mrf.mxu2  ;;  %v4108_v15 = vld [vmem:[#allocation2 + $0xd4] sm:$0xf]  ;;  %v7769_v32 = vor.u32 %v8957_v57, %v7766_v28  ;;  %v7772_v19 = vld [vmem:[#allocation2 + $0x38] sm:$0xf] }
 0x2af   : > { %4106 = vst [vmem:[#allocation2 + $0xbc] sm:$0xf] %v4105_v55  ;;  %v3664_v7 = vshrl.u32 %v3501_v27, 16  ;;  %v3667_v16 = vshll.u32 %v3501_v27, 16 }
 0x2b0   : > { %3533 = vst [vmem:[#allocation2 + $0xc4] sm:$0xf] %v3501_v27  ;;  %v3438_v62 = vadd.f32 %v10496_v36, %v3402_v46  ;;  %v3349_v0 = vpop.f32.mrf.mxu0  ;;  %v8053_v27 = vor.u32 %v8886_v25, %v8052_v54 }
 0x2b1   : > { %v3666_v24 = vrot.slane %v3664_v7, 7  ;;  %v3966_v30 = vrot.slane %v3664_v7, 4  ;;  %v3967_v53 = vrot.slane %v3667_v16, 5  ;;  %v3258_v42 = vpop.f32.mrf.mxu3 }
 0x2b2   : > { %v3470_v2 = vmax.f32 %v3438_v62, 0.0  ;;  %v3259_v14 = vadd.f32 %v3258_v42, %v3169_v51  ;;  %v2569_v62 = vadd.f32 %v10225_v31, %v10233_v22 }
 0x2b3   : > { %v3669_v23 = vor.u32 %v3667_v16, %v3666_v24  ;;  %v3968_v17 = vor.u32 %v3967_v53, %v3966_v30  ;;  %v3670_v18 = vrot.slane %v3666_v24, 4 }
 0x2b4   : > { %v3502_v4 = vpack.c.bf16 %v3470_v2, %v3470_v2  ;;  %v3348_v34 = vadd.f32 %v3347_v35, %v3259_v14  ;;  %v8973_v38 = vld [vmem:[#allocation2 + $0xb0] sm:$0xf0]  ;;  %v8959_v35 = vld [vmem:[#allocation2 + $0x40] sm:$0xf0]  ;;  %v3871_v14 = vld [vmem:[#allocation2 + $0xd8] sm:$0xf] }
 0x2b5   : > { %v3868_v37 = vsel %vm9253_vm7, %v3669_v23, %v3867_v61  ;;  %v7825_v40 = vor.u32 %v8973_v38, %v7824_v13  ;;  %v3969_v8 = vrot.slane %v3968_v17, 4  ;;  %v7773_v16 = vor.u32 %v8959_v35, %v7772_v19  ;;  %v8064_v35 = vld [vmem:[#allocation2 + $0x30] sm:$0xf] }
 0x2b6   : > { %3869 = vst [vmem:[#allocation2 + $0xc0] sm:$0xf] %v3868_v37  ;;  %v3672_v56 = vshrl.u32 %v3502_v4, 16  ;;  %v3675_v49 = vshll.u32 %v3502_v4, 16  ;;  %v3403_v26 = vadd.f32 %v3348_v34, %v10227_v20  ;;  %v3171_v6 = vpop.f32.mrf.mxu2 }
 0x2b7   : > { %3534 = vst [vmem:[#allocation2 + $0xd0] sm:$0xf] %v3502_v4 }
 0x2b8   : > { %v3674_v52 = vrot.slane %v3672_v56, 7  ;;  %v3970_v3 = vrot.slane %v3675_v49, 5  ;;  %v3972_v10 = vrot.slane %v3672_v56, 4  ;;  %v3439_v1 = vadd.f32 %v10496_v36, %v3403_v26  ;;  %4838 = vmatmul.bf16.gmra.mxu1 %v7825_v40  ;;  %v3352_v21 = vpop.f32.mrf.mxu0 }
 0x2b9   : > { %v3260_v9 = vpop.f32.mrf.mxu3 }
 0x2ba   : > { %v3677_v63 = vor.u32 %v3675_v49, %v3674_v52  ;;  %v3971_v45 = vsel %vm9778_vm13, %v3969_v8, %v3970_v3  ;;  %v3973_v47 = vor.u32 %v3972_v10, %v3970_v3  ;;  %v3471_v20 = vmax.f32 %v3439_v1, 0.0  ;;  %v8889_v52 = vld [vmem:[#allocation2 + $0x38] sm:$0xf0] }
 0x2bb   : > { %4107 = vst [vmem:[#allocation2 + $0xc8] sm:$0xf] %v3971_v45  ;;  %v3261_v41 = vadd.f32 %v3260_v9, %v3171_v6  ;;  %4902 = vmatmul.bf16.gmra.mxu2 %v7769_v32  ;;  %5480 = vmatmul.bf16.gmra.mxu0 %v8053_v27  ;;  %v8941_v3 = vld [vmem:[%s11245_s3 + $0x58] sm:$0xff]  ;;  %v8960_v9 = vld [vmem:[#allocation2 + $0x4c] sm:$0xf]  ;;  %v8065_v32 = vor.u32 %v8889_v52, %v8064_v35 }
 0x2bc   : > { %v3678_v55 = vsel %vm9240_vm6, %v3670_v18, %v3677_v63  ;;  %v3974_v46 = vrot.slane %v3973_v47, 4  ;;  %v3503_v7 = vpack.c.bf16 %v3471_v20, %v3471_v20  ;;  %v7778_v6 = vld [vmem:[#allocation2 + $0x54] sm:$0xf0]  ;;  %5560 = vmatpush.bf16.msrb.mxu1 %v8941_v3 }
 0x2bd   : > { %3870 = vst [vmem:[#allocation2 + $0xcc] sm:$0xf] %v3678_v55  ;;  %v3350_v51 = vadd.f32 %v3349_v0, %v3261_v41  ;;  %v7836_v40 = vld [vmem:[#allocation2 + $0xc0] sm:$0xf]  ;;  %v7781_v41 = vor.u32 %v8960_v9, %v7778_v6 }
 0x2be   : > { %v4109_v24 = vsel %vm9786_vm14, %v3974_v46, %v4108_v15  ;;  %3535 = vst [vmem:[#allocation2 + $0xdc] sm:$0xf] %v3503_v7  ;;  %v3680_v30 = vshrl.u32 %v3503_v7, 16  ;;  %v3683_v53 = vshll.u32 %v3503_v7, 16  ;;  %4991 = vmatmul.bf16.gmra.mxu3 %v7773_v16  ;;  %v3174_v2 = vpop.f32.mrf.mxu2  ;;  %v7784_v7 = vld [vmem:[#allocation2 + $0x50] sm:$0xf]  ;;  %v2574_v16 = vadd.f32 %v10236_v59, %v10241_v39 }
 0x2bf   : > { %4110 = vst [vmem:[#allocation2 + $0xd4] sm:$0xf] %v4109_v24  ;;  %v3404_v42 = vadd.f32 %v3350_v51, %v2569_v62  ;;  %v10523_v62 = vpop.f32.mrf.mxu1  ;;  %v4112_v51 = vld [vmem:[#allocation2 + $0xec] sm:$0xf] }
 0x2c0   : > { %v3682_v61 = vrot.slane %v3680_v30, 7  ;;  %v3975_v23 = vrot.slane %v3680_v30, 4  ;;  %v3976_v17 = vrot.slane %v3683_v53, 5  ;;  %v3354_v34 = vpop.f32.mrf.mxu0 }
 0x2c1   : > { %v3440_v31 = vadd.f32 %v10496_v36, %v3404_v42  ;;  %v3263_v22 = vpop.f32.mrf.mxu3 }
 0x2c2   : > { %v3685_v0 = vor.u32 %v3683_v53, %v3682_v61  ;;  %v3264_v4 = vadd.f32 %v3263_v22, %v3174_v2  ;;  %v3977_v49 = vor.u32 %v3976_v17, %v3975_v23  ;;  %v3686_v19 = vrot.slane %v3682_v61, 4 }
 0x2c3   : > { %v3472_v13 = vmax.f32 %v3440_v31, 0.0 }
 0x2c4   : > { %v3872_v38 = vsel %vm9253_vm7, %v3685_v0, %v3871_v14  ;;  %v3353_v37 = vadd.f32 %v3352_v21, %v3264_v4  ;;  %v8976_v56 = vld [vmem:[#allocation2 + $0xc8] sm:$0xf0]  ;;  %v3978_v63 = vrot.slane %v3977_v49, 4  ;;  %v8962_v21 = vld [vmem:[#allocation2 + $0x58] sm:$0xf0] }
 0x2c5   : > { %3873 = vst [vmem:[#allocation2 + $0xd8] sm:$0xf] %v3872_v38  ;;  %v3504_v26 = vpack.c.bf16 %v3472_v13, %v3472_v13  ;;  %v7837_v8 = vor.u32 %v8976_v56, %v7836_v40  ;;  %v7785_v53 = vor.u32 %v8962_v21, %v7784_v7  ;;  %v3875_v4 = vld [vmem:[#allocation2 + $0xf0] sm:$0xf]  ;;  %v2579_v7 = vadd.f32 %v10244_v48, %v10252_v12 }
 0x2c6   : > { %v3405_v25 = vadd.f32 %v3353_v37, %v10238_v5  ;;  %v3176_v18 = vpop.f32.mrf.mxu2 }
 0x2c7   : > { %3536 = vst [vmem:[#allocation2 + $0xe8] sm:$0xf] %v3504_v26  ;;  %v3688_v10 = vshrl.u32 %v3504_v26, 16  ;;  %v3691_v1 = vshll.u32 %v3504_v26, 16 }
 0x2c8   : > { %v3441_v28 = vadd.f32 %v10496_v36, %v3405_v25  ;;  %4843 = vmatmul.bf16.gmra.mxu1 %v7837_v8  ;;  %v3357_v15 = vpop.f32.mrf.mxu0 }
 0x2c9   : > { %v3690_v45 = vrot.slane %v3688_v10, 7  ;;  %v3979_v47 = vrot.slane %v3691_v1, 5  ;;  %v3981_v20 = vrot.slane %v3688_v10, 4  ;;  %v3265_v5 = vpop.f32.mrf.mxu3 }
 0x2ca   : > { %v3473_v57 = vmax.f32 %v3441_v28, 0.0  ;;  %v3266_v54 = vadd.f32 %v3265_v5, %v3176_v18  ;;  %v8892_v18 = vld [vmem:[#allocation2 + $0x50] sm:$0xf0] }
 0x2cb   : > { %v3693_v27 = vor.u32 %v3691_v1, %v3690_v45  ;;  %v3980_v55 = vsel %vm9778_vm13, %v3978_v63, %v3979_v47  ;;  %v3982_v46 = vor.u32 %v3981_v20, %v3979_v47  ;;  %4907 = vmatmul.bf16.gmra.mxu2 %v7781_v41  ;;  %5485 = vmatmul.bf16.gmra.mxu0 %v8065_v32  ;;  %v7790_v20 = vld [vmem:[#allocation2 + $0x6c] sm:$0xf0] }
 0x2cc   : > { %4111 = vst [vmem:[#allocation2 + $0xe0] sm:$0xf] %v3980_v55  ;;  %v3505_v24 = vpack.c.bf16 %v3473_v57, %v3473_v57  ;;  %v3355_v30 = vadd.f32 %v3354_v34, %v3266_v54  ;;  %v7848_v52 = vld [vmem:[#allocation2 + $0xd8] sm:$0xf]  ;;  %v8965_v54 = vld [vmem:[#allocation2 + $0x70] sm:$0xf0] }
 0x2cd   : > { %v3694_v42 = vsel %vm9240_vm6, %v3686_v19, %v3693_v27  ;;  %v3983_v61 = vrot.slane %v3982_v46, 4  ;;  %v8963_v27 = vld [vmem:[#allocation2 + $0x64] sm:$0xf]  ;;  %v7796_v55 = vld [vmem:[#allocation2 + $0x68] sm:$0xf] }
 0x2ce   : > { %3874 = vst [vmem:[#allocation2 + $0xe4] sm:$0xf] %v3694_v42  ;;  %v3696_v2 = vshrl.u32 %v3505_v24, 16  ;;  %v3699_v14 = vshll.u32 %v3505_v24, 16  ;;  %v3406_v23 = vadd.f32 %v3355_v30, %v2574_v16  ;;  %4996 = vmatmul.bf16.gmra.mxu3 %v7785_v53  ;;  %v3179_v0 = vpop.f32.mrf.mxu2  ;;  %v8076_v46 = vld [vmem:[#allocation2 + $0x48] sm:$0xf] }
 0x2cf   : > { %v4113_v59 = vsel %vm9786_vm14, %v3983_v61, %v4112_v51  ;;  %3537 = vst [vmem:[#allocation2 + $0xf4] sm:$0xf] %v3505_v24  ;;  %v4116_v16 = vld [vmem:[#allocation2 + $0x104] sm:$0xf]  ;;  %v7793_v24 = vor.u32 %v8963_v27, %v7790_v20  ;;  %v8077_v30 = vor.u32 %v8892_v18, %v8076_v46  ;;  %v8966_v46 = vld [vmem:[#allocation2 + $0x7c] sm:$0xf] }
 0x2d0   : > { %4114 = vst [vmem:[#allocation2 + $0xec] sm:$0xf] %v4113_v59  ;;  %v3698_v39 = vrot.slane %v3696_v2, 7  ;;  %v3984_v17 = vrot.slane %v3696_v2, 4  ;;  %v3985_v31 = vrot.slane %v3699_v14, 5  ;;  %v3442_v22 = vadd.f32 %v10496_v36, %v3406_v23  ;;  %v3359_v37 = vpop.f32.mrf.mxu0 }
 0x2d1   : > { %v3268_v34 = vpop.f32.mrf.mxu3 }
 0x2d2   : > { %v3701_v13 = vor.u32 %v3699_v14, %v3698_v39  ;;  %v3474_v38 = vmax.f32 %v3442_v22, 0.0  ;;  %v3269_v40 = vadd.f32 %v3268_v34, %v3179_v0  ;;  %v3986_v49 = vor.u32 %v3985_v31, %v3984_v17 }
 0x2d3   : > { %v3702_v5 = vrot.slane %v3698_v39, 4  ;;  %v7797_v14 = vor.u32 %v8965_v54, %v7796_v55  ;;  %v7802_v54 = vld [vmem:[#allocation2 + $0x84] sm:$0xf0] }
 0x2d4   : > { %v3876_v56 = vsel %vm9253_vm7, %v3701_v13, %v3875_v4  ;;  %v3506_v26 = vpack.c.bf16 %v3474_v38, %v3474_v38  ;;  %v10532_v8 = vpop.f32.mrf.mxu1  ;;  %v3358_v25 = vadd.f32 %v3357_v15, %v3269_v40  ;;  %v3987_v9 = vrot.slane %v3986_v49, 4  ;;  %v3879_v13 = vld [vmem:[#allocation2 + $0x108] sm:$0xf] }
 0x2d5   : > { %3877 = vst [vmem:[#allocation2 + $0xf0] sm:$0xf] %v3876_v56  ;;  %v8979_v3 = vld [vmem:[#allocation2 + $0xe0] sm:$0xf0] }
 0x2d6   : > { %3538 = vst [vmem:[#allocation2 + $0x100] sm:$0xf] %v3506_v26  ;;  %v3704_v10 = vshrl.u32 %v3506_v26, 16  ;;  %v3707_v1 = vshll.u32 %v3506_v26, 16  ;;  %v7849_v6 = vor.u32 %v8979_v3, %v7848_v52  ;;  %v3407_v28 = vadd.f32 %v3358_v25, %v10246_v60  ;;  %v3181_v47 = vpop.f32.mrf.mxu2 }
 0x2d8   : > { %v3706_v35 = vrot.slane %v3704_v10, 7  ;;  %v3988_v63 = vrot.slane %v3707_v1, 5  ;;  %v3990_v45 = vrot.slane %v3704_v10, 4  ;;  %4848 = vmatmul.bf16.gmra.mxu1 %v7849_v6  ;;  %v3443_v21 = vadd.f32 %v10496_v36, %v3407_v28  ;;  %v3362_v60 = vpop.f32.mrf.mxu0  ;;  %v8940_v28 = vld [vmem:[%s11245_s3 + $0x50] sm:$0xff] }
 0x2d9   : > { %v3270_v57 = vpop.f32.mrf.mxu3  ;;  %5561 = vmatpush.bf16.msrb.mxu1 %v8940_v28 }
 0x2da   : > { %v3709_v15 = vor.u32 %v3707_v1, %v3706_v35  ;;  %v3989_v41 = vsel %vm9778_vm13, %v3987_v9, %v3988_v63  ;;  %v3991_v32 = vor.u32 %v3990_v45, %v3988_v63  ;;  %v3271_v19 = vadd.f32 %v3270_v57, %v3181_v47  ;;  %v8895_v45 = vld [vmem:[#allocation2 + $0x68] sm:$0xf0] }
 0x2db   : > { %4115 = vst [vmem:[#allocation2 + $0xf8] sm:$0xf] %v3989_v41  ;;  %v3475_v51 = vmax.f32 %v3443_v21, 0.0  ;;  %4912 = vmatmul.bf16.gmra.mxu2 %v7793_v24  ;;  %5490 = vmatmul.bf16.gmra.mxu0 %v8077_v30  ;;  %v7805_v24 = vor.u32 %v8966_v46, %v7802_v54  ;;  %v7808_v30 = vld [vmem:[#allocation2 + $0x80] sm:$0xf] }
 0x2dc   : > { %v3710_v53 = vsel %vm9240_vm6, %v3702_v5, %v3709_v15  ;;  %v3992_v42 = vrot.slane %v3991_v32, 4  ;;  %v3360_v61 = vadd.f32 %v3359_v37, %v3271_v19  ;;  %v10542_v2 = vpop.f32.mrf.mxu1  ;;  %v7860_v3 = vld [vmem:[#allocation2 + $0xf0] sm:$0xf]  ;;  %v8968_v32 = vld [vmem:[#allocation2 + $0x88] sm:$0xf0] }
 0x2dd   : > { %3878 = vst [vmem:[#allocation2 + $0xfc] sm:$0xf] %v3710_v53  ;;  %v3507_v23 = vpack.c.bf16 %v3475_v51, %v3475_v51  ;;  %v8100_v54 = vld [vmem:[#allocation2 + $0x78] sm:$0xf]  ;;  %v7862_v58 = vld [vmem:[#allocation2 + $0xfc] sm:$0xf0] }
 0x2de   : > { %v4117_v48 = vsel %vm9786_vm14, %v3992_v42, %v4116_v16  ;;  %v3408_v12 = vadd.f32 %v3360_v61, %v2579_v7  ;;  %5001 = vmatmul.bf16.gmra.mxu3 %v7797_v14  ;;  %v3184_v31 = vpop.f32.mrf.mxu2  ;;  %v8088_v7 = vld [vmem:[#allocation2 + $0x60] sm:$0xf]  ;;  %v4120_v16 = vld [vmem:[#allocation2 + $0x11c] sm:$0xf] }
 0x2df   : > { %4118 = vst [vmem:[#allocation2 + $0x104] sm:$0xf] %v4117_v48  ;;  %v3712_v59 = vshrl.u32 %v3507_v23, 16  ;;  %v3715_v39 = vshll.u32 %v3507_v23, 16  ;;  %v8089_v53 = vor.u32 %v8895_v45, %v8088_v7  ;;  %v7809_v48 = vor.u32 %v8968_v32, %v7808_v30 }
 0x2e0   : > { %3539 = vst [vmem:[#allocation2 + $0x10c] sm:$0xf] %v3507_v23  ;;  %v3444_v17 = vadd.f32 %v10496_v36, %v3408_v12  ;;  %v3364_v40 = vpop.f32.mrf.mxu0  ;;  %v2584_v12 = vadd.f32 %v10255_v43, %v10260_v29 }
 0x2e1   : > { %v3714_v22 = vrot.slane %v3712_v59, 7  ;;  %v3993_v0 = vrot.slane %v3712_v59, 4  ;;  %v3994_v4 = vrot.slane %v3715_v39, 5  ;;  %v3273_v34 = vpop.f32.mrf.mxu3 }
 0x2e2   : > { %v3476_v38 = vmax.f32 %v3444_v17, 0.0  ;;  %v3274_v37 = vadd.f32 %v3273_v34, %v3184_v31  ;;  %v3883_v34 = vld [vmem:[#allocation2 + $0x120] sm:$0xf] }
 0x2e3   : > { %v3717_v56 = vor.u32 %v3715_v39, %v3714_v22  ;;  %v3995_v49 = vor.u32 %v3994_v4, %v3993_v0  ;;  %v3718_v15 = vrot.slane %v3714_v22, 4 }
 0x2e4   : > { %v3508_v26 = vpack.c.bf16 %v3476_v38, %v3476_v38  ;;  %v3363_v25 = vadd.f32 %v3362_v60, %v3274_v37  ;;  %v10547_v52 = vpop.f32.mrf.mxu1  ;;  %v8982_v10 = vld [vmem:[#allocation2 + $0xf8] sm:$0xf0] }
 0x2e5   : > { %v3880_v1 = vsel %vm9253_vm7, %v3717_v56, %v3879_v13  ;;  %v7861_v6 = vor.u32 %v8982_v10, %v7860_v3  ;;  %v3996_v63 = vrot.slane %v3995_v49, 4  ;;  %v8913_v44 = vld [vmem:[#allocation2 + $0xf8] sm:$0xf0] }
 0x2e6   : > { %3881 = vst [vmem:[#allocation2 + $0x108] sm:$0xf] %v3880_v1  ;;  %v3720_v18 = vshrl.u32 %v3508_v26, 16  ;;  %v3723_v9 = vshll.u32 %v3508_v26, 16  ;;  %v3409_v35 = vadd.f32 %v3363_v25, %v10257_v33  ;;  %v3186_v57 = vpop.f32.mrf.mxu2 }
 0x2e7   : > { %3540 = vst [vmem:[#allocation2 + $0x118] sm:$0xf] %v3508_v26 }
 0x2e8   : > { %v3722_v47 = vrot.slane %v3720_v18, 7  ;;  %v3997_v20 = vrot.slane %v3723_v9, 5  ;;  %v3999_v5 = vrot.slane %v3720_v18, 4  ;;  %v3445_v21 = vadd.f32 %v10496_v36, %v3409_v35  ;;  %4853 = vmatmul.bf16.gmra.mxu1 %v7861_v6  ;;  %v3367_v55 = vpop.f32.mrf.mxu0 }
 0x2e9   : > { %v3275_v41 = vpop.f32.mrf.mxu3 }
 0x2ea   : > { %v3725_v19 = vor.u32 %v3723_v9, %v3722_v47  ;;  %v3998_v60 = vsel %vm9778_vm13, %v3996_v63, %v3997_v20  ;;  %v4000_v33 = vor.u32 %v3999_v5, %v3997_v20  ;;  %v3477_v27 = vmax.f32 %v3445_v21, 0.0  ;;  %v11406_v9 = vld [vmem:[#allocation12_spill] sm:$0xff]  ;;  %v8898_v63 = vld [vmem:[#allocation2 + $0x80] sm:$0xf0]  ;;  %v7814_v20 = vld [vmem:[#allocation2 + $0x9c] sm:$0xf0] }
 0x2eb   : > { %4119 = vst [vmem:[#allocation2 + $0x110] sm:$0xf] %v3998_v60  ;;  %v3276_v51 = vadd.f32 %v3275_v41, %v3186_v57  ;;  %4917 = vmatmul.bf16.gmra.mxu2 %v7805_v24  ;;  %5495 = vmatmul.bf16.gmra.mxu0 %v8089_v53  ;;  %v8969_v57 = vld [vmem:[#allocation2 + $0x94] sm:$0xf] }
 0x2ec   : > { %v3726_v42 = vsel %vm9240_vm6, %v3718_v15, %v3725_v19  ;;  %v4001_v61 = vrot.slane %v4000_v33, 4  ;;  %v3509_v14 = vpack.c.bf16 %v3477_v27, %v3477_v27  ;;  %v10560_v23 = vpop.f32.mrf.mxu1  ;;  %v8971_v33 = vld [vmem:[#allocation2 + $0xa0] sm:$0xf0]  ;;  %v7817_v7 = vor.u32 %v8969_v57, %v7814_v20  ;;  %v8939_v20 = vld [vmem:[%s11245_s3 + $0x48] sm:$0xff] }
 0x2ed   : > { %3882 = vst [vmem:[#allocation2 + $0x114] sm:$0xf] %v3726_v42  ;;  %v3365_v59 = vadd.f32 %v3364_v40, %v3276_v51  ;;  %v7872_v3 = vld [vmem:[#allocation2 + $0x108] sm:$0xf]  ;;  %v7820_v42 = vld [vmem:[#allocation2 + $0x98] sm:$0xf]  ;;  %5562 = vmatpush.bf16.msrb.mxu1 %v8939_v20 }
 0x2ee   : > { %v4121_v39 = vsel %vm9786_vm14, %v4001_v61, %v4120_v16  ;;  %3541 = vst [vmem:[#allocation2 + $0x124] sm:$0xf] %v3509_v14  ;;  %v3728_v17 = vshrl.u32 %v3509_v14, 16  ;;  %v3731_v31 = vshll.u32 %v3509_v14, 16  ;;  %5006 = vmatmul.bf16.gmra.mxu3 %v7809_v48  ;;  %v3189_v4 = vpop.f32.mrf.mxu2  ;;  %v8101_v16 = vor.u32 %v8898_v63, %v8100_v54  ;;  %v11407_v61 = vld [vmem:[#allocation13_spill] sm:$0xff]  ;;  %v11408_v14 = vld [vmem:[#allocation11_spill] sm:$0xff] }
 0x2ef   : > { %4122 = vst [vmem:[#allocation2 + $0x11c] sm:$0xf] %v4121_v39  ;;  %v3410_v22 = vadd.f32 %v3365_v59, %v2584_v12  ;;  %v2589_v48 = vadd.f32 %v11408_v14, %v11407_v61  ;;  %v4124_v12 = vld [vmem:[#allocation2 + $0x134] sm:$0xf]  ;;  %v8972_v14 = vld [vmem:[#allocation2 + $0xac] sm:$0xf] }
 0x2f0   : > { %v3730_v0 = vrot.slane %v3728_v17, 7  ;;  %v4002_v13 = vrot.slane %v3728_v17, 4  ;;  %v4003_v38 = vrot.slane %v3731_v31, 5  ;;  %v3369_v56 = vpop.f32.mrf.mxu0  ;;  %v7821_v17 = vor.u32 %v8971_v33, %v7820_v42  ;;  %v11409_v54 = vld [vmem:[#allocation15_spill] sm:$0xff] }
 0x2f1   : > { %v3446_v43 = vadd.f32 %v10496_v36, %v3410_v22  ;;  %v3278_v29 = vpop.f32.mrf.mxu3 }
 0x2f2   : > { %v3733_v37 = vor.u32 %v3731_v31, %v3730_v0  ;;  %v3279_v40 = vadd.f32 %v3278_v29, %v3189_v4  ;;  %v4004_v1 = vor.u32 %v4003_v38, %v4002_v13  ;;  %v3734_v51 = vrot.slane %v3730_v0, 4 }
 0x2f3   : > { %v3478_v49 = vmax.f32 %v3446_v43, 0.0 }
 0x2f4   : > { %v3884_v26 = vsel %vm9253_vm7, %v3733_v37, %v3883_v34  ;;  %v3368_v25 = vadd.f32 %v3367_v55, %v3279_v40  ;;  %v8985_v10 = vld [vmem:[#allocation2 + $0x110] sm:$0xf0]  ;;  %v4005_v15 = vrot.slane %v4004_v1, 4 }
 0x2f5   : > { %3885 = vst [vmem:[#allocation2 + $0x120] sm:$0xf] %v3884_v26  ;;  %v3510_v6 = vpack.c.bf16 %v3478_v49, %v3478_v49  ;;  %v10569_v28 = vpop.f32.mrf.mxu1  ;;  %v7873_v18 = vor.u32 %v8985_v10, %v7872_v3  ;;  %v3887_v49 = vld [vmem:[#allocation2 + $0x138] sm:$0xf] }
 0x2f6   : > { %v3411_v35 = vadd.f32 %v3368_v25, %v11406_v9  ;;  %v3191_v21 = vpop.f32.mrf.mxu2 }
 0x2f7   : > { %3542 = vst [vmem:[#allocation2 + $0x130] sm:$0xf] %v3510_v6  ;;  %v3736_v45 = vshrl.u32 %v3510_v6, 16  ;;  %v3739_v47 = vshll.u32 %v3510_v6, 16 }
 0x2f8   : > { %v3447_v5 = vadd.f32 %v10496_v36, %v3411_v35  ;;  %4858 = vmatmul.bf16.gmra.mxu1 %v7873_v18  ;;  %v3372_v46 = vpop.f32.mrf.mxu0 }
 0x2f9   : > { %v3738_v41 = vrot.slane %v3736_v45, 7  ;;  %v4006_v32 = vrot.slane %v3739_v47, 5  ;;  %v4008_v19 = vrot.slane %v3736_v45, 4  ;;  %v3280_v60 = vpop.f32.mrf.mxu3 }
 0x2fa   : > { %v3479_v27 = vmax.f32 %v3447_v5, 0.0  ;;  %v3281_v55 = vadd.f32 %v3280_v60, %v3191_v21 }
 0x2fb   : > { %v3741_v24 = vor.u32 %v3739_v47, %v3738_v41  ;;  %v4007_v30 = vsel %vm9778_vm13, %v4005_v15, %v4006_v32  ;;  %v4009_v53 = vor.u32 %v4008_v19, %v4006_v32  ;;  %4922 = vmatmul.bf16.gmra.mxu2 %v7817_v7  ;;  %5500 = vmatmul.bf16.gmra.mxu0 %v8101_v16  ;;  %v8901_v41 = vld [vmem:[#allocation2 + $0x98] sm:$0xf0] }
 0x2fc   : > { %4123 = vst [vmem:[#allocation2 + $0x128] sm:$0xf] %v4007_v30  ;;  %v3511_v59 = vpack.c.bf16 %v3479_v27, %v3479_v27  ;;  %v3370_v39 = vadd.f32 %v3369_v56, %v3281_v55  ;;  %v7884_v35 = vld [vmem:[#allocation2 + $0x120] sm:$0xf]  ;;  %v7826_v55 = vld [vmem:[#allocation2 + $0xb4] sm:$0xf0] }
 0x2fd   : > { %v3742_v31 = vsel %vm9240_vm6, %v3734_v51, %v3741_v24  ;;  %v4010_v22 = vrot.slane %v4009_v53, 4  ;;  %v10579_v4 = vpop.f32.mrf.mxu1  ;;  %v8974_v51 = vld [vmem:[#allocation2 + $0xb8] sm:$0xf0] }
 0x2fe   : > { %3886 = vst [vmem:[#allocation2 + $0x12c] sm:$0xf] %v3742_v31  ;;  %v3744_v0 = vshrl.u32 %v3511_v59, 16  ;;  %v3747_v34 = vshll.u32 %v3511_v59, 16  ;;  %v3412_v13 = vadd.f32 %v3370_v39, %v2589_v48  ;;  %5011 = vmatmul.bf16.gmra.mxu3 %v7821_v17  ;;  %v3194_v56 = vpop.f32.mrf.mxu2  ;;  %v7832_v48 = vld [vmem:[#allocation2 + $0xb0] sm:$0xf] }
 0x2ff   : > { %v4125_v38 = vsel %vm9786_vm14, %v4010_v22, %v4124_v12  ;;  %3543 = vst [vmem:[#allocation2 + $0x13c] sm:$0xf] %v3511_v59  ;;  %v8112_v12 = vld [vmem:[#allocation2 + $0x90] sm:$0xf]  ;;  %v11410_v59 = vld [vmem:[#allocation16_spill] sm:$0xff]  ;;  %v11411_v39 = vld [vmem:[#allocation14_spill] sm:$0xff] }
 0x300   : > { %4126 = vst [vmem:[#allocation2 + $0x134] sm:$0xf] %v4125_v38  ;;  %v3746_v43 = vrot.slane %v3744_v0, 7  ;;  %v4011_v29 = vrot.slane %v3744_v0, 4  ;;  %v4012_v37 = vrot.slane %v3747_v34, 5  ;;  %v3448_v40 = vadd.f32 %v10496_v36, %v3412_v13  ;;  %v3374_v10 = vpop.f32.mrf.mxu0 }
 0x301   : > { %v3283_v26 = vpop.f32.mrf.mxu3  ;;  %v2594_v17 = vadd.f32 %v11411_v39, %v11410_v59  ;;  %v4128_v31 = vld [vmem:[#allocation2 + $0x14c] sm:$0xf]  ;;  %v7829_v0 = vor.u32 %v8972_v14, %v7826_v55 }
 0x302   : > { %v3749_v25 = vor.u32 %v3747_v34, %v3746_v43  ;;  %v3480_v3 = vmax.f32 %v3448_v40, 0.0  ;;  %v3284_v1 = vadd.f32 %v3283_v26, %v3194_v56  ;;  %v4013_v18 = vor.u32 %v4012_v37, %v4011_v29  ;;  %v11412_v55 = vld [vmem:[#allocation6_spill] sm:$0xff] }
 0x303   : > { %v8113_v34 = vor.u32 %v8901_v41, %v8112_v12  ;;  %v7833_v29 = vor.u32 %v8974_v51, %v7832_v48  ;;  %v8977_v12 = vld [vmem:[#allocation2 + $0xd0] sm:$0xf0] }
 0x304   : > { %v3888_v6 = vsel %vm9253_vm7, %v3749_v25, %v3887_v49  ;;  %v3512_v9 = vpack.c.bf16 %v3480_v3, %v3480_v3  ;;  %v3373_v63 = vadd.f32 %v3372_v46, %v3284_v1  ;;  %v4014_v32 = vrot.slane %v4013_v18, 4 }
 0x305   : > { %3889 = vst [vmem:[#allocation2 + $0x138] sm:$0xf] %v3888_v6  ;;  %v10586_v45 = vpop.f32.mrf.mxu1  ;;  %v8988_v47 = vld [vmem:[#allocation2 + $0x128] sm:$0xf0]  ;;  %v3750_v46 = vrot.slane %v3746_v43, 4 }
 0x306   : > { %3544 = vst [vmem:[#allocation2 + $0x148] sm:$0xf] %v3512_v9  ;;  %v3752_v5 = vshrl.u32 %v3512_v9, 16  ;;  %v3755_v21 = vshll.u32 %v3512_v9, 16  ;;  %v7885_v57 = vor.u32 %v8988_v47, %v7884_v35  ;;  %v3413_v15 = vadd.f32 %v3373_v63, %v11409_v54  ;;  %v3196_v27 = vpop.f32.mrf.mxu2  ;;  %v3891_v35 = vld [vmem:[#allocation2 + $0x150] sm:$0xf] }
 0x308   : > { %v3754_v19 = vrot.slane %v3752_v5, 7  ;;  %v4015_v60 = vrot.slane %v3755_v21, 5  ;;  %v4017_v33 = vrot.slane %v3752_v5, 4  ;;  %4863 = vmatmul.bf16.gmra.mxu1 %v7885_v57  ;;  %v3449_v7 = vadd.f32 %v10496_v36, %v3413_v15  ;;  %v3377_v61 = vpop.f32.mrf.mxu0 }
 0x309   : > { %v3285_v16 = vpop.f32.mrf.mxu3 }
 0x30a   : > { %v3757_v24 = vor.u32 %v3755_v21, %v3754_v19  ;;  %v4016_v30 = vsel %vm9778_vm13, %v4014_v32, %v4015_v60  ;;  %v4018_v53 = vor.u32 %v4017_v33, %v4015_v60  ;;  %v3286_v42 = vadd.f32 %v3285_v16, %v3196_v27  ;;  %v8904_v16 = vld [vmem:[#allocation2 + $0xb0] sm:$0xf0] }
 0x30b   : > { %4127 = vst [vmem:[#allocation2 + $0x140] sm:$0xf] %v4016_v30  ;;  %v3481_v22 = vmax.f32 %v3449_v7, 0.0  ;;  %4927 = vmatmul.bf16.gmra.mxu2 %v7829_v0  ;;  %5505 = vmatmul.bf16.gmra.mxu0 %v8113_v34  ;;  %v8975_v0 = vld [vmem:[#allocation2 + $0xc4] sm:$0xf] }
 0x30c   : > { %v3758_v13 = vsel %vm9240_vm6, %v3750_v46, %v3757_v24  ;;  %v4019_v38 = vrot.slane %v4018_v53, 4  ;;  %v3375_v43 = vadd.f32 %v3374_v10, %v3286_v42  ;;  %v7896_v15 = vld [vmem:[#allocation2 + $0x138] sm:$0xf]  ;;  %v8124_v34 = vld [vmem:[#allocation2 + $0xa8] sm:$0xf] }
 0x30d   : > { %3890 = vst [vmem:[#allocation2 + $0x144] sm:$0xf] %v3758_v13  ;;  %v3513_v37 = vpack.c.bf16 %v3481_v22, %v3481_v22  ;;  %v10599_v40 = vpop.f32.mrf.mxu1  ;;  %v4132_v13 = vld [vmem:[#allocation2 + $0x164] sm:$0xf] }
 0x30e   : > { %v4129_v56 = vsel %vm9786_vm14, %v4019_v38, %v4128_v31  ;;  %v3414_v49 = vadd.f32 %v3375_v43, %v2594_v17  ;;  %5016 = vmatmul.bf16.gmra.mxu3 %v7833_v29  ;;  %v3199_v1 = vpop.f32.mrf.mxu2  ;;  %v7844_v29 = vld [vmem:[#allocation2 + $0xc8] sm:$0xf] }
 0x30f   : > { %4130 = vst [vmem:[#allocation2 + $0x14c] sm:$0xf] %v4129_v56  ;;  %v3760_v26 = vshrl.u32 %v3513_v37, 16  ;;  %v3763_v25 = vshll.u32 %v3513_v37, 16 }
 0x310   : > { %3545 = vst [vmem:[#allocation2 + $0x154] sm:$0xf] %v3513_v37  ;;  %v3450_v3 = vadd.f32 %v10496_v36, %v3414_v49  ;;  %v3379_v20 = vpop.f32.mrf.mxu0  ;;  %v8125_v37 = vor.u32 %v8904_v16, %v8124_v34 }
 0x311   : > { %v3762_v10 = vrot.slane %v3760_v26, 7  ;;  %v4020_v6 = vrot.slane %v3760_v26, 4  ;;  %v4021_v18 = vrot.slane %v3763_v25, 5  ;;  %v3288_v9 = vpop.f32.mrf.mxu3 }
 0x312   : > { %v3482_v63 = vmax.f32 %v3450_v3, 0.0  ;;  %v3289_v47 = vadd.f32 %v3288_v9, %v3199_v1  ;;  %v11413_v3 = vld [vmem:[#allocation17_spill] sm:$0xff]  ;;  %v11414_v1 = vld [vmem:[#allocation7_spill] sm:$0xff] }
 0x313   : > { %v3765_v5 = vor.u32 %v3763_v25, %v3762_v10  ;;  %v4022_v21 = vor.u32 %v4021_v18, %v4020_v6  ;;  %v3766_v14 = vrot.slane %v3762_v10, 4  ;;  %v7845_v25 = vor.u32 %v8977_v12, %v7844_v29 }
 0x314   : > { %v3514_v57 = vpack.c.bf16 %v3482_v63, %v3482_v63  ;;  %v3378_v54 = vadd.f32 %v3377_v61, %v3289_v47  ;;  %v8991_v41 = vld [vmem:[#allocation2 + $0x140] sm:$0xf0]  ;;  %v7838_v61 = vld [vmem:[#allocation2 + $0xcc] sm:$0xf0]  ;;  %v2599_v10 = vadd.f32 %v11414_v1, %v11413_v3 }
 0x315   : > { %v3892_v32 = vsel %vm9253_vm7, %v3765_v5, %v3891_v35  ;;  %v10606_v19 = vpop.f32.mrf.mxu1  ;;  %v7897_v60 = vor.u32 %v8991_v41, %v7896_v15  ;;  %v4023_v7 = vrot.slane %v4022_v21, 4  ;;  %v7841_v43 = vor.u32 %v8975_v0, %v7838_v61  ;;  %v8938_v5 = vld [vmem:[%s11245_s3 + $0x40] sm:$0xff]  ;;  %v11415_v61 = vld [vmem:[#allocation8_spill] sm:$0xff] }
 0x316   : > { %3893 = vst [vmem:[#allocation2 + $0x150] sm:$0xf] %v3892_v32  ;;  %v3768_v33 = vshrl.u32 %v3514_v57, 16  ;;  %v3771_v27 = vshll.u32 %v3514_v57, 16  ;;  %v3415_v46 = vadd.f32 %v3378_v54, %v11412_v55  ;;  %v3201_v42 = vpop.f32.mrf.mxu2  ;;  %5563 = vmatpush.bf16.msrb.mxu1 %v8938_v5  ;;  %v8136_v0 = vld [vmem:[#allocation2 + $0xc0] sm:$0xf] }
 0x317   : > { %3546 = vst [vmem:[#allocation2 + $0x160] sm:$0xf] %v3514_v57 }
 0x318   : > { %v3770_v51 = vrot.slane %v3768_v33, 7  ;;  %v4024_v24 = vrot.slane %v3771_v27, 5  ;;  %v4026_v30 = vrot.slane %v3768_v33, 4  ;;  %v3451_v53 = vadd.f32 %v10496_v36, %v3415_v46  ;;  %4868 = vmatmul.bf16.gmra.mxu1 %v7897_v60  ;;  %v3382_v22 = vpop.f32.mrf.mxu0 }
 0x319   : > { %v3290_v48 = vpop.f32.mrf.mxu3 }
 0x31a   : > { %v3773_v59 = vor.u32 %v3771_v27, %v3770_v51  ;;  %v4025_v39 = vsel %vm9778_vm13, %v4023_v7, %v4024_v24  ;;  %v4027_v17 = vor.u32 %v4026_v30, %v4024_v24  ;;  %v3483_v31 = vmax.f32 %v3451_v53, 0.0 }
 0x31b   : > { %4131 = vst [vmem:[#allocation2 + $0x158] sm:$0xf] %v4025_v39  ;;  %v3291_v38 = vadd.f32 %v3290_v48, %v3201_v42  ;;  %4932 = vmatmul.bf16.gmra.mxu2 %v7841_v43  ;;  %5510 = vmatmul.bf16.gmra.mxu0 %v8125_v37  ;;  %v8907_v48 = vld [vmem:[#allocation2 + $0xc8] sm:$0xf0]  ;;  %v7850_v39 = vld [vmem:[#allocation2 + $0xe4] sm:$0xf0] }
 0x31c   : > { %v3774_v56 = vsel %vm9240_vm6, %v3766_v14, %v3773_v59  ;;  %v4028_v49 = vrot.slane %v4027_v17, 4  ;;  %v3515_v26 = vpack.c.bf16 %v3483_v31, %v3483_v31  ;;  %v8980_v37 = vld [vmem:[#allocation2 + $0xe8] sm:$0xf0]  ;;  %v8137_v3 = vor.u32 %v8907_v48, %v8136_v0 }
 0x31d   : > { %3894 = vst [vmem:[#allocation2 + $0x15c] sm:$0xf] %v3774_v56  ;;  %v3380_v6 = vadd.f32 %v3379_v20, %v3291_v38  ;;  %v10616_v18 = vpop.f32.mrf.mxu1  ;;  %v3895_v20 = vld [vmem:[#allocation2 + $0x168] sm:$0xf]  ;;  %v7908_v16 = vld [vmem:[#allocation2 + $0x150] sm:$0xf] }
 0x31e   : > { %v4133_v9 = vsel %vm9786_vm14, %v4028_v49, %v4132_v13  ;;  %3547 = vst [vmem:[#allocation2 + $0x16c] sm:$0xf] %v3515_v26  ;;  %v3776_v35 = vshrl.u32 %v3515_v26, 16  ;;  %v3779_v63 = vshll.u32 %v3515_v26, 16  ;;  %5021 = vmatmul.bf16.gmra.mxu3 %v7845_v25  ;;  %v3204_v57 = vpop.f32.mrf.mxu2 }
 0x31f   : > { %4134 = vst [vmem:[#allocation2 + $0x164] sm:$0xf] %v4133_v9  ;;  %v3416_v47 = vadd.f32 %v3380_v6, %v2599_v10  ;;  %v7856_v9 = vld [vmem:[#allocation2 + $0xe0] sm:$0xf] }
 0x320   : > { %v3778_v21 = vrot.slane %v3776_v35, 7  ;;  %v4029_v54 = vrot.slane %v3776_v35, 4  ;;  %v4030_v15 = vrot.slane %v3779_v63, 5  ;;  %v3384_v27 = vpop.f32.mrf.mxu0  ;;  %v11416_v35 = vld [vmem:[#allocation9_spill] sm:$0xff] }
 0x321   : > { %v3452_v41 = vadd.f32 %v10496_v36, %v3416_v47  ;;  %v3293_v32 = vpop.f32.mrf.mxu3  ;;  %v4136_v47 = vld [vmem:[#allocation2 + $0x17c] sm:$0xf] }
 0x322   : > { %v3781_v60 = vor.u32 %v3779_v63, %v3778_v21  ;;  %v3294_v33 = vadd.f32 %v3293_v32, %v3204_v57  ;;  %v4031_v24 = vor.u32 %v4030_v15, %v4029_v54  ;;  %v3782_v1 = vrot.slane %v3778_v21, 4 }
 0x323   : > { %v3484_v55 = vmax.f32 %v3452_v41, 0.0  ;;  %v2604_v63 = vadd.f32 %v10523_v62, %v11416_v35  ;;  %v9081_v62 = vld [vmem:[%s11245_s3 + $0x1b8] sm:$0xff] }
 0x324   : > { %v3896_v46 = vsel %vm9253_vm7, %v3781_v60, %v3895_v20  ;;  %v3383_v7 = vadd.f32 %v3382_v22, %v3294_v33  ;;  %v8994_v51 = vld [vmem:[#allocation2 + $0x158] sm:$0xf0]  ;;  %v4032_v34 = vrot.slane %v4031_v24, 4  ;;  %v7857_v20 = vor.u32 %v8980_v37, %v7856_v9  ;;  %6247 = vmatpush.bf16.msra.mxu3 %v9081_v62  ;;  %v3899_v24 = vld [vmem:[#allocation2 + $0x180] sm:$0xf] }
 0x325   : > { %3897 = vst [vmem:[#allocation2 + $0x168] sm:$0xf] %v3896_v46  ;;  %v3516_v30 = vpack.c.bf16 %v3484_v55, %v3484_v55  ;;  %v10626_v53 = vpop.f32.mrf.mxu1  ;;  %v7909_v42 = vor.u32 %v8994_v51, %v7908_v16  ;;  %v8978_v22 = vld [vmem:[#allocation2 + $0xdc] sm:$0xf]  ;;  %v8910_v37 = vld [vmem:[#allocation2 + $0xe0] sm:$0xf0] }
 0x326   : > { %v3417_v14 = vadd.f32 %v3383_v7, %v11415_v61  ;;  %v3206_v31 = vpop.f32.mrf.mxu2  ;;  %v7853_v25 = vor.u32 %v8978_v22, %v7850_v39  ;;  %v9126_v7 = vld [vmem:[%s11244_s2] ss:$0 sm:$0xff] }
 0x327   : > { %3548 = vst [vmem:[#allocation2 + $0x178] sm:$0xf] %v3516_v30  ;;  %v3784_v12 = vshrl.u32 %v3516_v30, 16  ;;  %v3787_v59 = vshll.u32 %v3516_v30, 16 }
 0x328   : > { %v3453_v17 = vadd.f32 %v10496_v36, %v3417_v14  ;;  %4873 = vmatmul.bf16.gmra.mxu1 %v7909_v42  ;;  %v5476_v26 = vpop.f32.mrf.mxu0 }
 0x329   : > { %v3786_v13 = vrot.slane %v3784_v12, 7  ;;  %v4033_v38 = vrot.slane %v3787_v59, 5  ;;  %v4035_v43 = vrot.slane %v3784_v12, 4  ;;  %v3295_v29 = vpop.f32.mrf.mxu3 }
 0x32a   : > { %v3485_v56 = vmax.f32 %v3453_v17, 0.0  ;;  %v3296_v49 = vadd.f32 %v3295_v29, %v3206_v31 }
 0x32b   : > { %v3789_v10 = vor.u32 %v3787_v59, %v3786_v13  ;;  %v4034_v36 = vsel %vm9778_vm13, %v4032_v34, %v4033_v38  ;;  %v4036_v6 = vor.u32 %v4035_v43, %v4033_v38  ;;  %4937 = vmatmul.bf16.gmra.mxu2 %v7853_v25  ;;  %5515 = vmatmul.bf16.gmra.mxu0 %v8137_v3  ;;  %v8953_v59 = vld [vmem:[%s11245_s3 + $0xb8] sm:$0xff] }
 0x32c   : > { %4135 = vst [vmem:[#allocation2 + $0x170] sm:$0xf] %v4034_v36  ;;  %v3517_v5 = vpack.c.bf16 %v3485_v56, %v3485_v56  ;;  %v3385_v57 = vadd.f32 %v3384_v27, %v3296_v49  ;;  %v7920_v22 = vld [vmem:[#allocation2 + $0x168] sm:$0xf]  ;;  %5645 = vmatpush.bf16.msra.mxu2 %v8953_v59 }
 0x32d   : > { %v3790_v54 = vsel %vm9240_vm6, %v3782_v1, %v3789_v10  ;;  %v4037_v15 = vrot.slane %v4036_v6, 4  ;;  %v10636_v41 = vpop.f32.mrf.mxu1  ;;  %v9097_v10 = vld [vmem:[%s11245_s3 + $0x238] sm:$0xff]  ;;  %v8983_v6 = vld [vmem:[#allocation2 + $0x100] sm:$0xf0] }
 0x32e   : > { %3898 = vst [vmem:[#allocation2 + $0x174] sm:$0xf] %v3790_v54  ;;  %v3792_v21 = vshrl.u32 %v3517_v5, 16  ;;  %v3795_v32 = vshll.u32 %v3517_v5, 16  ;;  %v3418_v60 = vadd.f32 %v3385_v57, %v2604_v63  ;;  %5026 = vmatmul.bf16.gmra.mxu3 %v7857_v20  ;;  %v4898_v51 = vpop.f32.mrf.mxu2  ;;  %v8981_v57 = vld [vmem:[#allocation2 + $0xf4] sm:$0xf]  ;;  %6425 = vmatpush.bf16.msra.mxu1 %v9097_v10 }
 0x32f   : > { %v4137_v33 = vsel %vm9786_vm14, %v4037_v15, %v4136_v47  ;;  %3549 = vst [vmem:[#allocation2 + $0x184] sm:$0xf] %v3517_v5  ;;  %v4899_v30 = vadd.f32 %v4898_v51, %v10532_v8  ;;  %v9089_v8 = vld [vmem:[%s11245_s3 + $0x1f8] sm:$0xff]  ;;  %v4140_v54 = vld [vmem:[#allocation2 + $0x194] sm:$0xf] }
 0x330   : > { %4138 = vst [vmem:[#allocation2 + $0x17c] sm:$0xf] %v4137_v33  ;;  %v3794_v27 = vrot.slane %v3792_v21, 7  ;;  %v4038_v55 = vrot.slane %v3792_v21, 4  ;;  %v4039_v46 = vrot.slane %v3795_v32, 5  ;;  %v3454_v16 = vadd.f32 %v9126_v7, %v3418_v60  ;;  %v5478_v48 = vpop.f32.mrf.mxu0  ;;  %6336 = vmatpush.bf16.msra.mxu0 %v9089_v8 }
 0x331   : > { %v4987_v42 = vpop.f32.mrf.mxu3  ;;  %v8148_v20 = vld [vmem:[#allocation2 + $0xd8] sm:$0xf]  ;;  %v7865_v21 = vor.u32 %v8981_v57, %v7862_v58  ;;  %v9096_v57 = vld [vmem:[%s11245_s3 + $0x230] sm:$0xff] }
 0x332   : > { %v3797_v61 = vor.u32 %v3795_v32, %v3794_v27  ;;  %v3486_v14 = vmax.f32 %v3454_v16, 0.0  ;;  %v4988_v12 = vadd.f32 %v4987_v42, %v4899_v30  ;;  %v4040_v17 = vor.u32 %v4039_v46, %v4038_v55  ;;  %v7868_v32 = vld [vmem:[#allocation2 + $0xf8] sm:$0xf]  ;;  %6426 = vmatpush.bf16.msra.mxu1 %v9096_v57  ;;  %v9087_v57 = vld [vmem:[%s11245_s3 + $0x1e8] sm:$0xff] }
 0x333   : > { %v3798_v9 = vrot.slane %v3794_v27, 4  ;;  %v8149_v60 = vor.u32 %v8910_v37, %v8148_v20  ;;  %v7869_v33 = vor.u32 %v8983_v6, %v7868_v32  ;;  %v8987_v32 = vld [vmem:[#allocation2 + $0x124] sm:$0xf] }
 0x334   : > { %v3900_v39 = vsel %vm9253_vm7, %v3797_v61, %v3899_v24  ;;  %v3518_v31 = vpack.c.bf16 %v3486_v14, %v3486_v14  ;;  %v10657_v13 = vadd.f32 %v5476_v26, %v4988_v12  ;;  %v4041_v56 = vrot.slane %v4040_v17, 4  ;;  %v7874_v12 = vld [vmem:[#allocation2 + $0x114] sm:$0xf0]  ;;  %v8986_v17 = vld [vmem:[#allocation2 + $0x118] sm:$0xf0] }
 0x335   : > { %3901 = vst [vmem:[#allocation2 + $0x180] sm:$0xf] %v3900_v39  ;;  %v10652_v0 = vpop.f32.mrf.mxu1  ;;  %v8997_v34 = vld [vmem:[#allocation2 + $0x170] sm:$0xf0] }
 0x336   : > { %3550 = vst [vmem:[#allocation2 + $0x190] sm:$0xf] %v3518_v31  ;;  %v3800_v38 = vshrl.u32 %v3518_v31, 16  ;;  %v3803_v43 = vshll.u32 %v3518_v31, 16  ;;  %v7921_v29 = vor.u32 %v8997_v34, %v7920_v22  ;;  %v4900_v1 = vpop.f32.mrf.mxu2  ;;  %v8160_v22 = vld [vmem:[#allocation2 + $0xf0] sm:$0xf] }
 0x337   : > { %v4901_v26 = vadd.f32 %v4900_v1, %v10542_v2  ;;  %v8042_v1 = vld [vmem:[#allocation2 + $0xc] sm:$0xf0] }
 0x338   : > { %v3802_v49 = vrot.slane %v3800_v38, 7  ;;  %v4042_v25 = vrot.slane %v3803_v43, 5  ;;  %v4044_v3 = vrot.slane %v3800_v38, 4  ;;  %4878 = vmatmul.bf16.gmra.mxu1 %v7921_v29  ;;  %v5481_v5 = vpop.f32.mrf.mxu0  ;;  %v7880_v38 = vld [vmem:[#allocation2 + $0x110] sm:$0xf] }
 0x339   : > { %v4989_v36 = vpop.f32.mrf.mxu3  ;;  %v7881_v29 = vor.u32 %v8986_v17, %v7880_v38  ;;  %v7898_v17 = vld [vmem:[#allocation2 + $0x144] sm:$0xf0]  ;;  %v8184_v38 = vld [vmem:[#allocation2 + $0x120] sm:$0xf] }
 0x33a   : > { %v3805_v35 = vor.u32 %v3803_v43, %v3802_v49  ;;  %v4043_v63 = vsel %vm9778_vm13, %v4041_v56, %v4042_v25  ;;  %v4045_v47 = vor.u32 %v4044_v3, %v4042_v25  ;;  %v4990_v15 = vadd.f32 %v4989_v36, %v4901_v26  ;;  %v8882_v3 = vld [vmem:[#allocation2 + $0x4] sm:$0xf]  ;;  %v8952_v36 = vld [vmem:[%s11245_s3 + $0xb0] sm:$0xff] }
 0x33b   : > { %4139 = vst [vmem:[#allocation2 + $0x188] sm:$0xf] %v4043_v63  ;;  %4942 = vmatmul.bf16.gmra.mxu2 %v7865_v21  ;;  %5520 = vmatmul.bf16.gmra.mxu0 %v8149_v60  ;;  %v8161_v43 = vor.u32 %v8913_v44, %v8160_v22  ;;  %v8045_v6 = vor.u32 %v8882_v3, %v8042_v1  ;;  %v8172_v60 = vld [vmem:[#allocation2 + $0x108] sm:$0xf] }
 0x33c   : > { %v3806_v2 = vsel %vm9240_vm6, %v3798_v9, %v3805_v35  ;;  %v4046_v62 = vrot.slane %v4045_v47, 4  ;;  %v10669_v11 = vadd.f32 %v5478_v48, %v4990_v15  ;;  %v7932_v24 = vld [vmem:[#allocation2 + $0x180] sm:$0xf]  ;;  %5646 = vmatpush.bf16.msra.mxu2 %v8952_v36  ;;  %v9088_v35 = vld [vmem:[%s11245_s3 + $0x1f0] sm:$0xff] }
 0x33d   : > { %3902 = vst [vmem:[#allocation2 + $0x18c] sm:$0xf] %v3806_v2  ;;  %v10667_v27 = vpop.f32.mrf.mxu1  ;;  %6337 = vmatpush.bf16.msra.mxu0 %v9088_v35  ;;  %v7886_v47 = vld [vmem:[#allocation2 + $0x12c] sm:$0xf0]  ;;  %v8989_v15 = vld [vmem:[#allocation2 + $0x130] sm:$0xf0] }
 0x33e   : > { %v4141_v55 = vsel %vm9786_vm14, %v4046_v62, %v4140_v54  ;;  %5031 = vmatmul.bf16.gmra.mxu3 %v7869_v33  ;;  %v4903_v46 = vpop.f32.mrf.mxu2  ;;  %v7889_v62 = vor.u32 %v8987_v32, %v7886_v47  ;;  %v7892_v33 = vld [vmem:[#allocation2 + $0x128] sm:$0xf]  ;;  %v8066_v35 = vld [vmem:[#allocation2 + $0x3c] sm:$0xf0] }
 0x33f   : > { %4142 = vst [vmem:[#allocation2 + $0x194] sm:$0xf] %v4141_v55  ;;  %v4904_v7 = vadd.f32 %v4903_v46, %v10547_v52  ;;  %v8984_v52 = vld [vmem:[#allocation2 + $0x10c] sm:$0xf]  ;;  %v7893_v46 = vor.u32 %v8989_v15, %v7892_v33  ;;  %v7910_v15 = vld [vmem:[#allocation2 + $0x15c] sm:$0xf0] }
 0x340   : > { %v5483_v50 = vpop.f32.mrf.mxu0  ;;  %v7877_v8 = vor.u32 %v8984_v52, %v7874_v12  ;;  %v8885_v12 = vld [vmem:[#allocation2 + $0x1c] sm:$0xf]  ;;  %v9095_v32 = vld [vmem:[%s11245_s3 + $0x228] sm:$0xff] }
 0x341   : > { %v4992_v16 = vpop.f32.mrf.mxu3  ;;  %6338 = vmatpush.bf16.msra.mxu0 %v9087_v57  ;;  %6427 = vmatpush.bf16.msra.mxu1 %v9095_v32  ;;  %v8208_v32 = vld [vmem:[#allocation2 + $0x150] sm:$0xf] }
 0x342   : > { %v4993_v51 = vadd.f32 %v4992_v16, %v4904_v7 }
 0x344   : > { %v9000_v30 = vld [vmem:[#allocation2 + $0x188] sm:$0xf0]  ;;  %v10676_v14 = vadd.f32 %v5481_v5, %v4993_v51  ;;  %v8916_v5 = vld [vmem:[#allocation2 + $0x110] sm:$0xf0] }
 0x345   : > { %v10674_v42 = vpop.f32.mrf.mxu1  ;;  %v7933_v61 = vor.u32 %v9000_v30, %v7932_v24  ;;  %v8173_v55 = vor.u32 %v8916_v5, %v8172_v60  ;;  %v8888_v5 = vld [vmem:[#allocation2 + $0x34] sm:$0xf] }
 0x346   : > { %v4905_v48 = vpop.f32.mrf.mxu2 }
 0x347   : > { %v4906_v59 = vadd.f32 %v4905_v48, %v10560_v23  ;;  %v9080_v23 = vld [vmem:[%s11245_s3 + $0x1b0] sm:$0xff] }
 0x348   : > { %4883 = vmatmul.bf16.gmra.mxu1 %v7933_v61  ;;  %v5486_v31 = vpop.f32.mrf.mxu0  ;;  %6248 = vmatpush.bf16.msra.mxu3 %v9080_v23  ;;  %v8054_v61 = vld [vmem:[#allocation2 + $0x24] sm:$0xf0]  ;;  %v7904_v23 = vld [vmem:[#allocation2 + $0x140] sm:$0xf] }
 0x349   : > { %v4994_v39 = vpop.f32.mrf.mxu3 }
 0x34a   : > { %v4995_v34 = vadd.f32 %v4994_v39, %v4906_v59  ;;  %v8057_v59 = vor.u32 %v8885_v12, %v8054_v61  ;;  %v9078_v61 = vld [vmem:[%s11245_s3 + $0x1a0] sm:$0xff] }
 0x34b   : > { %4947 = vmatmul.bf16.gmra.mxu2 %v7877_v8  ;;  %5525 = vmatmul.bf16.gmra.mxu0 %v8161_v43 }
 0x34c   : > { %v10681_v37 = vadd.f32 %v5483_v50, %v4995_v34  ;;  %v8992_v34 = vld [vmem:[#allocation2 + $0x148] sm:$0xf0] }
 0x34d   : > { %v10679_v58 = vpop.f32.mrf.mxu1 }
 0x34e   : > { %5036 = vmatmul.bf16.gmra.mxu3 %v7881_v29  ;;  %v4908_v56 = vpop.f32.mrf.mxu2 }
 0x34f   : > { %v4909_v49 = vadd.f32 %v4908_v56, %v10569_v28 }
 0x350   : > { %v5488_v10 = vpop.f32.mrf.mxu0 }
 0x351   : > { %v4997_v25 = vpop.f32.mrf.mxu3 }
 0x352   : > { %v4998_v26 = vadd.f32 %v4997_v25, %v4909_v49  ;;  %v7905_v49 = vor.u32 %v8992_v34, %v7904_v23  ;;  %v9076_v23 = vld [vmem:[%s11245_s3 + $0x190] sm:$0xff] }
 0x354   : > { %v10695_v63 = vadd.f32 %v5486_v31, %v4998_v26  ;;  %v8919_v31 = vld [vmem:[#allocation2 + $0x128] sm:$0xf0] }
 0x355   : > { %v10690_v9 = vpop.f32.mrf.mxu1  ;;  %v8185_v56 = vor.u32 %v8919_v31, %v8184_v38  ;;  %v9077_v31 = vld [vmem:[%s11245_s3 + $0x198] sm:$0xff] }
 0x356   : > { %v4910_v28 = vpop.f32.mrf.mxu2  ;;  %v8078_v38 = vld [vmem:[#allocation2 + $0x54] sm:$0xf0] }
 0x357   : > { %v4911_v20 = vadd.f32 %v4910_v28, %v10579_v4  ;;  %v8951_v28 = vld [vmem:[%s11245_s3 + $0xa8] sm:$0xff] }
 0x358   : > { %5564 = vmatmul.bf16.vlgmr.msrb.gmra.mxu1 %v8045_v6  ;;  %v5491_v21 = vpop.f32.mrf.mxu0  ;;  %5647 = vmatpush.bf16.msra.mxu2 %v8951_v28  ;;  %v9083_v28 = vld [vmem:[%s11245_s3 + $0x1c8] sm:$0xff] }
 0x359   : > { %v4999_v54 = vpop.f32.mrf.mxu3 }
 0x35a   : > { %v5000_v2 = vadd.f32 %v4999_v54, %v4911_v20  ;;  %v8069_v54 = vor.u32 %v8888_v5, %v8066_v35  ;;  %v9075_v35 = vld [vmem:[%s11245_s3 + $0x188] sm:$0xff] }
 0x35b   : > { %4952 = vmatmul.bf16.gmra.mxu2 %v7889_v62  ;;  %5530 = vmatmul.bf16.gmra.mxu0 %v8173_v55  ;;  %v8995_v62 = vld [vmem:[#allocation2 + $0x160] sm:$0xf0]  ;;  %v8993_v55 = vld [vmem:[#allocation2 + $0x154] sm:$0xf] }
 0x35c   : > { %v10703_v16 = vadd.f32 %v5488_v10, %v5000_v2 }
 0x35d   : > { %v10701_v7 = vpop.f32.mrf.mxu1 }
 0x35e   : > { %5041 = vmatmul.bf16.gmra.mxu3 %v7893_v46  ;;  %v4913_v50 = vpop.f32.mrf.mxu2  ;;  %v7916_v46 = vld [vmem:[#allocation2 + $0x158] sm:$0xf] }
 0x35f   : > { %v4914_v4 = vadd.f32 %v4913_v50, %v10586_v45  ;;  %v8990_v45 = vld [vmem:[#allocation2 + $0x13c] sm:$0xf]  ;;  %v8196_v50 = vld [vmem:[#allocation2 + $0x138] sm:$0xf]  ;;  %v7917_v12 = vor.u32 %v8995_v62, %v7916_v46 }
 0x360   : > { %v5493_v24 = vpop.f32.mrf.mxu0  ;;  %v7901_v29 = vor.u32 %v8990_v45, %v7898_v17  ;;  %v8949_v17 = vld [vmem:[%s11245_s3 + $0x98] sm:$0xff] }
 0x361   : > { %v5002_v51 = vpop.f32.mrf.mxu3 }
 0x362   : > { %v5003_v30 = vadd.f32 %v5002_v51, %v4914_v4  ;;  %v7913_v51 = vor.u32 %v8993_v55, %v7910_v15  ;;  %v8996_v15 = vld [vmem:[#allocation2 + $0x16c] sm:$0xf]  ;;  %v9082_v55 = vld [vmem:[%s11245_s3 + $0x1c0] sm:$0xff] }
 0x364   : > { %v10708_v44 = vadd.f32 %v5491_v21, %v5003_v30  ;;  %v8922_v21 = vld [vmem:[#allocation2 + $0x140] sm:$0xf0] }
 0x365   : > { %v10706_v48 = vpop.f32.mrf.mxu1  ;;  %v8950_v30 = vld [vmem:[%s11245_s3 + $0xa0] sm:$0xff] }
 0x366   : > { %v4915_v39 = vpop.f32.mrf.mxu2  ;;  %5648 = vmatpush.bf16.msra.mxu2 %v8950_v30 }
 0x367   : > { %v4916_v52 = vadd.f32 %v4915_v39, %v10599_v40  ;;  %v9079_v40 = vld [vmem:[%s11245_s3 + $0x1a8] sm:$0xff] }
 0x368   : > { %5569 = vmatmul.bf16.gmra.mxu1 %v8057_v59  ;;  %v5496_v8 = vpop.f32.mrf.mxu0  ;;  %6249 = vmatpush.bf16.msra.mxu3 %v9079_v40 }
 0x369   : > { %v5004_v22 = vpop.f32.mrf.mxu3 }
 0x36a   : > { %v5005_v43 = vadd.f32 %v5004_v22, %v4916_v52  ;;  %v9085_v52 = vld [vmem:[%s11245_s3 + $0x1d8] sm:$0xff]  ;;  %5649 = vmatpush.bf16.msra.mxu2 %v8949_v17 }
 0x36b   : > { %4957 = vmatmul.bf16.gmra.mxu2 %v7901_v29  ;;  %5535 = vmatmul.bf16.gmra.mxu0 %v8185_v56  ;;  %v8948_v29 = vld [vmem:[%s11245_s3 + $0x90] sm:$0xff] }
 0x36c   : > { %v10713_v3 = vadd.f32 %v5493_v24, %v5005_v43  ;;  %v8197_v24 = vor.u32 %v8922_v21, %v8196_v50  ;;  %6250 = vmatpush.bf16.msra.mxu3 %v9078_v61  ;;  %v9084_v56 = vld [vmem:[%s11245_s3 + $0x1d0] sm:$0xff] }
 0x36d   : > { %v10711_v25 = vpop.f32.mrf.mxu1  ;;  %v7928_v21 = vld [vmem:[#allocation2 + $0x170] sm:$0xf] }
 0x36e   : > { %5046 = vmatmul.bf16.gmra.mxu3 %v7905_v49  ;;  %v4918_v1 = vpop.f32.mrf.mxu2  ;;  %v8891_v49 = vld [vmem:[#allocation2 + $0x4c] sm:$0xf]  ;;  %5650 = vmatpush.bf16.msra.mxu2 %v8948_v29  ;;  %v9001_v29 = vld [vmem:[#allocation2 + $0x190] sm:$0xf0] }
 0x36f   : > { %v4919_v10 = vadd.f32 %v4918_v1, %v10606_v19  ;;  %v8081_v1 = vor.u32 %v8891_v49, %v8078_v38  ;;  %v9094_v38 = vld [vmem:[%s11245_s3 + $0x220] sm:$0xff]  ;;  %v8220_v49 = vld [vmem:[#allocation2 + $0x168] sm:$0xf] }
 0x370   : > { %v5498_v36 = vpop.f32.mrf.mxu0  ;;  %6251 = vmatpush.bf16.msra.mxu3 %v9077_v31  ;;  %v8894_v31 = vld [vmem:[#allocation2 + $0x64] sm:$0xf]  ;;  %6428 = vmatpush.bf16.msra.mxu1 %v9094_v38 }
 0x371   : > { %v5007_v26 = vpop.f32.mrf.mxu3 }
 0x372   : > { %v5008_v6 = vadd.f32 %v5007_v26, %v4919_v10  ;;  %v7922_v10 = vld [vmem:[#allocation2 + $0x174] sm:$0xf0]  ;;  %v8925_v26 = vld [vmem:[#allocation2 + $0x158] sm:$0xf0] }
 0x373   : > { %v8209_v62 = vor.u32 %v8925_v26, %v8208_v32  ;;  %v7940_v26 = vld [vmem:[#allocation2 + $0x188] sm:$0xf]  ;;  %v8897_v32 = vld [vmem:[#allocation2 + $0x7c] sm:$0xf] }
 0x374   : > { %v10727_v20 = vadd.f32 %v5496_v8, %v5008_v6  ;;  %6252 = vmatpush.bf16.msra.mxu3 %v9076_v23  ;;  %v8947_v6 = vld [vmem:[%s11245_s3 + $0x88] sm:$0xff] }
 0x375   : > { %v10722_v47 = vpop.f32.mrf.mxu1  ;;  %5651 = vmatpush.bf16.msra.mxu2 %v8947_v6  ;;  %v7941_v6 = vor.u32 %v9001_v29, %v7940_v26  ;;  %v8114_v29 = vld [vmem:[#allocation2 + $0x9c] sm:$0xf0]  ;;  %v8887_v26 = vld [vmem:[#allocation2 + $0x28] sm:$0xf0] }
 0x376   : > { %v4920_v19 = vpop.f32.mrf.mxu2 }
 0x377   : > { %v4921_v60 = vadd.f32 %v4920_v19, %v10616_v18  ;;  %v9086_v18 = vld [vmem:[%s11245_s3 + $0x1e0] sm:$0xff] }
 0x378   : > { %5574 = vmatmul.bf16.gmra.mxu1 %v8069_v54  ;;  %v5501_v33 = vpop.f32.mrf.mxu0  ;;  %6339 = vmatpush.bf16.msra.mxu0 %v9086_v18  ;;  %v8998_v54 = vld [vmem:[#allocation2 + $0x178] sm:$0xf0] }
 0x379   : > { %v5009_v2 = vpop.f32.mrf.mxu3  ;;  %6253 = vmatpush.bf16.msra.mxu3 %v9075_v35  ;;  %v7929_v46 = vor.u32 %v8998_v54, %v7928_v21 }
 0x37a   : > { %v5010_v4 = vadd.f32 %v5009_v2, %v4921_v60  ;;  %v7925_v2 = vor.u32 %v8996_v15, %v7922_v10  ;;  %v8102_v15 = vld [vmem:[#allocation2 + $0x84] sm:$0xf0] }
 0x37b   : > { %4962 = vmatmul.bf16.gmra.mxu2 %v7913_v51  ;;  %5540 = vmatmul.bf16.gmra.mxu0 %v8197_v24 }
 0x37c   : > { %v10744_v39 = vadd.f32 %v5498_v36, %v5010_v4  ;;  %6340 = vmatpush.bf16.msra.mxu0 %v9085_v52 }
 0x37d   : > { %v10742_v59 = vpop.f32.mrf.mxu1 }
 0x37e   : > { %5051 = vmatmul.bf16.gmra.mxu3 %v7917_v12  ;;  %v4923_v22 = vpop.f32.mrf.mxu2  ;;  %v8090_v12 = vld [vmem:[#allocation2 + $0x6c] sm:$0xf0] }
 0x37f   : > { %v4924_v34 = vadd.f32 %v4923_v22, %v10626_v53  ;;  %v8093_v22 = vor.u32 %v8894_v31, %v8090_v12  ;;  %v8376_v12 = vld [vmem:[#allocation2 + $0x30] sm:$0xf] }
 0x380   : > { %v5503_v45 = vpop.f32.mrf.mxu0  ;;  %6341 = vmatpush.bf16.msra.mxu0 %v9084_v56  ;;  %v8999_v56 = vld [vmem:[#allocation2 + $0x184] sm:$0xf] }
 0x381   : > { %v5012_v8 = vpop.f32.mrf.mxu3 }
 0x382   : > { %v5013_v43 = vadd.f32 %v5012_v8, %v4924_v34  ;;  %v7934_v8 = vld [vmem:[#allocation2 + $0x18c] sm:$0xf0] }
 0x383   : > { %v7937_v10 = vor.u32 %v8999_v56, %v7934_v8  ;;  %v8900_v56 = vld [vmem:[#allocation2 + $0x94] sm:$0xf] }
 0x384   : > { %v10767_v40 = vadd.f32 %v5501_v33, %v5013_v43  ;;  %6342 = vmatpush.bf16.msra.mxu0 %v9083_v28  ;;  %v8946_v33 = vld [vmem:[%s11245_s3 + $0x80] sm:$0xff] }
 0x385   : > { %v10765_v53 = vpop.f32.mrf.mxu1  ;;  %5652 = vmatpush.bf16.msra.mxu2 %v8946_v33  ;;  %v8884_v33 = vld [vmem:[#allocation2 + $0x10] sm:$0xf0] }
 0x386   : > { %v4925_v36 = vpop.f32.mrf.mxu2 }
 0x387   : > { %v4926_v5 = vadd.f32 %v4925_v36, %v10636_v41  ;;  %v9074_v41 = vld [vmem:[%s11245_s3 + $0x180] sm:$0xff] }
 0x388   : > { %5579 = vmatmul.bf16.gmra.mxu1 %v8081_v1  ;;  %v5506_v19 = vpop.f32.mrf.mxu0  ;;  %6254 = vmatpush.bf16.msra.mxu3 %v9074_v41 }
 0x389   : > { %v5014_v57 = vpop.f32.mrf.mxu3  ;;  %6343 = vmatpush.bf16.msra.mxu0 %v9082_v55  ;;  %v8378_v55 = vld [vmem:[#allocation2 + $0x3c] sm:$0xf0] }
 0x38a   : > { %v5015_v60 = vadd.f32 %v5014_v57, %v4926_v5 }
 0x38b   : > { %4967 = vmatmul.bf16.gmra.mxu2 %v7925_v2  ;;  %5545 = vmatmul.bf16.gmra.mxu0 %v8209_v62  ;;  %v8105_v2 = vor.u32 %v8897_v32, %v8102_v15  ;;  %v8048_v62 = vld [vmem:[#allocation2 + $0x8] sm:$0xf] }
 0x38c   : > { %v10790_v4 = vadd.f32 %v5503_v45, %v5015_v60  ;;  %v8928_v45 = vld [vmem:[#allocation2 + $0x170] sm:$0xf0] }
 0x38d   : > { %v10788_v50 = vpop.f32.mrf.mxu1  ;;  %v8221_v36 = vor.u32 %v8928_v45, %v8220_v49 }
 0x38e   : > { %5056 = vmatmul.bf16.gmra.mxu3 %v7929_v46  ;;  %v4928_v51 = vpop.f32.mrf.mxu2 }
 0x38f   : > { %v4929_v24 = vadd.f32 %v4928_v51, %v10652_v0 }
 0x390   : > { %v5508_v61 = vpop.f32.mrf.mxu0 }
 0x391   : > { %v5017_v30 = vpop.f32.mrf.mxu3 }
 0x392   : > { %v5018_v18 = vadd.f32 %v5017_v30, %v4929_v24  ;;  %v8049_v24 = vor.u32 %v8884_v33, %v8048_v62 }
 0x394   : > { %v10795_v52 = vadd.f32 %v5506_v19, %v5018_v18 }
 0x395   : > { %v10793_v17 = vpop.f32.mrf.mxu1 }
 0x396   : > { %v4930_v34 = vpop.f32.mrf.mxu2 }
 0x397   : > { %v4931_v0 = vadd.f32 %v4930_v34, %v10667_v27 }
 0x398   : > { %5584 = vmatmul.bf16.gmra.mxu1 %v8093_v22  ;;  %v5511_v23 = vpop.f32.mrf.mxu0 }
 0x399   : > { %v5019_v43 = vpop.f32.mrf.mxu3 }
 0x39a   : > { %v5020_v1 = vadd.f32 %v5019_v43, %v4931_v0 }
 0x39b   : > { %4972 = vmatmul.bf16.gmra.mxu2 %v7937_v10  ;;  %5550 = vmatmul.bf16.gmra.mxu0 %v8221_v36  ;;  %v8390_v36 = vld [vmem:[#allocation2 + $0x54] sm:$0xf0] }
 0x39c   : > { %v10803_v28 = vadd.f32 %v5508_v61, %v5020_v1  ;;  %v9026_v61 = vld [vmem:[#allocation2 + $0x34] sm:$0xf]  ;;  %v8117_v1 = vor.u32 %v8900_v56, %v8114_v29  ;;  %v9032_v56 = vld [vmem:[#allocation2 + $0x64] sm:$0xf] }
 0x39d   : > { %v10801_v35 = vpop.f32.mrf.mxu1  ;;  %v8381_v31 = vor.u32 %v9026_v61, %v8378_v55 }
 0x39e   : > { %5061 = vmatmul.bf16.gmra.mxu3 %v7941_v6  ;;  %v4933_v5 = vpop.f32.mrf.mxu2  ;;  %v9093_v6 = vld [vmem:[%s11245_s3 + $0x218] sm:$0xff] }
 0x39f   : > { %v4934_v27 = vadd.f32 %v4933_v5, %v10674_v42  ;;  %v9027_v42 = vld [vmem:[#allocation2 + $0x38] sm:$0xf0]  ;;  %6429 = vmatpush.bf16.msra.mxu1 %v9093_v6 }
 0x3a0   : > { %v5513_v54 = vpop.f32.mrf.mxu0  ;;  %v8377_v22 = vor.u32 %v9027_v42, %v8376_v12 }
 0x3a1   : > { %v5022_v57 = vpop.f32.mrf.mxu3 }
 0x3a2   : > { %v5023_v19 = vadd.f32 %v5022_v57, %v4934_v27  ;;  %v9030_v27 = vld [vmem:[#allocation2 + $0x50] sm:$0xf0] }
 0x3a4   : > { %v10808_v60 = vadd.f32 %v5511_v23, %v5023_v19  ;;  %v9029_v19 = vld [vmem:[#allocation2 + $0x4c] sm:$0xf] }
 0x3a5   : > { %v10806_v21 = vpop.f32.mrf.mxu1  ;;  %v8393_v62 = vor.u32 %v9029_v19, %v8390_v36 }
 0x3a6   : > { %v4935_v41 = vpop.f32.mrf.mxu2 }
 0x3a7   : > { %v4936_v46 = vadd.f32 %v4935_v41, %v10679_v58 }
 0x3a8   : > { %5589 = vmatmul.bf16.gmra.mxu1 %v8105_v2  ;;  %v5516_v30 = vpop.f32.mrf.mxu0  ;;  %v8388_v2 = vld [vmem:[#allocation2 + $0x48] sm:$0xf] }
 0x3a9   : > { %v5024_v51 = vpop.f32.mrf.mxu3  ;;  %v8389_v33 = vor.u32 %v9030_v27, %v8388_v2  ;;  %v8906_v2 = vld [vmem:[#allocation2 + $0xc4] sm:$0xf] }
 0x3aa   : > { %v5025_v18 = vadd.f32 %v5024_v51, %v4936_v46 }
 0x3ab   : > { %5653 = vmatmul.bf16.vlgmr.msra.gmra.mxu2 %v8049_v24  ;;  %6344 = vmatmul.bf16.vlgmr.msra.gmra.mxu0 %v8381_v31 }
 0x3ac   : > { %v10813_v8 = vadd.f32 %v5513_v54, %v5025_v18  ;;  %v8060_v54 = vld [vmem:[#allocation2 + $0x20] sm:$0xf]  ;;  %v8903_v18 = vld [vmem:[#allocation2 + $0xac] sm:$0xf] }
 0x3ad   : > { %v10811_v34 = vpop.f32.mrf.mxu1  ;;  %v8061_v32 = vor.u32 %v8887_v26, %v8060_v54  ;;  %v8400_v26 = vld [vmem:[#allocation2 + $0x60] sm:$0xf] }
 0x3ae   : > { %6255 = vmatmul.bf16.vlgmr.msra.gmra.mxu3 %v8377_v22  ;;  %v4938_v45 = vpop.f32.mrf.mxu2 }
 0x3af   : > { %v4939_v38 = vadd.f32 %v4938_v45, %v10690_v9  ;;  %v8890_v45 = vld [vmem:[#allocation2 + $0x40] sm:$0xf0] }
 0x3b0   : > { %v5518_v0 = vpop.f32.mrf.mxu0 }
 0x3b1   : > { %v5027_v58 = vpop.f32.mrf.mxu3 }
 0x3b2   : > { %v5028_v43 = vadd.f32 %v5027_v58, %v4939_v38  ;;  %v8402_v38 = vld [vmem:[#allocation2 + $0x6c] sm:$0xf0] }
 0x3b3   : > { %v8405_v36 = vor.u32 %v9032_v56, %v8402_v38 }
 0x3b4   : > { %v10818_v49 = vadd.f32 %v5516_v30, %v5028_v43  ;;  %v8126_v30 = vld [vmem:[#allocation2 + $0xb4] sm:$0xf0]  ;;  %v9033_v43 = vld [vmem:[#allocation2 + $0x68] sm:$0xf0] }
 0x3b5   : > { %v10816_v23 = vpop.f32.mrf.mxu1  ;;  %v8129_v31 = vor.u32 %v8903_v18, %v8126_v30  ;;  %v8401_v6 = vor.u32 %v9033_v43, %v8400_v26  ;;  %v9036_v18 = vld [vmem:[#allocation2 + $0x80] sm:$0xf0] }
 0x3b6   : > { %v4940_v10 = vpop.f32.mrf.mxu2 }
 0x3b7   : > { %v4941_v9 = vadd.f32 %v4940_v10, %v10701_v7 }
 0x3b8   : > { %5594 = vmatmul.bf16.gmra.mxu1 %v8117_v1  ;;  %v5521_v57 = vpop.f32.mrf.mxu0 }
 0x3b9   : > { %v5029_v5 = vpop.f32.mrf.mxu3 }
 0x3ba   : > { %v5030_v15 = vadd.f32 %v5029_v5, %v4941_v9 }
 0x3bb   : > { %5658 = vmatmul.bf16.gmra.mxu2 %v8061_v32  ;;  %6349 = vmatmul.bf16.gmra.mxu0 %v8393_v62 }
 0x3bc   : > { %v10826_v55 = vadd.f32 %v5518_v0, %v5030_v15  ;;  %v8138_v15 = vld [vmem:[#allocation2 + $0xcc] sm:$0xf0] }
 0x3bd   : > { %v10824_v41 = vpop.f32.mrf.mxu1 }
 0x3be   : > { %6260 = vmatmul.bf16.gmra.mxu3 %v8389_v33  ;;  %v4943_v46 = vpop.f32.mrf.mxu2 }
 0x3bf   : > { %v4944_v7 = vadd.f32 %v4943_v46, %v10706_v48  ;;  %v8072_v48 = vld [vmem:[#allocation2 + $0x38] sm:$0xf]  ;;  %v8141_v46 = vor.u32 %v8906_v2, %v8138_v15 }
 0x3c0   : > { %v5523_v24 = vpop.f32.mrf.mxu0  ;;  %v8073_v10 = vor.u32 %v8890_v45, %v8072_v48  ;;  %v9035_v45 = vld [vmem:[#allocation2 + $0x7c] sm:$0xf] }
 0x3c1   : > { %v5032_v51 = vpop.f32.mrf.mxu3 }
 0x3c2   : > { %v5033_v42 = vadd.f32 %v5032_v51, %v4944_v7  ;;  %v8893_v51 = vld [vmem:[#allocation2 + $0x58] sm:$0xf0] }
 0x3c4   : > { %v10831_v12 = vadd.f32 %v5521_v57, %v5033_v42 }
 0x3c5   : > { %v10829_v61 = vpop.f32.mrf.mxu1 }
 0x3c6   : > { %v4945_v22 = vpop.f32.mrf.mxu2 }
 0x3c7   : > { %v4946_v58 = vadd.f32 %v4945_v22, %v10711_v25  ;;  %v8084_v22 = vld [vmem:[#allocation2 + $0x50] sm:$0xf] }
 0x3c8   : > { %5599 = vmatmul.bf16.gmra.mxu1 %v8129_v31  ;;  %v5526_v29 = vpop.f32.mrf.mxu0 }
 0x3c9   : > { %v5034_v0 = vpop.f32.mrf.mxu3 }
 0x3ca   : > { %v5035_v1 = vadd.f32 %v5034_v0, %v4946_v58  ;;  %v8412_v58 = vld [vmem:[#allocation2 + $0x78] sm:$0xf] }
 0x3cb   : > { %5663 = vmatmul.bf16.gmra.mxu2 %v8073_v10  ;;  %6354 = vmatmul.bf16.gmra.mxu0 %v8405_v36  ;;  %v8413_v43 = vor.u32 %v9036_v18, %v8412_v58 }
 0x3cc   : > { %v10836_v5 = vadd.f32 %v5523_v24, %v5035_v1  ;;  %v8414_v24 = vld [vmem:[#allocation2 + $0x84] sm:$0xf0] }
 0x3cd   : > { %v10834_v9 = vpop.f32.mrf.mxu1  ;;  %v8417_v0 = vor.u32 %v9035_v45, %v8414_v24  ;;  %v9038_v24 = vld [vmem:[#allocation2 + $0x94] sm:$0xf] }
 0x3ce   : > { %6265 = vmatmul.bf16.gmra.mxu3 %v8401_v6  ;;  %v4948_v27 = vpop.f32.mrf.mxu2  ;;  %v8150_v6 = vld [vmem:[#allocation2 + $0xe4] sm:$0xf0] }
 0x3cf   : > { %v4949_v25 = vadd.f32 %v4948_v27, %v10722_v47  ;;  %v9092_v47 = vld [vmem:[%s11245_s3 + $0x210] sm:$0xff] }
 0x3d0   : > { %v5528_v54 = vpop.f32.mrf.mxu0  ;;  %6430 = vmatpush.bf16.msra.mxu1 %v9092_v47 }
 0x3d1   : > { %v5037_v57 = vpop.f32.mrf.mxu3 }
 0x3d2   : > { %v5038_v19 = vadd.f32 %v5037_v57, %v4949_v25  ;;  %v8909_v25 = vld [vmem:[#allocation2 + $0xdc] sm:$0xf] }
 0x3d4   : > { %v10839_v62 = vadd.f32 %v5526_v29, %v5038_v19 }
 0x3d5   : > { %v5565_v32 = vpop.f32.mrf.mxu1 }
 0x3d6   : > { %v10842_v33 = vadd.f32 %v5565_v32, %v10657_v13  ;;  %v4950_v7 = vpop.f32.mrf.mxu2  ;;  %v8085_v13 = vor.u32 %v8893_v51, %v8084_v22  ;;  %v8426_v32 = vld [vmem:[#allocation2 + $0x9c] sm:$0xf0]  ;;  %v8096_v51 = vld [vmem:[#allocation2 + $0x68] sm:$0xf] }
 0x3d7   : > { %v4951_v42 = vadd.f32 %v4950_v7, %v10742_v59  ;;  %v8429_v18 = vor.u32 %v9038_v24, %v8426_v32  ;;  %v9041_v32 = vld [vmem:[#allocation2 + $0xac] sm:$0xf] }
 0x3d8   : > { %5604 = vmatmul.bf16.gmra.mxu1 %v8141_v46  ;;  %v5531_v31 = vpop.f32.mrf.mxu0 }
 0x3d9   : > { %v5039_v30 = vpop.f32.mrf.mxu3 }
 0x3da   : > { %v5040_v38 = vadd.f32 %v5039_v30, %v4951_v42  ;;  %v8424_v30 = vld [vmem:[#allocation2 + $0x90] sm:$0xf] }
 0x3db   : > { %5668 = vmatmul.bf16.gmra.mxu2 %v8085_v13  ;;  %6359 = vmatmul.bf16.gmra.mxu0 %v8417_v0 }
 0x3dc   : > { %v10848_v48 = vadd.f32 %v5528_v54, %v5040_v38  ;;  %v8153_v54 = vor.u32 %v8909_v25, %v8150_v6  ;;  %v8438_v6 = vld [vmem:[#allocation2 + $0xb4] sm:$0xf0] }
 0x3dd   : > { %v5567_v29 = vpop.f32.mrf.mxu1 }
 0x3de   : > { %v10851_v56 = vadd.f32 %v5567_v29, %v10669_v11  ;;  %6270 = vmatmul.bf16.gmra.mxu3 %v8413_v43  ;;  %v4953_v59 = vpop.f32.mrf.mxu2  ;;  %v8896_v11 = vld [vmem:[#allocation2 + $0x70] sm:$0xf0]  ;;  %v8162_v43 = vld [vmem:[#allocation2 + $0xfc] sm:$0xf0] }
 0x3df   : > { %v4954_v1 = vadd.f32 %v4953_v59, %v10765_v53  ;;  %v9039_v53 = vld [vmem:[#allocation2 + $0x98] sm:$0xf0]  ;;  %v8097_v42 = vor.u32 %v8896_v11, %v8096_v51  ;;  %v8912_v59 = vld [vmem:[#allocation2 + $0xf4] sm:$0xf]  ;;  %v8108_v11 = vld [vmem:[#allocation2 + $0x80] sm:$0xf] }
 0x3e0   : > { %v5533_v26 = vpop.f32.mrf.mxu0 }
 0x3e1   : > { %v5042_v10 = vpop.f32.mrf.mxu3 }
 0x3e2   : > { %v5043_v36 = vadd.f32 %v5042_v10, %v4954_v1 }
 0x3e4   : > { %v10854_v57 = vadd.f32 %v5531_v31, %v5043_v36  ;;  %v8425_v31 = vor.u32 %v9039_v53, %v8424_v30  ;;  %v8441_v53 = vor.u32 %v9041_v32, %v8438_v6  ;;  %v9044_v6 = vld [vmem:[#allocation2 + $0xc4] sm:$0xf] }
 0x3e5   : > { %v5570_v27 = vpop.f32.mrf.mxu1 }
 0x3e6   : > { %v10857_v19 = vadd.f32 %v5570_v27, %v10676_v14  ;;  %v4955_v15 = vpop.f32.mrf.mxu2 }
 0x3e7   : > { %v4956_v2 = vadd.f32 %v4955_v15, %v10788_v50 }
 0x3e8   : > { %5609 = vmatmul.bf16.gmra.mxu1 %v8153_v54  ;;  %v5536_v7 = vpop.f32.mrf.mxu0  ;;  %v9042_v54 = vld [vmem:[#allocation2 + $0xb0] sm:$0xf0] }
 0x3e9   : > { %v5044_v46 = vpop.f32.mrf.mxu3 }
 0x3ea   : > { %v5045_v47 = vadd.f32 %v5044_v46, %v4956_v2  ;;  %v8436_v46 = vld [vmem:[#allocation2 + $0xa8] sm:$0xf] }
 0x3eb   : > { %5673 = vmatmul.bf16.gmra.mxu2 %v8097_v42  ;;  %6364 = vmatmul.bf16.gmra.mxu0 %v8429_v18 }
 0x3ec   : > { %v10860_v14 = vadd.f32 %v5533_v26, %v5045_v47  ;;  %v8165_v26 = vor.u32 %v8912_v59, %v8162_v43 }
 0x3ed   : > { %v5572_v22 = vpop.f32.mrf.mxu1 }
 0x3ee   : > { %v10863_v45 = vadd.f32 %v5572_v22, %v10681_v37  ;;  %6275 = vmatmul.bf16.gmra.mxu3 %v8425_v31  ;;  %v4958_v50 = vpop.f32.mrf.mxu2  ;;  %v8899_v37 = vld [vmem:[#allocation2 + $0x88] sm:$0xf0]  ;;  %v8174_v22 = vld [vmem:[#allocation2 + $0x114] sm:$0xf0] }
 0x3ef   : > { %v4959_v38 = vadd.f32 %v4958_v50, %v10793_v17  ;;  %v9091_v17 = vld [vmem:[%s11245_s3 + $0x208] sm:$0xff] }
 0x3f0   : > { %v5538_v58 = vpop.f32.mrf.mxu0  ;;  %6431 = vmatpush.bf16.msra.mxu1 %v9091_v17 }
 0x3f1   : > { %v5047_v13 = vpop.f32.mrf.mxu3 }
 0x3f2   : > { %v5048_v0 = vadd.f32 %v5047_v13, %v4959_v38  ;;  %v8915_v38 = vld [vmem:[#allocation2 + $0x10c] sm:$0xf] }
 0x3f4   : > { %v10866_v1 = vadd.f32 %v5536_v7, %v5048_v0  ;;  %v8437_v7 = vor.u32 %v9042_v54, %v8436_v46 }
 0x3f5   : > { %v5575_v29 = vpop.f32.mrf.mxu1 }
 0x3f6   : > { %v10869_v10 = vadd.f32 %v5575_v29, %v10695_v63  ;;  %v4960_v36 = vpop.f32.mrf.mxu2  ;;  %v8109_v63 = vor.u32 %v8899_v37, %v8108_v11  ;;  %v8450_v29 = vld [vmem:[#allocation2 + $0xcc] sm:$0xf0]  ;;  %v8120_v37 = vld [vmem:[#allocation2 + $0x98] sm:$0xf] }
 0x3f7   : > { %v4961_v27 = vadd.f32 %v4960_v36, %v10801_v35  ;;  %v8453_v54 = vor.u32 %v9044_v6, %v8450_v29  ;;  %v9047_v29 = vld [vmem:[#allocation2 + $0xdc] sm:$0xf] }
 0x3f8   : > { %5614 = vmatmul.bf16.gmra.mxu1 %v8165_v26  ;;  %v5541_v15 = vpop.f32.mrf.mxu0 }
 0x3f9   : > { %v5049_v25 = vpop.f32.mrf.mxu3 }
 0x3fa   : > { %v5050_v2 = vadd.f32 %v5049_v25, %v4961_v27  ;;  %v8448_v25 = vld [vmem:[#allocation2 + $0xc0] sm:$0xf] }
 0x3fb   : > { %5678 = vmatmul.bf16.gmra.mxu2 %v8109_v63  ;;  %6369 = vmatmul.bf16.gmra.mxu0 %v8441_v53 }
 0x3fc   : > { %v10875_v24 = vadd.f32 %v5538_v58, %v5050_v2  ;;  %v8177_v58 = vor.u32 %v8915_v38, %v8174_v22  ;;  %v8462_v22 = vld [vmem:[#allocation2 + $0xe4] sm:$0xf0] }
 0x3fd   : > { %v5577_v51 = vpop.f32.mrf.mxu1 }
 0x3fe   : > { %v10878_v47 = vadd.f32 %v5577_v51, %v10703_v16  ;;  %6280 = vmatmul.bf16.gmra.mxu3 %v8437_v7  ;;  %v4963_v35 = vpop.f32.mrf.mxu2  ;;  %v8902_v16 = vld [vmem:[#allocation2 + $0xa0] sm:$0xf0]  ;;  %v8186_v7 = vld [vmem:[#allocation2 + $0x12c] sm:$0xf0] }
 0x3ff   : > { %v4964_v42 = vadd.f32 %v4963_v35, %v10806_v21  ;;  %v9045_v21 = vld [vmem:[#allocation2 + $0xc8] sm:$0xf0]  ;;  %v8121_v27 = vor.u32 %v8902_v16, %v8120_v37  ;;  %v8918_v35 = vld [vmem:[#allocation2 + $0x124] sm:$0xf]  ;;  %v8132_v16 = vld [vmem:[#allocation2 + $0xb0] sm:$0xf] }
 0x400   : > { %v5543_v18 = vpop.f32.mrf.mxu0 }
 0x401   : > { %v5052_v30 = vpop.f32.mrf.mxu3 }
 0x402   : > { %v5053_v31 = vadd.f32 %v5052_v30, %v4964_v42 }
 0x404   : > { %v10881_v13 = vadd.f32 %v5541_v15, %v5053_v31  ;;  %v8449_v15 = vor.u32 %v9045_v21, %v8448_v25  ;;  %v8465_v21 = vor.u32 %v9047_v29, %v8462_v22  ;;  %v9050_v22 = vld [vmem:[#allocation2 + $0xf4] sm:$0xf] }
 0x405   : > { %v5580_v50 = vpop.f32.mrf.mxu1 }
 0x406   : > { %v10884_v0 = vadd.f32 %v5580_v50, %v10708_v44  ;;  %v4965_v43 = vpop.f32.mrf.mxu2 }
 0x407   : > { %v4966_v59 = vadd.f32 %v4965_v43, %v10811_v34 }
 0x408   : > { %5619 = vmatmul.bf16.gmra.mxu1 %v8177_v58  ;;  %v5546_v36 = vpop.f32.mrf.mxu0  ;;  %v9048_v58 = vld [vmem:[#allocation2 + $0xe0] sm:$0xf0] }
 0x409   : > { %v5054_v26 = vpop.f32.mrf.mxu3 }
 0x40a   : > { %v5055_v17 = vadd.f32 %v5054_v26, %v4966_v59  ;;  %v8460_v26 = vld [vmem:[#allocation2 + $0xd8] sm:$0xf] }
 0x40b   : > { %5683 = vmatmul.bf16.gmra.mxu2 %v8121_v27  ;;  %6374 = vmatmul.bf16.gmra.mxu0 %v8453_v54 }
 0x40c   : > { %v10887_v44 = vadd.f32 %v5543_v18, %v5055_v17  ;;  %v8189_v18 = vor.u32 %v8918_v35, %v8186_v7 }
 0x40d   : > { %v5582_v11 = vpop.f32.mrf.mxu1 }
 0x40e   : > { %v10890_v32 = vadd.f32 %v5582_v11, %v10713_v3  ;;  %6285 = vmatmul.bf16.gmra.mxu3 %v8449_v15  ;;  %v4968_v34 = vpop.f32.mrf.mxu2  ;;  %v8905_v3 = vld [vmem:[#allocation2 + $0xb8] sm:$0xf0]  ;;  %v8198_v11 = vld [vmem:[#allocation2 + $0x144] sm:$0xf0] }
 0x40f   : > { %v4969_v2 = vadd.f32 %v4968_v34, %v10816_v23  ;;  %v9090_v23 = vld [vmem:[%s11245_s3 + $0x200] sm:$0xff] }
 0x410   : > { %v5548_v46 = vpop.f32.mrf.mxu0  ;;  %6432 = vmatpush.bf16.msra.mxu1 %v9090_v23 }
 0x411   : > { %v5057_v63 = vpop.f32.mrf.mxu3 }
 0x412   : > { %v5058_v53 = vadd.f32 %v5057_v63, %v4969_v2  ;;  %v8921_v2 = vld [vmem:[#allocation2 + $0x13c] sm:$0xf] }
 0x414   : > { %v10893_v42 = vadd.f32 %v5546_v36, %v5058_v53  ;;  %v8461_v36 = vor.u32 %v9048_v58, %v8460_v26 }
 0x415   : > { %v5585_v51 = vpop.f32.mrf.mxu1 }
 0x416   : > { %v10896_v30 = vadd.f32 %v5585_v51, %v10727_v20  ;;  %v4970_v31 = vpop.f32.mrf.mxu2  ;;  %v8133_v20 = vor.u32 %v8905_v3, %v8132_v16  ;;  %v8474_v51 = vld [vmem:[#allocation2 + $0xfc] sm:$0xf0]  ;;  %v8144_v3 = vld [vmem:[#allocation2 + $0xc8] sm:$0xf] }
 0x417   : > { %v4971_v50 = vadd.f32 %v4970_v31, %v10824_v41  ;;  %v8477_v58 = vor.u32 %v9050_v22, %v8474_v51 }
 0x418   : > { %5624 = vmatmul.bf16.gmra.mxu1 %v8189_v18  ;;  %v5551_v43 = vpop.f32.mrf.mxu0 }
 0x419   : > { %v5059_v38 = vpop.f32.mrf.mxu3 }
 0x41a   : > { %v5060_v59 = vadd.f32 %v5059_v38, %v4971_v50  ;;  %v8472_v38 = vld [vmem:[#allocation2 + $0xf0] sm:$0xf] }
 0x41b   : > { %5688 = vmatmul.bf16.gmra.mxu2 %v8133_v20  ;;  %6379 = vmatmul.bf16.gmra.mxu0 %v8465_v21 }
 0x41c   : > { %v10902_v6 = vadd.f32 %v5548_v46, %v5060_v59  ;;  %v8201_v46 = vor.u32 %v8921_v2, %v8198_v11 }
 0x41d   : > { %v5587_v37 = vpop.f32.mrf.mxu1 }
 0x41e   : > { %v10905_v17 = vadd.f32 %v5587_v37, %v10744_v39  ;;  %6290 = vmatmul.bf16.gmra.mxu3 %v8461_v36  ;;  %v4973_v41 = vpop.f32.mrf.mxu2  ;;  %v8908_v39 = vld [vmem:[#allocation2 + $0xd0] sm:$0xf0]  ;;  %v8210_v36 = vld [vmem:[#allocation2 + $0x15c] sm:$0xf0] }
 0x41f   : > { %v4974_v27 = vadd.f32 %v4973_v41, %v10829_v61  ;;  %v9051_v61 = vld [vmem:[#allocation2 + $0xf8] sm:$0xf0]  ;;  %v8145_v50 = vor.u32 %v8908_v39, %v8144_v3  ;;  %v8924_v41 = vld [vmem:[#allocation2 + $0x154] sm:$0xf] }
 0x420   : > { %v5553_v54 = vpop.f32.mrf.mxu0 }
 0x421   : > { %v5062_v25 = vpop.f32.mrf.mxu3 }
 0x422   : > { %v5063_v15 = vadd.f32 %v5062_v25, %v4974_v27  ;;  %v8213_v25 = vor.u32 %v8924_v41, %v8210_v36 }
 0x424   : > { %v10908_v63 = vadd.f32 %v5551_v43, %v5063_v15  ;;  %v8473_v43 = vor.u32 %v9051_v61, %v8472_v38  ;;  %v8486_v15 = vld [vmem:[#allocation2 + $0x114] sm:$0xf0] }
 0x425   : > { %v5590_v34 = vpop.f32.mrf.mxu1 }
 0x426   : > { %v10911_v53 = vadd.f32 %v5590_v34, %v10767_v40  ;;  %v4975_v7 = vpop.f32.mrf.mxu2  ;;  %v9054_v34 = vld [vmem:[#allocation2 + $0x110] sm:$0xf0] }
 0x427   : > { %v4976_v35 = vadd.f32 %v4975_v7, %v10834_v9  ;;  %v9053_v7 = vld [vmem:[#allocation2 + $0x10c] sm:$0xf] }
 0x428   : > { %5629 = vmatmul.bf16.gmra.mxu1 %v8201_v46  ;;  %v6345_v31 = vpop.f32.mrf.mxu0  ;;  %v8156_v46 = vld [vmem:[#allocation2 + $0xe0] sm:$0xf] }
 0x429   : > { %v5064_v18 = vpop.f32.mrf.mxu3 }
 0x42a   : > { %v5065_v23 = vadd.f32 %v5064_v18, %v4976_v35  ;;  %v8484_v35 = vld [vmem:[#allocation2 + $0x108] sm:$0xf]  ;;  %v8489_v18 = vor.u32 %v9053_v7, %v8486_v15  ;;  %v8496_v15 = vld [vmem:[#allocation2 + $0x120] sm:$0xf] }
 0x42b   : > { %5693 = vmatmul.bf16.gmra.mxu2 %v8145_v50  ;;  %6384 = vmatmul.bf16.gmra.mxu0 %v8477_v58  ;;  %v8222_v50 = vld [vmem:[#allocation2 + $0x174] sm:$0xf0] }
 0x42c   : > { %v10914_v40 = vadd.f32 %v5553_v54, %v5065_v23 }
 0x42d   : > { %v5592_v16 = vpop.f32.mrf.mxu1 }
 0x42e   : > { %v10917_v29 = vadd.f32 %v5592_v16, %v10790_v4  ;;  %6295 = vmatmul.bf16.gmra.mxu3 %v8473_v43  ;;  %v5654_v9 = vpop.f32.mrf.mxu2  ;;  %v8911_v4 = vld [vmem:[#allocation2 + $0xe8] sm:$0xf0] }
 0x42f   : > { %v10920_v59 = vadd.f32 %v5654_v9, %v10842_v33  ;;  %v8157_v51 = vor.u32 %v8911_v4, %v8156_v46  ;;  %v8927_v43 = vld [vmem:[#allocation2 + $0x16c] sm:$0xf] }
 0x430   : > { %v6347_v21 = vpop.f32.mrf.mxu0  ;;  %v8225_v9 = vor.u32 %v8927_v43, %v8222_v50 }
 0x431   : > { %v6256_v20 = vpop.f32.mrf.mxu3 }
 0x432   : > { %v10922_v26 = vadd.f32 %v6345_v31, %v6256_v20 }
 0x435   : > { %v5595_v37 = vpop.f32.mrf.mxu1 }
 0x436   : > { %v10925_v27 = vadd.f32 %v5595_v37, %v10795_v52  ;;  %v5656_v54 = vpop.f32.mrf.mxu2  ;;  %v8485_v52 = vor.u32 %v9054_v34, %v8484_v35  ;;  %v9057_v37 = vld [vmem:[#allocation2 + $0x128] sm:$0xf0] }
 0x437   : > { %v10928_v11 = vadd.f32 %v5656_v54, %v10851_v56  ;;  %v9056_v54 = vld [vmem:[#allocation2 + $0x124] sm:$0xf]  ;;  %v8497_v34 = vor.u32 %v9057_v37, %v8496_v15  ;;  %v8508_v37 = vld [vmem:[#allocation2 + $0x138] sm:$0xf] }
 0x438   : > { %5634 = vmatmul.bf16.gmra.mxu1 %v8213_v25  ;;  %v6350_v39 = vpop.f32.mrf.mxu0  ;;  %v8168_v25 = vld [vmem:[#allocation2 + $0xf8] sm:$0xf] }
 0x439   : > { %v6258_v33 = vpop.f32.mrf.mxu3 }
 0x43a   : > { %v10930_v2 = vadd.f32 %v6347_v21, %v6258_v33  ;;  %v8498_v21 = vld [vmem:[#allocation2 + $0x12c] sm:$0xf0] }
 0x43b   : > { %5698 = vmatmul.bf16.gmra.mxu2 %v8157_v51  ;;  %6389 = vmatmul.bf16.gmra.mxu0 %v8489_v18  ;;  %v8501_v33 = vor.u32 %v9056_v54, %v8498_v21  ;;  %v9028_v18 = vld [vmem:[#allocation2 + $0x40] sm:$0xf0]  ;;  %v9059_v21 = vld [vmem:[#allocation2 + $0x13c] sm:$0xf] }
 0x43d   : > { %v5597_v61 = vpop.f32.mrf.mxu1 }
 0x43e   : > { %v10933_v31 = vadd.f32 %v5597_v61, %v10803_v28  ;;  %6300 = vmatmul.bf16.gmra.mxu3 %v8485_v52  ;;  %v5659_v56 = vpop.f32.mrf.mxu2  ;;  %v8914_v28 = vld [vmem:[#allocation2 + $0x100] sm:$0xf0]  ;;  %v8384_v61 = vld [vmem:[#allocation2 + $0x38] sm:$0xf] }
 0x43f   : > { %v10936_v3 = vadd.f32 %v5659_v56, %v10857_v19  ;;  %v8169_v4 = vor.u32 %v8914_v28, %v8168_v25  ;;  %v8180_v28 = vld [vmem:[#allocation2 + $0x110] sm:$0xf] }
 0x440   : > { %v6352_v38 = vpop.f32.mrf.mxu0 }
 0x441   : > { %v6261_v22 = vpop.f32.mrf.mxu3 }
 0x442   : > { %v10938_v23 = vadd.f32 %v6350_v39, %v6261_v22  ;;  %v8385_v22 = vor.u32 %v9028_v18, %v8384_v61  ;;  %v8920_v18 = vld [vmem:[#allocation2 + $0x130] sm:$0xf0] }
 0x445   : > { %v5600_v58 = vpop.f32.mrf.mxu1 }
 0x446   : > { %v10941_v16 = vadd.f32 %v5600_v58, %v10808_v60  ;;  %v5661_v20 = vpop.f32.mrf.mxu2 }
 0x447   : > { %v10944_v36 = vadd.f32 %v5661_v20, %v10863_v45 }
 0x448   : > { %5639 = vmatmul.bf16.gmra.mxu1 %v8225_v9  ;;  %v6355_v7 = vpop.f32.mrf.mxu0  ;;  %v9060_v9 = vld [vmem:[#allocation2 + $0x140] sm:$0xf0] }
 0x449   : > { %v6263_v19 = vpop.f32.mrf.mxu3 }
 0x44a   : > { %v10946_v41 = vadd.f32 %v6352_v38, %v6263_v19  ;;  %v8510_v38 = vld [vmem:[#allocation2 + $0x144] sm:$0xf0] }
 0x44b   : > { %5703 = vmatmul.bf16.gmra.mxu2 %v8169_v4  ;;  %6394 = vmatmul.bf16.gmra.mxu0 %v8501_v33  ;;  %v8513_v25 = vor.u32 %v9059_v21, %v8510_v38  ;;  %v9031_v33 = vld [vmem:[#allocation2 + $0x58] sm:$0xf0]  ;;  %v8408_v21 = vld [vmem:[#allocation2 + $0x68] sm:$0xf] }
 0x44d   : > { %v5602_v60 = vpop.f32.mrf.mxu1 }
 0x44e   : > { %v10949_v46 = vadd.f32 %v5602_v60, %v10813_v8  ;;  %6305 = vmatmul.bf16.gmra.mxu3 %v8497_v34  ;;  %v5664_v45 = vpop.f32.mrf.mxu2  ;;  %v8917_v8 = vld [vmem:[#allocation2 + $0x118] sm:$0xf0]  ;;  %v8396_v60 = vld [vmem:[#allocation2 + $0x50] sm:$0xf] }
 0x44f   : > { %v10952_v39 = vadd.f32 %v5664_v45, %v10869_v10  ;;  %v8181_v19 = vor.u32 %v8917_v8, %v8180_v28  ;;  %v8397_v45 = vor.u32 %v9031_v33, %v8396_v60 }
 0x450   : > { %v6357_v58 = vpop.f32.mrf.mxu0 }
 0x451   : > { %v6266_v51 = vpop.f32.mrf.mxu3 }
 0x452   : > { %v10954_v35 = vadd.f32 %v6355_v7, %v6266_v51 }
 0x455   : > { %v5605_v52 = vpop.f32.mrf.mxu1 }
 0x456   : > { %v10957_v56 = vadd.f32 %v5605_v52, %v10818_v49  ;;  %v5666_v50 = vpop.f32.mrf.mxu2  ;;  %v8509_v49 = vor.u32 %v9060_v9, %v8508_v37  ;;  %v8522_v52 = vld [vmem:[#allocation2 + $0x15c] sm:$0xf0]  ;;  %v9034_v9 = vld [vmem:[#allocation2 + $0x70] sm:$0xf0]  ;;  %v8923_v37 = vld [vmem:[#allocation2 + $0x148] sm:$0xf0] }
 0x457   : > { %v10960_v43 = vadd.f32 %v5666_v50, %v10878_v47  ;;  %v9062_v50 = vld [vmem:[#allocation2 + $0x154] sm:$0xf] }
 0x458   : > { %6433 = vmatmul.bf16.vlgmr.msra.gmra.mxu1 %v8385_v22  ;;  %v8192_v22 = vld [vmem:[#allocation2 + $0x128] sm:$0xf]  ;;  %v8525_v38 = vor.u32 %v9062_v50, %v8522_v52  ;;  %v8420_v52 = vld [vmem:[#allocation2 + $0x80] sm:$0xf]  ;;  %v8926_v50 = vld [vmem:[#allocation2 + $0x160] sm:$0xf0] }
 0x459   : > { %v6268_v10 = vpop.f32.mrf.mxu3  ;;  %v8193_v8 = vor.u32 %v8920_v18, %v8192_v22 }
 0x45a   : > { %v10962_v20 = vadd.f32 %v6357_v58, %v6268_v10 }
 0x45b   : > { %5708 = vmatmul.bf16.gmra.mxu2 %v8181_v19  ;;  %6399 = vmatmul.bf16.gmra.mxu0 %v8513_v25  ;;  %v8409_v19 = vor.u32 %v9034_v9, %v8408_v21  ;;  %v8534_v25 = vld [vmem:[#allocation2 + $0x174] sm:$0xf0]  ;;  %v8544_v9 = vld [vmem:[#allocation2 + $0x180] sm:$0xf] }
 0x45d   : > { %v5607_v54 = vpop.f32.mrf.mxu1 }
 0x45e   : > { %v10965_v4 = vadd.f32 %v5607_v54, %v10826_v55  ;;  %6310 = vmatmul.bf16.gmra.mxu3 %v8509_v49  ;;  %v5669_v15 = vpop.f32.mrf.mxu2  ;;  %v9063_v55 = vld [vmem:[#allocation2 + $0x158] sm:$0xf0]  ;;  %v9066_v49 = vld [vmem:[#allocation2 + $0x170] sm:$0xf0]  ;;  %v8204_v54 = vld [vmem:[#allocation2 + $0x140] sm:$0xf] }
 0x45f   : > { %v10968_v47 = vadd.f32 %v5669_v15, %v10884_v0  ;;  %v8520_v0 = vld [vmem:[#allocation2 + $0x150] sm:$0xf]  ;;  %v9065_v15 = vld [vmem:[#allocation2 + $0x16c] sm:$0xf]  ;;  %v8205_v33 = vor.u32 %v8923_v37, %v8204_v54 }
 0x460   : > { %v8521_v58 = vor.u32 %v9063_v55, %v8520_v0  ;;  %v8537_v60 = vor.u32 %v9065_v15, %v8534_v25  ;;  %v9069_v0 = vld [vmem:[#allocation2 + $0x188] sm:$0xf0]  ;;  %v8432_v25 = vld [vmem:[#allocation2 + $0x98] sm:$0xf]  ;;  %v8929_v15 = vld [vmem:[#allocation2 + $0x178] sm:$0xf0] }
 0x461   : > { %v8545_v21 = vor.u32 %v9069_v0, %v8544_v9  ;;  %v8456_v0 = vld [vmem:[#allocation2 + $0xc8] sm:$0xf] }
 0x465   : > { %v5610_v34 = vpop.f32.mrf.mxu1 }
 0x466   : > { %v10971_v7 = vadd.f32 %v5610_v34, %v10831_v12  ;;  %v5671_v51 = vpop.f32.mrf.mxu2  ;;  %v8532_v34 = vld [vmem:[#allocation2 + $0x168] sm:$0xf] }
 0x467   : > { %v10974_v61 = vadd.f32 %v5671_v51, %v10890_v32 }
 0x468   : > { %6438 = vmatmul.bf16.gmra.mxu1 %v8397_v45  ;;  %v8533_v45 = vor.u32 %v9066_v49, %v8532_v34 }
 0x46b   : > { %5713 = vmatmul.bf16.gmra.mxu2 %v8193_v8  ;;  %6404 = vmatmul.bf16.gmra.mxu0 %v8525_v38  ;;  %v8546_v8 = vld [vmem:[#allocation2 + $0x18c] sm:$0xf0]  ;;  %v8216_v38 = vld [vmem:[#allocation2 + $0x158] sm:$0xf] }
 0x46d   : > { %v5612_v10 = vpop.f32.mrf.mxu1 }
 0x46e   : > { %v10977_v12 = vadd.f32 %v5612_v10, %v10836_v5  ;;  %6315 = vmatmul.bf16.gmra.mxu3 %v8521_v58  ;;  %v9068_v58 = vld [vmem:[#allocation2 + $0x184] sm:$0xf]  ;;  %v8217_v10 = vor.u32 %v8926_v50, %v8216_v38  ;;  %v9046_v50 = vld [vmem:[#allocation2 + $0xd0] sm:$0xf0] }
 0x475   : > { %v5615_v28 = vpop.f32.mrf.mxu1 }
 0x476   : > { %v10980_v32 = vadd.f32 %v5615_v28, %v10839_v62  ;;  %v9037_v62 = vld [vmem:[#allocation2 + $0x88] sm:$0xf0]  ;;  %v8549_v28 = vor.u32 %v9068_v58, %v8546_v8 }
 0x477   : > { %v8421_v22 = vor.u32 %v9037_v62, %v8420_v52  ;;  %v8444_v62 = vld [vmem:[#allocation2 + $0xb0] sm:$0xf] }
 0x478   : > { %6443 = vmatmul.bf16.gmra.mxu1 %v8409_v19 }
 0x47b   : > { %5718 = vmatmul.bf16.gmra.mxu2 %v8205_v33  ;;  %6409 = vmatmul.bf16.gmra.mxu0 %v8537_v60  ;;  %v8228_v33 = vld [vmem:[#allocation2 + $0x170] sm:$0xf] }
 0x47c   : > { %v8229_v34 = vor.u32 %v8929_v15, %v8228_v33 }
 0x47d   : > { %v5617_v5 = vpop.f32.mrf.mxu1 }
 0x47e   : > { %v10983_v51 = vadd.f32 %v5617_v5, %v10848_v48  ;;  %6320 = vmatmul.bf16.gmra.mxu3 %v8533_v45  ;;  %v9043_v5 = vld [vmem:[#allocation2 + $0xb8] sm:$0xf0] }
 0x47f   : > { %v8445_v52 = vor.u32 %v9043_v5, %v8444_v62 }
 0x485   : > { %v5620_v18 = vpop.f32.mrf.mxu1 }
 0x486   : > { %v10986_v55 = vadd.f32 %v5620_v18, %v10854_v57  ;;  %v9040_v57 = vld [vmem:[#allocation2 + $0xa0] sm:$0xf0] }
 0x487   : > { %v8433_v54 = vor.u32 %v9040_v57, %v8432_v25 }
 0x488   : > { %6448 = vmatmul.bf16.gmra.mxu1 %v8421_v22 }
 0x48b   : > { %5723 = vmatmul.bf16.gmra.mxu2 %v8217_v10  ;;  %6414 = vmatmul.bf16.gmra.mxu0 %v8549_v28  ;;  %v8468_v28 = vld [vmem:[#allocation2 + $0xe0] sm:$0xf] }
 0x48d   : > { %v5622_v48 = vpop.f32.mrf.mxu1 }
 0x48e   : > { %v10989_v19 = vadd.f32 %v5622_v48, %v10860_v14  ;;  %6325 = vmatmul.bf16.gmra.mxu3 %v8545_v21 }
 0x495   : > { %v5625_v37 = vpop.f32.mrf.mxu1 }
 0x496   : > { %v10992_v49 = vadd.f32 %v5625_v37, %v10866_v1  ;;  %v11017_v37 = vpop.f32.mrf.mxu3 }
 0x498   : > { %6453 = vmatmul.bf16.gmra.mxu1 %v8433_v54  ;;  %v8480_v54 = vld [vmem:[#allocation2 + $0xf8] sm:$0xf] }
 0x49b   : > { %5728 = vmatmul.bf16.gmra.mxu2 %v8229_v34  ;;  %v4143_v34 = vld [vmem:[%s9194_s6] sm:$0xff] }
 0x49d   : > { %v5627_v60 = vpop.f32.mrf.mxu1 }
 0x49e   : > { %v10995_v45 = vadd.f32 %v5627_v60, %v10875_v24  ;;  %v8457_v24 = vor.u32 %v9046_v50, %v8456_v0  ;;  %v4144_v50 = vld [vmem:[%s9194_s6 + $0x8] sm:$0xff]  ;;  %v9055_v0 = vld [vmem:[#allocation2 + $0x118] sm:$0xf0] }
 0x4a5   : > { %v5630_v14 = vpop.f32.mrf.mxu1 }
 0x4a6   : > { %v10998_v18 = vadd.f32 %v5630_v14, %v10881_v13  ;;  %v9049_v13 = vld [vmem:[#allocation2 + $0xe8] sm:$0xf0]  ;;  %v11030_v14 = vpop.f32.mrf.mxu3 }
 0x4a8   : > { %6458 = vmatmul.bf16.gmra.mxu1 %v8445_v52 }
 0x4ad   : > { %v5632_v1 = vpop.f32.mrf.mxu1 }
 0x4ae   : > { %v11001_v22 = vadd.f32 %v5632_v1, %v10887_v44  ;;  %v8469_v44 = vor.u32 %v9049_v13, %v8468_v28 }
 0x4b5   : > { %v5635_v8 = vpop.f32.mrf.mxu1 }
 0x4b6   : > { %v11004_v38 = vadd.f32 %v5635_v8, %v10893_v42  ;;  %v11015_v42 = vpop.f32.mrf.mxu0 }
 0x4b8   : > { %6463 = vmatmul.bf16.gmra.mxu1 %v8457_v24 }
 0x4bd   : > { %v5637_v58 = vpop.f32.mrf.mxu1 }
 0x4be   : > { %v11007_v10 = vadd.f32 %v5637_v58, %v10902_v6  ;;  %v9052_v6 = vld [vmem:[#allocation2 + $0x100] sm:$0xf0]  ;;  %v11027_v60 = vpop.f32.mrf.mxu0  ;;  %v11046_v58 = vpop.f32.mrf.mxu2 }
 0x4bf   : > { %v8481_v33 = vor.u32 %v9052_v6, %v8480_v54 }
 0x4c5   : > { %v5640_v9 = vpop.f32.mrf.mxu1 }
 0x4c6   : > { %v11010_v21 = vadd.f32 %v5640_v9, %v10908_v63  ;;  %v11023_v63 = vld [vmem:[%s11246_s4] ss:$0 sm:$0xff]  ;;  %v11044_v24 = vpop.f32.mrf.mxu0  ;;  %v11048_v9 = vpop.f32.mrf.mxu3 }
 0x4c8   : > { %6468 = vmatmul.bf16.gmra.mxu1 %v8469_v44  ;;  %v8492_v44 = vld [vmem:[#allocation2 + $0x110] sm:$0xf] }
 0x4cd   : > { %v5642_v48 = vpop.f32.mrf.mxu1 }
 0x4ce   : > { %v11013_v57 = vadd.f32 %v5642_v48, %v10914_v40 }
 0x4d5   : > { %v6434_v25 = vpop.f32.mrf.mxu1 }
 0x4d6   : > { %v6435_v15 = vadd.f32 %v6434_v25, %v10922_v26  ;;  %v4145_v25 = vld [vmem:[%s9194_s6 + $0x10] sm:$0xff] }
 0x4d8   : > { %v6514_v40 = vadd.f32 %v6435_v15, %v10920_v59  ;;  %6473 = vmatmul.bf16.gmra.mxu1 %v8481_v33 }
 0x4da   : > { %v6550_v5 = vadd.f32 %v11023_v63, %v6514_v40  ;;  %v11055_v40 = vpop.f32.mrf.mxu0 }
 0x4dc   : > { %v6582_v62 = vadd.f32 %v6550_v5, %v4143_v34  ;;  %v11057_v34 = vpop.f32.mrf.mxu2 }
 0x4dd   : > { %v6436_v26 = vpop.f32.mrf.mxu1 }
 0x4de   : > { %v6614_v52 = vmax.f32 %v6582_v62, 0.0  ;;  %v6437_v59 = vadd.f32 %v6436_v26, %v10930_v2 }
 0x4e0   : > { %6646 = vst [vmem:[%s11037_s26] sm:$0xff] %v6614_v52  ;;  %v6515_v1 = vadd.f32 %v6437_v59, %v10928_v11  ;;  %v8493_v11 = vor.u32 %v9055_v0, %v8492_v44  ;;  %v9058_v59 = vld [vmem:[#allocation2 + $0x130] sm:$0xf0] }
 0x4e2   : > { %v6551_v8 = vadd.f32 %v11023_v63, %v6515_v1 }
 0x4e4   : > { %v6583_v13 = vadd.f32 %v6551_v8, %v4144_v50  ;;  %v8504_v8 = vld [vmem:[#allocation2 + $0x128] sm:$0xf]  ;;  %v11069_v44 = vpop.f32.mrf.mxu2 }
 0x4e5   : > { %v6439_v28 = vpop.f32.mrf.mxu1 }
 0x4e6   : > { %v6615_v48 = vmax.f32 %v6583_v13, 0.0  ;;  %v6440_v2 = vadd.f32 %v6439_v28, %v10938_v23  ;;  %v11060_v23 = vpop.f32.mrf.mxu3  ;;  %v8505_v28 = vor.u32 %v9058_v59, %v8504_v8 }
 0x4e8   : > { %6647 = vst [vmem:[%s11037_s26 + $0x8] sm:$0xff] %v6615_v48  ;;  %v6516_v6 = vadd.f32 %v6440_v2, %v10936_v3  ;;  %6478 = vmatmul.bf16.gmra.mxu1 %v8493_v11  ;;  %v4146_v3 = vld [vmem:[%s9194_s6 + $0x18] sm:$0xff]  ;;  %v4147_v2 = vld [vmem:[%s9194_s6 + $0x20] sm:$0xff] }
 0x4ea   : > { %v6552_v54 = vadd.f32 %v11023_v63, %v6516_v6 }
 0x4ec   : > { %v6584_v15 = vadd.f32 %v6552_v54, %v4145_v25 }
 0x4ed   : > { %v6441_v33 = vpop.f32.mrf.mxu1 }
 0x4ee   : > { %v6616_v5 = vmax.f32 %v6584_v15, 0.0  ;;  %v6442_v62 = vadd.f32 %v6441_v33, %v10946_v41  ;;  %v11067_v41 = vpop.f32.mrf.mxu0  ;;  %v11073_v48 = vpop.f32.mrf.mxu3  ;;  %v4148_v33 = vld [vmem:[%s9194_s6 + $0x28] sm:$0xff] }
 0x4f0   : > { %6648 = vst [vmem:[%s11037_s26 + $0x10] sm:$0xff] %v6616_v5  ;;  %v6517_v26 = vadd.f32 %v6442_v62, %v10944_v36 }
 0x4f2   : > { %v6553_v52 = vadd.f32 %v11023_v63, %v6517_v26 }
 0x4f4   : > { %v6585_v1 = vadd.f32 %v6553_v52, %v4146_v3  ;;  %v9061_v3 = vld [vmem:[#allocation2 + $0x148] sm:$0xf0]  ;;  %v6361_v52 = vadd.f32 %v11015_v42, %v11017_v37 }
 0x4f5   : > { %v6444_v50 = vpop.f32.mrf.mxu1 }
 0x4f6   : > { %v6617_v0 = vmax.f32 %v6585_v1, 0.0  ;;  %v6445_v13 = vadd.f32 %v6444_v50, %v10954_v35  ;;  %v11081_v5 = vpop.f32.mrf.mxu0  ;;  %v11086_v26 = vpop.f32.mrf.mxu3  ;;  %v8516_v1 = vld [vmem:[#allocation2 + $0x140] sm:$0xf] }
 0x4f7   : > { %v8517_v8 = vor.u32 %v9061_v3, %v8516_v1  ;;  %v8528_v3 = vld [vmem:[#allocation2 + $0x158] sm:$0xf] }
 0x4f8   : > { %6649 = vst [vmem:[%s11037_s26 + $0x18] sm:$0xff] %v6617_v0  ;;  %v6518_v36 = vadd.f32 %v6445_v13, %v10952_v39  ;;  %6483 = vmatmul.bf16.gmra.mxu1 %v8505_v28  ;;  %v11083_v39 = vpop.f32.mrf.mxu2  ;;  %v4149_v13 = vld [vmem:[%s9194_s6 + $0x30] sm:$0xff] }
 0x4fa   : > { %v6554_v11 = vadd.f32 %v11023_v63, %v6518_v36  ;;  %v6363_v36 = vadd.f32 %v11027_v60, %v11030_v14  ;;  %v6366_v60 = vadd.f32 %v11044_v24, %v11048_v9  ;;  %v4151_v24 = vld [vmem:[%s9194_s6 + $0x40] sm:$0xff] }
 0x4fc   : > { %v6586_v6 = vadd.f32 %v6554_v11, %v4147_v2 }
 0x4fd   : > { %v6446_v25 = vpop.f32.mrf.mxu1 }
 0x4fe   : > { %v6618_v54 = vmax.f32 %v6586_v6, 0.0  ;;  %v6447_v35 = vadd.f32 %v6446_v25, %v10962_v20  ;;  %v11096_v2 = vpop.f32.mrf.mxu0  ;;  %v11100_v11 = vpop.f32.mrf.mxu3 }
 0x500   : > { %6650 = vst [vmem:[%s11037_s26 + $0x20] sm:$0xff] %v6618_v54  ;;  %v6519_v15 = vadd.f32 %v6447_v35, %v10960_v43  ;;  %v11098_v42 = vpop.f32.mrf.mxu2  ;;  %v4150_v35 = vld [vmem:[%s9194_s6 + $0x38] sm:$0xff] }
 0x502   : > { %v6555_v62 = vadd.f32 %v11023_v63, %v6519_v15 }
 0x504   : > { %v6587_v59 = vadd.f32 %v6555_v62, %v4148_v33  ;;  %v9064_v33 = vld [vmem:[#allocation2 + $0x160] sm:$0xf0] }
 0x505   : > { %v6449_v20 = vpop.f32.mrf.mxu1 }
 0x506   : > { %v6619_v50 = vmax.f32 %v6587_v59, 0.0  ;;  %v6450_v43 = vadd.f32 %v6449_v20, %v6361_v52  ;;  %v5675_v52 = vadd.f32 %v11046_v58, %v10896_v30  ;;  %v11110_v59 = vpop.f32.mrf.mxu0  ;;  %v6368_v30 = vadd.f32 %v11055_v40, %v11060_v23 }
 0x508   : > { %6651 = vst [vmem:[%s11037_s26 + $0x28] sm:$0xff] %v6619_v50  ;;  %v6520_v0 = vadd.f32 %v6450_v43, %v10968_v47  ;;  %6488 = vmatmul.bf16.gmra.mxu1 %v8517_v8  ;;  %v11112_v20 = vpop.f32.mrf.mxu2  ;;  %v8529_v50 = vor.u32 %v9064_v33, %v8528_v3  ;;  %v11114_v43 = vpop.f32.mrf.mxu3  ;;  %v9067_v33 = vld [vmem:[#allocation2 + $0x178] sm:$0xf0] }
 0x50a   : > { %v6556_v28 = vadd.f32 %v11023_v63, %v6520_v0 }
 0x50c   : > { %v6588_v37 = vadd.f32 %v6556_v28, %v4149_v13  ;;  %v5677_v13 = vadd.f32 %v11057_v34, %v10905_v17  ;;  %v6371_v17 = vadd.f32 %v11067_v41, %v11073_v48 }
 0x50d   : > { %v6451_v6 = vpop.f32.mrf.mxu1 }
 0x50e   : > { %v6620_v25 = vmax.f32 %v6588_v37, 0.0  ;;  %v6452_v54 = vadd.f32 %v6451_v6, %v6363_v36  ;;  %v11123_v37 = vpop.f32.mrf.mxu0 }
 0x510   : > { %6652 = vst [vmem:[%s11037_s26 + $0x30] sm:$0xff] %v6620_v25  ;;  %v6521_v47 = vadd.f32 %v6452_v54, %v10974_v61  ;;  %v11125_v6 = vpop.f32.mrf.mxu2  ;;  %v8556_v54 = vld [vmem:[#allocation2 + $0x198] sm:$0xf] }
 0x512   : > { %v6557_v15 = vadd.f32 %v11023_v63, %v6521_v47  ;;  %v9072_v47 = vld [vmem:[#allocation2 + $0x1a0] sm:$0xf0] }
 0x513   : > { %v8557_v40 = vor.u32 %v9072_v47, %v8556_v54  ;;  %v4154_v54 = vld [vmem:[%s9194_s6 + $0x58] sm:$0xff] }
 0x514   : > { %v6589_v14 = vadd.f32 %v6557_v15, %v4150_v35  ;;  %v11128_v35 = vpop.f32.mrf.mxu3  ;;  %v4152_v15 = vld [vmem:[%s9194_s6 + $0x48] sm:$0xff] }
 0x515   : > { %v6454_v62 = vpop.f32.mrf.mxu1  ;;  %6330 = vmatmul.bf16.gmra.mxu3 %v8557_v40  ;;  %v6376_v40 = vadd.f32 %v11096_v2, %v11100_v11  ;;  %v6378_v11 = vadd.f32 %v11110_v59, %v11114_v43  ;;  %v6381_v59 = vadd.f32 %v11123_v37, %v11128_v35 }
 0x516   : > { %v6621_v1 = vmax.f32 %v6589_v14, 0.0  ;;  %v6455_v61 = vadd.f32 %v6454_v62, %v6366_v60  ;;  %v8540_v14 = vld [vmem:[#allocation2 + $0x170] sm:$0xf]  ;;  %v5680_v62 = vadd.f32 %v11069_v44, %v10911_v53  ;;  %v6373_v53 = vadd.f32 %v11081_v5, %v11086_v26 }
 0x518   : > { %6653 = vst [vmem:[%s11037_s26 + $0x38] sm:$0xff] %v6621_v1  ;;  %v6522_v8 = vadd.f32 %v6455_v61, %v5675_v52  ;;  %6493 = vmatmul.bf16.gmra.mxu1 %v8529_v50  ;;  %v8541_v1 = vor.u32 %v9067_v33, %v8540_v14  ;;  %v9071_v50 = vld [vmem:[#allocation2 + $0x19c] sm:$0xf]  ;;  %v11138_v41 = vpop.f32.mrf.mxu2 }
 0x51a   : > { %v6558_v9 = vadd.f32 %v11023_v63, %v6522_v8  ;;  %v8558_v8 = vld [vmem:[#allocation2 + $0x1a4] sm:$0xf0] }
 0x51c   : > { %v6590_v58 = vadd.f32 %v6558_v9, %v4151_v24  ;;  %v4153_v24 = vld [vmem:[%s9194_s6 + $0x50] sm:$0xff]  ;;  %v8561_v9 = vor.u32 %v9071_v50, %v8558_v8 }
 0x51d   : > { %v6456_v0 = vpop.f32.mrf.mxu1 }
 0x51e   : > { %v6622_v28 = vmax.f32 %v6590_v58, 0.0  ;;  %v6457_v36 = vadd.f32 %v6456_v0, %v6368_v30  ;;  %v6382_v30 = vpop.f32.mrf.mxu0  ;;  %v6293_v58 = vpop.f32.mrf.mxu3  ;;  %6419 = vmatmul.bf16.gmra.mxu0 %v8561_v9 }
 0x51f   : > { %v6383_v37 = vadd.f32 %v6382_v30, %v6293_v58 }
 0x520   : > { %6654 = vst [vmem:[%s11037_s26 + $0x40] sm:$0xff] %v6622_v28  ;;  %v6523_v25 = vadd.f32 %v6457_v36, %v5677_v13  ;;  %v5682_v13 = vadd.f32 %v11083_v39, %v10917_v29  ;;  %v5694_v5 = vpop.f32.mrf.mxu2  ;;  %v5685_v29 = vadd.f32 %v11098_v42, %v10925_v27 }
 0x521   : > { %v5695_v58 = vadd.f32 %v5694_v5, %v10957_v56 }
 0x522   : > { %v6559_v23 = vadd.f32 %v11023_v63, %v6523_v25 }
 0x524   : > { %v6591_v34 = vadd.f32 %v6559_v23, %v4152_v15  ;;  %v9070_v15 = vld [vmem:[#allocation2 + $0x190] sm:$0xf0] }
 0x525   : > { %v6459_v60 = vpop.f32.mrf.mxu1 }
 0x526   : > { %v6623_v3 = vmax.f32 %v6591_v34, 0.0  ;;  %v6460_v52 = vadd.f32 %v6459_v60, %v6371_v17  ;;  %v6385_v23 = vpop.f32.mrf.mxu0  ;;  %v6296_v33 = vpop.f32.mrf.mxu3  ;;  %v8552_v34 = vld [vmem:[#allocation2 + $0x188] sm:$0xf] }
 0x527   : > { %v8553_v14 = vor.u32 %v9070_v15, %v8552_v34  ;;  %v5692_v34 = vadd.f32 %v11138_v41, %v10949_v46 }
 0x528   : > { %6655 = vst [vmem:[%s11037_s26 + $0x48] sm:$0xff] %v6623_v3  ;;  %v6524_v61 = vadd.f32 %v6460_v52, %v5680_v62  ;;  %6498 = vmatmul.bf16.gmra.mxu1 %v8541_v1  ;;  %v4155_v3 = vld [vmem:[%s9194_s6 + $0x60] sm:$0xff]  ;;  %v5696_v42 = vpop.f32.mrf.mxu2 }
 0x52a   : > { %v6560_v48 = vadd.f32 %v11023_v63, %v6524_v61  ;;  %v5687_v61 = vadd.f32 %v11112_v20, %v10933_v31  ;;  %v5690_v20 = vadd.f32 %v11125_v6, %v10941_v16 }
 0x52c   : > { %v6592_v44 = vadd.f32 %v6560_v48, %v4153_v24  ;;  %v4156_v48 = vld [vmem:[%s9194_s6 + $0x68] sm:$0xff] }
 0x52d   : > { %v6461_v0 = vpop.f32.mrf.mxu1 }
 0x52e   : > { %v6624_v28 = vmax.f32 %v6592_v44, 0.0  ;;  %v6462_v36 = vadd.f32 %v6461_v0, %v6373_v53  ;;  %v6387_v27 = vpop.f32.mrf.mxu0  ;;  %v6298_v24 = vpop.f32.mrf.mxu3  ;;  %v8564_v53 = vld [vmem:[#allocation2 + $0x1a0] sm:$0xf]  ;;  %v9073_v44 = vld [vmem:[#allocation2 + $0x1a8] sm:$0xf0] }
 0x530   : > { %6656 = vst [vmem:[%s11037_s26 + $0x50] sm:$0xff] %v6624_v28  ;;  %v6525_v25 = vadd.f32 %v6462_v36, %v5682_v13  ;;  %v8565_v13 = vor.u32 %v9073_v44, %v8564_v53 }
 0x532   : > { %v6561_v47 = vadd.f32 %v11023_v63, %v6525_v25 }
 0x534   : > { %v6593_v26 = vadd.f32 %v6561_v47, %v4154_v54  ;;  %v5699_v54 = vpop.f32.mrf.mxu2 }
 0x535   : > { %v6464_v17 = vpop.f32.mrf.mxu1 }
 0x536   : > { %v6625_v39 = vmax.f32 %v6593_v26, 0.0  ;;  %v6465_v60 = vadd.f32 %v6464_v17, %v6376_v40  ;;  %v6390_v25 = vpop.f32.mrf.mxu0  ;;  %v6301_v15 = vpop.f32.mrf.mxu3  ;;  %v4157_v40 = vld [vmem:[%s9194_s6 + $0x70] sm:$0xff] }
 0x538   : > { %6657 = vst [vmem:[%s11037_s26 + $0x58] sm:$0xff] %v6625_v39  ;;  %v6526_v62 = vadd.f32 %v6465_v60, %v5685_v29  ;;  %6503 = vmatmul.bf16.gmra.mxu1 %v8553_v14  ;;  %v4158_v39 = vld [vmem:[%s9194_s6 + $0x78] sm:$0xff] }
 0x53a   : > { %v6562_v2 = vadd.f32 %v11023_v63, %v6526_v62 }
 0x53c   : > { %v6594_v52 = vadd.f32 %v6562_v2, %v4155_v3  ;;  %v5701_v14 = vpop.f32.mrf.mxu2  ;;  %v6386_v2 = vadd.f32 %v6385_v23, %v6296_v33  ;;  %v5697_v23 = vadd.f32 %v5696_v42, %v10965_v4 }
 0x53d   : > { %v6466_v1 = vpop.f32.mrf.mxu1 }
 0x53e   : > { %v6626_v50 = vmax.f32 %v6594_v52, 0.0  ;;  %v6467_v8 = vadd.f32 %v6466_v1, %v6378_v11  ;;  %v6392_v60 = vpop.f32.mrf.mxu0  ;;  %v6303_v3 = vpop.f32.mrf.mxu3  ;;  %v4159_v1 = vld [vmem:[%s9194_s6 + $0x80] sm:$0xff] }
 0x540   : > { %6658 = vst [vmem:[%s11037_s26 + $0x60] sm:$0xff] %v6626_v50  ;;  %v6527_v9 = vadd.f32 %v6467_v8, %v5687_v61  ;;  %v6388_v50 = vadd.f32 %v6387_v27, %v6298_v24  ;;  %v5700_v27 = vadd.f32 %v5699_v54, %v10971_v7 }
 0x542   : > { %v6563_v0 = vadd.f32 %v11023_v63, %v6527_v9 }
 0x544   : > { %v6595_v43 = vadd.f32 %v6563_v0, %v4156_v48  ;;  %v5704_v9 = vpop.f32.mrf.mxu2  ;;  %v4160_v0 = vld [vmem:[%s9194_s6 + $0x88] sm:$0xff] }
 0x545   : > { %v6469_v31 = vpop.f32.mrf.mxu1 }
 0x546   : > { %v6627_v28 = vmax.f32 %v6595_v43, 0.0  ;;  %v6470_v36 = vadd.f32 %v6469_v31, %v6381_v59  ;;  %v6395_v8 = vpop.f32.mrf.mxu0  ;;  %v6306_v53 = vpop.f32.mrf.mxu3  ;;  %v6391_v43 = vadd.f32 %v6390_v25, %v6301_v15  ;;  %v5702_v25 = vadd.f32 %v5701_v14, %v10977_v12 }
 0x548   : > { %6659 = vst [vmem:[%s11037_s26 + $0x68] sm:$0xff] %v6627_v28  ;;  %v6528_v47 = vadd.f32 %v6470_v36, %v5690_v20  ;;  %6508 = vmatmul.bf16.gmra.mxu1 %v8565_v13 }
 0x54a   : > { %v6564_v26 = vadd.f32 %v11023_v63, %v6528_v47  ;;  %v4161_v47 = vld [vmem:[%s9194_s6 + $0x90] sm:$0xff] }
 0x54c   : > { %v6596_v35 = vadd.f32 %v6564_v26, %v4157_v40  ;;  %v5706_v20 = vpop.f32.mrf.mxu2  ;;  %v6393_v26 = vadd.f32 %v6392_v60, %v6303_v3  ;;  %v5705_v60 = vadd.f32 %v5704_v9, %v10980_v32 }
 0x54d   : > { %v6471_v17 = vpop.f32.mrf.mxu1 }
 0x54e   : > { %v6628_v16 = vmax.f32 %v6596_v35, 0.0  ;;  %v6472_v6 = vadd.f32 %v6471_v17, %v6383_v37  ;;  %v6397_v24 = vpop.f32.mrf.mxu0  ;;  %v6308_v4 = vpop.f32.mrf.mxu3 }
 0x550   : > { %6660 = vst [vmem:[%s11037_s26 + $0x70] sm:$0xff] %v6628_v16  ;;  %v6529_v29 = vadd.f32 %v6472_v6, %v5692_v34  ;;  %v4162_v6 = vld [vmem:[%s9194_s6 + $0x98] sm:$0xff] }
 0x552   : > { %v6565_v62 = vadd.f32 %v11023_v63, %v6529_v29 }
 0x554   : > { %v6597_v11 = vadd.f32 %v6565_v62, %v4158_v39  ;;  %v5709_v17 = vpop.f32.mrf.mxu2  ;;  %v6396_v39 = vadd.f32 %v6395_v8, %v6306_v53 }
 0x555   : > { %v6474_v30 = vpop.f32.mrf.mxu1 }
 0x556   : > { %v6629_v52 = vmax.f32 %v6597_v11, 0.0  ;;  %v6475_v46 = vadd.f32 %v6474_v30, %v6386_v2  ;;  %v6400_v54 = vpop.f32.mrf.mxu0  ;;  %v6311_v16 = vpop.f32.mrf.mxu3  ;;  %v4163_v11 = vld [vmem:[%s9194_s6 + $0xa0] sm:$0xff] }
 0x558   : > { %6661 = vst [vmem:[%s11037_s26 + $0x78] sm:$0xff] %v6629_v52  ;;  %v6530_v41 = vadd.f32 %v6475_v46, %v5695_v58 }
 0x55a   : > { %v6566_v61 = vadd.f32 %v11023_v63, %v6530_v41  ;;  %v6398_v41 = vadd.f32 %v6397_v24, %v6308_v4 }
 0x55c   : > { %v6598_v48 = vadd.f32 %v6566_v61, %v4159_v1  ;;  %v5711_v58 = vpop.f32.mrf.mxu2 }
 0x55d   : > { %v6476_v44 = vpop.f32.mrf.mxu1 }
 0x55e   : > { %v6630_v33 = vmax.f32 %v6598_v48, 0.0  ;;  %v6477_v56 = vadd.f32 %v6476_v44, %v6388_v50  ;;  %v6402_v30 = vpop.f32.mrf.mxu0  ;;  %v6313_v46 = vpop.f32.mrf.mxu3  ;;  %v5707_v50 = vadd.f32 %v5706_v20, %v10983_v51  ;;  %v4164_v48 = vld [vmem:[%s9194_s6 + $0xa8] sm:$0xff]  ;;  %v6401_v44 = vadd.f32 %v6400_v54, %v6311_v16 }
 0x55f   : > { %v6403_v24 = vadd.f32 %v6402_v30, %v6313_v46  ;;  %v4168_v30 = vld [vmem:[%s9194_s6 + $0xc8] sm:$0xff] }
 0x560   : > { %6662 = vst [vmem:[%s11037_s26 + $0x80] sm:$0xff] %v6630_v33  ;;  %v6531_v5 = vadd.f32 %v6477_v56, %v5697_v23 }
 0x562   : > { %v6567_v59 = vadd.f32 %v11023_v63, %v6531_v5 }
 0x564   : > { %v6599_v13 = vadd.f32 %v6567_v59, %v4160_v0  ;;  %v5714_v33 = vpop.f32.mrf.mxu2  ;;  %v5710_v59 = vadd.f32 %v5709_v17, %v10986_v55 }
 0x565   : > { %v6479_v31 = vpop.f32.mrf.mxu1  ;;  %v5715_v54 = vadd.f32 %v5714_v33, %v10992_v49 }
 0x566   : > { %v6631_v28 = vmax.f32 %v6599_v13, 0.0  ;;  %v6480_v36 = vadd.f32 %v6479_v31, %v6391_v43  ;;  %v6405_v23 = vpop.f32.mrf.mxu0  ;;  %v6316_v5 = vpop.f32.mrf.mxu3  ;;  %v4165_v31 = vld [vmem:[%s9194_s6 + $0xb0] sm:$0xff] }
 0x568   : > { %6663 = vst [vmem:[%s11037_s26 + $0x88] sm:$0xff] %v6631_v28  ;;  %v6532_v42 = vadd.f32 %v6480_v36, %v5700_v27  ;;  %v5712_v36 = vadd.f32 %v5711_v58, %v10989_v19 }
 0x56a   : > { %v6568_v40 = vadd.f32 %v11023_v63, %v6532_v42 }
 0x56c   : > { %v6600_v37 = vadd.f32 %v6568_v40, %v4161_v47  ;;  %v5716_v42 = vpop.f32.mrf.mxu2 }
 0x56d   : > { %v6481_v35 = vpop.f32.mrf.mxu1 }
 0x56e   : > { %v6632_v15 = vmax.f32 %v6600_v37, 0.0  ;;  %v6482_v7 = vadd.f32 %v6481_v35, %v6393_v26  ;;  %v6407_v4 = vpop.f32.mrf.mxu0  ;;  %v6318_v55 = vpop.f32.mrf.mxu3  ;;  %v4166_v37 = vld [vmem:[%s9194_s6 + $0xb8] sm:$0xff] }
 0x570   : > { %6664 = vst [vmem:[%s11037_s26 + $0x90] sm:$0xff] %v6632_v15  ;;  %v6533_v34 = vadd.f32 %v6482_v7, %v5702_v25  ;;  %v6406_v25 = vadd.f32 %v6405_v23, %v6316_v5 }
 0x572   : > { %v6569_v29 = vadd.f32 %v11023_v63, %v6533_v34 }
 0x574   : > { %v6601_v62 = vadd.f32 %v6569_v29, %v4162_v6  ;;  %v5719_v16 = vpop.f32.mrf.mxu2 }
 0x575   : > { %v6484_v2 = vpop.f32.mrf.mxu1 }
 0x576   : > { %v6633_v3 = vmax.f32 %v6601_v62, 0.0  ;;  %v6485_v12 = vadd.f32 %v6484_v2, %v6396_v39  ;;  %v6410_v34 = vpop.f32.mrf.mxu0  ;;  %v6321_v29 = vpop.f32.mrf.mxu3  ;;  %v4167_v39 = vld [vmem:[%s9194_s6 + $0xc0] sm:$0xff]  ;;  %v6408_v2 = vadd.f32 %v6407_v4, %v6318_v55 }
 0x577   : > { %v4171_v55 = vld [vmem:[%s9194_s6 + $0xe0] sm:$0xff] }
 0x578   : > { %6665 = vst [vmem:[%s11037_s26 + $0x98] sm:$0xff] %v6633_v3  ;;  %v6534_v14 = vadd.f32 %v6485_v12, %v5705_v60  ;;  %v5717_v12 = vadd.f32 %v5716_v42, %v10995_v45 }
 0x57a   : > { %v6570_v52 = vadd.f32 %v11023_v63, %v6534_v14 }
 0x57c   : > { %v6602_v1 = vadd.f32 %v6570_v52, %v4163_v11  ;;  %v5721_v52 = vpop.f32.mrf.mxu2 }
 0x57d   : > { %v6486_v61 = vpop.f32.mrf.mxu1 }
 0x57e   : > { %v6634_v8 = vmax.f32 %v6602_v1, 0.0  ;;  %v6487_v32 = vadd.f32 %v6486_v61, %v6398_v41  ;;  %v6412_v58 = vpop.f32.mrf.mxu0  ;;  %v6323_v41 = vpop.f32.mrf.mxu3  ;;  %v6411_v1 = vadd.f32 %v6410_v34, %v6321_v29 }
 0x580   : > { %6666 = vst [vmem:[%s11037_s26 + $0xa0] sm:$0xff] %v6634_v8  ;;  %v6535_v9 = vadd.f32 %v6487_v32, %v5707_v50  ;;  %v5720_v8 = vadd.f32 %v5719_v16, %v10998_v18  ;;  %v4172_v16 = vld [vmem:[%s9194_s6 + $0xe8] sm:$0xff] }
 0x582   : > { %v6571_v53 = vadd.f32 %v11023_v63, %v6535_v9 }
 0x584   : > { %v6603_v56 = vadd.f32 %v6571_v53, %v4164_v48  ;;  %v4169_v48 = vld [vmem:[%s9194_s6 + $0xd0] sm:$0xff]  ;;  %v5724_v33 = vpop.f32.mrf.mxu2 }
 0x585   : > { %v6489_v0 = vpop.f32.mrf.mxu1 }
 0x586   : > { %v6635_v43 = vmax.f32 %v6603_v56, 0.0  ;;  %v6490_v51 = vadd.f32 %v6489_v0, %v6401_v44  ;;  %v6413_v44 = vadd.f32 %v6412_v58, %v6323_v41  ;;  %v6415_v23 = vpop.f32.mrf.mxu0  ;;  %v6326_v5 = vpop.f32.mrf.mxu3 }
 0x588   : > { %6667 = vst [vmem:[%s11037_s26 + $0xa8] sm:$0xff] %v6635_v43  ;;  %v6536_v13 = vadd.f32 %v6490_v51, %v5710_v59  ;;  %v5722_v59 = vadd.f32 %v5721_v52, %v11001_v22 }
 0x58a   : > { %v6572_v27 = vadd.f32 %v11023_v63, %v6536_v13  ;;  %v4170_v13 = vld [vmem:[%s9194_s6 + $0xd8] sm:$0xff] }
 0x58c   : > { %v6604_v20 = vadd.f32 %v6572_v27, %v4165_v31  ;;  %v6416_v27 = vadd.f32 %v6415_v23, %v6326_v5 }
 0x58d   : > { %v6491_v28 = vpop.f32.mrf.mxu1 }
 0x58e   : > { %v6636_v47 = vmax.f32 %v6604_v20, 0.0  ;;  %v6492_v40 = vadd.f32 %v6491_v28, %v6403_v24  ;;  %v5725_v28 = vadd.f32 %v5724_v33, %v11004_v38  ;;  %v6328_v22 = vpop.f32.mrf.mxu3 }
 0x590   : > { %6668 = vst [vmem:[%s11037_s26 + $0xb0] sm:$0xff] %v6636_v47  ;;  %v6537_v26 = vadd.f32 %v6492_v40, %v5712_v36  ;;  %v6417_v36 = vpop.f32.mrf.mxu0  ;;  %v5726_v47 = vpop.f32.mrf.mxu2 }
 0x592   : > { %v6573_v35 = vadd.f32 %v11023_v63, %v6537_v26 }
 0x594   : > { %v6605_v15 = vadd.f32 %v6573_v35, %v4166_v37  ;;  %v6418_v37 = vadd.f32 %v6417_v36, %v6328_v22 }
 0x595   : > { %v6494_v7 = vpop.f32.mrf.mxu1 }
 0x596   : > { %v6637_v17 = vmax.f32 %v6605_v15, 0.0  ;;  %v6495_v19 = vadd.f32 %v6494_v7, %v6406_v25  ;;  %v5727_v15 = vadd.f32 %v5726_v47, %v11007_v10 }
 0x598   : > { %6669 = vst [vmem:[%s11037_s26 + $0xb8] sm:$0xff] %v6637_v17  ;;  %v6538_v6 = vadd.f32 %v6495_v19, %v5715_v54  ;;  %v6331_v54 = vpop.f32.mrf.mxu3  ;;  %v5729_v34 = vpop.f32.mrf.mxu2 }
 0x59a   : > { %v6574_v62 = vadd.f32 %v11023_v63, %v6538_v6 }
 0x59b   : > { %v6420_v17 = vpop.f32.mrf.mxu0 }
 0x59c   : > { %v6606_v60 = vadd.f32 %v6574_v62, %v4167_v39  ;;  %v6421_v6 = vadd.f32 %v6420_v17, %v6331_v54 }
 0x59d   : > { %v6496_v3 = vpop.f32.mrf.mxu1 }
 0x59e   : > { %v6638_v14 = vmax.f32 %v6606_v60, 0.0  ;;  %v6497_v49 = vadd.f32 %v6496_v3, %v6408_v2  ;;  %v5730_v2 = vadd.f32 %v5729_v34, %v11010_v21 }
 0x5a0   : > { %6670 = vst [vmem:[%s11037_s26 + $0xc0] sm:$0xff] %v6638_v14  ;;  %v6539_v11 = vadd.f32 %v6497_v49, %v5717_v12  ;;  %v6333_v12 = vpop.f32.mrf.mxu3  ;;  %v4173_v49 = vld [vmem:[%s9194_s6 + $0xf0] sm:$0xff] }
 0x5a2   : > { %v6575_v46 = vadd.f32 %v11023_v63, %v6539_v11 }
 0x5a3   : > { %v6422_v14 = vpop.f32.mrf.mxu0 }
 0x5a4   : > { %v6607_v61 = vadd.f32 %v6575_v46, %v4168_v30  ;;  %v5731_v30 = vpop.f32.mrf.mxu2  ;;  %v6423_v58 = vadd.f32 %v6422_v14, %v6333_v12 }
 0x5a5   : > { %v6499_v50 = vpop.f32.mrf.mxu1  ;;  %v5732_v41 = vadd.f32 %v5731_v30, %v11013_v57 }
 0x5a6   : > { %v6639_v32 = vmax.f32 %v6607_v61, 0.0  ;;  %v6500_v45 = vadd.f32 %v6499_v50, %v6411_v1  ;;  %v4174_v50 = vld [vmem:[%s9194_s6 + $0xf8] sm:$0xff] }
 0x5a8   : > { %6671 = vst [vmem:[%s11037_s26 + $0xc8] sm:$0xff] %v6639_v32  ;;  %v6540_v9 = vadd.f32 %v6500_v45, %v5720_v8 }
 0x5aa   : > { %v6576_v53 = vadd.f32 %v11023_v63, %v6540_v9 }
 0x5ac   : > { %v6608_v56 = vadd.f32 %v6576_v53, %v4169_v48 }
 0x5ad   : > { %v6501_v0 = vpop.f32.mrf.mxu1 }
 0x5ae   : > { %v6640_v43 = vmax.f32 %v6608_v56, 0.0  ;;  %v6502_v18 = vadd.f32 %v6501_v0, %v6413_v44 }
 0x5b0   : > { %6672 = vst [vmem:[%s11037_s26 + $0xd0] sm:$0xff] %v6640_v43  ;;  %v6541_v51 = vadd.f32 %v6502_v18, %v5722_v59 }
 0x5b2   : > { %v6577_v31 = vadd.f32 %v11023_v63, %v6541_v51 }
 0x5b4   : > { %v6609_v24 = vadd.f32 %v6577_v31, %v4170_v13 }
 0x5b5   : > { %v6504_v20 = vpop.f32.mrf.mxu1 }
 0x5b6   : > { %v6641_v4 = vmax.f32 %v6609_v24, 0.0  ;;  %v6505_v42 = vadd.f32 %v6504_v20, %v6416_v27 }
 0x5b8   : > { %6673 = vst [vmem:[%s11037_s26 + $0xd8] sm:$0xff] %v6641_v4  ;;  %v6542_v40 = vadd.f32 %v6505_v42, %v5725_v28 }
 0x5ba   : > { %v6578_v26 = vadd.f32 %v11023_v63, %v6542_v40 }
 0x5bc   : > { %v6610_v35 = vadd.f32 %v6578_v26, %v4171_v55 }
 0x5bd   : > { %v6506_v25 = vpop.f32.mrf.mxu1 }
 0x5be   : > { %v6642_v7 = vmax.f32 %v6610_v35, 0.0  ;;  %v6507_v38 = vadd.f32 %v6506_v25, %v6418_v37 }
 0x5c0   : > { %6674 = vst [vmem:[%s11037_s26 + $0xe0] sm:$0xff] %v6642_v7  ;;  %v6543_v19 = vadd.f32 %v6507_v38, %v5727_v15 }
 0x5c2   : > { %v6579_v29 = vadd.f32 %v11023_v63, %v6543_v19 }
 0x5c4   : > { %v6611_v39 = vadd.f32 %v6579_v29, %v4172_v16 }
 0x5c5   : > { %v6509_v62 = vpop.f32.mrf.mxu1 }
 0x5c6   : > { %v6643_v60 = vmax.f32 %v6611_v39, 0.0  ;;  %v6510_v10 = vadd.f32 %v6509_v62, %v6421_v6 }
 0x5c8   : > { %6675 = vst [vmem:[%s11037_s26 + $0xe8] sm:$0xff] %v6643_v60  ;;  %v6544_v3 = vadd.f32 %v6510_v10, %v5730_v2 }
 0x5ca   : > { %v6580_v11 = vadd.f32 %v11023_v63, %v6544_v3 }
 0x5cc   : > { %v6612_v52 = vadd.f32 %v6580_v11, %v4173_v49 }
 0x5cd   : > { %v6511_v46 = vpop.f32.mrf.mxu1 }
 0x5ce   : > { %v6644_v1 = vmax.f32 %v6612_v52, 0.0  ;;  %v6512_v21 = vadd.f32 %v6511_v46, %v6423_v58 }
 0x5d0   : > { %6676 = vst [vmem:[%s11037_s26 + $0xf0] sm:$0xff] %v6644_v1  ;;  %v6545_v61 = vadd.f32 %v6512_v21, %v5732_v41 }
 0x5d2   : > { %v6581_v8 = vadd.f32 %v11023_v63, %v6545_v61 }
 0x5d4   : > { %v6613_v32 = vadd.f32 %v6581_v8, %v4174_v50 }
 0x5d6   : > { %v6645_v45 = vmax.f32 %v6613_v32, 0.0 }
 0x5d8   : > { %6677 = vst [vmem:[%s11037_s26 + $0xf8] sm:$0xff] %v6645_v45 }
 0x5d9 PF: > { %s15_s18 = sadd.s32 1, %s9133_s18  }
 0x5da   : > { %p12_p4 = scmp.ge.s32.totalorder %s15_s18, 4  }
 0x5dc   :  { %14 = sbr.rel (!%p12_p4) target bundleno = 1 (0x1), region = 77 }

</bundles_post_ra>
